<compile_context>
chip_gen: v7x
topology: tpu7x:2x2x1
jax: 0.10.0
libtpu: 0.0.40
codegen_flags: <defaults>
</compile_context>

<pallas_src>
import functools

import jax
import jax.numpy as jnp
from jax.experimental import pallas as pl
from jax.experimental.pallas import tpu as pltpu


# =============================== Pallas kernel ================================

def _window_attn_kernel(*refs, num_heads, head_dim, scale, b_tile, has_mask):
    """One grid step: full W-MSA forward for B_TILE windows of (N, C) tokens."""
    if has_mask:
        (x_ref, wqkv_ref, bqkv_ref, bias_ref, mask_ref,
         wproj_ref, bproj_ref, o_ref) = refs
    else:
        (x_ref, wqkv_ref, bqkv_ref, bias_ref,
         wproj_ref, bproj_ref, o_ref) = refs
        mask_ref = None

    C = num_heads * head_dim
    N = x_ref.shape[1]
    M = b_tile * N

    # qkv projection for all B_TILE windows at once (bf16 MXU, f32 accum).
    x = x_ref[...].reshape(M, C).astype(jnp.bfloat16)               # (M, C)
    qkv = jnp.dot(x, wqkv_ref[...],
                  preferred_element_type=jnp.float32) + bqkv_ref[...]   # (M, 3C) f32
    qkv = qkv.reshape(b_tile, N, 3 * C)

    mask = None
    if has_mask:
        mask = mask_ref[...].astype(jnp.float32)                     # (b_tile, N, N)

    acc = jnp.zeros((M, C), jnp.float32)
    for h in range(num_heads):                                       # static unroll
        lo, hi = h * head_dim, (h + 1) * head_dim
        # qk scale applied to q in-kernel (free VPU filler under MXU-bound).
        q = (qkv[:, :, lo:hi] * scale).astype(jnp.bfloat16)          # (b_tile, N, hd)
        k = qkv[:, :, C + lo:C + hi].astype(jnp.bfloat16)
        v = qkv[:, :, 2 * C + lo:2 * C + hi].astype(jnp.bfloat16)

        # scores: batched q @ k^T over the window axis -> (b_tile, N, N) f32
        s = jax.lax.dot_general(
            q, k, dimension_numbers=(((2,), (2,)), ((0,), (0,))),
            preferred_element_type=jnp.float32)
        s = s + bias_ref[h][None]                                    # rel-pos bias (f32)
        if has_mask:
            s = s + mask                                             # window mask (f32)

        # Numerically stable softmax with deferred normalization.
        m = jnp.max(s, axis=-1, keepdims=True)
        p = jnp.exp(s - m)                                           # (b_tile, N, N) f32
        l = jnp.sum(p, axis=-1, keepdims=True)                       # (b_tile, N, 1)

        pv = jax.lax.dot_general(
            p.astype(jnp.bfloat16), v,
            dimension_numbers=(((2,), (1,)), ((0,), (0,))),
            preferred_element_type=jnp.float32)                      # (b_tile, N, hd)
        pv = pv * pl.reciprocal(l, approx=True)                      # deferred 1/l (EUP)

        # split-matmul == concat(heads) @ Wproj  (avoids in-kernel concat)
        pv = pv.reshape(M, head_dim).astype(jnp.bfloat16)
        acc = acc + jnp.dot(pv, wproj_ref[lo:hi, :],
                            preferred_element_type=jnp.float32)

    out = acc + bproj_ref[...]
    o_ref[...] = out.reshape(b_tile, N, C).astype(o_ref.dtype)


# ================================ JAX wrapper =================================

def _relative_position_bias(table, window_size, num_heads):
    """(num_heads, N, N) additive bias, exactly as in the PyTorch module."""
    Wh, Ww = window_size
    N = Wh * Ww
    coords = jnp.stack(jnp.meshgrid(jnp.arange(Wh), jnp.arange(Ww),
                                    indexing='ij'))                  # (2, Wh, Ww)
    coords_flatten = coords.reshape(2, -1)                           # (2, N)
    rel = coords_flatten[:, :, None] - coords_flatten[:, None, :]    # (2, N, N)
    rel = jnp.transpose(rel, (1, 2, 0))                              # (N, N, 2)
    idx = (rel[..., 0] + (Wh - 1)) * (2 * Ww - 1) + (rel[..., 1] + (Ww - 1))
    bias = jnp.take(table, idx.reshape(-1), axis=0)                  # (N*N, nH)
    bias = bias.reshape(N, N, num_heads)
    return jnp.transpose(bias, (2, 0, 1)).astype(jnp.float32)        # (nH, N, N)


def _choose_b_tile(B_, max_tile=8):
    """Largest divisor of B_ <= max_tile that keeps >= 2 grid steps (v7x 2 TCs)."""
    best = 1
    for t in range(1, min(max_tile, B_) + 1):
        if B_ % t == 0 and (B_ // t >= 2 or B_ == 1):
            best = t
    return best


def window_attention_forward(x, params, *, window_size, num_heads,
                             mask=None, qk_scale=None, b_tile=None):
    """x: (num_windows*B, N, C); mask: (nW, N, N) additive 0/-inf mask or None."""
    B_, N, C = x.shape
    head_dim = C // num_heads
    scale = float(qk_scale) if qk_scale is not None else float(head_dim) ** (-0.5)

    if b_tile is None:
        b_tile = _choose_b_tile(B_)
    assert B_ % b_tile == 0, (B_, b_tile)
    num_blocks = B_ // b_tile

    rel_bias = _relative_position_bias(params['rel_bias_table'],
                                       window_size, num_heads)       # (nH, N, N) f32

    # Weights pre-cast to bf16 (halves weight DMA; matmuls accumulate in f32).
    wqkv = params['wqkv'].astype(jnp.bfloat16)
    wproj = params['wproj'].astype(jnp.bfloat16)
    bqkv = params['bqkv'].astype(jnp.float32)
    bproj = params['bproj'].astype(jnp.float32)

    in_specs = [
        pl.BlockSpec((b_tile, N, C), lambda b: (b, 0, 0)),           # x (B_TILE windows)
        pl.BlockSpec((C, 3 * C), lambda b: (0, 0)),                  # qkv weight (bf16)
        pl.BlockSpec((1, 3 * C), lambda b: (0, 0)),                  # qkv bias (f32)
        pl.BlockSpec((num_heads, N, N), lambda b: (0, 0, 0)),        # rel-pos bias (f32)
    ]
    inputs = [x, wqkv, bqkv, rel_bias]

    has_mask = mask is not None
    if has_mask:
        nW = mask.shape[0]
        mask_bf16 = mask.astype(jnp.bfloat16)                        # bf16 halves mask DMA
        if b_tile <= nW and nW % b_tile == 0:
            n_mask_blocks = nW // b_tile
            mask_arr = mask_bf16
            mask_idx = lambda b: (b % n_mask_blocks, 0, 0)           # window b -> mask b%nW
        else:
            mask_arr = jnp.tile(mask_bf16, (B_ // nW, 1, 1))         # fallback layout
            mask_idx = lambda b: (b, 0, 0)
        in_specs.append(pl.BlockSpec((b_tile, N, N), mask_idx))
        inputs.append(mask_arr)

    in_specs += [
        pl.BlockSpec((C, C), lambda b: (0, 0)),                      # proj weight (bf16)
        pl.BlockSpec((1, C), lambda b: (0, 0)),                      # proj bias (f32)
    ]
    inputs += [wproj, bproj]

    kernel = functools.partial(_window_attn_kernel,
                               num_heads=num_heads, head_dim=head_dim,
                               scale=scale, b_tile=b_tile, has_mask=has_mask)
    return pl.pallas_call(
        kernel,
        out_shape=jax.ShapeDtypeStruct((B_, N, C), x.dtype),
        grid=(num_blocks,),
        in_specs=in_specs,
        out_specs=pl.BlockSpec((b_tile, N, C), lambda b: (b, 0, 0)),
        compiler_params=pltpu.CompilerParams(
            dimension_semantics=("parallel",)),
    )(*inputs)


# ============================ pure-JAX reference ==============================

def _reference(x, params, *, window_size, num_heads, mask=None):
    B_, N, C = x.shape
    hd = C // num_heads
    scale = hd ** (-0.5)
    hp = jax.lax.Precision.HIGHEST
    qkv = jnp.einsum('bnc,cd->bnd', x, params['wqkv'], precision=hp) + params['bqkv']
    qkv = qkv.reshape(B_, N, 3, num_heads, hd).transpose(2, 0, 3, 1, 4)
    q, k, v = qkv[0] * scale, qkv[1], qkv[2]
    attn = jnp.einsum('bhqd,bhkd->bhqk', q, k, precision=hp)
    attn = attn + _relative_position_bias(params['rel_bias_table'],
                                          window_size, num_heads)[None]
    if mask is not None:
        nW = mask.shape[0]
        attn = attn.reshape(B_ // nW, nW, num_heads, N, N) + mask[None, :, None]
        attn = attn.reshape(B_, num_heads, N, N)
    attn = jax.nn.softmax(attn, axis=-1)
    out = jnp.einsum('bhqk,bhkd->bhqd', attn, v, precision=hp)
    out = out.transpose(0, 2, 1, 3).reshape(B_, N, C)
    return jnp.einsum('bnc,cd->bnd', out, params['wproj'], precision=hp) + params['bproj']


# ==================================== main ====================================

if __name__ == "__main__":
    B_ = 8                      # num_windows * batch
    window_size = (8, 8)
    N = window_size[0] * window_size[1]          # 64 tokens per window
    dim = 128
    num_heads = 4
    table_len = (2 * window_size[0] - 1) * (2 * window_size[1] - 1)

    key = jax.random.PRNGKey(0)
    ks = jax.random.split(key, 6)
    params = {
        # weights stored as (in, out) so the kernel does x @ W (same math as
        # PyTorch's x @ weight.T with weight of shape (out, in)).
        'wqkv': 0.05 * jax.random.normal(ks[0], (dim, 3 * dim), jnp.float32),
        'bqkv': 0.05 * jax.random.normal(ks[1], (1, 3 * dim), jnp.float32),
        'wproj': 0.05 * jax.random.normal(ks[2], (dim, dim), jnp.float32),
        'bproj': 0.05 * jax.random.normal(ks[3], (1, dim), jnp.float32),
        'rel_bias_table': 0.02 * jax.random.normal(
            ks[4], (table_len, num_heads), jnp.float32),
    }
    x = jax.random.normal(ks[5], (B_, N, dim), jnp.float32)

    TOL = 2e-2   # bf16-MXU kernel vs f32 HIGHEST-precision reference

    # ---- no-mask path -------------------------------------------------------
    fwd = jax.jit(functools.partial(window_attention_forward,
                                    window_size=window_size,
                                    num_heads=num_heads))
    out = jax.block_until_ready(fwd(x, params))
    assert out.shape == (B_, N, dim)
    ref = _reference(x, params, window_size=window_size, num_heads=num_heads)
    rel_err = float(jnp.max(jnp.abs(out - ref)) / (jnp.max(jnp.abs(ref)) + 1e-8))
    assert rel_err < TOL, f"no-mask mismatch vs reference: rel_err={rel_err}"

    # ---- shifted-window mask path (nW = 4, batch = 2) ------------------------
    nW = 4
    grp = (jnp.arange(N) >= N // 2).astype(jnp.int32)
    base = jnp.where(grp[:, None] == grp[None, :], 0.0, -100.0).astype(jnp.float32)
    win_sel = (jnp.arange(nW) % 2).astype(jnp.float32)               # windows 1,3 masked
    mask = base[None] * win_sel[:, None, None]                       # (nW, N, N)

    fwd_m = jax.jit(lambda x_, p_, m_: window_attention_forward(
        x_, p_, window_size=window_size, num_heads=num_heads, mask=m_))
    out_m = jax.block_until_ready(fwd_m(x, params, mask))
    ref_m = _reference(x, params, window_size=window_size,
                       num_heads=num_heads, mask=mask)
    rel_err_m = float(jnp.max(jnp.abs(out_m - ref_m)) / (jnp.max(jnp.abs(ref_m)) + 1e-8))
    assert rel_err_m < TOL, f"masked mismatch vs reference: rel_err={rel_err_m}"

    print("KERNEL_OK")
</pallas_src>

<mosaic_0001>
module attributes {stable_mosaic.version = 11 : i64} {
  func.func @_window_attn_kernel(%arg0: i32, %arg1: memref<4x64x128xf32, #tpu.memory_space<vmem>>, %arg2: memref<128x384xbf16, #tpu.memory_space<vmem>>, %arg3: memref<1x384xf32, #tpu.memory_space<vmem>>, %arg4: memref<4x64x64xf32, #tpu.memory_space<vmem>>, %arg5: memref<128x128xbf16, #tpu.memory_space<vmem>>, %arg6: memref<1x128xf32, #tpu.memory_space<vmem>>, %arg7: memref<4x64x128xf32, #tpu.memory_space<vmem>>) attributes {dimension_semantics = [#tpu.dimension_semantics<parallel>], iteration_bounds = array<i64: 2>, scalar_prefetch = 0 : i64, scratch_operands = 0 : i64, tpu.core_type = #tpu.core_type<tc>, window_params = [{transform_indices = @transform_0, window_bounds = array<i64: 4, 64, 128>}, {pipeline_mode = #tpu.pipeline_mode<synchronous>, transform_indices = @transform_1, window_bounds = array<i64: 128, 384>}, {pipeline_mode = #tpu.pipeline_mode<synchronous>, transform_indices = @transform_2, window_bounds = array<i64: 1, 384>}, {pipeline_mode = #tpu.pipeline_mode<synchronous>, transform_indices = @transform_3, window_bounds = array<i64: 4, 64, 64>}, {pipeline_mode = #tpu.pipeline_mode<synchronous>, transform_indices = @transform_4, window_bounds = array<i64: 128, 128>}, {pipeline_mode = #tpu.pipeline_mode<synchronous>, transform_indices = @transform_5, window_bounds = array<i64: 1, 128>}, {transform_indices = @transform_6, window_bounds = array<i64: 4, 64, 128>}]} {
    %c0 = arith.constant 0 : index
    %c0_0 = arith.constant 0 : index
    %c0_1 = arith.constant 0 : index
    %0 = vector.load %arg1[%c0, %c0_0, %c0_1] : memref<4x64x128xf32, #tpu.memory_space<vmem>>, vector<4x64x128xf32>
    %1 = vector.shape_cast %0 : vector<4x64x128xf32> to vector<256x128xf32>
    %2 = arith.truncf %1 : vector<256x128xf32> to vector<256x128xbf16>
    %c0_2 = arith.constant 0 : index
    %c0_3 = arith.constant 0 : index
    %3 = vector.load %arg2[%c0_2, %c0_3] : memref<128x384xbf16, #tpu.memory_space<vmem>>, vector<128x384xbf16>
    %cst = arith.constant dense<0.000000e+00> : vector<256x384xf32>
    %4 = tpu.matmul %2, %3, %cst {dimension_numbers = #tpu.dot_dimension_numbers<[1], [0], [0], [1], [0, 0, 1, 1], [], []>} : vector<256x128xbf16>, vector<128x384xbf16>, vector<256x384xf32> -> vector<256x384xf32>
    %c0_4 = arith.constant 0 : index
    %c0_5 = arith.constant 0 : index
    %5 = vector.load %arg3[%c0_4, %c0_5] : memref<1x384xf32, #tpu.memory_space<vmem>>, vector<1x384xf32>
    %6 = vector.broadcast %5 : vector<1x384xf32> to vector<256x384xf32>
    %7 = arith.addf %4, %6 : vector<256x384xf32>
    %8 = vector.shape_cast %7 : vector<256x384xf32> to vector<4x64x384xf32>
    %cst_6 = arith.constant 0.000000e+00 : f32
    %9 = vector.broadcast %cst_6 : f32 to vector<256x128xf32>
    %10 = vector.extract_strided_slice %8 {offsets = [0, 0, 0], sizes = [4, 64, 32], strides = [1, 1, 1]} : vector<4x64x384xf32> to vector<4x64x32xf32>
    %cst_7 = arith.constant 0.176776692 : f32
    %11 = vector.broadcast %cst_7 : f32 to vector<4x64x32xf32>
    %12 = arith.mulf %10, %11 : vector<4x64x32xf32>
    %13 = arith.truncf %12 : vector<4x64x32xf32> to vector<4x64x32xbf16>
    %14 = vector.extract_strided_slice %8 {offsets = [0, 0, 128], sizes = [4, 64, 32], strides = [1, 1, 1]} : vector<4x64x384xf32> to vector<4x64x32xf32>
    %15 = arith.truncf %14 : vector<4x64x32xf32> to vector<4x64x32xbf16>
    %16 = vector.extract_strided_slice %8 {offsets = [0, 0, 256], sizes = [4, 64, 32], strides = [1, 1, 1]} : vector<4x64x384xf32> to vector<4x64x32xf32>
    %17 = arith.truncf %16 : vector<4x64x32xf32> to vector<4x64x32xbf16>
    %cst_8 = arith.constant dense<0.000000e+00> : vector<4x64x64xf32>
    %18 = tpu.matmul %13, %15, %cst_8 {dimension_numbers = #tpu.dot_dimension_numbers<[2], [2], [1], [1], [0, 0, 0, 1, 1, 1], [0], [0]>} : vector<4x64x32xbf16>, vector<4x64x32xbf16>, vector<4x64x64xf32> -> vector<4x64x64xf32>
    %c0_9 = arith.constant 0 : index
    %c0_10 = arith.constant 0 : index
    %c0_11 = arith.constant 0 : index
    %19 = vector.load %arg4[%c0_9, %c0_10, %c0_11] : memref<4x64x64xf32, #tpu.memory_space<vmem>>, vector<1x64x64xf32>
    %20 = vector.shape_cast %19 : vector<1x64x64xf32> to vector<64x64xf32>
    %21 = vector.shape_cast %20 : vector<64x64xf32> to vector<1x64x64xf32>
    %22 = vector.broadcast %21 : vector<1x64x64xf32> to vector<4x64x64xf32>
    %23 = arith.addf %18, %22 : vector<4x64x64xf32>
    %cst_12 = arith.constant dense<0xFF800000> : vector<4x64xf32>
    %24 = vector.multi_reduction <maximumf>, %23, %cst_12 [2] : vector<4x64x64xf32> to vector<4x64xf32>
    %25 = vector.shape_cast %24 : vector<4x64xf32> to vector<4x64x1xf32>
    %26 = vector.broadcast %25 : vector<4x64x1xf32> to vector<4x64x64xf32>
    %27 = arith.subf %23, %26 : vector<4x64x64xf32>
    %28 = math.exp %27 : vector<4x64x64xf32>
    %cst_13 = arith.constant dense<0.000000e+00> : vector<4x64xf32>
    %29 = vector.multi_reduction <add>, %28, %cst_13 [2] : vector<4x64x64xf32> to vector<4x64xf32>
    %30 = vector.shape_cast %29 : vector<4x64xf32> to vector<4x64x1xf32>
    %31 = arith.truncf %28 : vector<4x64x64xf32> to vector<4x64x64xbf16>
    %cst_14 = arith.constant dense<0.000000e+00> : vector<4x64x32xf32>
    %32 = tpu.matmul %31, %17, %cst_14 {dimension_numbers = #tpu.dot_dimension_numbers<[2], [1], [1], [2], [0, 0, 0, 1, 1, 2], [0], [0]>} : vector<4x64x64xbf16>, vector<4x64x32xbf16>, vector<4x64x32xf32> -> vector<4x64x32xf32>
    %33 = tpu.reciprocal %30 {approx = true} : vector<4x64x1xf32> -> vector<4x64x1xf32>
    %34 = vector.broadcast %33 : vector<4x64x1xf32> to vector<4x64x32xf32>
    %35 = arith.mulf %32, %34 : vector<4x64x32xf32>
    %36 = vector.shape_cast %35 : vector<4x64x32xf32> to vector<256x32xf32>
    %37 = arith.truncf %36 : vector<256x32xf32> to vector<256x32xbf16>
    %c0_15 = arith.constant 0 : index
    %c0_16 = arith.constant 0 : index
    %38 = vector.load %arg5[%c0_15, %c0_16] : memref<128x128xbf16, #tpu.memory_space<vmem>>, vector<32x128xbf16>
    %cst_17 = arith.constant dense<0.000000e+00> : vector<256x128xf32>
    %39 = tpu.matmul %37, %38, %cst_17 {dimension_numbers = #tpu.dot_dimension_numbers<[1], [0], [0], [1], [0, 0, 1, 1], [], []>} : vector<256x32xbf16>, vector<32x128xbf16>, vector<256x128xf32> -> vector<256x128xf32>
    %40 = arith.addf %9, %39 : vector<256x128xf32>
    %41 = vector.extract_strided_slice %8 {offsets = [0, 0, 32], sizes = [4, 64, 32], strides = [1, 1, 1]} : vector<4x64x384xf32> to vector<4x64x32xf32>
    %cst_18 = arith.constant 0.176776692 : f32
    %42 = vector.broadcast %cst_18 : f32 to vector<4x64x32xf32>
    %43 = arith.mulf %41, %42 : vector<4x64x32xf32>
    %44 = arith.truncf %43 : vector<4x64x32xf32> to vector<4x64x32xbf16>
    %45 = vector.extract_strided_slice %8 {offsets = [0, 0, 160], sizes = [4, 64, 32], strides = [1, 1, 1]} : vector<4x64x384xf32> to vector<4x64x32xf32>
    %46 = arith.truncf %45 : vector<4x64x32xf32> to vector<4x64x32xbf16>
    %47 = vector.extract_strided_slice %8 {offsets = [0, 0, 288], sizes = [4, 64, 32], strides = [1, 1, 1]} : vector<4x64x384xf32> to vector<4x64x32xf32>
    %48 = arith.truncf %47 : vector<4x64x32xf32> to vector<4x64x32xbf16>
    %cst_19 = arith.constant dense<0.000000e+00> : vector<4x64x64xf32>
    %49 = tpu.matmul %44, %46, %cst_19 {dimension_numbers = #tpu.dot_dimension_numbers<[2], [2], [1], [1], [0, 0, 0, 1, 1, 1], [0], [0]>} : vector<4x64x32xbf16>, vector<4x64x32xbf16>, vector<4x64x64xf32> -> vector<4x64x64xf32>
    %c1 = arith.constant 1 : index
    %c0_20 = arith.constant 0 : index
    %c0_21 = arith.constant 0 : index
    %50 = vector.load %arg4[%c1, %c0_20, %c0_21] : memref<4x64x64xf32, #tpu.memory_space<vmem>>, vector<1x64x64xf32>
    %51 = vector.shape_cast %50 : vector<1x64x64xf32> to vector<64x64xf32>
    %52 = vector.shape_cast %51 : vector<64x64xf32> to vector<1x64x64xf32>
    %53 = vector.broadcast %52 : vector<1x64x64xf32> to vector<4x64x64xf32>
    %54 = arith.addf %49, %53 : vector<4x64x64xf32>
    %cst_22 = arith.constant dense<0xFF800000> : vector<4x64xf32>
    %55 = vector.multi_reduction <maximumf>, %54, %cst_22 [2] : vector<4x64x64xf32> to vector<4x64xf32>
    %56 = vector.shape_cast %55 : vector<4x64xf32> to vector<4x64x1xf32>
    %57 = vector.broadcast %56 : vector<4x64x1xf32> to vector<4x64x64xf32>
    %58 = arith.subf %54, %57 : vector<4x64x64xf32>
    %59 = math.exp %58 : vector<4x64x64xf32>
    %cst_23 = arith.constant dense<0.000000e+00> : vector<4x64xf32>
    %60 = vector.multi_reduction <add>, %59, %cst_23 [2] : vector<4x64x64xf32> to vector<4x64xf32>
    %61 = vector.shape_cast %60 : vector<4x64xf32> to vector<4x64x1xf32>
    %62 = arith.truncf %59 : vector<4x64x64xf32> to vector<4x64x64xbf16>
    %cst_24 = arith.constant dense<0.000000e+00> : vector<4x64x32xf32>
    %63 = tpu.matmul %62, %48, %cst_24 {dimension_numbers = #tpu.dot_dimension_numbers<[2], [1], [1], [2], [0, 0, 0, 1, 1, 2], [0], [0]>} : vector<4x64x64xbf16>, vector<4x64x32xbf16>, vector<4x64x32xf32> -> vector<4x64x32xf32>
    %64 = tpu.reciprocal %61 {approx = true} : vector<4x64x1xf32> -> vector<4x64x1xf32>
    %65 = vector.broadcast %64 : vector<4x64x1xf32> to vector<4x64x32xf32>
    %66 = arith.mulf %63, %65 : vector<4x64x32xf32>
    %67 = vector.shape_cast %66 : vector<4x64x32xf32> to vector<256x32xf32>
    %68 = arith.truncf %67 : vector<256x32xf32> to vector<256x32xbf16>
    %c32 = arith.constant 32 : index
    %c0_25 = arith.constant 0 : index
    %69 = vector.load %arg5[%c32, %c0_25] : memref<128x128xbf16, #tpu.memory_space<vmem>>, vector<32x128xbf16>
    %cst_26 = arith.constant dense<0.000000e+00> : vector<256x128xf32>
    %70 = tpu.matmul %68, %69, %cst_26 {dimension_numbers = #tpu.dot_dimension_numbers<[1], [0], [0], [1], [0, 0, 1, 1], [], []>} : vector<256x32xbf16>, vector<32x128xbf16>, vector<256x128xf32> -> vector<256x128xf32>
    %71 = arith.addf %40, %70 : vector<256x128xf32>
    %72 = vector.extract_strided_slice %8 {offsets = [0, 0, 64], sizes = [4, 64, 32], strides = [1, 1, 1]} : vector<4x64x384xf32> to vector<4x64x32xf32>
    %cst_27 = arith.constant 0.176776692 : f32
    %73 = vector.broadcast %cst_27 : f32 to vector<4x64x32xf32>
    %74 = arith.mulf %72, %73 : vector<4x64x32xf32>
    %75 = arith.truncf %74 : vector<4x64x32xf32> to vector<4x64x32xbf16>
    %76 = vector.extract_strided_slice %8 {offsets = [0, 0, 192], sizes = [4, 64, 32], strides = [1, 1, 1]} : vector<4x64x384xf32> to vector<4x64x32xf32>
    %77 = arith.truncf %76 : vector<4x64x32xf32> to vector<4x64x32xbf16>
    %78 = vector.extract_strided_slice %8 {offsets = [0, 0, 320], sizes = [4, 64, 32], strides = [1, 1, 1]} : vector<4x64x384xf32> to vector<4x64x32xf32>
    %79 = arith.truncf %78 : vector<4x64x32xf32> to vector<4x64x32xbf16>
    %cst_28 = arith.constant dense<0.000000e+00> : vector<4x64x64xf32>
    %80 = tpu.matmul %75, %77, %cst_28 {dimension_numbers = #tpu.dot_dimension_numbers<[2], [2], [1], [1], [0, 0, 0, 1, 1, 1], [0], [0]>} : vector<4x64x32xbf16>, vector<4x64x32xbf16>, vector<4x64x64xf32> -> vector<4x64x64xf32>
    %c2 = arith.constant 2 : index
    %c0_29 = arith.constant 0 : index
    %c0_30 = arith.constant 0 : index
    %81 = vector.load %arg4[%c2, %c0_29, %c0_30] : memref<4x64x64xf32, #tpu.memory_space<vmem>>, vector<1x64x64xf32>
    %82 = vector.shape_cast %81 : vector<1x64x64xf32> to vector<64x64xf32>
    %83 = vector.shape_cast %82 : vector<64x64xf32> to vector<1x64x64xf32>
    %84 = vector.broadcast %83 : vector<1x64x64xf32> to vector<4x64x64xf32>
    %85 = arith.addf %80, %84 : vector<4x64x64xf32>
    %cst_31 = arith.constant dense<0xFF800000> : vector<4x64xf32>
    %86 = vector.multi_reduction <maximumf>, %85, %cst_31 [2] : vector<4x64x64xf32> to vector<4x64xf32>
    %87 = vector.shape_cast %86 : vector<4x64xf32> to vector<4x64x1xf32>
    %88 = vector.broadcast %87 : vector<4x64x1xf32> to vector<4x64x64xf32>
    %89 = arith.subf %85, %88 : vector<4x64x64xf32>
    %90 = math.exp %89 : vector<4x64x64xf32>
    %cst_32 = arith.constant dense<0.000000e+00> : vector<4x64xf32>
    %91 = vector.multi_reduction <add>, %90, %cst_32 [2] : vector<4x64x64xf32> to vector<4x64xf32>
    %92 = vector.shape_cast %91 : vector<4x64xf32> to vector<4x64x1xf32>
    %93 = arith.truncf %90 : vector<4x64x64xf32> to vector<4x64x64xbf16>
    %cst_33 = arith.constant dense<0.000000e+00> : vector<4x64x32xf32>
    %94 = tpu.matmul %93, %79, %cst_33 {dimension_numbers = #tpu.dot_dimension_numbers<[2], [1], [1], [2], [0, 0, 0, 1, 1, 2], [0], [0]>} : vector<4x64x64xbf16>, vector<4x64x32xbf16>, vector<4x64x32xf32> -> vector<4x64x32xf32>
    %95 = tpu.reciprocal %92 {approx = true} : vector<4x64x1xf32> -> vector<4x64x1xf32>
    %96 = vector.broadcast %95 : vector<4x64x1xf32> to vector<4x64x32xf32>
    %97 = arith.mulf %94, %96 : vector<4x64x32xf32>
    %98 = vector.shape_cast %97 : vector<4x64x32xf32> to vector<256x32xf32>
    %99 = arith.truncf %98 : vector<256x32xf32> to vector<256x32xbf16>
    %c64 = arith.constant 64 : index
    %c0_34 = arith.constant 0 : index
    %100 = vector.load %arg5[%c64, %c0_34] : memref<128x128xbf16, #tpu.memory_space<vmem>>, vector<32x128xbf16>
    %cst_35 = arith.constant dense<0.000000e+00> : vector<256x128xf32>
    %101 = tpu.matmul %99, %100, %cst_35 {dimension_numbers = #tpu.dot_dimension_numbers<[1], [0], [0], [1], [0, 0, 1, 1], [], []>} : vector<256x32xbf16>, vector<32x128xbf16>, vector<256x128xf32> -> vector<256x128xf32>
    %102 = arith.addf %71, %101 : vector<256x128xf32>
    %103 = vector.extract_strided_slice %8 {offsets = [0, 0, 96], sizes = [4, 64, 32], strides = [1, 1, 1]} : vector<4x64x384xf32> to vector<4x64x32xf32>
    %cst_36 = arith.constant 0.176776692 : f32
    %104 = vector.broadcast %cst_36 : f32 to vector<4x64x32xf32>
    %105 = arith.mulf %103, %104 : vector<4x64x32xf32>
    %106 = arith.truncf %105 : vector<4x64x32xf32> to vector<4x64x32xbf16>
    %107 = vector.extract_strided_slice %8 {offsets = [0, 0, 224], sizes = [4, 64, 32], strides = [1, 1, 1]} : vector<4x64x384xf32> to vector<4x64x32xf32>
    %108 = arith.truncf %107 : vector<4x64x32xf32> to vector<4x64x32xbf16>
    %109 = vector.extract_strided_slice %8 {offsets = [0, 0, 352], sizes = [4, 64, 32], strides = [1, 1, 1]} : vector<4x64x384xf32> to vector<4x64x32xf32>
    %110 = arith.truncf %109 : vector<4x64x32xf32> to vector<4x64x32xbf16>
    %cst_37 = arith.constant dense<0.000000e+00> : vector<4x64x64xf32>
    %111 = tpu.matmul %106, %108, %cst_37 {dimension_numbers = #tpu.dot_dimension_numbers<[2], [2], [1], [1], [0, 0, 0, 1, 1, 1], [0], [0]>} : vector<4x64x32xbf16>, vector<4x64x32xbf16>, vector<4x64x64xf32> -> vector<4x64x64xf32>
    %c3 = arith.constant 3 : index
    %c0_38 = arith.constant 0 : index
    %c0_39 = arith.constant 0 : index
    %112 = vector.load %arg4[%c3, %c0_38, %c0_39] : memref<4x64x64xf32, #tpu.memory_space<vmem>>, vector<1x64x64xf32>
    %113 = vector.shape_cast %112 : vector<1x64x64xf32> to vector<64x64xf32>
    %114 = vector.shape_cast %113 : vector<64x64xf32> to vector<1x64x64xf32>
    %115 = vector.broadcast %114 : vector<1x64x64xf32> to vector<4x64x64xf32>
    %116 = arith.addf %111, %115 : vector<4x64x64xf32>
    %cst_40 = arith.constant dense<0xFF800000> : vector<4x64xf32>
    %117 = vector.multi_reduction <maximumf>, %116, %cst_40 [2] : vector<4x64x64xf32> to vector<4x64xf32>
    %118 = vector.shape_cast %117 : vector<4x64xf32> to vector<4x64x1xf32>
    %119 = vector.broadcast %118 : vector<4x64x1xf32> to vector<4x64x64xf32>
    %120 = arith.subf %116, %119 : vector<4x64x64xf32>
    %121 = math.exp %120 : vector<4x64x64xf32>
    %cst_41 = arith.constant dense<0.000000e+00> : vector<4x64xf32>
    %122 = vector.multi_reduction <add>, %121, %cst_41 [2] : vector<4x64x64xf32> to vector<4x64xf32>
    %123 = vector.shape_cast %122 : vector<4x64xf32> to vector<4x64x1xf32>
    %124 = arith.truncf %121 : vector<4x64x64xf32> to vector<4x64x64xbf16>
    %cst_42 = arith.constant dense<0.000000e+00> : vector<4x64x32xf32>
    %125 = tpu.matmul %124, %110, %cst_42 {dimension_numbers = #tpu.dot_dimension_numbers<[2], [1], [1], [2], [0, 0, 0, 1, 1, 2], [0], [0]>} : vector<4x64x64xbf16>, vector<4x64x32xbf16>, vector<4x64x32xf32> -> vector<4x64x32xf32>
    %126 = tpu.reciprocal %123 {approx = true} : vector<4x64x1xf32> -> vector<4x64x1xf32>
    %127 = vector.broadcast %126 : vector<4x64x1xf32> to vector<4x64x32xf32>
    %128 = arith.mulf %125, %127 : vector<4x64x32xf32>
    %129 = vector.shape_cast %128 : vector<4x64x32xf32> to vector<256x32xf32>
    %130 = arith.truncf %129 : vector<256x32xf32> to vector<256x32xbf16>
    %c96 = arith.constant 96 : index
    %c0_43 = arith.constant 0 : index
    %131 = vector.load %arg5[%c96, %c0_43] : memref<128x128xbf16, #tpu.memory_space<vmem>>, vector<32x128xbf16>
    %cst_44 = arith.constant dense<0.000000e+00> : vector<256x128xf32>
    %132 = tpu.matmul %130, %131, %cst_44 {dimension_numbers = #tpu.dot_dimension_numbers<[1], [0], [0], [1], [0, 0, 1, 1], [], []>} : vector<256x32xbf16>, vector<32x128xbf16>, vector<256x128xf32> -> vector<256x128xf32>
    %133 = arith.addf %102, %132 : vector<256x128xf32>
    %c0_45 = arith.constant 0 : index
    %c0_46 = arith.constant 0 : index
    %134 = vector.load %arg6[%c0_45, %c0_46] : memref<1x128xf32, #tpu.memory_space<vmem>>, vector<1x128xf32>
    %135 = vector.broadcast %134 : vector<1x128xf32> to vector<256x128xf32>
    %136 = arith.addf %133, %135 : vector<256x128xf32>
    %137 = vector.shape_cast %136 : vector<256x128xf32> to vector<4x64x128xf32>
    %c0_47 = arith.constant 0 : index
    %c0_48 = arith.constant 0 : index
    %c0_49 = arith.constant 0 : index
    %138 = vector.load %arg7[%c0_47, %c0_48, %c0_49] : memref<4x64x128xf32, #tpu.memory_space<vmem>>, vector<4x64x128xf32>
    tpu.vector_store %arg7[%c0_47, %c0_48, %c0_49], %137 {strides = array<i32>} : memref<4x64x128xf32, #tpu.memory_space<vmem>>, vector<4x64x128xf32>,
    return
  }
  func.func @transform_0(%arg0: i32) -> (i32, i32, i32) {
    %c0_i32 = arith.constant 0 : i32
    %c0_i32_0 = arith.constant 0 : i32
    %c0_i32_1 = arith.constant 0 : i32
    return %arg0, %c0_i32, %c0_i32_0 : i32, i32, i32
  }
  func.func @transform_1(%arg0: i32) -> (i32, i32) {
    %c0_i32 = arith.constant 0 : i32
    %c0_i32_0 = arith.constant 0 : i32
    %c0_i32_1 = arith.constant 0 : i32
    return %c0_i32, %c0_i32_0 : i32, i32
  }
  func.func @transform_2(%arg0: i32) -> (i32, i32) {
    %c0_i32 = arith.constant 0 : i32
    %c0_i32_0 = arith.constant 0 : i32
    %c0_i32_1 = arith.constant 0 : i32
    return %c0_i32, %c0_i32_0 : i32, i32
  }
  func.func @transform_3(%arg0: i32) -> (i32, i32, i32) {
    %c0_i32 = arith.constant 0 : i32
    %c0_i32_0 = arith.constant 0 : i32
    %c0_i32_1 = arith.constant 0 : i32
    %c0_i32_2 = arith.constant 0 : i32
    return %c0_i32, %c0_i32_0, %c0_i32_1 : i32, i32, i32
  }
  func.func @transform_4(%arg0: i32) -> (i32, i32) {
    %c0_i32 = arith.constant 0 : i32
    %c0_i32_0 = arith.constant 0 : i32
    %c0_i32_1 = arith.constant 0 : i32
    return %c0_i32, %c0_i32_0 : i32, i32
  }
  func.func @transform_5(%arg0: i32) -> (i32, i32) {
    %c0_i32 = arith.constant 0 : i32
    %c0_i32_0 = arith.constant 0 : i32
    %c0_i32_1 = arith.constant 0 : i32
    return %c0_i32, %c0_i32_0 : i32, i32
  }
  func.func @transform_6(%arg0: i32) -> (i32, i32, i32) {
    %c0_i32 = arith.constant 0 : i32
    %c0_i32_0 = arith.constant 0 : i32
    %c0_i32_1 = arith.constant 0 : i32
    return %arg0, %c0_i32, %c0_i32_0 : i32, i32, i32
  }
}

</mosaic_0001>

<bundles_post_ra>
// kernel: sub.8
= control target key start
LH: loop header
LB: loop body
LE: loop exit
PB: predicated region body
PF: predicated region fallthrough
CT: control target
= control target key end

     0   :  { %s7_s6 = smov 3  ;;  %s21_s9 = smov 3  ;;  %vm4_vm0 = vcmask 64512   ;;  %vm11_vm1 = vcmask 523712   ;;  %vm18_vm2 = vcmask 458112   ;;  %vm25_vm3 = vcmask 392512   ;;  %s119_s0 = inlined_call_operand.vmem [shape: s32[2,8,8], index: 0, kind: input, shape index: {}]   ;;  %s120_s1 = inlined_call_operand.vmem [shape: s32[2,64], index: 1, kind: output, shape index: {}]  }
   0x1   :  { %v61_v0 = vld [vmem:[%s119_s0 + $0x7] ss:$8 sm:%s7_s6]   ;;  %s75_s10 = smov 56   ;;  %v63_v1 = vld [vmem:[%s119_s0 + $0x5] ss:$8 sm:%s21_s9]   ;;  %s14_s13 = smov 3 }
   0x2   :  { %9 = vrot.lane.b32.xlu0 %v61_v0, %s75_s10  ;;  %s76_s14 = smov 40   ;;  %v62_v2 = vld [vmem:[%s119_s0 + $0x6] ss:$8 sm:%s14_s13]   ;;  %s28_s17 = smov 3  ;;  %vm32_vm4 = vcmask 326912   ;;  %vm39_vm5 = vcmask 261312  }
   0x3   :  { %23 = vrot.lane.b32.xlu1 %v63_v1, %s76_s14  ;;  %v64_v3 = vld [vmem:[%s119_s0 + $0x4] ss:$8 sm:%s28_s17]   ;;  %s35_s20 = smov 3  ;;  %s42_s21 = smov 3  ;;  %vm46_vm6 = vcmask 195712   ;;  %vm53_vm7 = vcmask 130112  }
   0x4   :  { %s77_s22 = smov 48   ;;  %s78_s23 = smov 32   ;;  %v65_v4 = vld [vmem:[%s119_s0 + $0x3] ss:$8 sm:%s35_s20]   ;;  %v66_v5 = vld [vmem:[%s119_s0 + $0x2] ss:$8 sm:%s42_s21]  }
   0x5   :  { %s2_s26 = smov 3  ;;  %s49_s29 = smov 3 }
   0x6   :  { %16 = vrot.lane.b32.xlu0 %v62_v2, %s77_s22  ;;  %v3_v6 = vld [vmem:[%s119_s0] ss:$8 sm:%s2_s26]   ;;  %s79_s3 = smov 24   ;;  %s80_s4 = smov 16  }
   0x7   :  { %30 = vrot.lane.b32.xlu1 %v64_v3, %s78_s23  ;;  %5 = vst.msk [vmem:[#allocation0] sm:$0x3] %vm4_vm0, %v3_v6   ;;  %v67_v7 = vld [vmem:[%s119_s0 + $0x1] ss:$8 sm:%s49_s29]   ;;  %s81_s0 = smov 8  }
   0xa   :  { %37 = vrot.lane.b32.xlu0 %v65_v4, %s79_s3 }
   0xb   :  { %44 = vrot.lane.b32.xlu1 %v66_v5, %s80_s4 }
   0xe   :  { %51 = vrot.lane.b32.xlu0 %v67_v7, %s81_s0 }
  0x74   :  { %v10_v8 = vpop.permute.xlu0 %9  }
  0x75   :  { %12 = vst.msk [vmem:[#allocation0] sm:$0x3] %vm11_vm1, %v10_v8   ;;  %v24_v9 = vpop.permute.xlu1 %23  }
  0x78   :  { %v17_v10 = vpop.permute.xlu0 %16  }
  0x79   :  { %19 = vst.msk [vmem:[#allocation0] sm:$0x3] %vm18_vm2, %v17_v10   ;;  %v31_v11 = vpop.permute.xlu1 %30  }
  0x7a   :  { %26 = vst.msk [vmem:[#allocation0] sm:$0x3] %vm25_vm3, %v24_v9  }
  0x7b   :  { %33 = vst.msk [vmem:[#allocation0] sm:$0x3] %vm32_vm4, %v31_v11  }
  0x7c   :  { %v38_v12 = vpop.permute.xlu0 %37  }
  0x7d   :  { %40 = vst.msk [vmem:[#allocation0] sm:$0x3] %vm39_vm5, %v38_v12   ;;  %v45_v13 = vpop.permute.xlu1 %44  }
  0x7e   :  { %47 = vst.msk [vmem:[#allocation0] sm:$0x3] %vm46_vm6, %v45_v13  }
  0x80   :  { %v52_v14 = vpop.permute.xlu0 %51  }
  0x81   :  { %54 = vst.msk [vmem:[#allocation0] sm:$0x3] %vm53_vm7, %v52_v14  }
  0x88   :  { %v58_v15 = vld [vmem:[#allocation0] sm:$0x3] }
  0x89   :  { %60 = vst [vmem:[%s120_s1] sm:$0x3] %v58_v15 }

// kernel: window_attention_forward.1
= control target key start
LH: loop header
LB: loop body
LE: loop exit
PB: predicated region body
PF: predicated region fallthrough
CT: control target
= control target key end

     0   :  { %11 = vsyncpa [#allocation3], 0  ;;  %s11959_s0 = inlined_call_operand.vmem [shape: f32[8,64,128], index: 0, kind: input, shape index: {}]   ;;  %s11960_s1 = inlined_call_operand.vmem [shape: bf16[128,384], index: 1, kind: input, shape index: {}]   ;;  %s11961_s2 = inlined_call_operand.vmem [shape: f32[1,384], index: 2, kind: input, shape index: {}]   ;;  %s11962_s3 = inlined_call_operand.vmem [shape: f32[4,64,64], index: 3, kind: input, shape index: {}]   ;;  %s11963_s4 = inlined_call_operand.vmem [shape: bf16[128,128], index: 4, kind: input, shape index: {}]   ;;  %s11964_s5 = inlined_call_operand.vmem [shape: f32[1,128], index: 5, kind: input, shape index: {}]   ;;  %s11965_s6 = inlined_call_operand.hbm [shape: f32[8,64,128], index: 6, kind: output, shape index: {}]  }
   0x1   :  { %13 = vsyncpa [#allocation3 + $0x1], 0  ;;  %s8830_s21 = smov 0   ;;  %s8832_s22 = smov 0  }
   0x2   :  { %s8834_s23 = smov 0   ;;  %s8836_s24 = smov 0  }
   0x3 LB: > { %s8851_s25 = sadd.s32 4294967295, %s8786_s24   ;;  %s6641_s26 = sadd.s32 4294967294, %s8786_s24   ;;  %s8786_s24 = sphi %s8836_s24, %s12440_s24   ;;  %s8782_s23 = sphi %s8834_s23, %s12439_s23   ;;  %s8778_s22 = sphi %s8832_s22, %s12438_s22   ;;  %s8774_s21 = sphi %s8830_s21, %s12437_s21  }
   0x4   : > { %s8855_s27 = sadd.s32 1, %s8786_s24   ;;  %s157_s28 = sadd.s32 1, %s8782_s23 }
   0x5   : > { %s154_s29 = ssub.s32 %s8786_s24, %s8855_s27  ;;  %p167_p0 = scmp.ne.s32.totalorder %s8782_s23, %s8778_s22 }
   0x6   : > { %p155_p1 = scmp.eq.s32.totalorder %s154_s29, 0  ;;  %p168_p2 = scmp.eq.s32.totalorder %s8851_s25, 1 }
   0x7   : > { %p173_p3 = scmp.ne.s32.totalorder %s8778_s22, %s8774_s21  ;;  %p174_p4 = scmp.eq.s32.totalorder %s6641_s26, 1 }
   0x8   : > { %s8866_s30 = scalar_select %p155_p1, %s8782_s23, %s157_s28  }
   0x9   : > { %p8868_p5 = por %p168_p2, %p167_p0  ;;  %p8872_p6 = por %p174_p4, %p173_p3 }
   0xa   : > { %p6644_p7 = scmp.ge.s32.totalorder %s8786_s24, 1  ;;  %p217_p8 = scmp.lt.s32.totalorder %s8786_s24, 3 }
   0xc   : > { %p218_p9 = pnand %p6644_p7, %p217_p8 }
   0xe   : > { %221 = sbr.rel (%p218_p9) target bundleno = 3211 (0xc8b), region = 44 }
  0x15   : > { %v8172_v0 = vld [vmem:[%s11960_s1 + $0x4] ss:$12 sps:$4 sm:$0xff]   ;;  %s6646_s11 = sshll.u32 %s8851_s25, 2  ;;  %v8174_v1 = vld [vmem:[%s11960_s1] ss:$12 sps:$4 sm:$0xff]   ;;  %v8788_v2 = vmov 0  }
  0x16   : > { %514 = vmatprep.mubr.bf16.mxu0 %v8788_v2  ;;  %p249_p10 = scmp.lt.s32.totalorder %s6646_s11, 7  ;;  %482 = vmatprep.subr.bf16.mxu0 %v8172_v0  ;;  %v8175_v3 = vld [vmem:[%s11960_s1 + $0x1c] ss:$12 sps:$4 sm:$0xff]   ;;  %v8177_v4 = vld [vmem:[%s11960_s1 + $0x18] ss:$12 sps:$4 sm:$0xff]   ;;  %vm924_vm0 = vcmask 261120  }
  0x17   : > { %483 = vmatpush1.bf16.msra.mxu0 %v8174_v1  ;;  %v8178_v5 = vld [vmem:[%s11960_s1 + $0x34] ss:$12 sps:$4 sm:$0xff]   ;;  %v8180_v6 = vld [vmem:[%s11960_s1 + $0x30] ss:$12 sps:$4 sm:$0xff]   ;;  %v8181_v7 = vld [vmem:[%s11960_s1 + $0x4c] ss:$12 sps:$4 sm:$0xff]  }
  0x18   : > { %s12442_s11 = smov (!%p249_p10, %s6646_s11), 7  ;;  %484 = vmatprep.subr.bf16.mxu0 %v8175_v3  ;;  %v8183_v9 = vld [vmem:[%s11960_s1 + $0x48] ss:$12 sps:$4 sm:$0xff]   ;;  %v8184_v11 = vld [vmem:[%s11960_s1 + $0x64] ss:$12 sps:$4 sm:$0xff]   ;;  %vm1281_vm1 = vcmask 523264  }
  0x19   : > { %s6904_s20 = sshll.u32 %s12442_s11, 6  ;;  %v8186_v13 = vld [vmem:[%s11960_s1 + $0x60] ss:$12 sps:$4 sm:$0xff]   ;;  %v8187_v14 = vld [vmem:[%s11960_s1 + $0x7c] ss:$12 sps:$4 sm:$0xff]   ;;  %s8790_s14 = smov 64  }
  0x1a   : > { %s8901_s10 = scalar_lea.vmem %s11959_s0, %s6904_s20  ;;  %v8189_v15 = vld [vmem:[%s11960_s1 + $0x78] ss:$12 sps:$4 sm:$0xff]   ;;  %v8190_v16 = vld [vmem:[%s11960_s1 + $0x94] ss:$12 sps:$4 sm:$0xff]   ;;  %v8192_v17 = vld [vmem:[%s11960_s1 + $0x90] ss:$12 sps:$4 sm:$0xff]  }
  0x1b   : > { %485 = vmatpush1.bf16.msra.mxu0 %v8177_v4  ;;  %v257_v8 = vld [vmem:[%s8901_s10] sm:$0xff]  ;;  %v258_v10 = vld [vmem:[%s8901_s10 + $0x8] sm:$0xff]  ;;  %v8199_v23 = vld [vmem:[%s11960_s1 + $0x50] ss:$12 sps:$4 sm:$0xff]   ;;  %s8789_s20 = smov 96   ;;  %s8791_s26 = smov 32  }
  0x1c   : > { %486 = vmatprep.subr.bf16.mxu0 %v8178_v5  ;;  %v289_v12 = vpack.c.bf16 %v258_v10, %v257_v8  ;;  %v8193_v18 = vld [vmem:[%s11960_s1 + $0xac] ss:$12 sps:$4 sm:$0xff]   ;;  %v8196_v19 = vld [vmem:[%s11960_s1 + $0x8] ss:$12 sps:$4 sm:$0xff]   ;;  %v261_v29 = vld [vmem:[%s8901_s10 + $0x20] sm:$0xff]  ;;  %v339_v10 = vlaneseq  ;;  %s245_s16 = sand.u32 1, %s8778_s22  }
  0x1d   : > { %v8197_v20 = vld [vmem:[%s11960_s1 + $0x20] ss:$12 sps:$4 sm:$0xff]   ;;  %v8195_v21 = vld [vmem:[%s11960_s1 + $0xa8] ss:$12 sps:$4 sm:$0xff]   ;;  %7259 = vmatprep.subr.bf16.mxu1 %v8196_v19  ;;  %v8198_v22 = vld [vmem:[%s11960_s1 + $0x38] ss:$12 sps:$4 sm:$0xff]  }
  0x1e   : > { %7275 = vmatprep.mubr.bf16.mxu1 %v289_v12  ;;  %7260 = vmatpush3.bf16.msra.mxu1 %v8196_v19  ;;  %v259_v24 = vld [vmem:[%s8901_s10 + $0x10] sm:$0xff]  ;;  %v260_v25 = vld [vmem:[%s8901_s10 + $0x18] sm:$0xff]  ;;  %v8201_v28 = vld [vmem:[%s11960_s1 + $0x80] ss:$12 sps:$4 sm:$0xff]   ;;  %s6645_s17 = sshll.u32 %s245_s16, 8 }
  0x1f   : > { %487 = vmatpush1.bf16.msra.mxu0 %v8180_v6  ;;  %7261 = vmatprep.subr.bf16.mxu1 %v8197_v20  ;;  %v290_v26 = vpack.c.bf16 %v260_v25, %v259_v24  ;;  %v8200_v27 = vld [vmem:[%s11960_s1 + $0x68] ss:$12 sps:$4 sm:$0xff]   ;;  %v8202_v32 = vld [vmem:[%s11960_s1 + $0x98] ss:$12 sps:$4 sm:$0xff]   ;;  %v8203_v33 = vld [vmem:[%s11960_s1 + $0xb0] ss:$12 sps:$4 sm:$0xff]  }
  0x20   : > { %488 = vmatprep.subr.bf16.mxu0 %v8181_v7  ;;  %v262_v30 = vld [vmem:[%s8901_s10 + $0x28] sm:$0xff]  ;;  %v263_v34 = vld [vmem:[%s8901_s10 + $0x30] sm:$0xff]  ;;  %v264_v35 = vld [vmem:[%s8901_s10 + $0x38] sm:$0xff]  ;;  %s11819_s19 = scalar_lea.vmem [#allocation2], %s6645_s17 }
  0x21   : > { %v291_v31 = vpack.c.bf16 %v262_v30, %v261_v29  ;;  %v292_v36 = vpack.c.bf16 %v264_v35, %v263_v34  ;;  %v265_v37 = vld [vmem:[%s8901_s10 + $0x40] sm:$0xff]  ;;  %v266_v38 = vld [vmem:[%s8901_s10 + $0x48] sm:$0xff]  ;;  %v267_v40 = vld [vmem:[%s8901_s10 + $0x50] sm:$0xff]  ;;  %s6579_s28 = sshll.u32 %s11819_s19, 4  ;;  %s11910_s28 = int_to_ptr.vmem [resolvable:$true] %s6579_s28 }
  0x22   : > { %7262 = vmatpush3.bf16.msra.mxu1 %v8197_v20  ;;  %v293_v39 = vpack.c.bf16 %v266_v38, %v265_v37  ;;  %v268_v41 = vld [vmem:[%s8901_s10 + $0x58] sm:$0xff]  ;;  %v269_v43 = vld [vmem:[%s8901_s10 + $0x60] sm:$0xff]  ;;  %v270_v44 = vld [vmem:[%s8901_s10 + $0x68] sm:$0xff]  ;;  %s8724_s12 = scalar_lea.vmem %s11910_s28, 4096 }
  0x23   : > { %489 = vmatpush1.bf16.msra.mxu0 %v8183_v9  ;;  %7263 = vmatprep.subr.bf16.mxu1 %v8198_v22  ;;  %v294_v42 = vpack.c.bf16 %v268_v41, %v267_v40  ;;  %v295_v45 = vpack.c.bf16 %v270_v44, %v269_v43  ;;  %v271_v46 = vld [vmem:[%s8901_s10 + $0x70] sm:$0xff]  ;;  %v272_v47 = vld [vmem:[%s8901_s10 + $0x78] sm:$0xff]  ;;  %v273_v48 = vld [vmem:[%s8901_s10 + $0x80] sm:$0xff]  ;;  %p8725_p11 = scmp.ne.s32.totalorder %s11910_s28, %s8724_s12 }
  0x24   : > { %490 = vmatprep.subr.bf16.mxu0 %v8184_v11  ;;  %v274_v49 = vld [vmem:[%s8901_s10 + $0x88] sm:$0xff]  ;;  %v296_v50 = vpack.c.bf16 %v272_v47, %v271_v46  ;;  %v275_v52 = vld [vmem:[%s8901_s10 + $0x90] sm:$0xff]  ;;  %v276_v53 = vld [vmem:[%s8901_s10 + $0x98] sm:$0xff]  ;;  %v9004_v11 = vshrl.u32 %v339_v10, 7 }
  0x25   : > { %v297_v51 = vpack.c.bf16 %v274_v49, %v273_v48  ;;  %v277_v54 = vld [vmem:[%s8901_s10 + $0xa0] sm:$0xff]  ;;  %v278_v55 = vld [vmem:[%s8901_s10 + $0xa8] sm:$0xff]  ;;  %v298_v56 = vpack.c.bf16 %v276_v53, %v275_v52  ;;  %v279_v58 = vld [vmem:[%s8901_s10 + $0xb0] sm:$0xff]  ;;  %p8726_p12 = pnand %p8725_p11, %p8868_p5 }
  0x26   : > { %7264 = vmatpush3.bf16.msra.mxu1 %v8198_v22  ;;  %v299_v57 = vpack.c.bf16 %v278_v55, %v277_v54  ;;  %v280_v59 = vld [vmem:[%s8901_s10 + $0xb8] sm:$0xff]  ;;  %v281_v60 = vld [vmem:[%s8901_s10 + $0xc0] sm:$0xff]  ;;  %v282_v61 = vld [vmem:[%s8901_s10 + $0xc8] sm:$0xff] }
  0x27   : > { %491 = vmatpush1.bf16.msra.mxu0 %v8186_v13  ;;  %7265 = vmatprep.subr.bf16.mxu1 %v8199_v23  ;;  %v300_v62 = vpack.c.bf16 %v280_v59, %v279_v58  ;;  %v301_v63 = vpack.c.bf16 %v282_v61, %v281_v60  ;;  %v283_v0 = vld [vmem:[%s8901_s10 + $0xd0] sm:$0xff]  ;;  %v284_v1 = vld [vmem:[%s8901_s10 + $0xd8] sm:$0xff]  ;;  %v285_v3 = vld [vmem:[%s8901_s10 + $0xe0] sm:$0xff]  ;;  %p8727_p13 = pneg %p8726_p12 }
  0x28   : > { %492 = vmatprep.subr.bf16.mxu0 %v8187_v14  ;;  %v286_v4 = vld [vmem:[%s8901_s10 + $0xe8] sm:$0xff]  ;;  %v302_v5 = vpack.c.bf16 %v284_v1, %v283_v0  ;;  %v287_v7 = vld [vmem:[%s8901_s10 + $0xf0] sm:$0xff]  ;;  %v288_v8 = vld [vmem:[%s8901_s10 + $0xf8] sm:$0xff]  ;;  %v345_v14 = vsub.s32 1, %v9004_v11 }
  0x29   : > { %v303_v6 = vpack.c.bf16 %v286_v4, %v285_v3  ;;  %v304_v9 = vpack.c.bf16 %v288_v8, %v287_v7  ;;  %v9010_v13 = vld [vmem:[%s11961_s2] sm:$0x7] }
  0x2a   : > { %7266 = vmatpush3.bf16.msra.mxu1 %v8199_v23 }
  0x2b   : > { %493 = vmatpush1.bf16.msra.mxu0 %v8189_v15  ;;  %7267 = vmatprep.subr.bf16.mxu1 %v8200_v27 }
  0x2c   : > { %494 = vmatprep.subr.bf16.mxu0 %v8190_v16 }
  0x2e   : > { %7268 = vmatpush3.bf16.msra.mxu1 %v8200_v27 }
  0x2f   : > { %495 = vmatpush1.bf16.msra.mxu0 %v8192_v17  ;;  %7269 = vmatprep.subr.bf16.mxu1 %v8201_v28  ;;  %v9017_v17 = vrot.slane %v9010_v13, %v345_v14 }
  0x30   : > { %496 = vmatprep.subr.bf16.mxu0 %v8193_v18 }
  0x32   : > { %7270 = vmatpush3.bf16.msra.mxu1 %v8201_v28 }
  0x33   : > { %497 = vmatpush1.bf16.msra.mxu0 %v8195_v21  ;;  %7271 = vmatprep.subr.bf16.mxu1 %v8202_v32 }
  0x36   : > { %515 = vmatmul.mubr.bf16.vlgmr.msra.gmra.mrb[0].mxu0 %v289_v12  ;;  %7272 = vmatpush3.bf16.msra.mxu1 %v8202_v32  ;;  %v341_v12 = vsub.s32 0, %v9004_v11 }
  0x37   : > { %524 = vmatprep.mubr.bf16.mxu0 %v8788_v2  ;;  %7273 = vmatprep.subr.bf16.mxu1 %v8203_v33 }
  0x38   : > { %v9014_v15 = vrot.slane %v9010_v13, %v341_v12 }
  0x3a   : > { %7274 = vmatpush3.bf16.msra.mxu1 %v8203_v33 }
  0x3d   : > { %7276 = vmatmul.mubr.bf16.vlgmr.msra.gmra.mrb[0].mxu1 %v290_v26 }
  0x3e   : > { %525 = vmatmul.mubr.bf16.gmra.mrb[4].mxu0 %v290_v26  ;;  %7279 = vmatprep.mubr.bf16.mxu1 %v291_v31 }
  0x3f   : > { %534 = vmatprep.mubr.bf16.mxu0 %v8788_v2 }
  0x45   : > { %7280 = vmatmul.mubr.bf16.gmra.mrb[4].mxu1 %v292_v36 }
  0x46   : > { %535 = vmatmul.mubr.bf16.gmra.mrb[8].mxu0 %v291_v31  ;;  %7283 = vmatprep.mubr.bf16.mxu1 %v293_v39 }
  0x47   : > { %544 = vmatprep.mubr.bf16.mxu0 %v8788_v2 }
  0x4d   : > { %7284 = vmatmul.mubr.bf16.gmra.mrb[8].mxu1 %v294_v42 }
  0x4e   : > { %545 = vmatmul.mubr.bf16.gmra.mrb[12].mxu0 %v292_v36  ;;  %7287 = vmatprep.mubr.bf16.mxu1 %v295_v45 }
  0x4f   : > { %554 = vmatprep.mubr.bf16.mxu0 %v8788_v2 }
  0x55   : > { %7288 = vmatmul.mubr.bf16.gmra.mrb[12].mxu1 %v296_v50 }
  0x56   : > { %555 = vmatmul.mubr.bf16.gmra.mrb[16].mxu0 %v293_v39  ;;  %7291 = vmatprep.mubr.bf16.mxu1 %v297_v51 }
  0x57   : > { %564 = vmatprep.mubr.bf16.mxu0 %v8788_v2 }
  0x5d   : > { %7292 = vmatmul.mubr.bf16.gmra.mrb[16].mxu1 %v298_v56 }
  0x5e   : > { %565 = vmatmul.mubr.bf16.gmra.mrb[20].mxu0 %v294_v42  ;;  %7295 = vmatprep.mubr.bf16.mxu1 %v299_v57 }
  0x5f   : > { %574 = vmatprep.mubr.bf16.mxu0 %v8788_v2 }
  0x65   : > { %7296 = vmatmul.mubr.bf16.gmra.mrb[20].mxu1 %v300_v62 }
  0x66   : > { %575 = vmatmul.mubr.bf16.gmra.mrb[24].mxu0 %v295_v45  ;;  %7299 = vmatprep.mubr.bf16.mxu1 %v301_v63 }
  0x67   : > { %584 = vmatprep.mubr.bf16.mxu0 %v8788_v2 }
  0x6d   : > { %7300 = vmatmul.mubr.bf16.gmra.mrb[24].mxu1 %v302_v5 }
  0x6e   : > { %585 = vmatmul.mubr.bf16.gmra.mrb[28].mxu0 %v296_v50  ;;  %7303 = vmatprep.mubr.bf16.mxu1 %v303_v6 }
  0x6f   : > { %594 = vmatprep.mubr.bf16.mxu0 %v8788_v2 }
  0x75   : > { %7304 = vmatmul.mubr.bf16.gmra.mrb[28].mxu1 %v304_v9 }
  0x76   : > { %595 = vmatmul.mubr.bf16.gmra.mrb[32].mxu0 %v297_v51 }
  0x77   : > { %604 = vmatprep.mubr.bf16.mxu0 %v8788_v2 }
  0x7e   : > { %605 = vmatmul.mubr.bf16.gmra.mrb[36].mxu0 %v298_v56 }
  0x7f   : > { %614 = vmatprep.mubr.bf16.mxu0 %v8788_v2 }
  0x86   : > { %615 = vmatmul.mubr.bf16.gmra.mrb[40].mxu0 %v299_v57 }
  0x87   : > { %624 = vmatprep.mubr.bf16.mxu0 %v8788_v2 }
  0x8e   : > { %625 = vmatmul.mubr.bf16.gmra.mrb[44].mxu0 %v300_v62 }
  0x8f   : > { %634 = vmatprep.mubr.bf16.mxu0 %v8788_v2 }
  0x96   : > { %635 = vmatmul.mubr.bf16.gmra.mrb[48].mxu0 %v301_v63 }
  0x97   : > { %644 = vmatprep.mubr.bf16.mxu0 %v8788_v2 }
  0x9e   : > { %645 = vmatmul.mubr.bf16.gmra.mrb[52].mxu0 %v302_v5 }
  0x9f   : > { %654 = vmatprep.mubr.bf16.mxu0 %v8788_v2 }
  0xa6   : > { %655 = vmatmul.mubr.bf16.gmra.mrb[56].mxu0 %v303_v6 }
  0xa7   : > { %664 = vmatprep.mubr.bf16.mxu0 %v8788_v2 }
  0xae   : > { %665 = vmatmul.mubr.bf16.gmra.mrb[60].mxu0 %v304_v9 }
 0x109   : > { %v516_v16 = vpop.f32.mrb[0].mxu0 }
 0x10a   : > { %v517_v2 = vadd.f32 %v516_v16, %v9014_v15  ;;  %v518_v18 = vpop.f32.mrb[1].mxu0 }
 0x10b   : > { %v520_v19 = vpop.f32.mrb[2].mxu0  ;;  %v519_v22 = vadd.f32 %v518_v18, %v9017_v17 }
 0x10c   : > { %v521_v20 = vadd.f32 %v520_v19, %v9014_v15  ;;  %v522_v21 = vpop.f32.mrb[3].mxu0  ;;  %v836_v24 = vmul.f32 0.17677669, %v517_v2 }
 0x10d   : > { %v523_v23 = vadd.f32 %v522_v21, %v9017_v17 }
 0x10e   : > { %v837_v25 = vmul.f32 0.17677669, %v521_v20 }
 0x10f   : > { %v9023_v26 = vpack.c.bf16 %v523_v23, %v519_v22 }
 0x110   : > { %v9025_v27 = vpack.c.bf16 %v837_v25, %v836_v24 }
 0x111   : > { %12099 = vst [vmem:[#allocation5_spill] sm:$0xff] %v9023_v26  ;;  %v526_v28 = vpop.f32.mrb[4].mxu0  ;;  %2003 = vrot.lane.b32.xlu0 %v9023_v26, %s8789_s20  ;;  %8063 = vmatprep.subr.msk.bf16.mxu1 %vm924_vm0, %v9023_v26  ;;  %v938_v29 = vsel %vm924_vm0, %v9023_v26, 0 }
 0x112   : > { %12100 = vst [vmem:[#allocation6_spill] sm:$0xff] %v9025_v27  ;;  %v527_v30 = vadd.f32 %v526_v28, %v9014_v15  ;;  %v528_v31 = vpop.f32.mrb[5].mxu0  ;;  %7308 = vmatpush3.bf16.xpose.msra.mxu1 %v938_v29  ;;  %7315 = vmatprep.mubr.msk.bf16.mxu1 %vm924_vm0, %v9025_v27 }
 0x113   : > { %v530_v32 = vpop.f32.mrb[6].mxu0  ;;  %v529_v35 = vadd.f32 %v528_v31, %v9017_v17 }
 0x114   : > { %v531_v33 = vadd.f32 %v530_v32, %v9014_v15  ;;  %v532_v34 = vpop.f32.mrb[7].mxu0  ;;  %v838_v37 = vmul.f32 0.17677669, %v527_v30 }
 0x115   : > { %v533_v36 = vadd.f32 %v532_v34, %v9017_v17  ;;  %1991 = vrot.lane.b32.xlu0 %v9025_v27, %s8789_s20 }
 0x116   : > { %v839_v38 = vmul.f32 0.17677669, %v531_v33 }
 0x117   : > { %v9041_v39 = vpack.c.bf16 %v533_v36, %v529_v35 }
 0x118   : > { %v9043_v40 = vpack.c.bf16 %v839_v38, %v838_v37 }
 0x119   : > { %12101 = vst [vmem:[#allocation7_spill] sm:$0xff] %v9041_v39  ;;  %v536_v41 = vpop.f32.mrb[8].mxu0  ;;  %2005 = vrot.lane.b32.xlu1 %v9041_v39, %s8789_s20  ;;  %8064 = vmatprep.subr.msk.bf16.mxu1 %vm924_vm0, %v9041_v39  ;;  %v941_v42 = vsel %vm924_vm0, %v9041_v39, 0 }
 0x11a   : > { %12102 = vst [vmem:[#allocation8_spill] sm:$0xff] %v9043_v40  ;;  %v537_v43 = vadd.f32 %v536_v41, %v9014_v15  ;;  %v538_v44 = vpop.f32.mrb[9].mxu0  ;;  %7310 = vmatpush3.bf16.xpose.msra.mxu1 %v941_v42 }
 0x11b   : > { %v540_v45 = vpop.f32.mrb[10].mxu0  ;;  %v539_v48 = vadd.f32 %v538_v44, %v9017_v17 }
 0x11c   : > { %v541_v46 = vadd.f32 %v540_v45, %v9014_v15  ;;  %v542_v47 = vpop.f32.mrb[11].mxu0  ;;  %v840_v50 = vmul.f32 0.17677669, %v537_v43 }
 0x11d   : > { %v543_v49 = vadd.f32 %v542_v47, %v9017_v17  ;;  %1993 = vrot.lane.b32.xlu1 %v9043_v40, %s8789_s20 }
 0x11e   : > { %v841_v51 = vmul.f32 0.17677669, %v541_v46 }
 0x11f   : > { %v9057_v52 = vpack.c.bf16 %v543_v49, %v539_v48 }
 0x120   : > { %v9059_v53 = vpack.c.bf16 %v841_v51, %v840_v50 }
 0x121   : > { %12103 = vst [vmem:[#allocation9_spill] sm:$0xff] %v9057_v52  ;;  %v546_v54 = vpop.f32.mrb[12].mxu0  ;;  %8065 = vmatprep.subr.msk.bf16.mxu1 %vm924_vm0, %v9057_v52  ;;  %2007 = vrot.lane.b32.xlu0 %v9057_v52, %s8789_s20  ;;  %v944_v55 = vsel %vm924_vm0, %v9057_v52, 0 }
 0x122   : > { %12104 = vst [vmem:[#allocation10_spill] sm:$0xff] %v9059_v53  ;;  %v547_v56 = vadd.f32 %v546_v54, %v9014_v15  ;;  %v548_v57 = vpop.f32.mrb[13].mxu0  ;;  %7312 = vmatpush3.bf16.xpose.msra.mxu1 %v944_v55 }
 0x123   : > { %v550_v58 = vpop.f32.mrb[14].mxu0  ;;  %v549_v61 = vadd.f32 %v548_v57, %v9017_v17  ;;  %v349_v57 = vsub.s32 2, %v9004_v11 }
 0x124   : > { %v551_v59 = vadd.f32 %v550_v58, %v9014_v15  ;;  %v552_v60 = vpop.f32.mrb[15].mxu0  ;;  %v842_v63 = vmul.f32 0.17677669, %v547_v56  ;;  %v7277_v58 = vpop.f32.mrb[0].mxu1 }
 0x125   : > { %v553_v62 = vadd.f32 %v552_v60, %v9017_v17 }
 0x126   : > { %v843_v0 = vmul.f32 0.17677669, %v551_v59 }
 0x127   : > { %v9071_v1 = vpack.c.bf16 %v553_v62, %v549_v61  ;;  %v709_v61 = vpop.f32.mrb[1].mxu1 }
 0x128   : > { %v9073_v3 = vpack.c.bf16 %v843_v0, %v842_v63  ;;  %v9137_v0 = vrot.slane %v9010_v13, %v349_v57 }
 0x129   : > { %12105 = vst [vmem:[#allocation11_spill] sm:$0xff] %v9071_v1  ;;  %v556_v4 = vpop.f32.mrb[16].mxu0  ;;  %8066 = vmatprep.subr.msk.bf16.mxu1 %vm924_vm0, %v9071_v1  ;;  %2009 = vrot.lane.b32.xlu0 %v9071_v1, %s8789_s20  ;;  %v947_v5 = vsel %vm924_vm0, %v9071_v1, 0 }
 0x12a   : > { %12106 = vst [vmem:[#allocation12_spill] sm:$0xff] %v9073_v3  ;;  %v557_v6 = vadd.f32 %v556_v4, %v9014_v15  ;;  %v558_v7 = vpop.f32.mrb[17].mxu0  ;;  %7314 = vmatpush3.bf16.xpose.msra.mxu1 %v947_v5  ;;  %v7278_v4 = vpop.f32.mrb[2].mxu1  ;;  %v718_v11 = vadd.f32 %v7277_v58, %v9137_v0 }
 0x12b   : > { %v560_v8 = vpop.f32.mrb[18].mxu0  ;;  %v559_v12 = vadd.f32 %v558_v7, %v9017_v17  ;;  %v712_v7 = vpop.f32.mrb[3].mxu1 }
 0x12c   : > { %v561_v9 = vadd.f32 %v560_v8, %v9014_v15  ;;  %v562_v10 = vpop.f32.mrb[19].mxu0  ;;  %v844_v16 = vmul.f32 0.17677669, %v557_v6 }
 0x12d   : > { %v563_v14 = vadd.f32 %v562_v10, %v9017_v17  ;;  %v721_v10 = vadd.f32 %v7278_v4, %v9137_v0 }
 0x12e   : > { %v845_v2 = vmul.f32 0.17677669, %v561_v9  ;;  %v710_v9 = vadd.f32 %v709_v61, %v9137_v0 }
 0x12f   : > { %v9085_v18 = vpack.c.bf16 %v563_v14, %v559_v12  ;;  %v7281_v12 = vpop.f32.mrb[4].mxu1 }
 0x130   : > { %v9087_v19 = vpack.c.bf16 %v845_v2, %v844_v16  ;;  %v713_v16 = vadd.f32 %v712_v7, %v9137_v0  ;;  %v734_v13 = vadd.f32 %v7281_v12, %v9137_v0  ;;  %v725_v2 = vpop.f32.mrb[5].mxu1 }
 0x131   : > { %12107 = vst [vmem:[#allocation13_spill] sm:$0xff] %v9085_v18  ;;  %v566_v20 = vpop.f32.mrb[20].mxu0  ;;  %2116 = vrot.lane.b32.xlu1 %v9085_v18, %s8789_s20  ;;  %7316 = vmatmul.mubr.msk.bf16.vlgmr.msra.gmra.mrb[32].mxu1 %vm924_vm0, %v9043_v40  ;;  %v1027_v21 = vsel %vm924_vm0, %v9085_v18, 0 }
 0x132   : > { %v567_v22 = vadd.f32 %v566_v20, %v9014_v15  ;;  %8067 = vmatprep.subr.msk.bf16.mxu1 %vm924_vm0, %v9085_v18  ;;  %v568_v23 = vpop.f32.mrb[21].mxu0  ;;  %7319 = vmatprep.mubr.msk.bf16.mxu1 %vm924_vm0, %v9059_v53 }
 0x133   : > { %7324 = vmatpush3.bf16.xpose.msra.mxu1 %v1027_v21  ;;  %v570_v24 = vpop.f32.mrb[22].mxu0  ;;  %v569_v29 = vadd.f32 %v568_v23, %v9017_v17  ;;  %v726_v23 = vadd.f32 %v725_v2, %v9137_v0 }
 0x134   : > { %v571_v25 = vadd.f32 %v570_v24, %v9014_v15  ;;  %v572_v28 = vpop.f32.mrb[23].mxu0  ;;  %v846_v31 = vmul.f32 0.17677669, %v567_v22  ;;  %v9152_v22 = vpack.c.bf16 %v721_v10, %v718_v11  ;;  %v7282_v24 = vpop.f32.mrb[6].mxu1 }
 0x135   : > { %v573_v30 = vadd.f32 %v572_v28, %v9017_v17 }
 0x136   : > { %v847_v32 = vmul.f32 0.17677669, %v571_v25  ;;  %12113 = vst [vmem:[#allocation19_spill] sm:$0xff] %v9152_v22 }
 0x137   : > { %v9103_v33 = vpack.c.bf16 %v573_v30, %v569_v29  ;;  %v9156_v29 = vpack.c.bf16 %v713_v16, %v710_v9  ;;  %v737_v30 = vadd.f32 %v7282_v24, %v9137_v0 }
 0x138   : > { %v9105_v34 = vpack.c.bf16 %v847_v32, %v846_v31  ;;  %v728_v31 = vpop.f32.mrb[7].mxu1 }
 0x139   : > { %12108 = vst [vmem:[#allocation14_spill] sm:$0xff] %v9103_v33  ;;  %v576_v35 = vpop.f32.mrb[24].mxu0  ;;  %2118 = vrot.lane.b32.xlu1 %v9103_v33, %s8789_s20  ;;  %7320 = vmatmul.mubr.msk.bf16.gmra.mrb[36].mxu1 %vm924_vm0, %v9073_v3  ;;  %v1030_v36 = vsel %vm924_vm0, %v9103_v33, 0  ;;  %12114 = vst [vmem:[#allocation20_spill] sm:$0xff] %v9156_v29 }
 0x13a   : > { %v577_v37 = vadd.f32 %v576_v35, %v9014_v15  ;;  %8068 = vmatprep.subr.msk.bf16.mxu1 %vm924_vm0, %v9103_v33  ;;  %v578_v38 = vpop.f32.mrb[25].mxu0  ;;  %7331 = vmatprep.mubr.msk.bf16.mxu1 %vm924_vm0, %v9087_v19  ;;  %v729_v35 = vadd.f32 %v728_v31, %v9137_v0 }
 0x13b   : > { %7326 = vmatpush3.bf16.xpose.msra.mxu1 %v1030_v36  ;;  %v580_v41 = vpop.f32.mrb[26].mxu0  ;;  %v579_v44 = vadd.f32 %v578_v38, %v9017_v17  ;;  %v7285_v36 = vpop.f32.mrb[8].mxu1 }
 0x13c   : > { %v581_v42 = vadd.f32 %v580_v41, %v9014_v15  ;;  %v582_v43 = vpop.f32.mrb[27].mxu0  ;;  %v848_v46 = vmul.f32 0.17677669, %v577_v37  ;;  %v9161_v41 = vpack.c.bf16 %v737_v30, %v734_v13 }
 0x13d   : > { %v583_v45 = vadd.f32 %v582_v43, %v9017_v17  ;;  %v741_v43 = vpop.f32.mrb[9].mxu1 }
 0x13e   : > { %v849_v47 = vmul.f32 0.17677669, %v581_v42  ;;  %12115 = vst [vmem:[#allocation21_spill] sm:$0xff] %v9161_v41  ;;  %v750_v42 = vadd.f32 %v7285_v36, %v9137_v0 }
 0x13f   : > { %v9121_v48 = vpack.c.bf16 %v583_v45, %v579_v44 }
 0x140   : > { %v9123_v49 = vpack.c.bf16 %v849_v47, %v848_v46  ;;  %v9166_v46 = vpack.c.bf16 %v729_v35, %v726_v23  ;;  %v742_v47 = vadd.f32 %v741_v43, %v9137_v0 }
 0x141   : > { %12109 = vst [vmem:[#allocation15_spill] sm:$0xff] %v9121_v48  ;;  %v586_v50 = vpop.f32.mrb[28].mxu0  ;;  %2120 = vrot.lane.b32.xlu1 %v9121_v48, %s8789_s20  ;;  %8069 = vmatprep.subr.msk.bf16.mxu1 %vm924_vm0, %v9121_v48  ;;  %v1033_v51 = vsel %vm924_vm0, %v9121_v48, 0 }
 0x142   : > { %12110 = vst [vmem:[#allocation16_spill] sm:$0xff] %v9123_v49  ;;  %v587_v54 = vadd.f32 %v586_v50, %v9014_v15  ;;  %v588_v55 = vpop.f32.mrb[29].mxu0  ;;  %12116 = vst [vmem:[#allocation22_spill] sm:$0xff] %v9166_v46  ;;  %v7286_v50 = vpop.f32.mrb[10].mxu1 }
 0x143   : > { %7328 = vmatpush3.bf16.xpose.msra.mxu1 %v1033_v51  ;;  %v590_v56 = vpop.f32.mrb[30].mxu0  ;;  %v589_v62 = vadd.f32 %v588_v55, %v9017_v17  ;;  %v753_v55 = vadd.f32 %v7286_v50, %v9137_v0 }
 0x144   : > { %v591_v59 = vadd.f32 %v590_v56, %v9014_v15  ;;  %v592_v60 = vpop.f32.mrb[31].mxu0  ;;  %v850_v5 = vmul.f32 0.17677669, %v587_v54  ;;  %v744_v56 = vpop.f32.mrb[11].mxu1 }
 0x145   : > { %v593_v63 = vadd.f32 %v592_v60, %v9017_v17  ;;  %v745_v58 = vadd.f32 %v744_v56, %v9137_v0  ;;  %v9175_v61 = vpack.c.bf16 %v753_v55, %v750_v42 }
 0x146   : > { %v851_v6 = vmul.f32 0.17677669, %v591_v59  ;;  %v7289_v59 = vpop.f32.mrb[12].mxu1 }
 0x147   : > { %v9139_v8 = vpack.c.bf16 %v593_v63, %v589_v62  ;;  %12119 = vst [vmem:[#allocation25_spill] sm:$0xff] %v9175_v61  ;;  %v766_v62 = vadd.f32 %v7289_v59, %v9137_v0  ;;  %v757_v63 = vpop.f32.mrb[13].mxu1 }
 0x148   : > { %v9144_v14 = vpack.c.bf16 %v851_v6, %v850_v5  ;;  %v9184_v6 = vpack.c.bf16 %v745_v58, %v742_v47  ;;  %v758_v7 = vadd.f32 %v757_v63, %v9137_v0  ;;  %v7290_v11 = vpop.f32.mrb[14].mxu1 }
 0x149   : > { %12111 = vst [vmem:[#allocation17_spill] sm:$0xff] %v9139_v8  ;;  %v596_v20 = vpop.f32.mrb[32].mxu0  ;;  %8070 = vmatprep.subr.msk.bf16.mxu1 %vm924_vm0, %v9139_v8  ;;  %v1036_v21 = vsel %vm924_vm0, %v9139_v8, 0  ;;  %v769_v12 = vadd.f32 %v7290_v11, %v9137_v0  ;;  %v760_v16 = vpop.f32.mrb[15].mxu1 }
 0x14a   : > { %12112 = vst [vmem:[#allocation18_spill] sm:$0xff] %v9144_v14  ;;  %v597_v25 = vadd.f32 %v596_v20, %v9014_v15  ;;  %v598_v28 = vpop.f32.mrb[33].mxu0  ;;  %12120 = vst [vmem:[#allocation26_spill] sm:$0xff] %v9184_v6  ;;  %v761_v2 = vadd.f32 %v760_v16, %v9137_v0  ;;  %v7293_v20 = vpop.f32.mrb[16].mxu1 }
 0x14b   : > { %7330 = vmatpush3.bf16.xpose.msra.mxu1 %v1036_v21  ;;  %v600_v32 = vpop.f32.mrb[34].mxu0  ;;  %v599_v44 = vadd.f32 %v598_v28, %v9017_v17  ;;  %v9197_v24 = vpack.c.bf16 %v769_v12, %v766_v62  ;;  %v773_v28 = vpop.f32.mrb[17].mxu1 }
 0x14c   : > { %v601_v37 = vadd.f32 %v600_v32, %v9014_v15  ;;  %v602_v38 = vpop.f32.mrb[35].mxu0  ;;  %v852_v51 = vmul.f32 0.17677669, %v597_v25  ;;  %v782_v25 = vadd.f32 %v7293_v20, %v9137_v0  ;;  %v9202_v32 = vpack.c.bf16 %v761_v2, %v758_v7  ;;  %v7294_v36 = vpop.f32.mrb[18].mxu1 }
 0x14d   : > { %v603_v45 = vadd.f32 %v602_v38, %v9017_v17  ;;  %12121 = vst [vmem:[#allocation27_spill] sm:$0xff] %v9197_v24  ;;  %v774_v35 = vadd.f32 %v773_v28, %v9137_v0  ;;  %v785_v42 = vadd.f32 %v7294_v36, %v9137_v0  ;;  %v776_v43 = vpop.f32.mrb[19].mxu1 }
 0x14e   : > { %v853_v54 = vmul.f32 0.17677669, %v601_v37  ;;  %12122 = vst [vmem:[#allocation28_spill] sm:$0xff] %v9202_v32  ;;  %v7297_v47 = vpop.f32.mrb[20].mxu1 }
 0x14f   : > { %v9170_v57 = vpack.c.bf16 %v603_v45, %v599_v44  ;;  %v777_v45 = vadd.f32 %v776_v43, %v9137_v0  ;;  %v789_v55 = vpop.f32.mrb[21].mxu1 }
 0x150   : > { %v9173_v60 = vpack.c.bf16 %v853_v54, %v852_v51  ;;  %v9211_v51 = vpack.c.bf16 %v785_v42, %v782_v25  ;;  %v798_v54 = vadd.f32 %v7297_v47, %v9137_v0  ;;  %v790_v62 = vadd.f32 %v789_v55, %v9137_v0  ;;  %v7298_v63 = vpop.f32.mrb[22].mxu1 }
 0x151   : > { %12117 = vst [vmem:[#allocation23_spill] sm:$0xff] %v9170_v57  ;;  %v606_v4 = vpop.f32.mrb[36].mxu0  ;;  %8071 = vmatprep.subr.msk.bf16.mxu0 %vm924_vm0, %v9170_v57  ;;  %2229 = vrot.lane.b32.xlu0 %v9170_v57, %s8789_s20  ;;  %v1116_v5 = vsel %vm924_vm0, %v9170_v57, 0  ;;  %v9218_v59 = vpack.c.bf16 %v777_v45, %v774_v35  ;;  %v801_v7 = vadd.f32 %v7298_v63, %v9137_v0  ;;  %v792_v11 = vpop.f32.mrb[23].mxu1  ;;  %v9410_v57 = vld [vmem:[%s11962_s3 + $0x28] sm:$0xff] }
 0x152   : > { %12118 = vst [vmem:[#allocation24_spill] sm:$0xff] %v9173_v60  ;;  %v607_v9 = vadd.f32 %v606_v4, %v9014_v15  ;;  %7332 = vmatmul.mubr.msk.bf16.vlgmr.msra.gmra.mrb[40].mxu1 %vm924_vm0, %v9105_v34  ;;  %v608_v10 = vpop.f32.mrb[37].mxu0  ;;  %7340 = vmatpush3.bf16.xpose.msra.mxu0 %v1116_v5  ;;  %12125 = vst [vmem:[#allocation31_spill] sm:$0xff] %v9211_v51  ;;  %v7301_v12 = vpop.f32.mrb[24].mxu1 }
 0x153   : > { %7335 = vmatprep.mubr.msk.bf16.mxu1 %vm924_vm0, %v9123_v49  ;;  %7347 = vmatprep.mubr.msk.bf16.mxu0 %vm924_vm0, %v9173_v60  ;;  %v610_v13 = vpop.f32.mrb[38].mxu0  ;;  %v609_v30 = vadd.f32 %v608_v10, %v9017_v17  ;;  %12126 = vst [vmem:[#allocation32_spill] sm:$0xff] %v9218_v59  ;;  %v793_v10 = vadd.f32 %v792_v11, %v9137_v0 }
 0x154   : > { %v611_v21 = vadd.f32 %v610_v13, %v9014_v15  ;;  %v612_v23 = vpop.f32.mrb[39].mxu0  ;;  %v854_v37 = vmul.f32 0.17677669, %v607_v9  ;;  %v9227_v2 = vpack.c.bf16 %v801_v7, %v798_v54  ;;  %v814_v20 = vadd.f32 %v7301_v12, %v9137_v0 }
 0x155   : > { %v613_v31 = vadd.f32 %v612_v23, %v9017_v17  ;;  %v9232_v28 = vpack.c.bf16 %v793_v10, %v790_v62 }
 0x156   : > { %v855_v38 = vmul.f32 0.17677669, %v611_v21  ;;  %12127 = vst [vmem:[#allocation33_spill] sm:$0xff] %v9227_v2  ;;  %v805_v21 = vpop.f32.mrb[25].mxu1 }
 0x157   : > { %v9206_v44 = vpack.c.bf16 %v613_v31, %v609_v30  ;;  %12128 = vst [vmem:[#allocation34_spill] sm:$0xff] %v9232_v28  ;;  %v806_v30 = vadd.f32 %v805_v21, %v9137_v0  ;;  %v7302_v31 = vpop.f32.mrb[26].mxu1 }
 0x158   : > { %v9209_v50 = vpack.c.bf16 %v855_v38, %v854_v37  ;;  %v817_v37 = vadd.f32 %v7302_v31, %v9137_v0  ;;  %v808_v38 = vpop.f32.mrb[27].mxu1 }
 0x159   : > { %12123 = vst [vmem:[#allocation29_spill] sm:$0xff] %v9206_v44  ;;  %v616_v56 = vpop.f32.mrb[40].mxu0  ;;  %8072 = vmatprep.subr.msk.bf16.mxu0 %vm924_vm0, %v9206_v44  ;;  %v1119_v58 = vsel %vm924_vm0, %v9206_v44, 0  ;;  %v809_v43 = vadd.f32 %v808_v38, %v9137_v0  ;;  %v7305_v45 = vpop.f32.mrb[28].mxu1 }
 0x15a   : > { %12124 = vst [vmem:[#allocation30_spill] sm:$0xff] %v9209_v50  ;;  %v617_v4 = vadd.f32 %v616_v56, %v9014_v15  ;;  %7336 = vmatmul.mubr.msk.bf16.gmra.mrb[44].mxu1 %vm924_vm0, %v9144_v14  ;;  %v618_v5 = vpop.f32.mrb[41].mxu0  ;;  %7342 = vmatpush3.bf16.xpose.msra.mxu0 %v1119_v58  ;;  %v9241_v54 = vpack.c.bf16 %v817_v37, %v814_v20  ;;  %v821_v56 = vpop.f32.mrb[29].mxu1 }
 0x15b   : > { %v620_v9 = vpop.f32.mrb[42].mxu0  ;;  %v619_v23 = vadd.f32 %v618_v5, %v9017_v17  ;;  %v830_v55 = vadd.f32 %v7305_v45, %v9137_v0  ;;  %v9248_v63 = vpack.c.bf16 %v809_v43, %v806_v30  ;;  %v7306_v5 = vpop.f32.mrb[30].mxu1 }
 0x15c   : > { %v621_v16 = vadd.f32 %v620_v9, %v9014_v15  ;;  %v622_v13 = vpop.f32.mrb[43].mxu0  ;;  %v856_v35 = vmul.f32 0.17677669, %v617_v4  ;;  %12131 = vst [vmem:[#allocation37_spill] sm:$0xff] %v9241_v54  ;;  %v822_v4 = vadd.f32 %v821_v56, %v9137_v0  ;;  %v833_v9 = vadd.f32 %v7306_v5, %v9137_v0  ;;  %v824_v10 = vpop.f32.mrb[31].mxu1 }
 0x15d   : > { %v623_v25 = vadd.f32 %v622_v13, %v9017_v17  ;;  %12132 = vst [vmem:[#allocation38_spill] sm:$0xff] %v9248_v63 }
 0x15e   : > { %v857_v36 = vmul.f32 0.17677669, %v621_v16  ;;  %v825_v16 = vadd.f32 %v824_v10, %v9137_v0  ;;  %v9255_v21 = vpack.c.bf16 %v833_v9, %v830_v55 }
 0x15f   : > { %v9236_v42 = vpack.c.bf16 %v623_v25, %v619_v23 }
 0x160   : > { %v9239_v47 = vpack.c.bf16 %v857_v36, %v856_v35  ;;  %v9259_v30 = vpack.c.bf16 %v825_v16, %v822_v4 }
 0x161   : > { %12129 = vst [vmem:[#allocation35_spill] sm:$0xff] %v9236_v42  ;;  %v626_v58 = vpop.f32.mrb[44].mxu0  ;;  %8073 = vmatprep.subr.msk.bf16.mxu0 %vm924_vm0, %v9236_v42  ;;  %v1122_v62 = vsel %vm924_vm0, %v9236_v42, 0 }
 0x162   : > { %12130 = vst [vmem:[#allocation36_spill] sm:$0xff] %v9239_v47  ;;  %v627_v7 = vadd.f32 %v626_v58, %v9014_v15  ;;  %v628_v11 = vpop.f32.mrb[45].mxu0  ;;  %7344 = vmatpush3.bf16.xpose.msra.mxu0 %v1122_v62  ;;  %12133 = vst [vmem:[#allocation39_spill] sm:$0xff] %v9259_v30 }
 0x163   : > { %v630_v12 = vpop.f32.mrb[46].mxu0  ;;  %v629_v23 = vadd.f32 %v628_v11, %v9017_v17 }
 0x164   : > { %v631_v13 = vadd.f32 %v630_v12, %v9014_v15  ;;  %v632_v20 = vpop.f32.mrb[47].mxu0  ;;  %v858_v31 = vmul.f32 0.17677669, %v627_v7 }
 0x165   : > { %v633_v25 = vadd.f32 %v632_v20, %v9017_v17 }
 0x166   : > { %v859_v35 = vmul.f32 0.17677669, %v631_v13 }
 0x167   : > { %v9261_v36 = vpack.c.bf16 %v633_v25, %v629_v23 }
 0x168   : > { %v9263_v37 = vpack.c.bf16 %v859_v35, %v858_v31 }
 0x169   : > { %12134 = vst [vmem:[#allocation40_spill] sm:$0xff] %v9261_v36  ;;  %v636_v38 = vpop.f32.mrb[48].mxu0  ;;  %8074 = vmatprep.subr.msk.bf16.mxu0 %vm924_vm0, %v9261_v36  ;;  %v1125_v0 = vsel %vm924_vm0, %v9261_v36, 0 }
 0x16a   : > { %12135 = vst [vmem:[#allocation41_spill] sm:$0xff] %v9263_v37  ;;  %v637_v43 = vadd.f32 %v636_v38, %v9014_v15  ;;  %v638_v45 = vpop.f32.mrb[49].mxu0  ;;  %7346 = vmatpush3.bf16.xpose.msra.mxu0 %v1125_v0 }
 0x16b   : > { %v639_v55 = vadd.f32 %v638_v45, %v9017_v17  ;;  %v640_v56 = vpop.f32.mrb[50].mxu0  ;;  %7371 = vmatprep.subr.bf16.mxu0 %v9156_v29 }
 0x16c   : > { %v860_v58 = vmul.f32 0.17677669, %v637_v43  ;;  %v641_v62 = vadd.f32 %v640_v56, %v9014_v15  ;;  %v642_v4 = vpop.f32.mrb[51].mxu0 }
 0x16d   : > { %v643_v5 = vadd.f32 %v642_v4, %v9017_v17 }
 0x16e   : > { %v861_v7 = vmul.f32 0.17677669, %v641_v62 }
 0x16f   : > { %v9274_v11 = vpack.c.bf16 %v643_v5, %v639_v55 }
 0x170   : > { %v9276_v9 = vpack.c.bf16 %v861_v7, %v860_v58 }
 0x171   : > { %12136 = vst [vmem:[#allocation42_spill] sm:$0xff] %v9274_v11  ;;  %v646_v10 = vpop.f32.mrb[52].mxu0  ;;  %7348 = vmatmul.mubr.msk.bf16.vlgmr.msra.gmra.mrb[64].mxu0 %vm924_vm0, %v9209_v50  ;;  %8075 = vmatprep.subr.msk.bf16.mxu1 %vm924_vm0, %v9274_v11  ;;  %v1205_v12 = vsel %vm924_vm0, %v9274_v11, 0 }
 0x172   : > { %12137 = vst [vmem:[#allocation43_spill] sm:$0xff] %v9276_v9  ;;  %v647_v16 = vadd.f32 %v646_v10, %v9014_v15  ;;  %v648_v13 = vpop.f32.mrb[53].mxu0  ;;  %7356 = vmatpush3.bf16.xpose.msra.mxu1 %v1205_v12  ;;  %7351 = vmatprep.mubr.msk.bf16.mxu0 %vm924_vm0, %v9239_v47 }
 0x173   : > { %v649_v20 = vadd.f32 %v648_v13, %v9017_v17  ;;  %v650_v23 = vpop.f32.mrb[54].mxu0  ;;  %7363 = vmatprep.mubr.msk.bf16.mxu1 %vm924_vm0, %v9276_v9  ;;  %7372 = vmatpush3.bf16.msra.mxu0 %v9156_v29 }
 0x174   : > { %v862_v25 = vmul.f32 0.17677669, %v647_v16  ;;  %v651_v31 = vadd.f32 %v650_v23, %v9014_v15  ;;  %v652_v35 = vpop.f32.mrb[55].mxu0  ;;  %7373 = vmatprep.subr.bf16.mxu0 %v9152_v22 }
 0x175   : > { %v653_v38 = vadd.f32 %v652_v35, %v9017_v17 }
 0x176   : > { %v863_v0 = vmul.f32 0.17677669, %v651_v31 }
 0x177   : > { %v9294_v43 = vpack.c.bf16 %v653_v38, %v649_v20  ;;  %7374 = vmatpush3.bf16.msra.mxu0 %v9152_v22 }
 0x178   : > { %v9297_v45 = vpack.c.bf16 %v863_v0, %v862_v25  ;;  %7375 = vmatprep.subr.bf16.mxu0 %v9166_v46 }
 0x179   : > { %12138 = vst [vmem:[#allocation44_spill] sm:$0xff] %v9294_v43  ;;  %v656_v55 = vpop.f32.mrb[56].mxu0  ;;  %7352 = vmatmul.mubr.msk.bf16.gmra.mrb[68].mxu0 %vm924_vm0, %v9263_v37  ;;  %8076 = vmatprep.subr.msk.bf16.mxu1 %vm924_vm0, %v9294_v43  ;;  %v1208_v56 = vsel %vm924_vm0, %v9294_v43, 0 }
 0x17a   : > { %12139 = vst [vmem:[#allocation45_spill] sm:$0xff] %v9297_v45  ;;  %v657_v58 = vadd.f32 %v656_v55, %v9014_v15  ;;  %v658_v62 = vpop.f32.mrb[57].mxu0  ;;  %7358 = vmatpush3.bf16.xpose.msra.mxu1 %v1208_v56 }
 0x17b   : > { %v659_v4 = vadd.f32 %v658_v62, %v9017_v17  ;;  %v660_v5 = vpop.f32.mrb[58].mxu0  ;;  %7376 = vmatpush3.bf16.msra.mxu0 %v9166_v46 }
 0x17c   : > { %v864_v7 = vmul.f32 0.17677669, %v657_v58  ;;  %v661_v10 = vadd.f32 %v660_v5, %v9014_v15  ;;  %v662_v12 = vpop.f32.mrb[59].mxu0  ;;  %7377 = vmatprep.subr.bf16.mxu0 %v9161_v41 }
 0x17d   : > { %v663_v16 = vadd.f32 %v662_v12, %v9017_v17 }
 0x17e   : > { %v865_v13 = vmul.f32 0.17677669, %v661_v10 }
 0x17f   : > { %v9312_v20 = vpack.c.bf16 %v663_v16, %v659_v4  ;;  %7378 = vmatpush3.bf16.msra.mxu0 %v9161_v41 }
 0x180   : > { %v9315_v23 = vpack.c.bf16 %v865_v13, %v864_v7  ;;  %7403 = vmatprep.subr.bf16.mxu0 %v9218_v59  ;;  %v9362_v13 = vld [vmem:[%s11962_s3 + $0x18] sm:$0xff] }
 0x181   : > { %12140 = vst [vmem:[#allocation46_spill] sm:$0xff] %v9312_v20  ;;  %v666_v25 = vpop.f32.mrb[60].mxu0  ;;  %8077 = vmatprep.subr.msk.bf16.mxu1 %vm924_vm0, %v9312_v20  ;;  %v1211_v31 = vsel %vm924_vm0, %v9312_v20, 0 }
 0x182   : > { %12141 = vst [vmem:[#allocation47_spill] sm:$0xff] %v9315_v23  ;;  %v667_v35 = vadd.f32 %v666_v25, %v9014_v15  ;;  %v668_v38 = vpop.f32.mrb[61].mxu0  ;;  %7360 = vmatpush3.bf16.xpose.msra.mxu1 %v1211_v31 }
 0x183   : > { %v669_v0 = vadd.f32 %v668_v38, %v9017_v17  ;;  %v670_v55 = vpop.f32.mrb[62].mxu0 }
 0x184   : > { %v866_v56 = vmul.f32 0.17677669, %v667_v35  ;;  %v671_v58 = vadd.f32 %v670_v55, %v9014_v15  ;;  %v672_v62 = vpop.f32.mrb[63].mxu0  ;;  %v9352_v15 = vld [vmem:[%s11962_s3 + $0x10] sm:$0xff]  ;;  %v9370_v35 = vld [vmem:[%s11962_s3 + $0x8] sm:$0xff] }
 0x185   : > { %v673_v4 = vadd.f32 %v672_v62, %v9017_v17  ;;  %v9357_v17 = vld [vmem:[%s11962_s3] sm:$0xff] }
 0x186   : > { %v867_v5 = vmul.f32 0.17677669, %v671_v58 }
 0x187   : > { %v9326_v7 = vpack.c.bf16 %v673_v4, %v669_v0 }
 0x188   : > { %v9328_v10 = vpack.c.bf16 %v867_v5, %v866_v56  ;;  %v9388_v5 = vld [vmem:[%s11962_s3 + $0x30] sm:$0xff] }
 0x189   : > { %12142 = vst [vmem:[#allocation48_spill] sm:$0xff] %v9326_v7  ;;  %8078 = vmatprep.subr.msk.bf16.mxu1 %vm924_vm0, %v9326_v7  ;;  %v1214_v12 = vsel %vm924_vm0, %v9326_v7, 0 }
 0x18a   : > { %12143 = vst [vmem:[#allocation49_spill] sm:$0xff] %v9328_v10  ;;  %7362 = vmatpush3.bf16.xpose.msra.mxu1 %v1214_v12 }
 0x18b   : > { %7387 = vmatprep.subr.bf16.mxu1 %v9184_v6 }
 0x191   : > { %7364 = vmatmul.mubr.msk.bf16.vlgmr.msra.gmra.mrb[48].mxu1 %vm924_vm0, %v9297_v45 }
 0x192   : > { %7367 = vmatprep.mubr.msk.bf16.mxu1 %vm924_vm0, %v9315_v23  ;;  %7388 = vmatpush3.bf16.msra.mxu1 %v9184_v6 }
 0x193   : > { %7389 = vmatprep.subr.bf16.mxu1 %v9175_v61 }
 0x196   : > { %7390 = vmatpush3.bf16.msra.mxu1 %v9175_v61 }
 0x197   : > { %7391 = vmatprep.subr.bf16.mxu1 %v9202_v32 }
 0x199   : > { %7368 = vmatmul.mubr.msk.bf16.gmra.mrb[52].mxu1 %vm924_vm0, %v9328_v10 }
 0x19a   : > { %7392 = vmatpush3.bf16.msra.mxu1 %v9202_v32 }
 0x19b   : > { %7393 = vmatprep.subr.bf16.mxu1 %v9197_v24 }
 0x19e   : > { %7394 = vmatpush3.bf16.msra.mxu1 %v9197_v24 }
 0x19f   : > { %7419 = vmatprep.subr.bf16.mxu1 %v9248_v63 }
 0x204   : > { %v7317_v16 = vpop.f32.mrb[32].mxu1 }
 0x205   : > { %v9365_v25 = vadd.f32 %v7317_v16, %v9352_v15  ;;  %v983_v31 = vpop.f32.mrb[33].mxu1 }
 0x206   : > { %v9373_v38 = vadd.f32 %v983_v31, %v9357_v17  ;;  %v7318_v0 = vpop.f32.mrb[34].mxu1 }
 0x207   : > { %v9376_v55 = vadd.f32 %v7318_v0, %v9362_v13  ;;  %v986_v56 = vpop.f32.mrb[35].mxu1  ;;  %v1288_v58 = vsel %vm1281_vm1, %v9365_v25, -inf  ;;  %v9397_v0 = vld [vmem:[%s11962_s3 + $0x38] sm:$0xff] }
 0x208   : > { %v9381_v62 = vadd.f32 %v986_v56, %v9370_v35  ;;  %1289 = vmax.xlane.f32.xlu1 %v1288_v58  ;;  %v1282_v4 = vsel %vm1281_vm1, %v9373_v38, -inf }
 0x209   : > { %1283 = vmax.xlane.f32.xlu0 %v1282_v4  ;;  %v1291_v12 = vsel %vm1281_vm1, %v9376_v55, -inf  ;;  %v9405_v4 = vld [vmem:[%s11962_s3 + $0x20] sm:$0xff] }
 0x20a   : > { %v1285_v31 = vsel %vm1281_vm1, %v9381_v62, -inf }
 0x20c   : > { %1292 = vmax.xlane.f32.xlu1 %v1291_v12  ;;  %v7321_v16 = vpop.f32.mrb[36].mxu1 }
 0x20d   : > { %v9400_v56 = vadd.f32 %v7321_v16, %v9388_v5  ;;  %v999_v58 = vpop.f32.mrb[37].mxu1  ;;  %1286 = vmax.xlane.f32.xlu0 %v1285_v31 }
 0x20e   : > { %v7322_v12 = vpop.f32.mrb[38].mxu1  ;;  %v9418_v1 = vadd.f32 %v999_v58, %v9405_v4 }
 0x20f   : > { %v9413_v33 = vadd.f32 %v7322_v12, %v9397_v0  ;;  %v1002_v18 = vpop.f32.mrb[39].mxu1  ;;  %v1300_v16 = vsel %vm1281_vm1, %v9400_v56, -inf }
 0x210   : > { %v9421_v48 = vadd.f32 %v1002_v18, %v9410_v57  ;;  %v1294_v40 = vsel %vm1281_vm1, %v9418_v1, -inf }
 0x211   : > { %1301 = vmax.xlane.f32.xlu0 %v1300_v16  ;;  %v1303_v31 = vsel %vm1281_vm1, %v9413_v33, -inf }
 0x212   : > { %1304 = vmax.xlane.f32.xlu1 %v1303_v31  ;;  %v1297_v12 = vsel %vm1281_vm1, %v9421_v48, -inf }
 0x215   : > { %1295 = vmax.xlane.f32.xlu0 %v1294_v40 }
 0x216   : > { %1298 = vmax.xlane.f32.xlu1 %v1297_v12 }
 0x225   : > { %v7333_v27 = vpop.f32.mrb[40].mxu1 }
 0x226   : > { %v9430_v58 = vadd.f32 %v7333_v27, %v9352_v15  ;;  %v1072_v52 = vpop.f32.mrb[41].mxu1 }
 0x227   : > { %v7334_v18 = vpop.f32.mrb[42].mxu1  ;;  %v9433_v16 = vadd.f32 %v1072_v52, %v9357_v17 }
 0x228   : > { %v9436_v26 = vadd.f32 %v7334_v18, %v9362_v13  ;;  %v1075_v31 = vpop.f32.mrb[43].mxu1  ;;  %v1312_v40 = vsel %vm1281_vm1, %v9430_v58, -inf }
 0x229   : > { %1313 = vmax.xlane.f32.xlu0 %v1312_v40  ;;  %v9441_v39 = vadd.f32 %v1075_v31, %v9370_v35  ;;  %v1306_v12 = vsel %vm1281_vm1, %v9433_v16, -inf }
 0x22a   : > { %v1315_v27 = vsel %vm1281_vm1, %v9436_v26, -inf }
 0x22b   : > { %1316 = vmax.xlane.f32.xlu1 %v1315_v27  ;;  %v1309_v32 = vsel %vm1281_vm1, %v9441_v39, -inf }
 0x22d   : > { %v7337_v52 = vpop.f32.mrb[44].mxu1  ;;  %1307 = vmax.xlane.f32.xlu0 %v1306_v12 }
 0x22e   : > { %v9448_v18 = vadd.f32 %v7337_v52, %v9388_v5  ;;  %v1088_v24 = vpop.f32.mrb[45].mxu1 }
 0x22f   : > { %v7338_v40 = vpop.f32.mrb[46].mxu1  ;;  %1310 = vmax.xlane.f32.xlu1 %v1309_v32  ;;  %v9453_v31 = vadd.f32 %v1088_v24, %v9405_v4 }
 0x230   : > { %v9456_v61 = vadd.f32 %v7338_v40, %v9397_v0  ;;  %v1091_v27 = vpop.f32.mrb[47].mxu1  ;;  %v1324_v6 = vsel %vm1281_vm1, %v9448_v18, -inf }
 0x231   : > { %1325 = vmax.xlane.f32.xlu0 %v1324_v6  ;;  %v9461_v12 = vadd.f32 %v1091_v27, %v9410_v57  ;;  %v1318_v32 = vsel %vm1281_vm1, %v9453_v31, -inf }
 0x232   : > { %v1327_v52 = vsel %vm1281_vm1, %v9456_v61, -inf }
 0x233   : > { %1328 = vmax.xlane.f32.xlu1 %v1327_v52  ;;  %v1321_v24 = vsel %vm1281_vm1, %v9461_v12, -inf }
 0x235   : > { %1319 = vmax.xlane.f32.xlu0 %v1318_v32 }
 0x237   : > { %1322 = vmax.xlane.f32.xlu1 %v1321_v24 }
 0x244   : > { %v7349_v40 = vpop.f32.mrb[64].mxu0 }
 0x245   : > { %v9470_v10 = vadd.f32 %v7349_v40, %v9352_v15  ;;  %v1161_v6 = vpop.f32.mrb[65].mxu0 }
 0x246   : > { %v7350_v45 = vpop.f32.mrb[66].mxu0  ;;  %v9473_v27 = vadd.f32 %v1161_v6, %v9357_v17 }
 0x247   : > { %v9476_v7 = vadd.f32 %v7350_v45, %v9362_v13  ;;  %v1164_v52 = vpop.f32.mrb[67].mxu0  ;;  %v1336_v32 = vsel %vm1281_vm1, %v9470_v10, -inf }
 0x248   : > { %1337 = vmax.xlane.f32.xlu0 %v1336_v32  ;;  %v9481_v47 = vadd.f32 %v1164_v52, %v9370_v35  ;;  %v1330_v40 = vsel %vm1281_vm1, %v9473_v27, -inf }
 0x249   : > { %v1339_v24 = vsel %vm1281_vm1, %v9476_v7, -inf }
 0x24a   : > { %1340 = vmax.xlane.f32.xlu1 %v1339_v24  ;;  %v1333_v41 = vsel %vm1281_vm1, %v9481_v47, -inf }
 0x24c   : > { %v7353_v6 = vpop.f32.mrb[68].mxu0  ;;  %1331 = vmax.xlane.f32.xlu0 %v1330_v40 }
 0x24d   : > { %v9488_v45 = vadd.f32 %v7353_v6, %v9388_v5  ;;  %v1177_v50 = vpop.f32.mrb[69].mxu0 }
 0x24e   : > { %v7354_v32 = vpop.f32.mrb[70].mxu0  ;;  %1334 = vmax.xlane.f32.xlu1 %v1333_v41  ;;  %v9493_v52 = vadd.f32 %v1177_v50, %v9405_v4 }
 0x24f   : > { %12144 = vst [vmem:[#allocation50_spill] sm:$0xff] %v9488_v45  ;;  %v9496_v43 = vadd.f32 %v7354_v32, %v9397_v0  ;;  %v1348_v24 = vsel %vm1281_vm1, %v9488_v45, -inf  ;;  %v1180_v46 = vpop.f32.mrb[71].mxu0 }
 0x250   : > { %12145 = vst [vmem:[#allocation51_spill] sm:$0xff] %v9493_v52  ;;  %1349 = vmax.xlane.f32.xlu0 %v1348_v24  ;;  %v9501_v40 = vadd.f32 %v1180_v46, %v9410_v57  ;;  %v1342_v41 = vsel %vm1281_vm1, %v9493_v52, -inf  ;;  %v9529_v52 = vpop.permute.xlu0 %2003 }
 0x251   : > { %12146 = vst [vmem:[#allocation52_spill] sm:$0xff] %v9496_v43  ;;  %v1351_v6 = vsel %vm1281_vm1, %v9496_v43, -inf }
 0x252   : > { %12147 = vst [vmem:[#allocation53_spill] sm:$0xff] %v9501_v40  ;;  %1352 = vmax.xlane.f32.xlu1 %v1351_v6  ;;  %v1345_v50 = vsel %vm1281_vm1, %v9501_v40, -inf }
 0x254   : > { %1343 = vmax.xlane.f32.xlu0 %v1342_v41 }
 0x256   : > { %1346 = vmax.xlane.f32.xlu1 %v1345_v50 }
 0x264   : > { %v7365_v32 = vpop.f32.mrb[48].mxu1 }
 0x265   : > { %v9510_v14 = vadd.f32 %v7365_v32, %v9352_v15  ;;  %v1250_v24 = vpop.f32.mrb[49].mxu1 }
 0x266   : > { %v9513_v46 = vadd.f32 %v1250_v24, %v9357_v17  ;;  %v7366_v22 = vpop.f32.mrb[50].mxu1  ;;  %v9527_v24 = vpop.permute.xlu1 %2005 }
 0x267   : > { %12148 = vst [vmem:[#allocation54_spill] sm:$0xff] %v9510_v14  ;;  %2231 = vrot.lane.b32.xlu1 %v9206_v44, %s8789_s20  ;;  %v1360_v6 = vsel %vm1281_vm1, %v9510_v14, -inf  ;;  %v1253_v41 = vpop.f32.mrb[51].mxu1  ;;  %12150 = vst [vmem:[#allocation56_spill] sm:$0xff] %v9527_v24 }
 0x268   : > { %12149 = vst [vmem:[#allocation55_spill] sm:$0xff] %v9513_v46  ;;  %1361 = vmax.xlane.f32.xlu0 %v1360_v6  ;;  %v1354_v50 = vsel %vm1281_vm1, %v9513_v46, -inf  ;;  %v9535_v6 = vpop.permute.xlu0 %1991  ;;  %v9545_v49 = vadd.f32 %v1253_v41, %v9370_v35 }
 0x269   : > { %12152 = vst [vmem:[#allocation58_spill] sm:$0xff] %v9535_v6 }
 0x26a   : > { %v9533_v44 = vpop.permute.xlu1 %1993  ;;  %12155 = vst [vmem:[#allocation61_spill] sm:$0xff] %v9545_v49 }
 0x26b   : > { %12151 = vst [vmem:[#allocation57_spill] sm:$0xff] %v9533_v44  ;;  %v1357_v44 = vsel %vm1281_vm1, %v9545_v49, -inf }
 0x26c   : > { %1355 = vmax.xlane.f32.xlu0 %v1354_v50  ;;  %v7369_v40 = vpop.f32.mrb[52].mxu1  ;;  %v9538_v50 = vadd.f32 %v7366_v22, %v9362_v13  ;;  %v9542_v46 = vpop.permute.xlu0 %2007 }
 0x26d   : > { %v9521_v15 = vpop.f32.mrb[53].mxu1  ;;  %12154 = vst [vmem:[#allocation60_spill] sm:$0xff] %v9542_v46 }
 0x26e   : > { %v9523_v32 = vpop.f32.mrb[54].mxu1  ;;  %12153 = vst [vmem:[#allocation59_spill] sm:$0xff] %v9538_v50  ;;  %v9540_v14 = vpop.permute.xlu1 %2116  ;;  %v1363_v24 = vsel %vm1281_vm1, %v9538_v50, -inf }
 0x26f   : > { %v9525_v17 = vpop.f32.mrb[55].mxu1 }
 0x272   : > { %v9549_v45 = vpop.permute.xlu1 %2118 }
 0x273   : > { %12156 = vst [vmem:[#allocation62_spill] sm:$0xff] %v9549_v45 }
 0x276   : > { %v9555_v22 = vpop.permute.xlu1 %2120 }
 0x277   : > { %12158 = vst [vmem:[#allocation64_spill] sm:$0xff] %v9555_v22 }
 0x282   : > { %2122 = vrot.lane.b32.xlu0 %v9139_v8, %s8789_s20  ;;  %v9551_v8 = vpop.permute.xlu0 %2009 }
 0x283   : > { %12157 = vst [vmem:[#allocation63_spill] sm:$0xff] %v9551_v8 }
 0x286   : > { %v9557_v13 = vpop.permute.xlu0 %2229 }
 0x287   : > { %12159 = vst [vmem:[#allocation65_spill] sm:$0xff] %v9557_v13 }
 0x28b   : > { %1364 = vmax.xlane.f32.xlu1 %v1363_v24 }
 0x28f   : > { %1358 = vmax.xlane.f32.xlu1 %v1357_v44  ;;  %v9564_v44 = vadd.f32 %v7369_v40, %v9388_v5 }
 0x295   : > { %v1290_v46 = vpop.xlane.xlu1 %1289 }
 0x296   : > { %v1284_v6 = vpop.xlane.xlu0 %1283  ;;  %v1380_v41 = vsub.f32 %v9365_v25, %v1290_v46 }
 0x297   : > { %v1378_v35 = vsub.f32 %v9373_v38, %v1284_v6 }
 0x298   : > { %v1414_v43 = vmul.f32 1.442695, %v1380_v41 }
 0x299   : > { %v1410_v50 = vmul.f32 1.442695, %v1378_v35  ;;  %v1293_v24 = vpop.xlane.xlu1 %1292 }
 0x29a   : > { %v1381_v45 = vsub.f32 %v9376_v55, %v1293_v24  ;;  %v1287_v29 = vpop.xlane.xlu0 %1286 }
 0x29b   : > { %v1379_v8 = vsub.f32 %v9381_v62, %v1287_v29  ;;  %8212 = vpow2.f32 %v1410_v50  ;;  %v1372_v29 = vsel %vm1281_vm1, %v9564_v44, -inf }
 0x29c   : > { %v1416_v49 = vmul.f32 1.442695, %v1381_v45 }
 0x29d   : > { %v1412_v22 = vmul.f32 1.442695, %v1379_v8 }
 0x29e   : > { %8214 = vpow2.f32 %v1416_v49  ;;  %v1302_v13 = vpop.xlane.xlu0 %1301 }
 0x29f   : > { %8216 = vpow2.f32 %v1412_v22  ;;  %v1384_v38 = vsub.f32 %v9400_v56, %v1302_v13  ;;  %v1305_v25 = vpop.xlane.xlu1 %1304 }
 0x2a0   : > { %8218 = vpow2.f32 %v1414_v43  ;;  %v1385_v46 = vsub.f32 %v9413_v33, %v1305_v25  ;;  %2106 = vrot.lane.b32.xlu1 %v9105_v34, %s8789_s20 }
 0x2a1   : > { %v1422_v55 = vmul.f32 1.442695, %v1384_v38  ;;  %1373 = vmax.xlane.f32.xlu0 %v1372_v29 }
 0x2a2   : > { %v1424_v62 = vmul.f32 1.442695, %v1385_v46  ;;  %v1296_v5 = vpop.xlane.xlu0 %1295 }
 0x2a3   : > { %v1382_v49 = vsub.f32 %v9418_v1, %v1296_v5  ;;  %v1299_v8 = vpop.xlane.xlu1 %1298  ;;  %8220 = vpow2.f32 %v1422_v55 }
 0x2a4   : > { %v1383_v45 = vsub.f32 %v9421_v48, %v1299_v8  ;;  %8222 = vpow2.f32 %v1424_v62 }
 0x2a5   : > { %v1418_v56 = vmul.f32 1.442695, %v1382_v49  ;;  %v9574_v33 = vpop.eup %8212 }
 0x2a6   : > { %v1420_v43 = vmul.f32 1.442695, %v1383_v45  ;;  %12160 = vst [vmem:[#allocation66_spill] sm:$0xff] %v9574_v33 }
 0x2a7   : > { %8224 = vpow2.f32 %v1418_v56 }
 0x2a8   : > { %v9576_v40 = vpop.eup %8214  ;;  %8226 = vpow2.f32 %v1420_v43 }
 0x2a9   : > { %12161 = vst [vmem:[#allocation67_spill] sm:$0xff] %v9576_v40  ;;  %v9578_v6 = vpop.eup %8216 }
 0x2aa   : > { %12162 = vst [vmem:[#allocation68_spill] sm:$0xff] %v9578_v6  ;;  %v9580_v50 = vpop.eup %8218  ;;  %v1570_v1 = vpack.c.bf16 %v9578_v6, %v9574_v33 }
 0x2ab   : > { %12163 = vst [vmem:[#allocation69_spill] sm:$0xff] %v9580_v50  ;;  %v1571_v48 = vpack.c.bf16 %v9576_v40, %v9580_v50 }
 0x2ac   : > { %7379 = vmatprep.mubr.msk.bf16.mxu0 %vm1281_vm1, %v1570_v1  ;;  %v9621_v1 = vadd.f32 %v9521_v15, %v9405_v4 }
 0x2ad   : > { %7380 = vmatmul.mubr.msk.bf16.vlgmr.msra.gmra.mrb[72].mxu0 %vm1281_vm1, %v1571_v48  ;;  %v9589_v22 = vpop.eup %8220 }
 0x2ae   : > { %7404 = vmatpush3.bf16.msra.mxu0 %v9218_v59  ;;  %12164 = vst [vmem:[#allocation70_spill] sm:$0xff] %v9589_v22  ;;  %v9592_v13 = vpop.eup %8222  ;;  %v1366_v4 = vsel %vm1281_vm1, %v9621_v1, -inf }
 0x2af   : > { %7405 = vmatprep.subr.bf16.mxu0 %v9211_v51  ;;  %12165 = vst [vmem:[#allocation71_spill] sm:$0xff] %v9592_v13  ;;  %v1573_v38 = vpack.c.bf16 %v9592_v13, %v9589_v22 }
 0x2b1   : > { %v9594_v35 = vpop.eup %8224 }
 0x2b2   : > { %12166 = vst [vmem:[#allocation72_spill] sm:$0xff] %v9594_v35  ;;  %v9596_v41 = vpop.eup %8226  ;;  %7406 = vmatpush3.bf16.msra.mxu0 %v9211_v51 }
 0x2b3   : > { %12167 = vst [vmem:[#allocation73_spill] sm:$0xff] %v9596_v41  ;;  %7407 = vmatprep.subr.bf16.mxu0 %v9232_v28  ;;  %v1572_v24 = vpack.c.bf16 %v9596_v41, %v9594_v35 }
 0x2b5   : > { %7383 = vmatprep.mubr.msk.bf16.mxu0 %vm1281_vm1, %v1572_v24 }
 0x2b6   : > { %7408 = vmatpush3.bf16.msra.mxu0 %v9232_v28  ;;  %v1314_v25 = vpop.xlane.xlu0 %1313 }
 0x2b7   : > { %7384 = vmatmul.mubr.msk.bf16.gmra.mrb[76].mxu0 %vm1281_vm1, %v1573_v38  ;;  %7409 = vmatprep.subr.bf16.mxu0 %v9227_v2  ;;  %v1388_v55 = vsub.f32 %v9430_v58, %v1314_v25 }
 0x2b8   : > { %v1317_v46 = vpop.xlane.xlu1 %1316  ;;  %2104 = vrot.lane.b32.xlu0 %v9087_v19, %s8789_s20 }
 0x2b9   : > { %v1389_v29 = vsub.f32 %v9436_v26, %v1317_v46  ;;  %v1430_v43 = vmul.f32 1.442695, %v1388_v55  ;;  %v9630_v46 = vadd.f32 %v9523_v32, %v9397_v0 }
 0x2ba   : > { %7410 = vmatpush3.bf16.msra.mxu0 %v9227_v2  ;;  %v1308_v62 = vpop.xlane.xlu0 %1307 }
 0x2bb   : > { %v1432_v5 = vmul.f32 1.442695, %v1389_v29  ;;  %v1386_v49 = vsub.f32 %v9433_v16, %v1308_v62  ;;  %8079 = vmatprep.subr.msk.bf16.mxu0 %vm924_vm0, %v9529_v52  ;;  %v1375_v0 = vsel %vm1281_vm1, %v9630_v46, -inf }
 0x2bc   : > { %v1311_v8 = vpop.xlane.xlu1 %1310  ;;  %2233 = vrot.lane.b32.xlu0 %v9236_v42, %s8789_s20 }
 0x2bd   : > { %v1426_v45 = vmul.f32 1.442695, %v1386_v49  ;;  %v1387_v56 = vsub.f32 %v9441_v39, %v1311_v8  ;;  %8228 = vpow2.f32 %v1432_v5 }
 0x2be   : > { %v1326_v26 = vpop.xlane.xlu0 %1325 }
 0x2bf   : > { %v1428_v58 = vmul.f32 1.442695, %v1387_v56  ;;  %8230 = vpow2.f32 %v1426_v45  ;;  %v1392_v24 = vsub.f32 %v9448_v18, %v1326_v26 }
 0x2c0   : > { %v1329_v16 = vpop.xlane.xlu1 %1328  ;;  %1995 = vrot.lane.b32.xlu0 %v9059_v53, %s8789_s20 }
 0x2c1   : > { %8232 = vpow2.f32 %v1428_v58  ;;  %v1393_v48 = vsub.f32 %v9456_v61, %v1329_v16  ;;  %v1438_v18 = vmul.f32 1.442695, %v1392_v24 }
 0x2c2   : > { %8234 = vpow2.f32 %v1430_v43  ;;  %v1320_v39 = vpop.xlane.xlu0 %1319 }
 0x2c3   : > { %v1440_v38 = vmul.f32 1.442695, %v1393_v48  ;;  %v1390_v25 = vsub.f32 %v9453_v31, %v1320_v39  ;;  %v9639_v31 = vadd.f32 %v9525_v17, %v9410_v57 }
 0x2c4   : > { %v1323_v15 = vpop.xlane.xlu1 %1322  ;;  %1997 = vrot.lane.b32.xlu0 %v9073_v3, %s8789_s20  ;;  %1367 = vmax.xlane.f32.xlu1 %v1366_v4 }
 0x2c5   : > { %v1434_v61 = vmul.f32 1.442695, %v1390_v25  ;;  %v1391_v29 = vsub.f32 %v9461_v12, %v1323_v15  ;;  %8236 = vpow2.f32 %v1440_v38  ;;  %v1369_v57 = vsel %vm1281_vm1, %v9639_v31, -inf }
 0x2c7   : > { %v1436_v55 = vmul.f32 1.442695, %v1391_v29  ;;  %8238 = vpow2.f32 %v1434_v61  ;;  %v9645_v32 = vpop.eup %8228 }
 0x2c8   : > { %2235 = vrot.lane.b32.xlu0 %v9261_v36, %s8789_s20  ;;  %1376 = vmax.xlane.f32.xlu1 %v1375_v0  ;;  %12168 = vst [vmem:[#allocation74_spill] sm:$0xff] %v9645_v32 }
 0x2c9   : > { %8240 = vpow2.f32 %v1436_v55  ;;  %v9647_v62 = vpop.eup %8230  ;;  %v12176_v55 = vld [vmem:[#allocation52_spill] sm:$0xff] }
 0x2ca   : > { %12169 = vst [vmem:[#allocation75_spill] sm:$0xff] %v9647_v62  ;;  %8242 = vpow2.f32 %v1438_v18 }
 0x2cb   : > { %v9649_v12 = vpop.eup %8232 }
 0x2cc   : > { %12170 = vst [vmem:[#allocation76_spill] sm:$0xff] %v9649_v12  ;;  %v9653_v17 = vpop.eup %8234  ;;  %2217 = vrot.lane.b32.xlu0 %v9173_v60, %s8789_s20  ;;  %1370 = vmax.xlane.f32.xlu1 %v1369_v57  ;;  %v1574_v5 = vpack.c.bf16 %v9649_v12, %v9647_v62  ;;  %v12178_v57 = vld [vmem:[#allocation50_spill] sm:$0xff] }
 0x2cd   : > { %12171 = vst [vmem:[#allocation77_spill] sm:$0xff] %v9653_v17  ;;  %v1575_v49 = vpack.c.bf16 %v9645_v32, %v9653_v17 }
 0x2ce   : > { %7395 = vmatprep.mubr.msk.bf16.mxu1 %vm1281_vm1, %v1574_v5 }
 0x2cf   : > { %7396 = vmatmul.mubr.msk.bf16.vlgmr.msra.gmra.mrb[56].mxu1 %vm1281_vm1, %v1575_v49  ;;  %v9666_v8 = vpop.eup %8236  ;;  %v12179_v49 = vld [vmem:[#allocation16_spill] sm:$0xff] }
 0x2d0   : > { %7420 = vmatpush3.bf16.msra.mxu1 %v9248_v63  ;;  %2346 = vrot.lane.b32.xlu0 %v9312_v20, %s8789_s20  ;;  %12172 = vst [vmem:[#allocation78_spill] sm:$0xff] %v9666_v8 }
 0x2d1   : > { %7421 = vmatprep.subr.bf16.mxu1 %v9241_v54  ;;  %v9669_v45 = vpop.eup %8238 }
 0x2d2   : > { %12173 = vst [vmem:[#allocation79_spill] sm:$0xff] %v9669_v45 }
 0x2d3   : > { %v9671_v56 = vpop.eup %8240 }
 0x2d4   : > { %12174 = vst [vmem:[#allocation80_spill] sm:$0xff] %v9671_v56  ;;  %v9673_v43 = vpop.eup %8242  ;;  %7422 = vmatpush3.bf16.msra.mxu1 %v9241_v54  ;;  %2223 = vrot.lane.b32.xlu0 %v9263_v37, %s8789_s20  ;;  %v1576_v26 = vpack.c.bf16 %v9671_v56, %v9669_v45 }
 0x2d5   : > { %12175 = vst [vmem:[#allocation81_spill] sm:$0xff] %v9673_v43  ;;  %7423 = vmatprep.subr.bf16.mxu1 %v9259_v30  ;;  %v1338_v58 = vpop.xlane.xlu0 %1337  ;;  %v1577_v16 = vpack.c.bf16 %v9666_v8, %v9673_v43 }
 0x2d6   : > { %7399 = vmatprep.mubr.msk.bf16.mxu1 %vm1281_vm1, %v1576_v26  ;;  %v1396_v39 = vsub.f32 %v9470_v10, %v1338_v58 }
 0x2d7   : > { %7400 = vmatmul.mubr.msk.bf16.gmra.mrb[60].mxu1 %vm1281_vm1, %v1577_v16  ;;  %v1341_v48 = vpop.xlane.xlu1 %1340  ;;  %v12180_v16 = vld [vmem:[#allocation51_spill] sm:$0xff] }
 0x2d8   : > { %7424 = vmatpush3.bf16.msra.mxu1 %v9259_v30  ;;  %v1397_v24 = vsub.f32 %v9476_v7, %v1341_v48  ;;  %2330 = vrot.lane.b32.xlu0 %v9276_v9, %s8789_s20  ;;  %v1446_v7 = vmul.f32 1.442695, %v1396_v39 }
 0x2d9   : > { %7425 = vmatprep.subr.bf16.mxu1 %v9255_v21  ;;  %v1332_v38 = vpop.xlane.xlu0 %1331 }
 0x2da   : > { %v1448_v25 = vmul.f32 1.442695, %v1397_v24  ;;  %v1394_v4 = vsub.f32 %v9473_v27, %v1332_v38  ;;  %v12181_v38 = vld [vmem:[#allocation53_spill] sm:$0xff] }
 0x2db   : > { %v1335_v15 = vpop.xlane.xlu1 %1334 }
 0x2dc   : > { %v1442_v61 = vmul.f32 1.442695, %v1394_v4  ;;  %7426 = vmatpush3.bf16.msra.mxu1 %v9255_v21  ;;  %v1395_v29 = vsub.f32 %v9481_v47, %v1335_v15  ;;  %2334 = vrot.lane.b32.xlu0 %v9315_v23, %s8789_s20  ;;  %8244 = vpow2.f32 %v1448_v25  ;;  %v12177_v47 = vld [vmem:[#allocation20_spill] sm:$0xff]  ;;  %v12182_v4 = vld [vmem:[#allocation19_spill] sm:$0xff] }
 0x2dd   : > { %8083 = vmatprep.subr.msk.bf16.mxu1 %vm924_vm0, %v9540_v14  ;;  %2342 = vrot.lane.b32.xlu1 %v9274_v11, %s8789_s20  ;;  %v1350_v10 = vpop.xlane.xlu0 %1349 }
 0x2de   : > { %v1444_v18 = vmul.f32 1.442695, %v1395_v29  ;;  %8246 = vpow2.f32 %v1442_v61  ;;  %v1400_v5 = vsub.f32 %v12178_v57, %v1350_v10  ;;  %v12183_v61 = vld [vmem:[#allocation18_spill] sm:$0xff] }
 0x2df   : > { %v1353_v27 = vpop.xlane.xlu1 %1352  ;;  %v12185_v10 = vld [vmem:[#allocation22_spill] sm:$0xff] }
 0x2e0   : > { %8248 = vpow2.f32 %v1444_v18  ;;  %v1401_v0 = vsub.f32 %v12176_v55, %v1353_v27  ;;  %2747 = vrot.lane.b32.xlu0 %v12177_v47, %s8789_s20  ;;  %v1454_v15 = vmul.f32 1.442695, %v1400_v5  ;;  %v12187_v27 = vld [vmem:[#allocation44_spill] sm:$0xff]  ;;  %v12213_v47 = vld [vmem:[#allocation61_spill] sm:$0xff] }
 0x2e1   : > { %8250 = vpow2.f32 %v1446_v7  ;;  %2108 = vrot.lane.b32.xlu1 %v12179_v49, %s8789_s20  ;;  %v1344_v26 = vpop.xlane.xlu0 %1343 }
 0x2e2   : > { %v1456_v58 = vmul.f32 1.442695, %v1401_v0  ;;  %v1398_v48 = vsub.f32 %v12180_v16, %v1344_v26  ;;  %v12190_v26 = vld [vmem:[#allocation21_spill] sm:$0xff]  ;;  %v2024_v16 = vsel %vm924_vm0, %v9529_v52, 0 }
 0x2e3   : > { %v1347_v24 = vpop.xlane.xlu1 %1346 }
 0x2e4   : > { %v1450_v39 = vmul.f32 1.442695, %v1398_v48  ;;  %v1399_v25 = vsub.f32 %v12181_v38, %v1347_v24  ;;  %2749 = vrot.lane.b32.xlu0 %v12182_v4, %s8789_s20  ;;  %8252 = vpow2.f32 %v1456_v58  ;;  %v12191_v58 = vld [vmem:[#allocation30_spill] sm:$0xff]  ;;  %v12193_v24 = vld [vmem:[#allocation56_spill] sm:$0xff] }
 0x2e5   : > { %2110 = vrot.lane.b32.xlu1 %v12183_v61, %s8789_s20  ;;  %v12195_v38 = vld [vmem:[#allocation36_spill] sm:$0xff] }
 0x2e6   : > { %v1452_v29 = vmul.f32 1.442695, %v1399_v25  ;;  %8254 = vpow2.f32 %v1450_v39  ;;  %v9712_v7 = vpop.eup %8244  ;;  %v12207_v4 = vld [vmem:[#allocation28_spill] sm:$0xff] }
 0x2e7   : > { %12184 = vst [vmem:[#allocation52_spill] sm:$0xff] %v9712_v7 }
 0x2e8   : > { %8256 = vpow2.f32 %v1452_v29  ;;  %2751 = vrot.lane.b32.xlu0 %v12185_v10, %s8789_s20  ;;  %v9716_v18 = vpop.eup %8246 }
 0x2e9   : > { %12186 = vst [vmem:[#allocation50_spill] sm:$0xff] %v9716_v18  ;;  %8258 = vpow2.f32 %v1454_v15  ;;  %2344 = vrot.lane.b32.xlu1 %v12187_v27, %s8789_s20 }
 0x2ea   : > { %v9720_v55 = vpop.eup %8248 }
 0x2eb   : > { %12188 = vst [vmem:[#allocation51_spill] sm:$0xff] %v9720_v55  ;;  %v9722_v0 = vpop.eup %8250  ;;  %v1578_v57 = vpack.c.bf16 %v9720_v55, %v9716_v18 }
 0x2ec   : > { %12189 = vst [vmem:[#allocation53_spill] sm:$0xff] %v9722_v0  ;;  %v1579_v5 = vpack.c.bf16 %v9712_v7, %v9722_v0  ;;  %2753 = vrot.lane.b32.xlu0 %v12190_v26, %s8789_s20  ;;  %v12206_v26 = vld [vmem:[#allocation65_spill] sm:$0xff]  ;;  %v12211_v7 = vld [vmem:[#allocation59_spill] sm:$0xff] }
 0x2ed   : > { %2219 = vrot.lane.b32.xlu1 %v12191_v58, %s8789_s20  ;;  %7411 = vmatprep.mubr.msk.bf16.mxu0 %vm1281_vm1, %v1578_v57  ;;  %v12198_v57 = vld [vmem:[#allocation48_spill] sm:$0xff] }
 0x2ee   : > { %7412 = vmatmul.mubr.msk.bf16.vlgmr.msra.gmra.mrb[80].mxu0 %vm1281_vm1, %v1579_v5  ;;  %v9736_v48 = vpop.eup %8252  ;;  %v2027_v5 = vsel %vm924_vm0, %v12193_v24, 0 }
 0x2ef   : > { %7436 = vmatpush3.bf16.xpose.msra.mxu0 %v2024_v16  ;;  %12192 = vst [vmem:[#allocation82_spill] sm:$0xff] %v9736_v48  ;;  %v12199_v16 = vld [vmem:[#allocation58_spill] sm:$0xff] }
 0x2f0   : > { %2933 = vrot.lane.b32.xlu0 %v9218_v59, %s8789_s20  ;;  %8080 = vmatprep.subr.msk.bf16.mxu0 %vm924_vm0, %v12193_v24  ;;  %v9742_v39 = vpop.eup %8254  ;;  %v12201_v59 = vld [vmem:[#allocation45_spill] sm:$0xff]  ;;  %v12203_v24 = vld [vmem:[#allocation63_spill] sm:$0xff] }
 0x2f1   : > { %12194 = vst [vmem:[#allocation56_spill] sm:$0xff] %v9742_v39  ;;  %2221 = vrot.lane.b32.xlu1 %v12195_v38, %s8789_s20 }
 0x2f2   : > { %v9746_v25 = vpop.eup %8256 }
 0x2f3   : > { %12196 = vst [vmem:[#allocation83_spill] sm:$0xff] %v9746_v25  ;;  %v9748_v15 = vpop.eup %8258  ;;  %v1580_v52 = vpack.c.bf16 %v9746_v25, %v9742_v39  ;;  %v2250_v25 = vsel %vm924_vm0, %v12206_v26, 0 }
 0x2f4   : > { %12197 = vst [vmem:[#allocation84_spill] sm:$0xff] %v9748_v15  ;;  %2937 = vrot.lane.b32.xlu0 %v9232_v28, %s8789_s20  ;;  %v1581_v29 = vpack.c.bf16 %v9736_v48, %v9748_v15  ;;  %v12200_v28 = vld [vmem:[#allocation60_spill] sm:$0xff]  ;;  %v12209_v48 = vld [vmem:[#allocation57_spill] sm:$0xff] }
 0x2f5   : > { %2348 = vrot.lane.b32.xlu1 %v12198_v57, %s8789_s20  ;;  %7415 = vmatprep.mubr.msk.bf16.mxu0 %vm1281_vm1, %v1580_v52  ;;  %v12202_v52 = vld [vmem:[#allocation49_spill] sm:$0xff] }
 0x2f6   : > { %7416 = vmatmul.mubr.msk.bf16.gmra.mrb[84].mxu0 %vm1281_vm1, %v1581_v29  ;;  %v2030_v29 = vsel %vm924_vm0, %v12200_v28, 0 }
 0x2f7   : > { %7438 = vmatpush3.bf16.xpose.msra.mxu0 %v2027_v5  ;;  %7443 = vmatprep.mubr.msk.bf16.mxu0 %vm924_vm0, %v12199_v16  ;;  %v12204_v5 = vld [vmem:[#allocation26_spill] sm:$0xff]  ;;  %v12205_v16 = vld [vmem:[#allocation25_spill] sm:$0xff] }
 0x2f8   : > { %3026 = vrot.lane.b32.xlu0 %v9248_v63, %s8789_s20  ;;  %8081 = vmatprep.subr.msk.bf16.mxu0 %vm924_vm0, %v12200_v28  ;;  %v2033_v63 = vsel %vm924_vm0, %v12203_v24, 0  ;;  %v12208_v28 = vld [vmem:[#allocation27_spill] sm:$0xff] }
 0x2f9   : > { %2332 = vrot.lane.b32.xlu1 %v12201_v59, %s8789_s20 }
 0x2fd   : > { %2336 = vrot.lane.b32.xlu1 %v12202_v52, %s8789_s20 }
 0x2ff   : > { %7440 = vmatpush3.bf16.xpose.msra.mxu0 %v2030_v29  ;;  %v1362_v29 = vpop.xlane.xlu0 %1361 }
 0x300   : > { %8082 = vmatprep.subr.msk.bf16.mxu0 %vm924_vm0, %v12203_v24 }
 0x301   : > { %2840 = vrot.lane.b32.xlu1 %v12204_v5, %s8789_s20 }
 0x305   : > { %2842 = vrot.lane.b32.xlu1 %v12205_v16, %s8789_s20  ;;  %v2232_v16 = vpop.permute.xlu1 %2231 }
 0x306   : > { %v2253_v24 = vsel %vm924_vm0, %v2232_v16, 0 }
 0x307   : > { %7442 = vmatpush3.bf16.xpose.msra.mxu0 %v2033_v63  ;;  %v1356_v63 = vpop.xlane.xlu0 %1355 }
 0x308   : > { %8087 = vmatprep.subr.msk.bf16.mxu0 %vm924_vm0, %v12206_v26  ;;  %v12212_v26 = vld [vmem:[#allocation54_spill] sm:$0xff] }
 0x309   : > { %2844 = vrot.lane.b32.xlu1 %v12207_v4, %s8789_s20  ;;  %v12210_v4 = vld [vmem:[#allocation55_spill] sm:$0xff]  ;;  %v1404_v55 = vsub.f32 %v12212_v26, %v1362_v29  ;;  %v12219_v29 = vld [vmem:[#allocation64_spill] sm:$0xff] }
 0x30a   : > { %v2143_v26 = vsel %vm924_vm0, %v12219_v29, 0 }
 0x30d   : > { %2846 = vrot.lane.b32.xlu1 %v12208_v28, %s8789_s20  ;;  %v1402_v28 = vsub.f32 %v12210_v4, %v1356_v63  ;;  %v2123_v63 = vpop.permute.xlu0 %2122 }
 0x30e   : > { %7444 = vmatmul.mubr.msk.bf16.vlgmr.msra.gmra.mrb[88].mxu0 %vm924_vm0, %v12209_v48 }
 0x30f   : > { %7468 = vmatpush3.bf16.xpose.msra.mxu0 %v2250_v25  ;;  %v1458_v25 = vmul.f32 1.442695, %v1402_v28 }
 0x310   : > { %8088 = vmatprep.subr.msk.bf16.mxu0 %vm924_vm0, %v2232_v16 }
 0x311   : > { %2935 = vrot.lane.b32.xlu1 %v9211_v51, %s8789_s20  ;;  %v1462_v51 = vmul.f32 1.442695, %v1404_v55  ;;  %8260 = vpow2.f32 %v1458_v25 }
 0x315   : > { %2939 = vrot.lane.b32.xlu1 %v9227_v2, %s8789_s20 }
 0x317   : > { %7470 = vmatpush3.bf16.xpose.msra.mxu0 %v2253_v24 }
 0x318   : > { %v1365_v48 = vpop.xlane.xlu1 %1364 }
 0x319   : > { %v1405_v5 = vsub.f32 %v12211_v7, %v1365_v48 }
 0x31b   : > { %v1464_v10 = vmul.f32 1.442695, %v1405_v5  ;;  %v9802_v16 = vpop.eup %8260 }
 0x31c   : > { %v1359_v8 = vpop.xlane.xlu1 %1358  ;;  %12214 = vst [vmem:[#allocation58_spill] sm:$0xff] %v9802_v16 }
 0x31d   : > { %v1403_v56 = vsub.f32 %v12213_v47, %v1359_v8  ;;  %8262 = vpow2.f32 %v1464_v10 }
 0x31f   : > { %v1460_v32 = vmul.f32 1.442695, %v1403_v56 }
 0x321   : > { %8264 = vpow2.f32 %v1460_v32  ;;  %v12218_v32 = vld [vmem:[#allocation62_spill] sm:$0xff] }
 0x322   : > { %8266 = vpow2.f32 %v1462_v51  ;;  %v2137_v51 = vsel %vm924_vm0, %v9540_v14, 0  ;;  %v2140_v55 = vsel %vm924_vm0, %v12218_v32, 0 }
 0x327   : > { %v9804_v4 = vpop.eup %8262 }
 0x328   : > { %12215 = vst [vmem:[#allocation60_spill] sm:$0xff] %v9804_v4 }
 0x32b   : > { %v9806_v24 = vpop.eup %8264 }
 0x32c   : > { %12216 = vst [vmem:[#allocation63_spill] sm:$0xff] %v9806_v24  ;;  %v9808_v7 = vpop.eup %8266  ;;  %v1582_v5 = vpack.c.bf16 %v9806_v24, %v9802_v16 }
 0x32d   : > { %12217 = vst [vmem:[#allocation65_spill] sm:$0xff] %v9808_v7  ;;  %v1583_v8 = vpack.c.bf16 %v9804_v4, %v9808_v7 }
 0x32e   : > { %7427 = vmatprep.mubr.msk.bf16.mxu1 %vm1281_vm1, %v1582_v5  ;;  %v1374_v56 = vpop.xlane.xlu0 %1373 }
 0x32f   : > { %7428 = vmatmul.mubr.msk.bf16.vlgmr.msra.gmra.mrb[64].mxu1 %vm1281_vm1, %v1583_v8 }
 0x330   : > { %7452 = vmatpush3.bf16.xpose.msra.mxu1 %v2137_v51  ;;  %v2146_v51 = vsel %vm924_vm0, %v2123_v63, 0 }
 0x331   : > { %8084 = vmatprep.subr.msk.bf16.mxu1 %vm924_vm0, %v12218_v32 }
 0x332   : > { %v2105_v47 = vpop.permute.xlu0 %2104 }
 0x336   : > { %v2234_v10 = vpop.permute.xlu0 %2233 }
 0x337   : > { %8089 = vmatprep.subr.msk.bf16.mxu0 %vm924_vm0, %v2234_v10  ;;  %v2256_v28 = vsel %vm924_vm0, %v2234_v10, 0  ;;  %v2107_v10 = vpop.permute.xlu1 %2106 }
 0x338   : > { %7454 = vmatpush3.bf16.xpose.msra.mxu1 %v2140_v55  ;;  %7472 = vmatpush3.bf16.xpose.msra.mxu0 %v2256_v28 }
 0x339   : > { %8085 = vmatprep.subr.msk.bf16.mxu1 %vm924_vm0, %v12219_v29 }
 0x33a   : > { %v1996_v48 = vpop.permute.xlu0 %1995 }
 0x33b   : > { %7447 = vmatprep.mubr.msk.bf16.mxu0 %vm924_vm0, %v1996_v48 }
 0x33e   : > { %v1998_v14 = vpop.permute.xlu0 %1997 }
 0x33f   : > { %7448 = vmatmul.mubr.msk.bf16.gmra.mrb[92].mxu0 %vm924_vm0, %v1998_v14 }
 0x340   : > { %7456 = vmatpush3.bf16.xpose.msra.mxu1 %v2143_v26 }
 0x341   : > { %8086 = vmatprep.subr.msk.bf16.mxu1 %vm924_vm0, %v2123_v63 }
 0x342   : > { %v2236_v25 = vpop.permute.xlu0 %2235 }
 0x343   : > { %8090 = vmatprep.subr.msk.bf16.mxu0 %vm924_vm0, %v2236_v25  ;;  %v2259_v5 = vsel %vm924_vm0, %v2236_v25, 0  ;;  %v1408_v25 = vsub.f32 %v9564_v44, %v1374_v56 }
 0x344   : > { %7474 = vmatpush3.bf16.xpose.msra.mxu0 %v2259_v5 }
 0x345   : > { %v1470_v24 = vmul.f32 1.442695, %v1408_v25 }
 0x346   : > { %v2218_v8 = vpop.permute.xlu0 %2217 }
 0x347   : > { %7475 = vmatprep.mubr.msk.bf16.mxu0 %vm924_vm0, %v2218_v8 }
 0x348   : > { %7458 = vmatpush3.bf16.xpose.msra.mxu1 %v2146_v51 }
 0x34a   : > { %v9835_v32 = vpop.permute.xlu0 %2346 }
 0x34e   : > { %v2224_v55 = vpop.permute.xlu0 %2223 }
 0x351   : > { %v1368_v28 = vpop.xlane.xlu1 %1367 }
 0x352   : > { %v2331_v29 = vpop.permute.xlu0 %2330  ;;  %v1406_v48 = vsub.f32 %v9621_v1, %v1368_v28 }
 0x354   : > { %v1466_v5 = vmul.f32 1.442695, %v1406_v48 }
 0x355   : > { %v1377_v14 = vpop.xlane.xlu1 %1376 }
 0x356   : > { %v1409_v26 = vsub.f32 %v9630_v46, %v1377_v14  ;;  %v9839_v4 = vpop.permute.xlu0 %2334  ;;  %8268 = vpow2.f32 %v1466_v5 }
 0x358   : > { %v1472_v63 = vmul.f32 1.442695, %v1409_v26 }
 0x359   : > { %v1371_v2 = vpop.xlane.xlu1 %1370 }
 0x35a   : > { %v1407_v8 = vsub.f32 %v9639_v31, %v1371_v2  ;;  %v2748_v51 = vpop.permute.xlu0 %2747  ;;  %8270 = vpow2.f32 %v1472_v63 }
 0x35b   : > { %7499 = vmatprep.subr.bf16.mxu0 %v2748_v51 }
 0x35c   : > { %v1468_v12 = vmul.f32 1.442695, %v1407_v8 }
 0x35d   : > { %v2343_v13 = vpop.permute.xlu1 %2342 }
 0x35e   : > { %8272 = vpow2.f32 %v1468_v12  ;;  %8091 = vmatprep.subr.msk.bf16.mxu1 %vm924_vm0, %v2343_v13  ;;  %v2750_v31 = vpop.permute.xlu0 %2749  ;;  %v2363_v5 = vsel %vm924_vm0, %v2343_v13, 0 }
 0x35f   : > { %8274 = vpow2.f32 %v1470_v24 }
 0x360   : > { %v9844_v28 = vpop.eup %8268 }
 0x361   : > { %v2109_v1 = vpop.permute.xlu1 %2108  ;;  %12220 = vst [vmem:[#allocation57_spill] sm:$0xff] %v9844_v28 }
 0x362   : > { %v2752_v26 = vpop.permute.xlu0 %2751 }
 0x364   : > { %v9846_v44 = vpop.eup %8270 }
 0x365   : > { %v2111_v46 = vpop.permute.xlu1 %2110  ;;  %12221 = vst [vmem:[#allocation55_spill] sm:$0xff] %v9846_v44 }
 0x366   : > { %v2754_v63 = vpop.permute.xlu0 %2753 }
 0x368   : > { %v9848_v56 = vpop.eup %8272 }
 0x369   : > { %12222 = vst [vmem:[#allocation59_spill] sm:$0xff] %v9848_v56  ;;  %v9850_v2 = vpop.eup %8274  ;;  %v2345_v48 = vpop.permute.xlu1 %2344  ;;  %v1584_v14 = vpack.c.bf16 %v9848_v56, %v9844_v28 }
 0x36a   : > { %12223 = vst [vmem:[#allocation54_spill] sm:$0xff] %v9850_v2  ;;  %v1585_v12 = vpack.c.bf16 %v9846_v44, %v9850_v2  ;;  %v9866_v8 = vpop.permute.xlu0 %2933  ;;  %v2366_v13 = vsel %vm924_vm0, %v2345_v48, 0 }
 0x36b   : > { %7431 = vmatprep.mubr.msk.bf16.mxu1 %vm1281_vm1, %v1584_v14 }
 0x36c   : > { %7432 = vmatmul.mubr.msk.bf16.gmra.mrb[68].mxu1 %vm1281_vm1, %v1585_v12 }
 0x36d   : > { %v2220_v24 = vpop.permute.xlu1 %2219  ;;  %7459 = vmatprep.mubr.msk.bf16.mxu1 %vm924_vm0, %v2105_v47 }
 0x36e   : > { %7476 = vmatmul.mubr.msk.bf16.vlgmr.msra.gmra.mrb[96].mxu0 %vm924_vm0, %v2220_v24 }
 0x36f   : > { %7500 = vmatpush3.bf16.msra.mxu0 %v2748_v51 }
 0x370   : > { %7501 = vmatprep.subr.bf16.mxu0 %v2750_v31 }
 0x371   : > { %v2222_v25 = vpop.permute.xlu1 %2221 }
 0x372   : > { %7479 = vmatprep.mubr.msk.bf16.mxu0 %vm924_vm0, %v2222_v25 }
 0x373   : > { %7502 = vmatpush3.bf16.msra.mxu0 %v2750_v31 }
 0x374   : > { %7503 = vmatprep.subr.bf16.mxu0 %v2752_v26  ;;  %7460 = vmatmul.mubr.msk.bf16.vlgmr.msra.gmra.mrb[72].mxu1 %vm924_vm0, %v2107_v10 }
 0x375   : > { %7484 = vmatpush3.bf16.xpose.msra.mxu1 %v2363_v5  ;;  %7463 = vmatprep.mubr.msk.bf16.mxu1 %vm924_vm0, %v2109_v1  ;;  %v2349_v47 = vpop.permute.xlu1 %2348 }
 0x376   : > { %8092 = vmatprep.subr.msk.bf16.mxu1 %vm924_vm0, %v2345_v48  ;;  %7480 = vmatmul.mubr.msk.bf16.gmra.mrb[100].mxu0 %vm924_vm0, %v2224_v55 }
 0x377   : > { %7504 = vmatpush3.bf16.msra.mxu0 %v2752_v26  ;;  %v2372_v26 = vsel %vm924_vm0, %v2349_v47, 0 }
 0x378   : > { %7505 = vmatprep.subr.bf16.mxu0 %v2754_v63 }
 0x379   : > { %v2333_v10 = vpop.permute.xlu1 %2332 }
 0x37b   : > { %7506 = vmatpush3.bf16.msra.mxu0 %v2754_v63  ;;  %v9897_v63 = vpop.permute.xlu0 %2937 }
 0x37c   : > { %7531 = vmatprep.subr.bf16.mxu0 %v9866_v8  ;;  %7464 = vmatmul.mubr.msk.bf16.gmra.mrb[76].mxu1 %vm924_vm0, %v2111_v46  ;;  %v2369_v46 = vsel %vm924_vm0, %v9835_v32, 0 }
 0x37d   : > { %7486 = vmatpush3.bf16.xpose.msra.mxu1 %v2366_v13  ;;  %7491 = vmatprep.mubr.msk.bf16.mxu1 %vm924_vm0, %v2331_v29  ;;  %v2337_v14 = vpop.permute.xlu1 %2336 }
 0x37e   : > { %8093 = vmatprep.subr.msk.bf16.mxu1 %vm924_vm0, %v9835_v32 }
 0x37f   : > { %v9900_v13 = vpop.permute.xlu0 %3026 }
 0x380   : > { %v9874_v55 = vpop.f32.mrb[72].mxu0 }
 0x381   : > { %12224 = vst [vmem:[#allocation61_spill] sm:$0xff] %v9874_v55  ;;  %v9876_v51 = vpop.f32.mrb[73].mxu0  ;;  %v2841_v48 = vpop.permute.xlu1 %2840 }
 0x382   : > { %12225 = vst [vmem:[#allocation62_spill] sm:$0xff] %v9876_v51  ;;  %v9878_v1 = vpop.f32.mrb[74].mxu0 }
 0x383   : > { %12226 = vst [vmem:[#allocation64_spill] sm:$0xff] %v9878_v1  ;;  %v9880_v31 = vpop.f32.mrb[75].mxu0 }
 0x384   : > { %12227 = vst [vmem:[#allocation85_spill] sm:$0xff] %v9880_v31 }
 0x385   : > { %7488 = vmatpush3.bf16.xpose.msra.mxu1 %v2369_v46  ;;  %v2843_v5 = vpop.permute.xlu1 %2842 }
 0x386   : > { %8094 = vmatprep.subr.msk.bf16.mxu1 %vm924_vm0, %v2349_v47 }
 0x389   : > { %v2845_v32 = vpop.permute.xlu1 %2844 }
 0x38a   : > { %v9885_v29 = vpop.f32.mrb[76].mxu0 }
 0x38b   : > { %12228 = vst [vmem:[#allocation86_spill] sm:$0xff] %v9885_v29  ;;  %v9887_v12 = vpop.f32.mrb[77].mxu0 }
 0x38c   : > { %12229 = vst [vmem:[#allocation87_spill] sm:$0xff] %v9887_v12  ;;  %v9889_v24 = vpop.f32.mrb[78].mxu0 }
 0x38d   : > { %12230 = vst [vmem:[#allocation88_spill] sm:$0xff] %v9889_v24  ;;  %v9892_v25 = vpop.f32.mrb[79].mxu0  ;;  %7490 = vmatpush3.bf16.xpose.msra.mxu1 %v2372_v26  ;;  %v2847_v47 = vpop.permute.xlu1 %2846 }
 0x38e   : > { %12231 = vst [vmem:[#allocation89_spill] sm:$0xff] %v9892_v25  ;;  %7515 = vmatprep.subr.bf16.mxu1 %v2841_v48 }
 0x394   : > { %7492 = vmatmul.mubr.msk.bf16.vlgmr.msra.gmra.mrb[80].mxu1 %vm924_vm0, %v2333_v10 }
 0x395   : > { %7495 = vmatprep.mubr.msk.bf16.mxu1 %vm924_vm0, %v9839_v4  ;;  %7516 = vmatpush3.bf16.msra.mxu1 %v2841_v48 }
 0x396   : > { %7517 = vmatprep.subr.bf16.mxu1 %v2843_v5 }
 0x399   : > { %7518 = vmatpush3.bf16.msra.mxu1 %v2843_v5 }
 0x39a   : > { %7519 = vmatprep.subr.bf16.mxu1 %v2845_v32 }
 0x39c   : > { %7496 = vmatmul.mubr.msk.bf16.gmra.mrb[84].mxu1 %vm924_vm0, %v2337_v14 }
 0x39d   : > { %7520 = vmatpush3.bf16.msra.mxu1 %v2845_v32 }
 0x39e   : > { %7521 = vmatprep.subr.bf16.mxu1 %v2847_v47 }
 0x3a1   : > { %7522 = vmatpush3.bf16.msra.mxu1 %v2847_v47 }
 0x3a2   : > { %v9902_v46 = vpop.f32.mrb[56].mxu1  ;;  %7547 = vmatprep.subr.bf16.mxu1 %v9900_v13 }
 0x3a3   : > { %12232 = vst [vmem:[#allocation90_spill] sm:$0xff] %v9902_v46  ;;  %v9905_v4 = vpop.f32.mrb[57].mxu1 }
 0x3a4   : > { %12233 = vst [vmem:[#allocation91_spill] sm:$0xff] %v9905_v4  ;;  %v9907_v10 = vpop.f32.mrb[58].mxu1 }
 0x3a5   : > { %12234 = vst [vmem:[#allocation92_spill] sm:$0xff] %v9907_v10  ;;  %v9909_v48 = vpop.f32.mrb[59].mxu1 }
 0x3a6   : > { %12235 = vst [vmem:[#allocation93_spill] sm:$0xff] %v9909_v48 }
 0x3aa   : > { %v9911_v26 = vpop.f32.mrb[60].mxu1 }
 0x3ab   : > { %12236 = vst [vmem:[#allocation94_spill] sm:$0xff] %v9911_v26  ;;  %v9913_v5 = vpop.f32.mrb[61].mxu1 }
 0x3ac   : > { %12237 = vst [vmem:[#allocation95_spill] sm:$0xff] %v9913_v5  ;;  %v9915_v14 = vpop.f32.mrb[62].mxu1 }
 0x3ad   : > { %12238 = vst [vmem:[#allocation96_spill] sm:$0xff] %v9915_v14  ;;  %v9917_v32 = vpop.f32.mrb[63].mxu1  ;;  %v9938_v14 = vld [vmem:[%s11962_s3 + $0x50] sm:$0xff] }
 0x3ae   : > { %12239 = vst [vmem:[#allocation97_spill] sm:$0xff] %v9917_v32 }
 0x3c1   : > { %v9919_v24 = vpop.f32.mrb[80].mxu0 }
 0x3c2   : > { %12240 = vst [vmem:[#allocation98_spill] sm:$0xff] %v9919_v24  ;;  %v9921_v47 = vpop.f32.mrb[81].mxu0 }
 0x3c3   : > { %12241 = vst [vmem:[#allocation99_spill] sm:$0xff] %v9921_v47  ;;  %v9923_v46 = vpop.f32.mrb[82].mxu0 }
 0x3c4   : > { %12242 = vst [vmem:[#allocation100_spill] sm:$0xff] %v9923_v46  ;;  %v9925_v29 = vpop.f32.mrb[83].mxu0  ;;  %v9943_v46 = vld [vmem:[%s11962_s3 + $0x40] sm:$0xff] }
 0x3c5   : > { %12243 = vst [vmem:[#allocation101_spill] sm:$0xff] %v9925_v29  ;;  %v9956_v29 = vld [vmem:[%s11962_s3 + $0x48] sm:$0xff] }
 0x3c9   : > { %v9927_v4 = vpop.f32.mrb[84].mxu0 }
 0x3ca   : > { %12244 = vst [vmem:[#allocation102_spill] sm:$0xff] %v9927_v4  ;;  %v9929_v10 = vpop.f32.mrb[85].mxu0  ;;  %v9948_v4 = vld [vmem:[%s11962_s3 + $0x58] sm:$0xff] }
 0x3cb   : > { %12245 = vst [vmem:[#allocation103_spill] sm:$0xff] %v9929_v10  ;;  %v9931_v48 = vpop.f32.mrb[86].mxu0 }
 0x3cc   : > { %12246 = vst [vmem:[#allocation104_spill] sm:$0xff] %v9931_v48  ;;  %v9933_v26 = vpop.f32.mrb[87].mxu0 }
 0x3cd   : > { %12247 = vst [vmem:[#allocation105_spill] sm:$0xff] %v9933_v26 }
 0x3e1   : > { %v7445_v24 = vpop.f32.mrb[88].mxu0 }
 0x3e2   : > { %v9951_v48 = vadd.f32 %v7445_v24, %v9938_v14  ;;  %v2069_v26 = vpop.f32.mrb[89].mxu0 }
 0x3e3   : > { %v7446_v10 = vpop.f32.mrb[90].mxu0  ;;  %v9959_v47 = vadd.f32 %v9943_v46, %v2069_v26 }
 0x3e4   : > { %v9962_v32 = vadd.f32 %v7446_v10, %v9948_v4  ;;  %v2072_v5 = vpop.f32.mrb[91].mxu0  ;;  %v2445_v25 = vsel %vm1281_vm1, %v9951_v48, -inf }
 0x3e5   : > { %2446 = vmax.xlane.f32.xlu0 %v2445_v25  ;;  %v9967_v24 = vadd.f32 %v9956_v29, %v2072_v5  ;;  %v2439_v1 = vsel %vm1281_vm1, %v9959_v47, -inf }
 0x3e6   : > { %v2448_v12 = vsel %vm1281_vm1, %v9962_v32, -inf }
 0x3e7   : > { %2449 = vmax.xlane.f32.xlu1 %v2448_v12  ;;  %v2442_v10 = vsel %vm1281_vm1, %v9967_v24, -inf  ;;  %v9986_v12 = vld [vmem:[%s11962_s3 + $0x70] sm:$0xff] }
 0x3e9   : > { %2440 = vmax.xlane.f32.xlu0 %v2439_v1  ;;  %v9991_v1 = vld [vmem:[%s11962_s3 + $0x60] sm:$0xff] }
 0x3eb   : > { %2443 = vmax.xlane.f32.xlu1 %v2442_v10  ;;  %v9996_v10 = vld [vmem:[%s11962_s3 + $0x78] sm:$0xff] }
 0x402   : > { %v9975_v26 = vpop.f32.mrb[64].mxu1 }
 0x403   : > { %12248 = vst [vmem:[#allocation106_spill] sm:$0xff] %v9975_v26  ;;  %v9977_v55 = vpop.f32.mrb[65].mxu1 }
 0x404   : > { %12249 = vst [vmem:[#allocation107_spill] sm:$0xff] %v9977_v55  ;;  %v9979_v25 = vpop.f32.mrb[66].mxu1  ;;  %v10004_v55 = vld [vmem:[%s11962_s3 + $0x68] sm:$0xff] }
 0x405   : > { %12250 = vst [vmem:[#allocation108_spill] sm:$0xff] %v9979_v25  ;;  %v9981_v5 = vpop.f32.mrb[67].mxu1 }
 0x406   : > { %12251 = vst [vmem:[#allocation109_spill] sm:$0xff] %v9981_v5 }
 0x412   : > { %v7449_v31 = vpop.f32.mrb[92].mxu0 }
 0x413   : > { %v9999_v25 = vadd.f32 %v7449_v31, %v9986_v12  ;;  %v2085_v26 = vpop.f32.mrb[93].mxu0 }
 0x414   : > { %v7450_v5 = vpop.f32.mrb[94].mxu0  ;;  %v10007_v51 = vadd.f32 %v9991_v1, %v2085_v26 }
 0x415   : > { %v10010_v44 = vadd.f32 %v7450_v5, %v9996_v10  ;;  %v2088_v56 = vpop.f32.mrb[95].mxu0  ;;  %v2457_v41 = vsel %vm1281_vm1, %v9999_v25, -inf }
 0x416   : > { %2458 = vmax.xlane.f32.xlu0 %v2457_v41  ;;  %v10015_v31 = vadd.f32 %v10004_v55, %v2088_v56  ;;  %v2451_v2 = vsel %vm1281_vm1, %v10007_v51, -inf }
 0x417   : > { %v2460_v40 = vsel %vm1281_vm1, %v10010_v44, -inf }
 0x418   : > { %2461 = vmax.xlane.f32.xlu1 %v2460_v40  ;;  %v2454_v26 = vsel %vm1281_vm1, %v10015_v31, -inf }
 0x41a   : > { %2452 = vmax.xlane.f32.xlu0 %v2451_v2 }
 0x41c   : > { %2455 = vmax.xlane.f32.xlu1 %v2454_v26 }
 0x43f   : > { %v10023_v5 = vpop.f32.mrb[68].mxu1 }
 0x440   : > { %12252 = vst [vmem:[#allocation110_spill] sm:$0xff] %v10023_v5  ;;  %v10025_v6 = vpop.f32.mrb[69].mxu1 }
 0x441   : > { %12253 = vst [vmem:[#allocation111_spill] sm:$0xff] %v10025_v6  ;;  %v10027_v41 = vpop.f32.mrb[70].mxu1  ;;  %v7477_v56 = vpop.f32.mrb[96].mxu0 }
 0x442   : > { %12254 = vst [vmem:[#allocation112_spill] sm:$0xff] %v10027_v41  ;;  %v10030_v28 = vadd.f32 %v7477_v56, %v9938_v14  ;;  %v10032_v7 = vpop.f32.mrb[71].mxu1  ;;  %v2295_v40 = vpop.f32.mrb[97].mxu0 }
 0x443   : > { %12255 = vst [vmem:[#allocation113_spill] sm:$0xff] %v10032_v7  ;;  %v7478_v16 = vpop.f32.mrb[98].mxu0 }
 0x444   : > { %v2298_v15 = vpop.f32.mrb[99].mxu0  ;;  %v2493_v2 = vsel %vm1281_vm1, %v10030_v28, -inf  ;;  %v10067_v35 = vadd.f32 %v7478_v16, %v9948_v4 }
 0x445   : > { %2494 = vmax.xlane.f32.xlu1 %v2493_v2 }
 0x447   : > { %v7461_v26 = vpop.f32.mrb[72].mxu1 }
 0x448   : > { %v10037_v5 = vadd.f32 %v7461_v26, %v9938_v14  ;;  %v2182_v6 = vpop.f32.mrb[73].mxu1  ;;  %v10050_v26 = vadd.f32 %v9956_v29, %v2298_v15 }
 0x449   : > { %v7462_v39 = vpop.f32.mrb[74].mxu1  ;;  %v7481_v41 = vpop.f32.mrb[100].mxu0  ;;  %v10040_v0 = vadd.f32 %v9943_v46, %v2182_v6 }
 0x44a   : > { %v10043_v56 = vadd.f32 %v7462_v39, %v9948_v4  ;;  %v2185_v7 = vpop.f32.mrb[75].mxu1  ;;  %v2311_v18 = vpop.f32.mrb[101].mxu0  ;;  %v2469_v43 = vsel %vm1281_vm1, %v10037_v5, -inf  ;;  %v10057_v39 = vadd.f32 %v9943_v46, %v2295_v40  ;;  %v2490_v15 = vsel %vm1281_vm1, %v10050_v26, -inf }
 0x44b   : > { %2470 = vmax.xlane.f32.xlu0 %v2469_v43  ;;  %v10047_v2 = vpop.f32.mrb[102].mxu0  ;;  %v2463_v17 = vsel %vm1281_vm1, %v10040_v0, -inf  ;;  %v10062_v43 = vadd.f32 %v7481_v41, %v9986_v12  ;;  %v10072_v59 = vadd.f32 %v9991_v1, %v2311_v18  ;;  %v10077_v41 = vadd.f32 %v9956_v29, %v2185_v7 }
 0x44c   : > { %v10052_v45 = vpop.f32.mrb[103].mxu0  ;;  %v2472_v6 = vsel %vm1281_vm1, %v10043_v56, -inf  ;;  %v2487_v40 = vsel %vm1281_vm1, %v10057_v39, -inf }
 0x44d   : > { %2473 = vmax.xlane.f32.xlu1 %v2472_v6 }
 0x44f   : > { %v7465_v62 = vpop.f32.mrb[76].mxu1  ;;  %2464 = vmax.xlane.f32.xlu0 %v2463_v17  ;;  %v2505_v17 = vsel %vm1281_vm1, %v10062_v43, -inf }
 0x450   : > { %v2198_v22 = vpop.f32.mrb[77].mxu1  ;;  %v10087_v18 = vadd.f32 %v7465_v62, %v9986_v12 }
 0x451   : > { %v7466_v52 = vpop.f32.mrb[78].mxu1  ;;  %2491 = vmax.xlane.f32.xlu1 %v2490_v15  ;;  %v2496_v15 = vsel %vm1281_vm1, %v10067_v35, -inf }
 0x452   : > { %v2201_v6 = vpop.f32.mrb[79].mxu1  ;;  %v10082_v16 = vadd.f32 %v7466_v52, %v9996_v10  ;;  %v10097_v52 = vadd.f32 %v9991_v1, %v2198_v22  ;;  %v2936_v22 = vpop.permute.xlu1 %2935 }
 0x453   : > { %2488 = vmax.xlane.f32.xlu0 %v2487_v40  ;;  %v2499_v40 = vsel %vm1281_vm1, %v10072_v59, -inf  ;;  %v10092_v7 = vadd.f32 %v10004_v55, %v2201_v6 }
 0x455   : > { %2506 = vmax.xlane.f32.xlu1 %v2505_v17  ;;  %v2466_v17 = vsel %vm1281_vm1, %v10077_v41, -inf  ;;  %v2478_v62 = vsel %vm1281_vm1, %v10092_v7, -inf }
 0x457   : > { %2497 = vmax.xlane.f32.xlu0 %v2496_v15  ;;  %v2484_v15 = vsel %vm1281_vm1, %v10082_v16, -inf }
 0x459   : > { %2500 = vmax.xlane.f32.xlu1 %v2499_v40  ;;  %v2481_v40 = vsel %vm1281_vm1, %v10087_v18, -inf }
 0x45b   : > { %2467 = vmax.xlane.f32.xlu0 %v2466_v17  ;;  %v2475_v17 = vsel %vm1281_vm1, %v10097_v52, -inf }
 0x45d   : > { %2485 = vmax.xlane.f32.xlu1 %v2484_v15 }
 0x45f   : > { %2482 = vmax.xlane.f32.xlu0 %v2481_v40 }
 0x461   : > { %2479 = vmax.xlane.f32.xlu1 %v2478_v62 }
 0x463   : > { %2476 = vmax.xlane.f32.xlu0 %v2475_v17 }
 0x467   : > { %v7493_v6 = vpop.f32.mrb[80].mxu1 }
 0x468   : > { %v10106_v50 = vadd.f32 %v7493_v6, %v9938_v14  ;;  %v2408_v15 = vpop.f32.mrb[81].mxu1  ;;  %v2940_v6 = vpop.permute.xlu1 %2939 }
 0x469   : > { %v7494_v57 = vpop.f32.mrb[82].mxu1  ;;  %v10109_v33 = vadd.f32 %v9943_v46, %v2408_v15 }
 0x46a   : > { %v2411_v38 = vpop.f32.mrb[83].mxu1  ;;  %v2517_v40 = vsel %vm1281_vm1, %v10106_v50, -inf  ;;  %v10114_v62 = vadd.f32 %v7494_v57, %v9948_v4 }
 0x46b   : > { %2518 = vmax.xlane.f32.xlu1 %v2517_v40  ;;  %v2511_v17 = vsel %vm1281_vm1, %v10109_v33, -inf }
 0x46c   : > { %v2520_v49 = vsel %vm1281_vm1, %v10114_v62, -inf }
 0x46f   : > { %2512 = vmax.xlane.f32.xlu1 %v2511_v17  ;;  %v7497_v14 = vpop.f32.mrb[84].mxu1 }
 0x470   : > { %v2424_v27 = vpop.f32.mrb[85].mxu1  ;;  %v10119_v61 = vadd.f32 %v7497_v14, %v9986_v12 }
 0x471   : > { %v7498_v11 = vpop.f32.mrb[86].mxu1 }
 0x472   : > { %v2427_v46 = vpop.f32.mrb[87].mxu1  ;;  %v2447_v15 = vpop.xlane.xlu0 %2446  ;;  %v10125_v4 = vadd.f32 %v7498_v11, %v9996_v10  ;;  %v2529_v53 = vsel %vm1281_vm1, %v10119_v61, -inf }
 0x473   : > { %2521 = vmax.xlane.f32.xlu1 %v2520_v49  ;;  %v2537_v17 = vsub.f32 %v9951_v48, %v2447_v15  ;;  %v10135_v11 = vadd.f32 %v10004_v55, %v2427_v46 }
 0x474   : > { %v2450_v40 = vpop.xlane.xlu1 %2449  ;;  %v2532_v48 = vsel %vm1281_vm1, %v10125_v4, -inf }
 0x475   : > { %v2538_v57 = vsub.f32 %v9962_v32, %v2450_v40  ;;  %v2571_v32 = vmul.f32 1.442695, %v2537_v17  ;;  %v10161_v40 = vadd.f32 %v10047_v2, %v9996_v10  ;;  %v10176_v10 = vadd.f32 %v9991_v1, %v2424_v27 }
 0x476   : > { %v2441_v3 = vpop.xlane.xlu0 %2440 }
 0x477   : > { %v2573_v12 = vmul.f32 1.442695, %v2538_v57  ;;  %v2535_v14 = vsub.f32 %v9959_v47, %v2441_v3  ;;  %2530 = vmax.xlane.f32.xlu1 %v2529_v53  ;;  %v2526_v53 = vsel %vm1281_vm1, %v10135_v11, -inf  ;;  %v10166_v57 = vadd.f32 %v10004_v55, %v10052_v45 }
 0x478   : > { %v2444_v23 = vpop.xlane.xlu1 %2443  ;;  %v2523_v55 = vsel %vm1281_vm1, %v10176_v10, -inf }
 0x479   : > { %v2567_v9 = vmul.f32 1.442695, %v2535_v14  ;;  %v2536_v49 = vsub.f32 %v9967_v24, %v2444_v23  ;;  %3028 = vrot.lane.b32.xlu0 %v9241_v54, %s8789_s20  ;;  %8276 = vpow2.f32 %v2573_v12  ;;  %v2502_v17 = vsel %vm1281_vm1, %v10166_v57, -inf }
 0x47b   : > { %v2569_v15 = vmul.f32 1.442695, %v2536_v49  ;;  %2533 = vmax.xlane.f32.xlu1 %v2532_v48  ;;  %8278 = vpow2.f32 %v2567_v9 }
 0x47d   : > { %8280 = vpow2.f32 %v2569_v15 }
 0x47e   : > { %8282 = vpow2.f32 %v2571_v32 }
 0x47f   : > { %2527 = vmax.xlane.f32.xlu1 %v2526_v53 }
 0x483   : > { %v10141_v3 = vpop.eup %8276 }
 0x485   : > { %v10143_v23 = vpop.eup %8278 }
 0x487   : > { %v10145_v47 = vpop.eup %8280 }
 0x488   : > { %v10147_v24 = vpop.eup %8282  ;;  %v2727_v46 = vpack.c.bf16 %v10145_v47, %v10143_v23 }
 0x489   : > { %v2728_v9 = vpack.c.bf16 %v10141_v3, %v10147_v24 }
 0x48a   : > { %7507 = vmatprep.mubr.msk.bf16.mxu0 %vm1281_vm1, %v2727_v46 }
 0x48b   : > { %7508 = vmatmul.mubr.msk.bf16.vlgmr.msra.gmra.mrb[104].mxu0 %vm1281_vm1, %v2728_v9 }
 0x48c   : > { %7532 = vmatpush3.bf16.msra.mxu0 %v9866_v8  ;;  %v2508_v8 = vsel %vm1281_vm1, %v10161_v40, -inf }
 0x48d   : > { %7533 = vmatprep.subr.bf16.mxu0 %v2936_v22 }
 0x490   : > { %7534 = vmatpush3.bf16.msra.mxu0 %v2936_v22  ;;  %3032 = vrot.lane.b32.xlu1 %v9255_v21, %s8789_s20  ;;  %v10171_v22 = vadd.f32 %v9956_v29, %v2411_v38 }
 0x491   : > { %7535 = vmatprep.subr.bf16.mxu0 %v9897_v63 }
 0x494   : > { %7536 = vmatpush3.bf16.msra.mxu0 %v9897_v63  ;;  %v2514_v63 = vsel %vm1281_vm1, %v10171_v22, -inf }
 0x495   : > { %7537 = vmatprep.subr.bf16.mxu0 %v2940_v6 }
 0x498   : > { %7538 = vmatpush3.bf16.msra.mxu0 %v2940_v6  ;;  %2509 = vmax.xlane.f32.xlu0 %v2508_v8 }
 0x49c   : > { %2503 = vmax.xlane.f32.xlu0 %v2502_v17 }
 0x4a0   : > { %2515 = vmax.xlane.f32.xlu0 %v2514_v63 }
 0x4a3   : > { %v2459_v45 = vpop.xlane.xlu0 %2458 }
 0x4a4   : > { %2524 = vmax.xlane.f32.xlu0 %v2523_v55  ;;  %v2541_v29 = vsub.f32 %v9999_v25, %v2459_v45 }
 0x4a5   : > { %v2462_v2 = vpop.xlane.xlu1 %2461 }
 0x4a6   : > { %v2542_v38 = vsub.f32 %v10010_v44, %v2462_v2  ;;  %v2579_v32 = vmul.f32 1.442695, %v2541_v29 }
 0x4a7   : > { %v2453_v6 = vpop.xlane.xlu0 %2452 }
 0x4a8   : > { %v2581_v12 = vmul.f32 1.442695, %v2542_v38  ;;  %v2539_v14 = vsub.f32 %v10007_v51, %v2453_v6 }
 0x4a9   : > { %v2456_v27 = vpop.xlane.xlu1 %2455 }
 0x4aa   : > { %v2575_v1 = vmul.f32 1.442695, %v2539_v14  ;;  %v2540_v49 = vsub.f32 %v10015_v31, %v2456_v27  ;;  %8284 = vpow2.f32 %v2581_v12 }
 0x4ac   : > { %v2577_v48 = vmul.f32 1.442695, %v2540_v49  ;;  %8286 = vpow2.f32 %v2575_v1 }
 0x4ae   : > { %8288 = vpow2.f32 %v2577_v48 }
 0x4af   : > { %8290 = vpow2.f32 %v2579_v32 }
 0x4b4   : > { %v10186_v15 = vpop.eup %8284 }
 0x4b6   : > { %v10188_v53 = vpop.eup %8286 }
 0x4b8   : > { %v10190_v44 = vpop.eup %8288 }
 0x4b9   : > { %v10192_v25 = vpop.eup %8290  ;;  %v2729_v51 = vpack.c.bf16 %v10190_v44, %v10188_v53 }
 0x4ba   : > { %3030 = vrot.lane.b32.xlu0 %v9259_v30, %s8789_s20  ;;  %v2730_v31 = vpack.c.bf16 %v10186_v15, %v10192_v25 }
 0x4bb   : > { %7511 = vmatprep.mubr.msk.bf16.mxu0 %vm1281_vm1, %v2729_v51 }
 0x4bc   : > { %7512 = vmatmul.mubr.msk.bf16.gmra.mrb[108].mxu0 %vm1281_vm1, %v2730_v31 }
 0x4d2   : > { %v2495_v46 = vpop.xlane.xlu1 %2494 }
 0x4d3   : > { %v2553_v9 = vsub.f32 %v10030_v28, %v2495_v46 }
 0x4d5   : > { %v2603_v45 = vmul.f32 1.442695, %v2553_v9 }
 0x4d8   : > { %v2471_v8 = vpop.xlane.xlu0 %2470 }
 0x4d9   : > { %v2545_v17 = vsub.f32 %v10037_v5, %v2471_v8 }
 0x4da   : > { %v2474_v63 = vpop.xlane.xlu1 %2473 }
 0x4db   : > { %v2587_v55 = vmul.f32 1.442695, %v2545_v17  ;;  %v2546_v49 = vsub.f32 %v10043_v56, %v2474_v63 }
 0x4dc   : > { %v2465_v2 = vpop.xlane.xlu0 %2464 }
 0x4dd   : > { %8292 = vpow2.f32 %v2587_v55  ;;  %v2543_v38 = vsub.f32 %v10040_v0, %v2465_v2  ;;  %v2589_v31 = vmul.f32 1.442695, %v2546_v49 }
 0x4de   : > { %v2492_v29 = vpop.xlane.xlu1 %2491  ;;  %8294 = vpow2.f32 %v2603_v45 }
 0x4df   : > { %v2583_v6 = vmul.f32 1.442695, %v2543_v38  ;;  %v2552_v12 = vsub.f32 %v10050_v26, %v2492_v29 }
 0x4e0   : > { %v2489_v14 = vpop.xlane.xlu0 %2488 }
 0x4e1   : > { %v2601_v27 = vmul.f32 1.442695, %v2552_v12  ;;  %v2551_v1 = vsub.f32 %v10057_v39, %v2489_v14  ;;  %8296 = vpow2.f32 %v2583_v6 }
 0x4e2   : > { %v2507_v28 = vpop.xlane.xlu1 %2506 }
 0x4e3   : > { %v2599_v5 = vmul.f32 1.442695, %v2551_v1  ;;  %8298 = vpow2.f32 %v2601_v27  ;;  %v2557_v56 = vsub.f32 %v10062_v43, %v2507_v28 }
 0x4e4   : > { %v2498_v32 = vpop.xlane.xlu0 %2497 }
 0x4e5   : > { %8300 = vpow2.f32 %v2599_v5  ;;  %v2554_v48 = vsub.f32 %v10067_v35, %v2498_v32  ;;  %v2611_v6 = vmul.f32 1.442695, %v2557_v56 }
 0x4e6   : > { %v2501_v0 = vpop.xlane.xlu1 %2500 }
 0x4e7   : > { %v8293_v51 = vpop.eup %8292  ;;  %v2605_v46 = vmul.f32 1.442695, %v2554_v48  ;;  %v2555_v32 = vsub.f32 %v10072_v59, %v2501_v0 }
 0x4e8   : > { %v2468_v9 = vpop.xlane.xlu0 %2467  ;;  %v2661_v26 = vsel %vm1281_vm1, %v8293_v51, 0.0  ;;  %v8295_v8 = vpop.eup %8294 }
 0x4e9   : > { %8302 = vpow2.f32 %v2605_v46  ;;  %v2544_v39 = vsub.f32 %v10077_v41, %v2468_v9  ;;  %2662 = vadd.xlane.f32.xlu0 %v2661_v26  ;;  %v2685_v55 = vsel %vm1281_vm1, %v8295_v8, 0.0  ;;  %v2607_v26 = vmul.f32 1.442695, %v2555_v32 }
 0x4ea   : > { %v2486_v17 = vpop.xlane.xlu1 %2485  ;;  %8304 = vpow2.f32 %v2589_v31 }
 0x4eb   : > { %v2585_v63 = vmul.f32 1.442695, %v2544_v39  ;;  %v2550_v45 = vsub.f32 %v10082_v16, %v2486_v17  ;;  %v8297_v2 = vpop.eup %8296 }
 0x4ec   : > { %v2483_v35 = vpop.xlane.xlu0 %2482  ;;  %v2655_v28 = vsel %vm1281_vm1, %v8297_v2, 0.0 }
 0x4ed   : > { %8306 = vpow2.f32 %v2585_v63  ;;  %v2549_v38 = vsub.f32 %v10087_v18, %v2483_v35  ;;  %2686 = vadd.xlane.f32.xlu0 %v2685_v55  ;;  %v8299_v29 = vpop.eup %8298  ;;  %v2597_v14 = vmul.f32 1.442695, %v2550_v45 }
 0x4ee   : > { %v2480_v12 = vpop.xlane.xlu1 %2479 }
 0x4ef   : > { %v8301_v41 = vpop.eup %8300  ;;  %v2595_v27 = vmul.f32 1.442695, %v2549_v38  ;;  %v2548_v43 = vsub.f32 %v10092_v7, %v2480_v12 }
 0x4f0   : > { %v2477_v1 = vpop.xlane.xlu0 %2476  ;;  %v2735_v16 = vpack.c.bf16 %v8299_v29, %v8301_v41  ;;  %v2679_v7 = vsel %vm1281_vm1, %v8301_v41, 0.0 }
 0x4f1   : > { %8308 = vpow2.f32 %v2595_v27  ;;  %v2593_v49 = vmul.f32 1.442695, %v2548_v43  ;;  %v2547_v5 = vsub.f32 %v10097_v52, %v2477_v1  ;;  %2656 = vadd.xlane.f32.xlu0 %v2655_v28 }
 0x4f2   : > { %8310 = vpow2.f32 %v2611_v6  ;;  %7539 = vmatprep.mubr.msk.bf16.mxu0 %vm1281_vm1, %v2735_v16 }
 0x4f3   : > { %v8303_v18 = vpop.eup %8302  ;;  %8312 = vpow2.f32 %v2597_v14  ;;  %v2591_v48 = vmul.f32 1.442695, %v2547_v5 }
 0x4f4   : > { %v2736_v31 = vpack.c.bf16 %v8303_v18, %v8295_v8  ;;  %8314 = vpow2.f32 %v2593_v49  ;;  %v2688_v46 = vsel %vm1281_vm1, %v8303_v18, 0.0  ;;  %v8305_v9 = vpop.eup %8304  ;;  %v3029_v35 = vpop.permute.xlu0 %3028 }
 0x4f5   : > { %8316 = vpow2.f32 %v2591_v48  ;;  %2680 = vadd.xlane.f32.xlu0 %v2679_v7  ;;  %2689 = vadd.xlane.f32.xlu1 %v2688_v46  ;;  %v2664_v56 = vsel %vm1281_vm1, %v8305_v9, 0.0  ;;  %v2732_v8 = vpack.c.bf16 %v8305_v9, %v8293_v51 }
 0x4f6   : > { %7540 = vmatmul.mubr.msk.bf16.vlgmr.msra.gmra.mrb[112].mxu0 %vm1281_vm1, %v2736_v31  ;;  %8318 = vpow2.f32 %v2607_v26 }
 0x4f7   : > { %v8307_v52 = vpop.eup %8306 }
 0x4f8   : > { %v2519_v39 = vpop.xlane.xlu1 %2518  ;;  %v2658_v59 = vsel %vm1281_vm1, %v8307_v52, 0.0  ;;  %v2731_v0 = vpack.c.bf16 %v8307_v52, %v8297_v2  ;;  %v2682_v2 = vsel %vm1281_vm1, %v8299_v29, 0.0 }
 0x4f9   : > { %v2561_v17 = vsub.f32 %v10106_v50, %v2519_v39  ;;  %2665 = vadd.xlane.f32.xlu0 %v2664_v56  ;;  %2659 = vadd.xlane.f32.xlu1 %v2658_v59 }
 0x4fa   : > { %7523 = vmatprep.mubr.msk.bf16.mxu1 %vm1281_vm1, %v2731_v0 }
 0x4fb   : > { %v8309_v63 = vpop.eup %8308  ;;  %7524 = vmatmul.mubr.msk.bf16.vlgmr.msra.gmra.mrb[88].mxu1 %vm1281_vm1, %v2732_v8  ;;  %v2619_v55 = vmul.f32 1.442695, %v2561_v17 }
 0x4fc   : > { %v10228_v45 = vpop.eup %8310  ;;  %v2513_v38 = vpop.xlane.xlu1 %2512  ;;  %7548 = vmatpush3.bf16.msra.mxu1 %v9900_v13  ;;  %v2673_v51 = vsel %vm1281_vm1, %v8309_v63, 0.0 }
 0x4fd   : > { %v8313_v50 = vpop.eup %8312  ;;  %v2559_v6 = vsub.f32 %v10109_v33, %v2513_v38  ;;  %7549 = vmatprep.subr.bf16.mxu1 %v3029_v35  ;;  %2683 = vadd.xlane.f32.xlu1 %v2682_v2  ;;  %8320 = vpow2.f32 %v2619_v55  ;;  %v2697_v29 = vsel %vm1281_vm1, %v10228_v45, 0.0 }
 0x4fe   : > { %v10234_v12 = vpop.eup %8314  ;;  %2674 = vadd.xlane.f32.xlu0 %v2673_v51  ;;  %v2676_v43 = vsel %vm1281_vm1, %v8313_v50, 0.0  ;;  %v2734_v1 = vpack.c.bf16 %v8313_v50, %v8309_v63 }
 0x4ff   : > { %v8317_v41 = vpop.eup %8316  ;;  %v2615_v14 = vmul.f32 1.442695, %v2559_v6 }
 0x500   : > { %v2522_v27 = vpop.xlane.xlu1 %2521  ;;  %7550 = vmatpush3.bf16.msra.mxu1 %v3029_v35  ;;  %v2733_v13 = vpack.c.bf16 %v10234_v12, %v8317_v41  ;;  %v2667_v16 = vsel %vm1281_vm1, %v8317_v41, 0.0  ;;  %v8319_v49 = vpop.eup %8318 }
 0x501   : > { %2677 = vadd.xlane.f32.xlu1 %v2676_v43  ;;  %8322 = vpow2.f32 %v2615_v14  ;;  %v2691_v18 = vsel %vm1281_vm1, %v8319_v49, 0.0  ;;  %v2562_v56 = vsub.f32 %v10114_v62, %v2522_v27 }
 0x502   : > { %2698 = vadd.xlane.f32.xlu0 %v2697_v29  ;;  %7527 = vmatprep.mubr.msk.bf16.mxu1 %vm1281_vm1, %v2733_v13 }
 0x503   : > { %7528 = vmatmul.mubr.msk.bf16.gmra.mrb[92].mxu1 %vm1281_vm1, %v2734_v1  ;;  %v2621_v63 = vmul.f32 1.442695, %v2562_v56 }
 0x504   : > { %v2531_v33 = vpop.xlane.xlu1 %2530 }
 0x505   : > { %v2565_v28 = vsub.f32 %v10119_v61, %v2531_v33 }
 0x506   : > { %2668 = vadd.xlane.f32.xlu0 %v2667_v16 }
 0x507   : > { %v2627_v5 = vmul.f32 1.442695, %v2565_v28  ;;  %v10245_v32 = vpop.eup %8320 }
 0x508   : > { %v2709_v48 = vsel %vm1281_vm1, %v10245_v32, 0.0  ;;  %v2534_v9 = vpop.xlane.xlu1 %2533 }
 0x509   : > { %8324 = vpow2.f32 %v2627_v5 }
 0x50a   : > { %2692 = vadd.xlane.f32.xlu0 %v2691_v18 }
 0x50b   : > { %v8323_v31 = vpop.eup %8322 }
 0x50c   : > { %v2703_v7 = vsel %vm1281_vm1, %v8323_v31, 0.0  ;;  %v2528_v0 = vpop.xlane.xlu1 %2527 }
 0x50d   : > { %v2564_v35 = vsub.f32 %v10135_v11, %v2528_v0 }
 0x50e   : > { %2710 = vadd.xlane.f32.xlu0 %v2709_v48 }
 0x50f   : > { %v2625_v51 = vmul.f32 1.442695, %v2564_v35 }
 0x512   : > { %2704 = vadd.xlane.f32.xlu0 %v2703_v7  ;;  %v8205_v7 = vld [vmem:[%s11963_s4 + $0x18] sm:$0xff]  }
 0x513   : > { %v10250_v61 = vpop.eup %8324 }
 0x514   : > { %v2721_v46 = vsel %vm1281_vm1, %v10250_v61, 0.0 }
 0x516   : > { %2722 = vadd.xlane.f32.xlu0 %v2721_v46  ;;  %v12257_v46 = vld [vmem:[#allocation5_spill] sm:$0xff] }
 0x525   : > { %v2510_v52 = vpop.xlane.xlu0 %2509 }
 0x526   : > { %v2558_v26 = vsub.f32 %v10161_v40, %v2510_v52  ;;  %v2566_v40 = vsub.f32 %v10125_v4, %v2534_v9  ;;  %v2670_v4 = vsel %vm1281_vm1, %v10234_v12, 0.0  ;;  %v12258_v9 = vld [vmem:[#allocation9_spill] sm:$0xff]  ;;  %v12259_v52 = vld [vmem:[#allocation6_spill] sm:$0xff] }
 0x528   : > { %v2613_v39 = vmul.f32 1.442695, %v2558_v26 }
 0x529   : > { %v2504_v59 = vpop.xlane.xlu0 %2503 }
 0x52a   : > { %8326 = vpow2.f32 %v2613_v39  ;;  %v2556_v8 = vsub.f32 %v10166_v57, %v2504_v59  ;;  %v2629_v57 = vmul.f32 1.442695, %v2566_v40  ;;  %v12260_v59 = vld [vmem:[#allocation8_spill] sm:$0xff] }
 0x52c   : > { %v2609_v17 = vmul.f32 1.442695, %v2556_v8  ;;  %v12261_v8 = vld [vmem:[#allocation15_spill] sm:$0xff] }
 0x52d   : > { %v2516_v55 = vpop.xlane.xlu0 %2515 }
 0x52e   : > { %8328 = vpow2.f32 %v2609_v17  ;;  %v2560_v38 = vsub.f32 %v10171_v22, %v2516_v55  ;;  %v3033_v22 = vpop.permute.xlu1 %3032  ;;  %v12262_v17 = vld [vmem:[#allocation17_spill] sm:$0xff] }
 0x52f   : > { %8330 = vpow2.f32 %v2621_v63 }
 0x530   : > { %v2617_v2 = vmul.f32 1.442695, %v2560_v38  ;;  %v12263_v38 = vld [vmem:[#allocation43_spill] sm:$0xff] }
 0x531   : > { %v2525_v50 = vpop.xlane.xlu0 %2524 }
 0x532   : > { %8332 = vpow2.f32 %v2617_v2  ;;  %v2563_v62 = vsub.f32 %v10176_v10, %v2525_v50  ;;  %v12264_v50 = vld [vmem:[#allocation47_spill] sm:$0xff] }
 0x533   : > { %8334 = vpow2.f32 %v2625_v51 }
 0x534   : > { %v8327_v6 = vpop.eup %8326  ;;  %v2623_v41 = vmul.f32 1.442695, %v2563_v62 }
 0x535   : > { %v3031_v14 = vpop.permute.xlu0 %3030  ;;  %v2700_v11 = vsel %vm1281_vm1, %v8327_v6, 0.0  ;;  %v2738_v10 = vpack.c.bf16 %v8327_v6, %v10228_v45 }
 0x536   : > { %8336 = vpow2.f32 %v2623_v41  ;;  %2701 = vadd.xlane.f32.xlu1 %v2700_v11  ;;  %7551 = vmatprep.subr.bf16.mxu1 %v3031_v14  ;;  %v12265_v41 = vld [vmem:[#allocation11_spill] sm:$0xff] }
 0x537   : > { %7552 = vmatpush3.bf16.msra.mxu1 %v3031_v14  ;;  %8338 = vpow2.f32 %v2629_v57  ;;  %v12266_v14 = vld [vmem:[#allocation13_spill] sm:$0xff] }
 0x538   : > { %v8329_v27 = vpop.eup %8328  ;;  %7553 = vmatprep.subr.bf16.mxu1 %v3033_v22 }
 0x539   : > { %v2737_v43 = vpack.c.bf16 %v8329_v27, %v8319_v49  ;;  %v8331_v13 = vpop.eup %8330  ;;  %v2694_v1 = vsel %vm1281_vm1, %v8329_v27, 0.0  ;;  %v12268_v27 = vld [vmem:[#allocation10_spill] sm:$0xff] }
 0x53a   : > { %2671 = vadd.xlane.f32.xlu1 %v2670_v4  ;;  %v2740_v28 = vpack.c.bf16 %v8331_v13, %v10245_v32  ;;  %v2712_v45 = vsel %vm1281_vm1, %v8331_v13, 0.0  ;;  %v12270_v13 = vld [vmem:[#allocation23_spill] sm:$0xff] }
 0x53b   : > { %7543 = vmatprep.mubr.msk.bf16.mxu0 %vm1281_vm1, %v2737_v43  ;;  %7554 = vmatpush3.bf16.msra.mxu1 %v3033_v22  ;;  %v12267_v22 = vld [vmem:[#allocation14_spill] sm:$0xff]  ;;  %v12269_v43 = vld [vmem:[#allocation12_spill] sm:$0xff] }
 0x53c   : > { %v8333_v29 = vpop.eup %8332  ;;  %7544 = vmatmul.mubr.msk.bf16.gmra.mrb[116].mxu0 %vm1281_vm1, %v2738_v10 }
 0x53d   : > { %v2739_v33 = vpack.c.bf16 %v8333_v29, %v8323_v31  ;;  %v8335_v16 = vpop.eup %8334  ;;  %v2706_v48 = vsel %vm1281_vm1, %v8333_v29, 0.0  ;;  %v8204_v31 = vld [vmem:[%s11963_s4 + $0x10] sm:$0xff]   ;;  %v12271_v29 = vld [vmem:[#allocation29_spill] sm:$0xff] }
 0x53e   : > { %2695 = vadd.xlane.f32.xlu1 %v2694_v1  ;;  %7963 = vmatprep.subr.bf16.mxu1 %v8204_v31  ;;  %v2718_v35 = vsel %vm1281_vm1, %v8335_v16, 0.0 }
 0x53f   : > { %7555 = vmatprep.mubr.msk.bf16.mxu1 %vm1281_vm1, %v2739_v33  ;;  %7563 = vmatprep.subr.bf16.mxu0 %v8204_v31 }
 0x540   : > { %v8337_v12 = vpop.eup %8336  ;;  %7556 = vmatmul.mubr.msk.bf16.vlgmr.msra.gmra.mrb[96].mxu1 %vm1281_vm1, %v2740_v28  ;;  %7564 = vmatpush3.bf16.msra.mxu0 %v8204_v31  ;;  %v2631_v28 = vsel %vm1281_vm1, %v10143_v23, 0.0 }
 0x541   : > { %v2715_v49 = vsel %vm1281_vm1, %v8337_v12, 0.0  ;;  %v2741_v5 = vpack.c.bf16 %v8335_v16, %v8337_v12  ;;  %v8339_v18 = vpop.eup %8338  ;;  %7965 = vmatpush3.bf16.msra.mxu1 %v8204_v31  ;;  %7565 = vmatprep.subr.bf16.mxu0 %v8205_v7  ;;  %v12272_v16 = vld [vmem:[#allocation16_spill] sm:$0xff]  ;;  %v2637_v12 = vsel %vm1281_vm1, %v10147_v24, 0.0  ;;  %v2643_v31 = vsel %vm1281_vm1, %v10188_v53, 0.0 }
 0x542   : > { %2713 = vadd.xlane.f32.xlu1 %v2712_v45  ;;  %2716 = vadd.xlane.f32.xlu0 %v2715_v49  ;;  %v2742_v32 = vpack.c.bf16 %v8339_v18, %v10250_v61  ;;  %v12256_v61 = vld [vmem:[#allocation7_spill] sm:$0xff]  ;;  %v2724_v63 = vsel %vm1281_vm1, %v8339_v18, 0.0  ;;  %v2640_v18 = vsel %vm1281_vm1, %v10141_v3, 0.0  ;;  %v12275_v24 = vld [vmem:[#allocation44_spill] sm:$0xff] }
 0x543   : > { %7559 = vmatprep.mubr.msk.bf16.mxu1 %vm1281_vm1, %v2741_v5  ;;  %7964 = vmatprep.subr.bf16.mxu1 %v8205_v7  ;;  %v12273_v5 = vld [vmem:[#allocation18_spill] sm:$0xff] }
 0x544   : > { %7566 = vmatpush3.bf16.msra.mxu0 %v8205_v7 }
 0x545   : > { %7966 = vmatpush3.bf16.msra.mxu1 %v8205_v7  ;;  %v2649_v7 = vsel %vm1281_vm1, %v10192_v25, 0.0  ;;  %v12278_v25 = vld [vmem:[#allocation48_spill] sm:$0xff] }
 0x546   : > { %2707 = vadd.xlane.f32.xlu1 %v2706_v48  ;;  %v12274_v48 = vld [vmem:[#allocation42_spill] sm:$0xff] }
 0x548   : > { %7560 = vmatmul.mubr.msk.bf16.gmra.mrb[100].mxu1 %vm1281_vm1, %v2742_v32 }
 0x557   : > { %3660 = vrot.lane.b32.xlu1 %v12256_v61, %s8790_s14 }
 0x558   : > { %3658 = vrot.lane.b32.xlu0 %v12257_v46, %s8790_s14 }
 0x55b   : > { %3662 = vrot.lane.b32.xlu1 %v12258_v9, %s8790_s14 }
 0x55c   : > { %3650 = vrot.lane.b32.xlu0 %v12259_v52, %s8790_s14 }
 0x55e   : > { %v10291_v26 = vpop.f32.mrb[104].mxu0 }
 0x55f   : > { %v10293_v39 = vpop.f32.mrb[105].mxu0 }
 0x560   : > { %v10295_v56 = vpop.f32.mrb[106].mxu0  ;;  %3652 = vrot.lane.b32.xlu0 %v12260_v59, %s8790_s14 }
 0x561   : > { %v10299_v0 = vpop.f32.mrb[107].mxu0 }
 0x564   : > { %3767 = vrot.lane.b32.xlu0 %v12261_v8, %s8790_s14 }
 0x568   : > { %3769 = vrot.lane.b32.xlu0 %v12262_v17, %s8790_s14 }
 0x56c   : > { %3755 = vrot.lane.b32.xlu0 %v9087_v19, %s8790_s14 }
 0x570   : > { %3757 = vrot.lane.b32.xlu0 %v9105_v34, %s8790_s14 }
 0x574   : > { %3872 = vrot.lane.b32.xlu0 %v9236_v42, %s8790_s14 }
 0x576   : > { %v2663_v55 = vpop.xlane.xlu0 %2662 }
 0x578   : > { %3874 = vrot.lane.b32.xlu0 %v9261_v36, %s8790_s14 }
 0x57a   : > { %v2687_v40 = vpop.xlane.xlu0 %2686 }
 0x57b   : > { %8340 = vrcp.f32 %v2687_v40 }
 0x57c   : > { %3860 = vrot.lane.b32.xlu0 %v9173_v60, %s8790_s14  ;;  %v12282_v60 = vld [vmem:[#allocation49_spill] sm:$0xff] }
 0x57e   : > { %v2657_v57 = vpop.xlane.xlu0 %2656 }
 0x57f   : > { %2725 = vadd.xlane.f32.xlu1 %v2724_v63 }
 0x580   : > { %3862 = vrot.lane.b32.xlu0 %v12191_v58, %s8790_s14  ;;  %v12284_v58 = vld [vmem:[#allocation75_spill] sm:$0xff] }
 0x582   : > { %v2681_v11 = vpop.xlane.xlu0 %2680  ;;  %v2690_v1 = vpop.xlane.xlu1 %2689 }
 0x583   : > { %2719 = vadd.xlane.f32.xlu1 %v2718_v35  ;;  %8342 = vrcp.f32 %v2690_v1  ;;  %v12276_v35 = vld [vmem:[#allocation36_spill] sm:$0xff]  ;;  %v12279_v1 = vld [vmem:[#allocation69_spill] sm:$0xff] }
 0x584   : > { %3977 = vrot.lane.b32.xlu0 %v9312_v20, %s8790_s14  ;;  %8344 = vrcp.f32 %v2681_v11 }
 0x586   : > { %v2666_v4 = vpop.xlane.xlu0 %2665  ;;  %v2660_v45 = vpop.xlane.xlu1 %2659 }
 0x588   : > { %3866 = vrot.lane.b32.xlu0 %v9263_v37, %s8790_s14 }
 0x58a   : > { %v2684_v23 = vpop.xlane.xlu1 %2683 }
 0x58b   : > { %v2675_v10 = vpop.xlane.xlu0 %2674  ;;  %8346 = vrcp.f32 %v2684_v23  ;;  %v12280_v23 = vld [vmem:[#allocation45_spill] sm:$0xff] }
 0x58c   : > { %3965 = vrot.lane.b32.xlu0 %v12263_v38, %s8790_s14  ;;  %8348 = vrcp.f32 %v2663_v55 }
 0x58d   : > { %8350 = vrcp.f32 %v2657_v57 }
 0x58e   : > { %v2678_v63 = vpop.xlane.xlu1 %2677  ;;  %8352 = vrcp.f32 %v2666_v4 }
 0x58f   : > { %v10325_v2 = vpop.f32.mrb[108].mxu0  ;;  %v10349_v33 = vpop.xlane.xlu0 %2698  ;;  %8354 = vrcp.f32 %v2660_v45 }
 0x590   : > { %v10327_v51 = vpop.f32.mrb[109].mxu0  ;;  %3969 = vrot.lane.b32.xlu0 %v12264_v50, %s8790_s14  ;;  %8356 = vrcp.f32 %v2675_v10  ;;  %v12283_v10 = vld [vmem:[#allocation70_spill] sm:$0xff] }
 0x591   : > { %v10331_v62 = vpop.f32.mrb[110].mxu0  ;;  %8358 = vrcp.f32 %v2678_v63 }
 0x592   : > { %v10333_v6 = vpop.f32.mrb[111].mxu0 }
 0x593   : > { %v2669_v49 = vpop.xlane.xlu0 %2668 }
 0x594   : > { %3664 = vrot.lane.b32.xlu1 %v12265_v41, %s8790_s14  ;;  %8360 = vrcp.f32 %v2669_v49 }
 0x597   : > { %v10363_v32 = vpop.xlane.xlu0 %2692 }
 0x598   : > { %3763 = vrot.lane.b32.xlu1 %v12266_v14, %s8790_s14 }
 0x59b   : > { %v10371_v3 = vpop.xlane.xlu0 %2710 }
 0x59c   : > { %3765 = vrot.lane.b32.xlu1 %v12267_v22, %s8790_s14 }
 0x59f   : > { %v10381_v40 = vpop.xlane.xlu0 %2704 }
 0x5a0   : > { %3654 = vrot.lane.b32.xlu1 %v12268_v27, %s8790_s14 }
 0x5a3   : > { %v10391_v45 = vpop.xlane.xlu0 %2722 }
 0x5a4   : > { %3656 = vrot.lane.b32.xlu1 %v12269_v43, %s8790_s14 }
 0x5a8   : > { %3868 = vrot.lane.b32.xlu1 %v12270_v13, %s8790_s14 }
 0x5ac   : > { %3870 = vrot.lane.b32.xlu1 %v12271_v29, %s8790_s14 }
 0x5af   : > { %2632 = vadd.xlane.f32.xlu0 %v2631_v28  ;;  %v12277_v28 = vld [vmem:[#allocation66_spill] sm:$0xff] }
 0x5b0   : > { %3759 = vrot.lane.b32.xlu1 %v12272_v16, %s8790_s14  ;;  %v1474_v53 = vsel %vm1281_vm1, %v12277_v28, 0.0 }
 0x5b3   : > { %2638 = vadd.xlane.f32.xlu0 %v2637_v12 }
 0x5b4   : > { %3761 = vrot.lane.b32.xlu1 %v12273_v5, %s8790_s14 }
 0x5b7   : > { %2641 = vadd.xlane.f32.xlu0 %v2640_v18  ;;  %v1480_v18 = vsel %vm1281_vm1, %v12279_v1, 0.0 }
 0x5b8   : > { %3973 = vrot.lane.b32.xlu1 %v12274_v48, %s8790_s14 }
 0x5bb   : > { %2644 = vadd.xlane.f32.xlu0 %v2643_v31  ;;  %v8341_v31 = vpop.eup %8340 }
 0x5bc   : > { %3975 = vrot.lane.b32.xlu1 %v12275_v24, %s8790_s14  ;;  %v8343_v28 = vpop.eup %8342 }
 0x5bd   : > { %v8345_v57 = vpop.eup %8344 }
 0x5be   : > { %v8347_v37 = vpop.eup %8346 }
 0x5bf   : > { %2650 = vadd.xlane.f32.xlu0 %v2649_v7 }
 0x5c0   : > { %3864 = vrot.lane.b32.xlu1 %v12276_v35, %s8790_s14  ;;  %v1492_v35 = vsel %vm1281_vm1, %v12283_v10, 0.0  ;;  %v1498_v10 = vsel %vm1281_vm1, %v12284_v58, 0.0 }
 0x5c3   : > { %v10377_v12 = vpop.xlane.xlu1 %2701  ;;  %1475 = vadd.xlane.f32.xlu0 %v1474_v53  ;;  %v12281_v53 = vld [vmem:[#allocation72_spill] sm:$0xff] }
 0x5c4   : > { %3979 = vrot.lane.b32.xlu1 %v12278_v25, %s8790_s14  ;;  %v1486_v50 = vsel %vm1281_vm1, %v12281_v53, 0.0 }
 0x5c7   : > { %v2672_v11 = vpop.xlane.xlu1 %2671  ;;  %1481 = vadd.xlane.f32.xlu0 %v1480_v18 }
 0x5c8   : > { %3967 = vrot.lane.b32.xlu1 %v12280_v23, %s8790_s14  ;;  %v8349_v23 = vpop.eup %8348  ;;  %8362 = vrcp.f32 %v2672_v11 }
 0x5c9   : > { %v7541_v7 = vpop.f32.mrb[112].mxu0  ;;  %8364 = vrcp.f32 %v10349_v33 }
 0x5ca   : > { %v2991_v55 = vpop.f32.mrb[113].mxu0  ;;  %v10393_v1 = vmul.f32 %v8341_v31, %v7541_v7  ;;  %v8351_v31 = vpop.eup %8350  ;;  %8366 = vrcp.f32 %v10363_v32 }
 0x5cb   : > { %v7542_v4 = vpop.f32.mrb[114].mxu0  ;;  %v10389_v38 = vpop.xlane.xlu1 %2695  ;;  %1487 = vadd.xlane.f32.xlu0 %v1486_v50  ;;  %v3163_v36 = vmul.f32 %v8345_v57, %v2991_v55  ;;  %8368 = vrcp.f32 %v10377_v12 }
 0x5cc   : > { %v10395_v18 = vmul.f32 %v8343_v28, %v7542_v4  ;;  %v2994_v20 = vpop.f32.mrb[115].mxu0  ;;  %3971 = vrot.lane.b32.xlu1 %v12282_v60, %s8790_s14  ;;  %v8353_v60 = vpop.eup %8352  ;;  %8370 = vrcp.f32 %v10389_v38  ;;  %v10486_v38 = vld [vmem:[%s11963_s4] sm:$0xff]  }
 0x5cd   : > { %v3164_v53 = vmul.f32 %v8347_v37, %v2994_v20  ;;  %v8355_v20 = vpop.eup %8354  ;;  %8372 = vrcp.f32 %v10371_v3  ;;  %7599 = vmatprep.subr.bf16.mxu0 %v10486_v38 }
 0x5ce   : > { %v3188_v50 = vpack.c.bf16 %v10395_v18, %v10393_v1  ;;  %v7525_v25 = vpop.f32.mrb[88].mxu1  ;;  %8374 = vrcp.f32 %v10381_v40 }
 0x5cf   : > { %v3187_v7 = vpack.c.bf16 %v3164_v53, %v3163_v36  ;;  %v2898_v28 = vpop.f32.mrb[89].mxu1  ;;  %v10403_v4 = vpop.xlane.xlu1 %2713  ;;  %1493 = vadd.xlane.f32.xlu0 %v1492_v35  ;;  %v3157_v49 = vmul.f32 %v8349_v23, %v7525_v25  ;;  %v12285_v25 = vld [vmem:[#allocation77_spill] sm:$0xff] }
 0x5d0   : > { %v10405_v63 = vpop.xlane.xlu0 %2716  ;;  %v7526_v37 = vpop.f32.mrb[90].mxu1  ;;  %v3155_v1 = vmul.f32 %v8351_v31, %v2898_v28  ;;  %8376 = vrcp.f32 %v10403_v4 }
 0x5d1   : > { %v3158_v55 = vmul.f32 %v8353_v60, %v7526_v37  ;;  %v2901_v57 = vpop.f32.mrb[91].mxu1  ;;  %v8357_v35 = vpop.eup %8356  ;;  %v1504_v60 = vsel %vm1281_vm1, %v12285_v25, 0.0 }
 0x5d2   : > { %v3156_v18 = vmul.f32 %v8355_v20, %v2901_v57  ;;  %v8359_v23 = vpop.eup %8358 }
 0x5d3   : > { %v3184_v24 = vpack.c.bf16 %v3158_v55, %v3157_v49  ;;  %v10409_v11 = vpop.xlane.xlu1 %2707  ;;  %1499 = vadd.xlane.f32.xlu0 %v1498_v10  ;;  %v8361_v37 = vpop.eup %8360 }
 0x5d4   : > { %v3183_v36 = vpack.c.bf16 %v3156_v18, %v3155_v1  ;;  %v3659_v53 = vpop.permute.xlu0 %3658  ;;  %v8363_v49 = vpop.eup %8362  ;;  %8378 = vrcp.f32 %v10409_v11 }
 0x5d5   : > { %8095 = vmatprep.subr.msk.bf16.mxu1 %vm924_vm0, %v3659_v53  ;;  %v3679_v58 = vsel %vm924_vm0, %v3659_v53, 0  ;;  %8380 = vrcp.f32 %v10391_v45 }
 0x5d6   : > { %v7529_v16 = vpop.f32.mrb[92].mxu1  ;;  %7575 = vmatprep.mubr.msk.bf16.mxu1 %vm924_vm0, %v3183_v36  ;;  %v12286_v36 = vld [vmem:[#allocation79_spill] sm:$0xff]  ;;  %8382 = vrcp.f32 %v10405_v63 }
 0x5d7   : > { %v2914_v31 = vpop.f32.mrb[93].mxu1  ;;  %v3661_v28 = vpop.permute.xlu1 %3660  ;;  %1505 = vadd.xlane.f32.xlu0 %v1504_v60  ;;  %7576 = vmatmul.mubr.msk.bf16.vlgmr.msra.gmra.mrb[104].mxu1 %vm924_vm0, %v3184_v24  ;;  %v3161_v55 = vmul.f32 %v8357_v35, %v7529_v16  ;;  %v1510_v25 = vsel %vm1281_vm1, %v12286_v36, 0.0  ;;  %v12287_v24 = vld [vmem:[#allocation81_spill] sm:$0xff] }
 0x5d8   : > { %7636 = vmatpush3.bf16.xpose.msra.mxu1 %v3679_v58  ;;  %v7530_v20 = vpop.f32.mrb[94].mxu1  ;;  %v3159_v18 = vmul.f32 %v8361_v37, %v2914_v31  ;;  %v1516_v53 = vsel %vm1281_vm1, %v12287_v24, 0.0  ;;  %v3682_v16 = vsel %vm924_vm0, %v3661_v28, 0  ;;  %v12289_v58 = vld [vmem:[#allocation53_spill] sm:$0xff]  ;;  %v2652_v24 = vsel %vm1281_vm1, %v10186_v15, 0.0 }
 0x5d9   : > { %v3162_v57 = vmul.f32 %v8359_v23, %v7530_v20  ;;  %8096 = vmatprep.subr.msk.bf16.mxu1 %vm924_vm0, %v3661_v28  ;;  %v2917_v1 = vpop.f32.mrb[95].mxu1  ;;  %v12288_v23 = vld [vmem:[#allocation50_spill] sm:$0xff]  ;;  %v1528_v37 = vsel %vm1281_vm1, %v12289_v58, 0.0  ;;  %v10433_v28 = vpop.permute.xlu0 %3650  ;;  %v12290_v20 = vld [vmem:[#allocation56_spill] sm:$0xff]  ;;  %v12297_v58 = vld [vmem:[#allocation67_spill] sm:$0xff] }
 0x5da   : > { %v3160_v10 = vmul.f32 %v8363_v49, %v2917_v1  ;;  %v1522_v31 = vsel %vm1281_vm1, %v12288_v23, 0.0  ;;  %v12291_v49 = vld [vmem:[#allocation84_spill] sm:$0xff]  ;;  %v2634_v1 = vsel %vm1281_vm1, %v10145_v47, 0.0  ;;  %v12294_v47 = vld [vmem:[#allocation57_spill] sm:$0xff]  ;;  %v12296_v23 = vld [vmem:[#allocation54_spill] sm:$0xff] }
 0x5db   : > { %v3186_v42 = vpack.c.bf16 %v3162_v57, %v3161_v55  ;;  %1511 = vadd.xlane.f32.xlu0 %v1510_v25  ;;  %v3663_v35 = vpop.permute.xlu1 %3662  ;;  %v1540_v55 = vsel %vm1281_vm1, %v12291_v49, 0.0  ;;  %v12293_v25 = vld [vmem:[#allocation65_spill] sm:$0xff]  ;;  %v12299_v49 = vld [vmem:[#allocation71_spill] sm:$0xff] }
 0x5dc   : > { %v3185_v60 = vpack.c.bf16 %v3160_v10, %v3159_v18  ;;  %v2646_v10 = vsel %vm1281_vm1, %v10190_v44, 0.0 }
 0x5dd   : > { %v10439_v57 = vpop.permute.xlu0 %3652 }
 0x5de   : > { %7579 = vmatprep.mubr.msk.bf16.mxu1 %vm924_vm0, %v3185_v60  ;;  %v1552_v60 = vsel %vm1281_vm1, %v12293_v25, 0.0 }
 0x5df   : > { %1517 = vadd.xlane.f32.xlu0 %v1516_v53  ;;  %7580 = vmatmul.mubr.msk.bf16.gmra.mrb[108].mxu1 %vm924_vm0, %v3186_v42  ;;  %v3685_v42 = vsel %vm924_vm0, %v3663_v35, 0  ;;  %v1558_v53 = vsel %vm1281_vm1, %v12294_v47, 0.0 }
 0x5e0   : > { %7638 = vmatpush3.bf16.xpose.msra.mxu1 %v3682_v16  ;;  %7583 = vmatprep.mubr.msk.bf16.mxu1 %vm924_vm0, %v3187_v7  ;;  %v1534_v7 = vsel %vm1281_vm1, %v12290_v20, 0.0 }
 0x5e1   : > { %8097 = vmatprep.subr.msk.bf16.mxu1 %vm924_vm0, %v3663_v35  ;;  %v10447_v36 = vpop.permute.xlu0 %3767  ;;  %v12295_v35 = vld [vmem:[#allocation68_spill] sm:$0xff] }
 0x5e2   : > { %v1477_v44 = vsel %vm1281_vm1, %v12295_v35, 0.0 }
 0x5e3   : > { %1523 = vadd.xlane.f32.xlu0 %v1522_v31  ;;  %v1564_v31 = vsel %vm1281_vm1, %v12296_v23, 0.0 }
 0x5e5   : > { %v10455_v16 = vpop.permute.xlu0 %3769 }
 0x5e7   : > { %1529 = vadd.xlane.f32.xlu0 %v1528_v37  ;;  %7584 = vmatmul.mubr.msk.bf16.gmra.mrb[112].mxu1 %vm924_vm0, %v3188_v50  ;;  %v12292_v50 = vld [vmem:[#allocation58_spill] sm:$0xff]  ;;  %v1483_v37 = vsel %vm1281_vm1, %v12297_v58, 0.0 }
 0x5e8   : > { %7640 = vmatpush3.bf16.xpose.msra.mxu1 %v3685_v42  ;;  %v1546_v18 = vsel %vm1281_vm1, %v12292_v50, 0.0  ;;  %v12298_v42 = vld [vmem:[#allocation73_spill] sm:$0xff]  ;;  %v8365_v50 = vpop.eup %8364 }
 0x5e9   : > { %v10463_v15 = vpop.permute.xlu0 %3755  ;;  %v1489_v20 = vsel %vm1281_vm1, %v12298_v42, 0.0  ;;  %v8367_v4 = vpop.eup %8366  ;;  %v12302_v42 = vld [vmem:[#allocation80_spill] sm:$0xff] }
 0x5ea   : > { %v8369_v25 = vpop.eup %8368 }
 0x5eb   : > { %1535 = vadd.xlane.f32.xlu0 %v1534_v7 }
 0x5ed   : > { %v10470_v7 = vpop.permute.xlu0 %3757 }
 0x5ef   : > { %1541 = vadd.xlane.f32.xlu0 %v1540_v55  ;;  %v1495_v55 = vsel %vm1281_vm1, %v12299_v49, 0.0 }
 0x5f0   : > { %2635 = vadd.xlane.f32.xlu1 %v2634_v1  ;;  %v12300_v1 = vld [vmem:[#allocation76_spill] sm:$0xff] }
 0x5f1   : > { %v1501_v33 = vsel %vm1281_vm1, %v12300_v1, 0.0  ;;  %v10481_v12 = vpop.permute.xlu0 %3872 }
 0x5f3   : > { %1547 = vadd.xlane.f32.xlu0 %v1546_v18  ;;  %v12301_v18 = vld [vmem:[#allocation74_spill] sm:$0xff] }
 0x5f4   : > { %2647 = vadd.xlane.f32.xlu1 %v2646_v10  ;;  %v1507_v40 = vsel %vm1281_vm1, %v12301_v18, 0.0 }
 0x5f5   : > { %v10493_v23 = vpop.permute.xlu0 %3874 }
 0x5f7   : > { %1553 = vadd.xlane.f32.xlu0 %v1552_v60 }
 0x5f8   : > { %2653 = vadd.xlane.f32.xlu1 %v2652_v24  ;;  %v8371_v24 = vpop.eup %8370 }
 0x5fb   : > { %1559 = vadd.xlane.f32.xlu0 %v1558_v53 }
 0x5fc   : > { %1478 = vadd.xlane.f32.xlu1 %v1477_v44  ;;  %v8373_v44 = vpop.eup %8372 }
 0x5fd   : > { %v8375_v49 = vpop.eup %8374 }
 0x5fe   : > { %v8377_v63 = vpop.eup %8376 }
 0x5ff   : > { %1565 = vadd.xlane.f32.xlu0 %v1564_v31  ;;  %v8379_v18 = vpop.eup %8378 }
 0x600   : > { %1484 = vadd.xlane.f32.xlu1 %v1483_v37 }
 0x604   : > { %1490 = vadd.xlane.f32.xlu1 %v1489_v20  ;;  %v1513_v20 = vsel %vm1281_vm1, %v12302_v42, 0.0  ;;  %v12306_v42 = vld [vmem:[#allocation51_spill] sm:$0xff] }
 0x608   : > { %1496 = vadd.xlane.f32.xlu1 %v1495_v55 }
 0x60c   : > { %1502 = vadd.xlane.f32.xlu1 %v1501_v33  ;;  %v2726_v32 = vpop.xlane.xlu1 %2725 }
 0x60d   : > { %8384 = vrcp.f32 %v2726_v32 }
 0x60f   : > { %v7545_v3 = vpop.f32.mrb[116].mxu0 }
 0x610   : > { %v3007_v10 = vpop.f32.mrb[117].mxu0  ;;  %1508 = vadd.xlane.f32.xlu1 %v1507_v40  ;;  %v2720_v11 = vpop.xlane.xlu1 %2719  ;;  %v3169_v47 = vmul.f32 %v8365_v50, %v7545_v3  ;;  %v12303_v3 = vld [vmem:[#allocation20_spill] sm:$0xff] }
 0x611   : > { %v7546_v60 = vpop.f32.mrb[118].mxu0  ;;  %v3167_v31 = vmul.f32 %v8367_v4, %v3007_v10  ;;  %8386 = vrcp.f32 %v2720_v11 }
 0x612   : > { %v3170_v53 = vmul.f32 %v8369_v25, %v7546_v60  ;;  %v3010_v35 = vpop.f32.mrb[119].mxu0  ;;  %v12304_v60 = vld [vmem:[#allocation78_spill] sm:$0xff] }
 0x613   : > { %v3168_v58 = vmul.f32 %v8371_v24, %v3010_v35  ;;  %v7557_v37 = vpop.f32.mrb[96].mxu1  ;;  %v1519_v24 = vsel %vm1281_vm1, %v12304_v60, 0.0 }
 0x614   : > { %v3190_v45 = vpack.c.bf16 %v3170_v53, %v3169_v47  ;;  %1514 = vadd.xlane.f32.xlu1 %v1513_v20  ;;  %v3665_v55 = vpop.permute.xlu1 %3664  ;;  %v3084_v1 = vpop.f32.mrb[97].mxu1  ;;  %v3173_v40 = vmul.f32 %v8373_v44, %v7557_v37  ;;  %v1525_v20 = vsel %vm1281_vm1, %v12306_v42, 0.0  ;;  %v12311_v42 = vld [vmem:[#allocation27_spill] sm:$0xff] }
 0x615   : > { %v3189_v33 = vpack.c.bf16 %v3168_v58, %v3167_v31  ;;  %v7558_v50 = vpop.f32.mrb[98].mxu1  ;;  %4374 = vrot.lane.b32.xlu0 %v12303_v3, %s8790_s14  ;;  %8098 = vmatprep.subr.msk.bf16.mxu1 %vm924_vm0, %v3665_v55  ;;  %v3688_v32 = vsel %vm924_vm0, %v3665_v55, 0  ;;  %v3171_v11 = vmul.f32 %v8375_v49, %v3084_v1  ;;  %v12305_v31 = vld [vmem:[#allocation22_spill] sm:$0xff]  ;;  %v10508_v44 = vpop.permute.xlu0 %3860 }
 0x616   : > { %v3174_v4 = vmul.f32 %v8377_v63, %v7558_v50  ;;  %v3087_v10 = vpop.f32.mrb[99].mxu1  ;;  %7642 = vmatpush3.bf16.xpose.msra.mxu1 %v3688_v32  ;;  %v8381_v58 = vpop.eup %8380  ;;  %v12307_v63 = vld [vmem:[#allocation26_spill] sm:$0xff] }
 0x617   : > { %v3172_v25 = vmul.f32 %v8379_v18, %v3087_v10  ;;  %7587 = vmatprep.mubr.msk.bf16.mxu1 %vm924_vm0, %v3189_v33  ;;  %v8383_v49 = vpop.eup %8382  ;;  %v12308_v10 = vld [vmem:[#allocation52_spill] sm:$0xff] }
 0x618   : > { %v3192_v47 = vpack.c.bf16 %v3174_v4, %v3173_v40  ;;  %1520 = vadd.xlane.f32.xlu1 %v1519_v24  ;;  %v3764_v53 = vpop.permute.xlu1 %3763  ;;  %7588 = vmatmul.mubr.msk.bf16.gmra.mrb[116].mxu1 %vm924_vm0, %v3190_v45  ;;  %v8385_v1 = vpop.eup %8384 }
 0x619   : > { %v3191_v35 = vpack.c.bf16 %v3172_v25, %v3171_v11  ;;  %4378 = vrot.lane.b32.xlu0 %v12305_v31, %s8790_s14  ;;  %8099 = vmatprep.subr.msk.bf16.mxu1 %vm924_vm0, %v3764_v53  ;;  %v1531_v11 = vsel %vm1281_vm1, %v12308_v10, 0.0  ;;  %v10517_v25 = vpop.permute.xlu0 %3862 }
 0x61b   : > { %v7561_v37 = vpop.f32.mrb[100].mxu1  ;;  %7591 = vmatprep.mubr.msk.bf16.mxu1 %vm924_vm0, %v3191_v35  ;;  %v8387_v33 = vpop.eup %8386  ;;  %v12309_v35 = vld [vmem:[#allocation25_spill] sm:$0xff] }
 0x61c   : > { %1526 = vadd.xlane.f32.xlu1 %v1525_v20  ;;  %v3100_v55 = vpop.f32.mrb[101].mxu1  ;;  %v3177_v50 = vmul.f32 %v8381_v58, %v7561_v37  ;;  %v12310_v58 = vld [vmem:[#allocation83_spill] sm:$0xff] }
 0x61d   : > { %v7562_v45 = vpop.f32.mrb[102].mxu1  ;;  %4463 = vrot.lane.b32.xlu0 %v12307_v63, %s8790_s14  ;;  %v3175_v40 = vmul.f32 %v8383_v49, %v3100_v55  ;;  %v1537_v37 = vsel %vm1281_vm1, %v12310_v58, 0.0  ;;  %v10527_v20 = vpop.permute.xlu0 %3977  ;;  %v12312_v49 = vld [vmem:[#allocation82_spill] sm:$0xff]  ;;  %v12318_v58 = vld [vmem:[#allocation55_spill] sm:$0xff] }
 0x61e   : > { %v3178_v32 = vmul.f32 %v8385_v1, %v7562_v45  ;;  %v3103_v18 = vpop.f32.mrb[103].mxu1  ;;  %v1543_v55 = vsel %vm1281_vm1, %v12312_v49, 0.0  ;;  %v3766_v1 = vpop.permute.xlu1 %3765  ;;  %v12314_v45 = vld [vmem:[#allocation63_spill] sm:$0xff] }
 0x61f   : > { %v3176_v4 = vmul.f32 %v8387_v33, %v3103_v18  ;;  %v1549_v33 = vsel %vm1281_vm1, %v12314_v45, 0.0  ;;  %v12316_v18 = vld [vmem:[#allocation60_spill] sm:$0xff] }
 0x620   : > { %v3194_v60 = vpack.c.bf16 %v3178_v32, %v3177_v50  ;;  %1532 = vadd.xlane.f32.xlu1 %v1531_v11  ;;  %7592 = vmatmul.mubr.msk.bf16.gmra.mrb[120].mxu1 %vm924_vm0, %v3192_v47  ;;  %v12313_v47 = vld [vmem:[#allocation31_spill] sm:$0xff]  ;;  %v12315_v32 = vld [vmem:[#allocation33_spill] sm:$0xff] }
 0x621   : > { %v3193_v24 = vpack.c.bf16 %v3176_v4, %v3175_v40  ;;  %4465 = vrot.lane.b32.xlu0 %v12309_v35, %s8790_s14  ;;  %v10538_v50 = vpop.permute.xlu0 %3866  ;;  %v1555_v40 = vsel %vm1281_vm1, %v12316_v18, 0.0  ;;  %v12317_v11 = vld [vmem:[#allocation59_spill] sm:$0xff] }
 0x622   : > { %v3655_v4 = vpop.permute.xlu1 %3654 }
 0x623   : > { %7595 = vmatprep.mubr.msk.bf16.mxu1 %vm924_vm0, %v3193_v24 }
 0x624   : > { %1538 = vadd.xlane.f32.xlu1 %v1537_v37  ;;  %v1567_v37 = vsel %vm1281_vm1, %v12318_v58, 0.0 }
 0x625   : > { %4469 = vrot.lane.b32.xlu0 %v12311_v42, %s8790_s14  ;;  %v10548_v10 = vpop.permute.xlu0 %3965 }
 0x626   : > { %v3657_v24 = vpop.permute.xlu1 %3656 }
 0x628   : > { %1544 = vadd.xlane.f32.xlu1 %v1543_v55  ;;  %7596 = vmatmul.mubr.msk.bf16.gmra.mrb[124].mxu1 %vm924_vm0, %v3194_v60  ;;  %v1561_v60 = vsel %vm1281_vm1, %v12317_v11, 0.0  ;;  %v3790_v55 = vsel %vm924_vm0, %v10447_v36, 0  ;;  %v12320_v11 = vld [vmem:[#allocation21_spill] sm:$0xff] }
 0x629   : > { %4554 = vrot.lane.b32.xlu0 %v12313_v47, %s8790_s14  ;;  %7643 = vmatprep.mubr.msk.bf16.mxu1 %vm924_vm0, %v10433_v28  ;;  %v3784_v28 = vsel %vm924_vm0, %v3764_v53, 0  ;;  %v10555_v49 = vpop.permute.xlu0 %3969 }
 0x62c   : > { %1550 = vadd.xlane.f32.xlu1 %v1549_v33  ;;  %v3869_v33 = vpop.permute.xlu1 %3868 }
 0x62d   : > { %4558 = vrot.lane.b32.xlu0 %v12315_v32, %s8790_s14 }
 0x630   : > { %1556 = vadd.xlane.f32.xlu1 %v1555_v40  ;;  %7644 = vmatmul.mubr.msk.bf16.vlgmr.msra.gmra.mrb[128].mxu1 %vm924_vm0, %v10439_v57  ;;  %v3787_v57 = vsel %vm924_vm0, %v3766_v1, 0  ;;  %v3871_v40 = vpop.permute.xlu1 %3870 }
 0x631   : > { %7652 = vmatpush3.bf16.xpose.msra.mxu1 %v3784_v28  ;;  %7647 = vmatprep.mubr.msk.bf16.mxu1 %vm924_vm0, %v3655_v4  ;;  %v12319_v4 = vld [vmem:[#allocation19_spill] sm:$0xff] }
 0x632   : > { %8100 = vmatprep.subr.msk.bf16.mxu1 %vm924_vm0, %v3766_v1 }
 0x634   : > { %1562 = vadd.xlane.f32.xlu1 %v1561_v60 }
 0x638   : > { %1568 = vadd.xlane.f32.xlu1 %v1567_v37  ;;  %7648 = vmatmul.mubr.msk.bf16.gmra.mrb[132].mxu1 %vm924_vm0, %v3657_v24  ;;  %v3760_v24 = vpop.permute.xlu1 %3759  ;;  %v3889_v37 = vsel %vm924_vm0, %v3869_v33, 0 }
 0x639   : > { %7654 = vmatpush3.bf16.xpose.msra.mxu1 %v3787_v57  ;;  %7659 = vmatprep.mubr.msk.bf16.mxu1 %vm924_vm0, %v10463_v15  ;;  %v3793_v15 = vsel %vm924_vm0, %v10455_v16, 0 }
 0x63a   : > { %8101 = vmatprep.subr.msk.bf16.mxu1 %vm924_vm0, %v10447_v36 }
 0x63c   : > { %v10563_v53 = vpop.xlane.xlu0 %2632 }
 0x640   : > { %v2639_v45 = vpop.xlane.xlu0 %2638 }
 0x641   : > { %7656 = vmatpush3.bf16.xpose.msra.mxu1 %v3790_v55  ;;  %8388 = vrcp.f32 %v2639_v45  ;;  %v12321_v45 = vld [vmem:[#allocation28_spill] sm:$0xff] }
 0x642   : > { %8102 = vmatprep.subr.msk.bf16.mxu1 %vm924_vm0, %v10455_v16 }
 0x644   : > { %v2642_v1 = vpop.xlane.xlu0 %2641 }
 0x645   : > { %8390 = vrcp.f32 %v2642_v1  ;;  %v12322_v1 = vld [vmem:[#allocation32_spill] sm:$0xff] }
 0x646   : > { %8392 = vrcp.f32 %v10563_v53 }
 0x648   : > { %v10571_v18 = vpop.xlane.xlu0 %2644 }
 0x649   : > { %7658 = vmatpush3.bf16.xpose.msra.mxu1 %v3793_v15  ;;  %4376 = vrot.lane.b32.xlu1 %v12319_v4, %s8790_s14  ;;  %v12323_v15 = vld [vmem:[#allocation34_spill] sm:$0xff] }
 0x64a   : > { %8103 = vmatprep.subr.msk.bf16.mxu1 %vm924_vm0, %v3869_v33 }
 0x64b   : > { %v8389_v28 = vpop.eup %8388 }
 0x64c   : > { %v10576_v36 = vpop.xlane.xlu0 %2650  ;;  %v10581_v58 = vmul.f32 %v8389_v28, %v10291_v26 }
 0x64d   : > { %4380 = vrot.lane.b32.xlu1 %v12320_v11, %s8790_s14 }
 0x64f   : > { %v8391_v60 = vpop.eup %8390 }
 0x650   : > { %v10584_v16 = vmul.f32 %v8391_v60, %v10295_v56  ;;  %7660 = vmatmul.mubr.msk.bf16.vlgmr.msra.gmra.mrb[136].mxu1 %vm924_vm0, %v10470_v7  ;;  %v1476_v57 = vpop.xlane.xlu0 %1475  ;;  %v3762_v56 = vpop.permute.xlu1 %3761  ;;  %v3892_v7 = vsel %vm924_vm0, %v3871_v40, 0 }
 0x651   : > { %7663 = vmatprep.mubr.msk.bf16.mxu1 %vm924_vm0, %v3760_v24  ;;  %7668 = vmatpush3.bf16.xpose.msra.mxu1 %v3889_v37  ;;  %v3895_v24 = vsel %vm924_vm0, %v10481_v12, 0 }
 0x652   : > { %4467 = vrot.lane.b32.xlu1 %v12321_v45, %s8790_s14  ;;  %8104 = vmatprep.subr.msk.bf16.mxu1 %vm924_vm0, %v3871_v40 }
 0x654   : > { %v10595_v26 = vpop.xlane.xlu0 %1481  ;;  %v3974_v28 = vpop.permute.xlu1 %3973 }
 0x656   : > { %4552 = vrot.lane.b32.xlu1 %v12322_v1, %s8790_s14 }
 0x658   : > { %7664 = vmatmul.mubr.msk.bf16.gmra.mrb[140].mxu1 %vm924_vm0, %v3762_v56  ;;  %v10601_v33 = vpop.xlane.xlu0 %1487  ;;  %v3976_v40 = vpop.permute.xlu1 %3975 }
 0x659   : > { %7670 = vmatpush3.bf16.xpose.msra.mxu1 %v3892_v7  ;;  %7675 = vmatprep.mubr.msk.bf16.mxu1 %vm924_vm0, %v10508_v44  ;;  %v3898_v7 = vsel %vm924_vm0, %v10493_v23, 0 }
 0x65a   : > { %4556 = vrot.lane.b32.xlu1 %v12323_v15, %s8790_s14  ;;  %8105 = vmatprep.subr.msk.bf16.mxu1 %vm924_vm0, %v10481_v12 }
 0x65c   : > { %v10609_v60 = vpop.xlane.xlu0 %1493  ;;  %v3865_v56 = vpop.permute.xlu1 %3864 }
 0x660   : > { %v10613_v37 = vpop.xlane.xlu0 %1499  ;;  %v3980_v12 = vpop.permute.xlu1 %3979 }
 0x661   : > { %7672 = vmatpush3.bf16.xpose.msra.mxu1 %v3895_v24  ;;  %v3994_v24 = vsel %vm924_vm0, %v3974_v28, 0 }
 0x662   : > { %8106 = vmatprep.subr.msk.bf16.mxu1 %vm924_vm0, %v10493_v23 }
 0x664   : > { %v10617_v44 = vpop.xlane.xlu0 %1505  ;;  %v3968_v23 = vpop.permute.xlu1 %3967 }
 0x668   : > { %v10621_v55 = vpop.xlane.xlu0 %1511 }
 0x669   : > { %7674 = vmatpush3.bf16.xpose.msra.mxu1 %v3898_v7  ;;  %v3997_v7 = vsel %vm924_vm0, %v3976_v40, 0 }
 0x66a   : > { %8107 = vmatprep.subr.msk.bf16.mxu1 %vm924_vm0, %v3974_v28 }
 0x66c   : > { %v10624_v32 = vpop.xlane.xlu0 %1517 }
 0x670   : > { %7676 = vmatmul.mubr.msk.bf16.vlgmr.msra.gmra.mrb[144].mxu1 %vm924_vm0, %v10517_v25  ;;  %v10629_v47 = vpop.xlane.xlu0 %1523  ;;  %v10640_v25 = vpop.permute.xlu1 %3971 }
 0x671   : > { %7679 = vmatprep.mubr.msk.bf16.mxu1 %vm924_vm0, %v3865_v56  ;;  %7684 = vmatpush3.bf16.xpose.msra.mxu1 %v3994_v24 }
 0x672   : > { %8108 = vmatprep.subr.msk.bf16.mxu1 %vm924_vm0, %v3976_v40 }
 0x674   : > { %v10633_v42 = vpop.xlane.xlu0 %1529 }
 0x678   : > { %7680 = vmatmul.mubr.msk.bf16.gmra.mrb[148].mxu1 %vm924_vm0, %v10538_v50  ;;  %v10638_v35 = vpop.xlane.xlu0 %1535  ;;  %v4000_v50 = vsel %vm924_vm0, %v10527_v20, 0 }
 0x679   : > { %7686 = vmatpush3.bf16.xpose.msra.mxu1 %v3997_v7  ;;  %7691 = vmatprep.mubr.msk.bf16.mxu1 %vm924_vm0, %v10548_v10  ;;  %v8393_v7 = vpop.eup %8392 }
 0x67a   : > { %8109 = vmatprep.subr.msk.bf16.mxu1 %vm924_vm0, %v10527_v20 }
 0x67c   : > { %v10647_v28 = vpop.xlane.xlu0 %1541 }
 0x67d   : > { %v2636_v56 = vpop.xlane.xlu1 %2635 }
 0x67e   : > { %8394 = vrcp.f32 %v2636_v56 }
 0x67f   : > { %8396 = vrcp.f32 %v10571_v18  ;;  %v4003_v18 = vsel %vm924_vm0, %v3980_v12, 0 }
 0x680   : > { %v10652_v40 = vpop.xlane.xlu0 %1547 }
 0x681   : > { %7688 = vmatpush3.bf16.xpose.msra.mxu1 %v4000_v50  ;;  %v2648_v24 = vpop.xlane.xlu1 %2647  ;;  %v3147_v50 = vmul.f32 %v8393_v7, %v10293_v39  ;;  %v12324_v7 = vpack.c.bf16 %v10584_v16, %v10581_v58 }
 0x682   : > { %8398 = vrcp.f32 %v2648_v24  ;;  %8110 = vmatprep.subr.msk.bf16.mxu1 %vm924_vm0, %v3980_v12 }
 0x683   : > { %8400 = vrcp.f32 %v10576_v36 }
 0x684   : > { %v10656_v10 = vpop.xlane.xlu0 %1553 }
 0x685   : > { %v2654_v53 = vpop.xlane.xlu1 %2653 }
 0x686   : > { %8402 = vrcp.f32 %v2654_v53 }
 0x687   : > { %8404 = vrcp.f32 %v1476_v57  ;;  %v8207_v57 = vld [vmem:[%s11963_s4 + $0x8] sm:$0xff]  }
 0x688   : > { %v8395_v56 = vpop.eup %8394  ;;  %v10659_v63 = vpop.xlane.xlu0 %1559 }
 0x689   : > { %7690 = vmatpush3.bf16.xpose.msra.mxu1 %v4003_v18  ;;  %v1479_v20 = vpop.xlane.xlu1 %1478  ;;  %v3148_v24 = vmul.f32 %v8395_v56, %v10299_v0  ;;  %v8397_v31 = vpop.eup %8396 }
 0x68a   : > { %8406 = vrcp.f32 %v1479_v20  ;;  %v3151_v53 = vmul.f32 %v8397_v31, %v10327_v51  ;;  %v12326_v20 = vld [vmem:[#allocation85_spill] sm:$0xff] }
 0x68b   : > { %v3179_v36 = vpack.c.bf16 %v3148_v24, %v3147_v50  ;;  %8408 = vrcp.f32 %v10595_v26 }
 0x68c   : > { %v8399_v3 = vpop.eup %8398  ;;  %v10664_v15 = vpop.xlane.xlu0 %1565 }
 0x68d   : > { %v1485_v12 = vpop.xlane.xlu1 %1484  ;;  %7567 = vmatprep.mubr.msk.bf16.mxu0 %vm924_vm0, %v3179_v36  ;;  %v3152_v39 = vmul.f32 %v8399_v3, %v10333_v6  ;;  %v8401_v0 = vpop.eup %8400  ;;  %v12327_v36 = vld [vmem:[#allocation61_spill] sm:$0xff] }
 0x68e   : > { %8410 = vrcp.f32 %v1485_v12  ;;  %7568 = vmatmul.mubr.msk.bf16.vlgmr.msra.gmra.mrb[120].mxu0 %vm924_vm0, %v12324_v7  ;;  %v3153_v6 = vmul.f32 %v8401_v0, %v10325_v2  ;;  %v12328_v12 = vld [vmem:[#allocation64_spill] sm:$0xff] }
 0x68f   : > { %7600 = vmatpush3.bf16.msra.mxu0 %v10486_v38  ;;  %v3181_v26 = vpack.c.bf16 %v3152_v39, %v3151_v53  ;;  %8412 = vrcp.f32 %v10601_v33 }
 0x690   : > { %v8403_v56 = vpop.eup %8402  ;;  %7692 = vmatmul.mubr.msk.bf16.vlgmr.msra.gmra.mrb[152].mxu1 %vm924_vm0, %v3968_v23  ;;  %v4375_v18 = vpop.permute.xlu0 %4374  ;;  %7601 = vmatprep.subr.bf16.mxu0 %v8207_v57  ;;  %v12325_v23 = vld [vmem:[#allocation62_spill] sm:$0xff] }
 0x691   : > { %7695 = vmatprep.mubr.msk.bf16.mxu1 %vm924_vm0, %v10555_v49  ;;  %v1491_v51 = vpop.xlane.xlu1 %1490  ;;  %7571 = vmatprep.mubr.msk.bf16.mxu0 %vm924_vm0, %v3181_v26  ;;  %v3154_v3 = vmul.f32 %v8403_v56, %v10331_v62  ;;  %v8405_v31 = vpop.eup %8404 }
 0x692   : > { %8414 = vrcp.f32 %v1491_v51  ;;  %v1926_v49 = vmul.f32 %v8405_v31, %v12325_v23 }
 0x693   : > { %7602 = vmatpush3.bf16.msra.mxu0 %v8207_v57  ;;  %v3182_v38 = vpack.c.bf16 %v3154_v3, %v3153_v6  ;;  %8416 = vrcp.f32 %v10609_v60  ;;  %v12330_v6 = vld [vmem:[#allocation89_spill] sm:$0xff] }
 0x694   : > { %v8407_v58 = vpop.eup %8406  ;;  %7699 = vmatprep.subr.bf16.mxu0 %v4375_v18  ;;  %v10685_v16 = vpop.permute.xlu0 %4378 }
 0x695   : > { %v1497_v33 = vpop.xlane.xlu1 %1496  ;;  %v1927_v50 = vmul.f32 %v8407_v58, %v12326_v20  ;;  %v8409_v24 = vpop.eup %8408 }
 0x696   : > { %8418 = vrcp.f32 %v1497_v33  ;;  %7572 = vmatmul.mubr.msk.bf16.gmra.mrb[124].mxu0 %vm924_vm0, %v3182_v38  ;;  %v1928_v57 = vmul.f32 %v8409_v24, %v12327_v36  ;;  %v12334_v36 = vld [vmem:[#allocation93_spill] sm:$0xff] }
 0x697   : > { %v1958_v2 = vpack.c.bf16 %v1927_v50, %v1926_v49  ;;  %8420 = vrcp.f32 %v10613_v37  ;;  %v12332_v49 = vld [vmem:[#allocation88_spill] sm:$0xff] }
 0x698   : > { %v8411_v62 = vpop.eup %8410  ;;  %7696 = vmatmul.mubr.msk.bf16.gmra.mrb[156].mxu1 %vm924_vm0, %v10640_v25  ;;  %v4464_v60 = vpop.permute.xlu0 %4463  ;;  %v12329_v25 = vld [vmem:[#allocation87_spill] sm:$0xff] }
 0x699   : > { %v1929_v53 = vmul.f32 %v8411_v62, %v12328_v12  ;;  %v1503_v39 = vpop.xlane.xlu1 %1502  ;;  %7603 = vmatprep.mubr.msk.bf16.mxu0 %vm924_vm0, %v1958_v2  ;;  %7715 = vmatprep.subr.bf16.mxu1 %v4464_v60  ;;  %v8413_v0 = vpop.eup %8412 }
 0x69a   : > { %8422 = vrcp.f32 %v1503_v39  ;;  %7716 = vmatpush3.bf16.msra.mxu1 %v4464_v60  ;;  %v1930_v51 = vmul.f32 %v8413_v0, %v12329_v25  ;;  %v12333_v60 = vld [vmem:[#allocation91_spill] sm:$0xff]  ;;  %v12335_v0 = vld [vmem:[#allocation90_spill] sm:$0xff] }
 0x69b   : > { %v1959_v7 = vpack.c.bf16 %v1929_v53, %v1928_v57  ;;  %8424 = vrcp.f32 %v10617_v44  ;;  %v12331_v44 = vld [vmem:[#allocation86_spill] sm:$0xff] }
 0x69c   : > { %v8415_v26 = vpop.eup %8414  ;;  %v4466_v37 = vpop.permute.xlu0 %4465 }
 0x69d   : > { %v1509_v56 = vpop.xlane.xlu1 %1508  ;;  %7717 = vmatprep.subr.bf16.mxu1 %v4466_v37  ;;  %v1931_v3 = vmul.f32 %v8415_v26, %v12330_v6  ;;  %v8417_v31 = vpop.eup %8416  ;;  %v12336_v26 = vld [vmem:[#allocation92_spill] sm:$0xff] }
 0x69e   : > { %8426 = vrcp.f32 %v1509_v56  ;;  %7604 = vmatmul.mubr.msk.bf16.vlgmr.msra.gmra.mrb[120].mxu0 %vm924_vm0, %v1959_v7  ;;  %7718 = vmatpush3.bf16.msra.mxu1 %v4466_v37  ;;  %v1932_v23 = vmul.f32 %v8417_v31, %v12331_v44 }
 0x69f   : > { %7700 = vmatpush3.bf16.msra.mxu0 %v4375_v18  ;;  %v1960_v38 = vpack.c.bf16 %v1931_v3, %v1930_v51  ;;  %8428 = vrcp.f32 %v10621_v55 }
 0x6a0   : > { %v8419_v58 = vpop.eup %8418 }
 0x6a1   : > { %v1515_v33 = vpop.xlane.xlu1 %1514  ;;  %7607 = vmatprep.mubr.msk.bf16.mxu0 %vm924_vm0, %v1960_v38  ;;  %v1933_v20 = vmul.f32 %v8419_v58, %v12332_v49  ;;  %v8421_v50 = vpop.eup %8420  ;;  %v12341_v38 = vld [vmem:[#allocation95_spill] sm:$0xff] }
 0x6a2   : > { %8430 = vrcp.f32 %v1515_v33  ;;  %v1934_v18 = vmul.f32 %v8421_v50, %v12333_v60  ;;  %v12342_v33 = vld [vmem:[#allocation97_spill] sm:$0xff] }
 0x6a3   : > { %v1961_v24 = vpack.c.bf16 %v1933_v20, %v1932_v23  ;;  %8432 = vrcp.f32 %v10624_v32 }
 0x6a4   : > { %v8423_v2 = vpop.eup %8422 }
 0x6a5   : > { %v1521_v62 = vpop.xlane.xlu1 %1520  ;;  %v1935_v57 = vmul.f32 %v8423_v2, %v12334_v36  ;;  %v8425_v12 = vpop.eup %8424  ;;  %v12344_v2 = vld [vmem:[#allocation96_spill] sm:$0xff] }
 0x6a6   : > { %8434 = vrcp.f32 %v1521_v62  ;;  %7608 = vmatmul.mubr.msk.bf16.gmra.mrb[124].mxu0 %vm924_vm0, %v1961_v24  ;;  %v1936_v7 = vmul.f32 %v8425_v12, %v12335_v0 }
 0x6a7   : > { %v1962_v55 = vpack.c.bf16 %v1935_v57, %v1934_v18  ;;  %8436 = vrcp.f32 %v10629_v47 }
 0x6a8   : > { %v8427_v53 = vpop.eup %8426 }
 0x6a9   : > { %v1527_v39 = vpop.xlane.xlu1 %1526  ;;  %7611 = vmatprep.mubr.msk.bf16.mxu0 %vm924_vm0, %v1962_v55  ;;  %v1937_v32 = vmul.f32 %v8427_v53, %v12336_v26  ;;  %v8429_v37 = vpop.eup %8428 }
 0x6aa   : > { %8438 = vrcp.f32 %v1527_v39  ;;  %v10712_v56 = vpop.f32.mrb[104].mxu1  ;;  %v1938_v58 = vmul.f32 %v8429_v37, %v12341_v38  ;;  %v12349_v39 = vld [vmem:[#allocation99_spill] sm:$0xff]  ;;  %v12352_v38 = vld [vmem:[#allocation100_spill] sm:$0xff] }
 0x6ab   : > { %12337 = vst [vmem:[#allocation7_spill] sm:$0xff] %v10712_v56  ;;  %v10714_v25 = vpop.f32.mrb[105].mxu1  ;;  %v1963_v51 = vpack.c.bf16 %v1937_v32, %v1936_v7  ;;  %8440 = vrcp.f32 %v10633_v42  ;;  %v12343_v42 = vld [vmem:[#allocation94_spill] sm:$0xff]  ;;  %v12350_v7 = vld [vmem:[#allocation101_spill] sm:$0xff] }
 0x6ac   : > { %12338 = vst [vmem:[#allocation5_spill] sm:$0xff] %v10714_v25  ;;  %v8431_v6 = vpop.eup %8430  ;;  %v10717_v3 = vpop.f32.mrb[106].mxu1 }
 0x6ad   : > { %12339 = vst [vmem:[#allocation9_spill] sm:$0xff] %v10717_v3  ;;  %v1533_v47 = vpop.xlane.xlu1 %1532  ;;  %v10719_v31 = vpop.f32.mrb[107].mxu1  ;;  %v1939_v44 = vmul.f32 %v8431_v6, %v12342_v33 }
 0x6ae   : > { %12340 = vst [vmem:[#allocation6_spill] sm:$0xff] %v10719_v31  ;;  %v8433_v23 = vpop.eup %8432  ;;  %8442 = vrcp.f32 %v1533_v47  ;;  %7612 = vmatmul.mubr.msk.bf16.gmra.mrb[128].mxu0 %vm924_vm0, %v1963_v51 }
 0x6af   : > { %v1964_v49 = vpack.c.bf16 %v1939_v44, %v1938_v58  ;;  %8444 = vrcp.f32 %v10638_v35  ;;  %v1940_v24 = vmul.f32 %v8433_v23, %v12343_v42 }
 0x6b0   : > { %v8435_v20 = vpop.eup %8434 }
 0x6b1   : > { %v1539_v50 = vpop.xlane.xlu1 %1538  ;;  %7615 = vmatprep.mubr.msk.bf16.mxu0 %vm924_vm0, %v1964_v49  ;;  %v1941_v62 = vmul.f32 %v8435_v20, %v12344_v2  ;;  %v8437_v60 = vpop.eup %8436 }
 0x6b2   : > { %8446 = vrcp.f32 %v1539_v50  ;;  %v10728_v18 = vpop.f32.mrb[108].mxu1  ;;  %v1942_v0 = vmul.f32 %v8437_v60, %v12349_v39 }
 0x6b3   : > { %12345 = vst [vmem:[#allocation8_spill] sm:$0xff] %v10728_v18  ;;  %v10730_v36 = vpop.f32.mrb[109].mxu1  ;;  %v1965_v57 = vpack.c.bf16 %v1941_v62, %v1940_v24  ;;  %8448 = vrcp.f32 %v10647_v28  ;;  %v12351_v28 = vld [vmem:[#allocation98_spill] sm:$0xff]  ;;  %v12357_v24 = vld [vmem:[#allocation103_spill] sm:$0xff]  ;;  %v12358_v62 = vld [vmem:[#allocation105_spill] sm:$0xff] }
 0x6b4   : > { %12346 = vst [vmem:[#allocation15_spill] sm:$0xff] %v10730_v36  ;;  %v8439_v12 = vpop.eup %8438  ;;  %v10733_v55 = vpop.f32.mrb[110].mxu1 }
 0x6b5   : > { %12347 = vst [vmem:[#allocation17_spill] sm:$0xff] %v10733_v55  ;;  %v1545_v35 = vpop.xlane.xlu1 %1544  ;;  %v10735_v53 = vpop.f32.mrb[111].mxu1  ;;  %v1943_v26 = vmul.f32 %v8439_v12, %v12350_v7  ;;  %v12360_v7 = vld [vmem:[#allocation104_spill] sm:$0xff] }
 0x6b6   : > { %12348 = vst [vmem:[#allocation11_spill] sm:$0xff] %v10735_v53  ;;  %v8441_v32 = vpop.eup %8440  ;;  %8450 = vrcp.f32 %v1545_v35  ;;  %7616 = vmatmul.mubr.msk.bf16.gmra.mrb[132].mxu0 %vm924_vm0, %v1965_v57 }
 0x6b7   : > { %v1966_v37 = vpack.c.bf16 %v1943_v26, %v1942_v0  ;;  %8452 = vrcp.f32 %v10652_v40  ;;  %v1944_v47 = vmul.f32 %v8441_v32, %v12351_v28  ;;  %v12361_v28 = vld [vmem:[#allocation107_spill] sm:$0xff] }
 0x6b8   : > { %v8443_v51 = vpop.eup %8442 }
 0x6b9   : > { %v1551_v6 = vpop.xlane.xlu1 %1550  ;;  %7619 = vmatprep.mubr.msk.bf16.mxu0 %vm924_vm0, %v1966_v37  ;;  %v1945_v58 = vmul.f32 %v8443_v51, %v12352_v38  ;;  %v8445_v33 = vpop.eup %8444  ;;  %v12362_v38 = vld [vmem:[#allocation109_spill] sm:$0xff] }
 0x6ba   : > { %8454 = vrcp.f32 %v1551_v6  ;;  %v10744_v44 = vpop.f32.mrb[112].mxu1  ;;  %v1946_v2 = vmul.f32 %v8445_v33, %v12357_v24 }
 0x6bb   : > { %12353 = vst [vmem:[#allocation13_spill] sm:$0xff] %v10744_v44  ;;  %v10746_v23 = vpop.f32.mrb[113].mxu1  ;;  %v1967_v49 = vpack.c.bf16 %v1945_v58, %v1944_v47  ;;  %8456 = vrcp.f32 %v10656_v10  ;;  %v12359_v10 = vld [vmem:[#allocation102_spill] sm:$0xff] }
 0x6bc   : > { %12354 = vst [vmem:[#allocation14_spill] sm:$0xff] %v10746_v23  ;;  %v8447_v20 = vpop.eup %8446  ;;  %v10749_v50 = vpop.f32.mrb[114].mxu1 }
 0x6bd   : > { %12355 = vst [vmem:[#allocation10_spill] sm:$0xff] %v10749_v50  ;;  %v1557_v40 = vpop.xlane.xlu1 %1556  ;;  %v10751_v42 = vpop.f32.mrb[115].mxu1  ;;  %v1947_v60 = vmul.f32 %v8447_v20, %v12358_v62 }
 0x6be   : > { %12356 = vst [vmem:[#allocation12_spill] sm:$0xff] %v10751_v42  ;;  %v8449_v57 = vpop.eup %8448  ;;  %8458 = vrcp.f32 %v1557_v40  ;;  %7620 = vmatmul.mubr.msk.bf16.gmra.mrb[136].mxu0 %vm924_vm0, %v1967_v49  ;;  %v12363_v40 = vld [vmem:[#allocation106_spill] sm:$0xff] }
 0x6bf   : > { %v1968_v12 = vpack.c.bf16 %v1947_v60, %v1946_v2  ;;  %8460 = vrcp.f32 %v10659_v63  ;;  %v1948_v0 = vmul.f32 %v8449_v57, %v12359_v10  ;;  %v12364_v2 = vld [vmem:[#allocation108_spill] sm:$0xff]  ;;  %v12366_v10 = vld [vmem:[#allocation113_spill] sm:$0xff] }
 0x6c0   : > { %v8451_v35 = vpop.eup %8450 }
 0x6c1   : > { %v1563_v39 = vpop.xlane.xlu1 %1562  ;;  %7623 = vmatprep.mubr.msk.bf16.mxu0 %vm924_vm0, %v1968_v12  ;;  %v1949_v26 = vmul.f32 %v8451_v35, %v12360_v7  ;;  %v8453_v32 = vpop.eup %8452  ;;  %v12365_v35 = vld [vmem:[#allocation111_spill] sm:$0xff] }
 0x6c2   : > { %8462 = vrcp.f32 %v1563_v39  ;;  %v1950_v47 = vmul.f32 %v8453_v32, %v12361_v28  ;;  %v12368_v28 = vld [vmem:[#allocation112_spill] sm:$0xff] }
 0x6c3   : > { %v1969_v37 = vpack.c.bf16 %v1949_v26, %v1948_v0  ;;  %8464 = vrcp.f32 %v10664_v15 }
 0x6c4   : > { %v8455_v51 = vpop.eup %8454 }
 0x6c5   : > { %v1569_v6 = vpop.xlane.xlu1 %1568  ;;  %v1951_v58 = vmul.f32 %v8455_v51, %v12362_v38  ;;  %v8457_v33 = vpop.eup %8456  ;;  %v12367_v51 = vld [vmem:[#allocation110_spill] sm:$0xff] }
 0x6c6   : > { %8466 = vrcp.f32 %v1569_v6  ;;  %7624 = vmatmul.mubr.msk.bf16.gmra.mrb[140].mxu0 %vm924_vm0, %v1969_v37  ;;  %v1952_v24 = vmul.f32 %v8457_v33, %v12363_v40  ;;  %v4470_v38 = vpop.permute.xlu0 %4469 }
 0x6c7   : > { %v1970_v63 = vpack.c.bf16 %v1951_v58, %v1950_v47 }
 0x6c8   : > { %v8459_v49 = vpop.eup %8458 }
 0x6c9   : > { %v4377_v20 = vpop.permute.xlu1 %4376  ;;  %7627 = vmatprep.mubr.msk.bf16.mxu0 %vm924_vm0, %v1970_v63  ;;  %v1953_v62 = vmul.f32 %v8459_v49, %v12364_v2  ;;  %v8461_v60 = vpop.eup %8460 }
 0x6ca   : > { %7701 = vmatprep.subr.bf16.mxu0 %v4377_v20  ;;  %v1954_v39 = vmul.f32 %v8461_v60, %v12365_v35  ;;  %v10806_v35 = vld [vmem:[%s11962_s3 + $0x90] sm:$0xff] }
 0x6cb   : > { %7702 = vmatpush3.bf16.msra.mxu0 %v4377_v20  ;;  %v1971_v15 = vpack.c.bf16 %v1953_v62, %v1952_v24 }
 0x6cc   : > { %v8463_v57 = vpop.eup %8462  ;;  %7703 = vmatprep.subr.bf16.mxu0 %v10685_v16 }
 0x6cd   : > { %v4381_v12 = vpop.permute.xlu1 %4380  ;;  %v1955_v0 = vmul.f32 %v8463_v57, %v12366_v10  ;;  %v8465_v7 = vpop.eup %8464  ;;  %v10811_v10 = vld [vmem:[%s11962_s3 + $0x80] sm:$0xff] }
 0x6ce   : > { %7628 = vmatmul.mubr.msk.bf16.gmra.mrb[144].mxu0 %vm924_vm0, %v1971_v15  ;;  %v1956_v6 = vmul.f32 %v8465_v7, %v12367_v51 }
 0x6cf   : > { %7704 = vmatpush3.bf16.msra.mxu0 %v10685_v16  ;;  %v1972_v26 = vpack.c.bf16 %v1955_v0, %v1954_v39  ;;  %v10816_v0 = vld [vmem:[%s11962_s3 + $0x98] sm:$0xff] }
 0x6d0   : > { %v8467_v32 = vpop.eup %8466  ;;  %7705 = vmatprep.subr.bf16.mxu0 %v4381_v12 }
 0x6d1   : > { %v4468_v37 = vpop.permute.xlu1 %4467  ;;  %7631 = vmatprep.mubr.msk.bf16.mxu0 %vm924_vm0, %v1972_v26  ;;  %v1957_v47 = vmul.f32 %v8467_v32, %v12368_v28 }
 0x6d2   : > { %7719 = vmatprep.subr.bf16.mxu1 %v4468_v37 }
 0x6d3   : > { %7706 = vmatpush3.bf16.msra.mxu0 %v4381_v12  ;;  %7720 = vmatpush3.bf16.msra.mxu1 %v4468_v37  ;;  %v1973_v58 = vpack.c.bf16 %v1957_v47, %v1956_v6  ;;  %v10824_v37 = vld [vmem:[%s11962_s3 + $0x88] sm:$0xff] }
 0x6d4   : > { %7721 = vmatprep.subr.bf16.mxu1 %v4470_v38 }
 0x6d5   : > { %v10775_v33 = vpop.permute.xlu1 %4552 }
 0x6d6   : > { %7632 = vmatmul.mubr.msk.bf16.gmra.mrb[148].mxu0 %vm924_vm0, %v1973_v58  ;;  %7731 = vmatprep.subr.bf16.mxu0 %v10775_v33 }
 0x6d7   : > { %7722 = vmatpush3.bf16.msra.mxu1 %v4470_v38 }
 0x6eb   : > { %v10779_v16 = vpop.f32.mrb[116].mxu1 }
 0x6ec   : > { %12369 = vst [vmem:[#allocation23_spill] sm:$0xff] %v10779_v16  ;;  %v10781_v63 = vpop.f32.mrb[117].mxu1 }
 0x6ed   : > { %12370 = vst [vmem:[#allocation29_spill] sm:$0xff] %v10781_v63  ;;  %v10783_v49 = vpop.f32.mrb[118].mxu1 }
 0x6ee   : > { %12371 = vst [vmem:[#allocation18_spill] sm:$0xff] %v10783_v49  ;;  %v10785_v20 = vpop.f32.mrb[119].mxu1 }
 0x6ef   : > { %12372 = vst [vmem:[#allocation42_spill] sm:$0xff] %v10785_v20 }
 0x6f3   : > { %v10787_v40 = vpop.f32.mrb[120].mxu1 }
 0x6f4   : > { %12373 = vst [vmem:[#allocation66_spill] sm:$0xff] %v10787_v40  ;;  %v10789_v24 = vpop.f32.mrb[121].mxu1 }
 0x6f5   : > { %12374 = vst [vmem:[#allocation69_spill] sm:$0xff] %v10789_v24  ;;  %v10791_v2 = vpop.f32.mrb[122].mxu1 }
 0x6f6   : > { %12375 = vst [vmem:[#allocation72_spill] sm:$0xff] %v10791_v2  ;;  %v10793_v62 = vpop.f32.mrb[123].mxu1 }
 0x6f7   : > { %12376 = vst [vmem:[#allocation70_spill] sm:$0xff] %v10793_v62 }
 0x6fb   : > { %v10795_v60 = vpop.f32.mrb[124].mxu1 }
 0x6fc   : > { %12377 = vst [vmem:[#allocation75_spill] sm:$0xff] %v10795_v60  ;;  %v10797_v15 = vpop.f32.mrb[125].mxu1 }
 0x6fd   : > { %12378 = vst [vmem:[#allocation77_spill] sm:$0xff] %v10797_v15  ;;  %v10799_v57 = vpop.f32.mrb[126].mxu1 }
 0x6fe   : > { %12379 = vst [vmem:[#allocation79_spill] sm:$0xff] %v10799_v57  ;;  %v10801_v12 = vpop.f32.mrb[127].mxu1 }
 0x6ff   : > { %12380 = vst [vmem:[#allocation81_spill] sm:$0xff] %v10801_v12 }
 0x703   : > { %v7645_v39 = vpop.f32.mrb[128].mxu1 }
 0x704   : > { %v10819_v7 = vadd.f32 %v7645_v39, %v10806_v35  ;;  %v3724_v26 = vpop.f32.mrb[129].mxu1  ;;  %v10842_v39 = vld [vmem:[%s11962_s3 + $0xb0] sm:$0xff] }
 0x705   : > { %v7646_v32 = vpop.f32.mrb[130].mxu1  ;;  %v10827_v51 = vadd.f32 %v10811_v10, %v3724_v26 }
 0x706   : > { %v10830_v6 = vadd.f32 %v7646_v32, %v10816_v0  ;;  %v3727_v28 = vpop.f32.mrb[131].mxu1  ;;  %v4076_v47 = vsel %vm1281_vm1, %v10819_v7, -inf }
 0x707   : > { %4077 = vmax.xlane.f32.xlu0 %v4076_v47  ;;  %v10835_v38 = vadd.f32 %v10824_v37, %v3727_v28  ;;  %v4070_v26 = vsel %vm1281_vm1, %v10827_v51, -inf  ;;  %v10849_v47 = vld [vmem:[%s11962_s3 + $0xa0] sm:$0xff]  ;;  %v10854_v28 = vld [vmem:[%s11962_s3 + $0xb8] sm:$0xff] }
 0x708   : > { %v4079_v58 = vsel %vm1281_vm1, %v10830_v6, -inf }
 0x709   : > { %4080 = vmax.xlane.f32.xlu1 %v4079_v58  ;;  %v4073_v57 = vsel %vm1281_vm1, %v10835_v38, -inf }
 0x70b   : > { %v7649_v32 = vpop.f32.mrb[132].mxu1  ;;  %4071 = vmax.xlane.f32.xlu0 %v4070_v26  ;;  %v10864_v26 = vld [vmem:[%s11962_s3 + $0xa8] sm:$0xff] }
 0x70c   : > { %v10857_v58 = vadd.f32 %v7649_v32, %v10842_v39  ;;  %v3740_v12 = vpop.f32.mrb[133].mxu1 }
 0x70d   : > { %v7650_v15 = vpop.f32.mrb[134].mxu1  ;;  %4074 = vmax.xlane.f32.xlu1 %v4073_v57  ;;  %v10867_v60 = vadd.f32 %v10849_v47, %v3740_v12 }
 0x70e   : > { %v10870_v62 = vadd.f32 %v7650_v15, %v10854_v28  ;;  %v3743_v2 = vpop.f32.mrb[135].mxu1  ;;  %v4088_v32 = vsel %vm1281_vm1, %v10857_v58, -inf }
 0x70f   : > { %4089 = vmax.xlane.f32.xlu0 %v4088_v32  ;;  %v10875_v24 = vadd.f32 %v10864_v26, %v3743_v2  ;;  %v4082_v40 = vsel %vm1281_vm1, %v10867_v60, -inf }
 0x710   : > { %v4091_v57 = vsel %vm1281_vm1, %v10870_v62, -inf }
 0x711   : > { %4092 = vmax.xlane.f32.xlu1 %v4091_v57  ;;  %v4085_v15 = vsel %vm1281_vm1, %v10875_v24, -inf }
 0x713   : > { %4083 = vmax.xlane.f32.xlu0 %v4082_v40 }
 0x715   : > { %4086 = vmax.xlane.f32.xlu1 %v4085_v15 }
 0x723   : > { %v7661_v12 = vpop.f32.mrb[136].mxu1 }
 0x724   : > { %v10884_v20 = vadd.f32 %v7661_v12, %v10806_v35  ;;  %v3829_v32 = vpop.f32.mrb[137].mxu1 }
 0x725   : > { %v10887_v2 = vadd.f32 %v10811_v10, %v3829_v32  ;;  %v7662_v49 = vpop.f32.mrb[138].mxu1 }
 0x726   : > { %v10890_v63 = vadd.f32 %v7662_v49, %v10816_v0  ;;  %v3832_v57 = vpop.f32.mrb[139].mxu1  ;;  %v4100_v40 = vsel %vm1281_vm1, %v10884_v20, -inf }
 0x727   : > { %4101 = vmax.xlane.f32.xlu1 %v4100_v40  ;;  %v4094_v15 = vsel %vm1281_vm1, %v10887_v2, -inf  ;;  %v10897_v12 = vadd.f32 %v10824_v37, %v3832_v57 }
 0x728   : > { %4095 = vmax.xlane.f32.xlu0 %v4094_v15  ;;  %v4103_v32 = vsel %vm1281_vm1, %v10890_v63, -inf }
 0x729   : > { %v4097_v15 = vsel %vm1281_vm1, %v10897_v12, -inf }
 0x72b   : > { %4104 = vmax.xlane.f32.xlu1 %v4103_v32  ;;  %v7665_v16 = vpop.f32.mrb[140].mxu1 }
 0x72c   : > { %v3845_v42 = vpop.f32.mrb[141].mxu1  ;;  %v10905_v23 = vadd.f32 %v7665_v16, %v10842_v39 }
 0x72d   : > { %v10902_v49 = vadd.f32 %v10849_v47, %v3845_v42  ;;  %v7666_v50 = vpop.f32.mrb[142].mxu1 }
 0x72e   : > { %v3848_v40 = vpop.f32.mrb[143].mxu1  ;;  %v10912_v32 = vadd.f32 %v7666_v50, %v10854_v28  ;;  %v4112_v42 = vsel %vm1281_vm1, %v10905_v23, -inf }
 0x72f   : > { %4098 = vmax.xlane.f32.xlu1 %v4097_v15  ;;  %v4106_v57 = vsel %vm1281_vm1, %v10902_v49, -inf  ;;  %v10917_v44 = vadd.f32 %v10864_v26, %v3848_v40 }
 0x730   : > { %4107 = vmax.xlane.f32.xlu0 %v4106_v57  ;;  %v4115_v16 = vsel %vm1281_vm1, %v10912_v32, -inf }
 0x731   : > { %v4109_v15 = vsel %vm1281_vm1, %v10917_v44, -inf }
 0x733   : > { %4113 = vmax.xlane.f32.xlu1 %v4112_v42 }
 0x737   : > { %4116 = vmax.xlane.f32.xlu1 %v4115_v16 }
 0x73b   : > { %4110 = vmax.xlane.f32.xlu1 %v4109_v15 }
 0x743   : > { %v7677_v53 = vpop.f32.mrb[144].mxu1 }
 0x744   : > { %v10924_v57 = vadd.f32 %v7677_v53, %v10806_v35  ;;  %v3934_v50 = vpop.f32.mrb[145].mxu1 }
 0x745   : > { %v10927_v55 = vadd.f32 %v10811_v10, %v3934_v50  ;;  %v7678_v42 = vpop.f32.mrb[146].mxu1 }
 0x746   : > { %v10930_v40 = vadd.f32 %v7678_v42, %v10816_v0  ;;  %v3937_v36 = vpop.f32.mrb[147].mxu1  ;;  %v4124_v16 = vsel %vm1281_vm1, %v10924_v57, -inf }
 0x747   : > { %4125 = vmax.xlane.f32.xlu1 %v4124_v16  ;;  %v4118_v15 = vsel %vm1281_vm1, %v10927_v55, -inf  ;;  %v10937_v53 = vadd.f32 %v10824_v37, %v3937_v36 }
 0x748   : > { %4119 = vmax.xlane.f32.xlu0 %v4118_v15  ;;  %v4127_v50 = vsel %vm1281_vm1, %v10930_v40, -inf }
 0x749   : > { %v4121_v15 = vsel %vm1281_vm1, %v10937_v53, -inf }
 0x74b   : > { %4128 = vmax.xlane.f32.xlu1 %v4127_v50  ;;  %v7681_v18 = vpop.f32.mrb[148].mxu1 }
 0x74c   : > { %v3950_v31 = vpop.f32.mrb[149].mxu1  ;;  %v10942_v3 = vadd.f32 %v7681_v18, %v10842_v39 }
 0x74d   : > { %v7682_v42 = vpop.f32.mrb[150].mxu1  ;;  %v10955_v56 = vadd.f32 %v10849_v47, %v3950_v31 }
 0x74e   : > { %v10945_v25 = vadd.f32 %v7682_v42, %v10854_v28  ;;  %v3953_v16 = vpop.f32.mrb[151].mxu1  ;;  %v4136_v18 = vsel %vm1281_vm1, %v10942_v3, -inf }
 0x74f   : > { %4122 = vmax.xlane.f32.xlu1 %v4121_v15  ;;  %v10950_v36 = vadd.f32 %v10864_v26, %v3953_v16  ;;  %v4130_v15 = vsel %vm1281_vm1, %v10955_v56, -inf }
 0x750   : > { %v4139_v50 = vsel %vm1281_vm1, %v10945_v25, -inf }
 0x751   : > { %4140 = vmax.xlane.f32.xlu0 %v4139_v50  ;;  %v4133_v42 = vsel %vm1281_vm1, %v10950_v36, -inf }
 0x753   : > { %4137 = vmax.xlane.f32.xlu1 %v4136_v18 }
 0x755   : > { %4134 = vmax.xlane.f32.xlu0 %v4133_v42 }
 0x757   : > { %4131 = vmax.xlane.f32.xlu1 %v4130_v15 }
 0x763   : > { %v7693_v16 = vpop.f32.mrb[152].mxu1 }
 0x764   : > { %v10964_v1 = vadd.f32 %v7693_v16, %v10806_v35  ;;  %v4039_v50 = vpop.f32.mrb[153].mxu1 }
 0x765   : > { %v7694_v45 = vpop.f32.mrb[154].mxu1  ;;  %v10967_v31 = vadd.f32 %v10811_v10, %v4039_v50 }
 0x766   : > { %v10970_v11 = vadd.f32 %v7694_v45, %v10816_v0  ;;  %v4042_v18 = vpop.f32.mrb[155].mxu1  ;;  %v4148_v42 = vsel %vm1281_vm1, %v10964_v1, -inf }
 0x767   : > { %4149 = vmax.xlane.f32.xlu1 %v4148_v42  ;;  %v10975_v4 = vadd.f32 %v10824_v37, %v4042_v18  ;;  %v4142_v15 = vsel %vm1281_vm1, %v10967_v31, -inf }
 0x768   : > { %v4151_v35 = vsel %vm1281_vm1, %v10970_v11, -inf }
 0x769   : > { %4152 = vmax.xlane.f32.xlu0 %v4151_v35  ;;  %v4145_v16 = vsel %vm1281_vm1, %v10975_v4, -inf }
 0x76b   : > { %4143 = vmax.xlane.f32.xlu1 %v4142_v15  ;;  %v7697_v10 = vpop.f32.mrb[156].mxu1 }
 0x76c   : > { %v10982_v45 = vadd.f32 %v7697_v10, %v10842_v39  ;;  %v4055_v0 = vpop.f32.mrb[157].mxu1  ;;  %v12382_v39 = vld [vmem:[#allocation38_spill] sm:$0xff]  ;;  %v11007_v10 = vpop.permute.xlu1 %4556 }
 0x76d   : > { %4146 = vmax.xlane.f32.xlu0 %v4145_v16  ;;  %v7698_v50 = vpop.f32.mrb[158].mxu1  ;;  %v10987_v37 = vadd.f32 %v10849_v47, %v4055_v0  ;;  %v4555_v47 = vpop.permute.xlu0 %4554 }
 0x76e   : > { %12381 = vst [vmem:[#allocation50_spill] sm:$0xff] %v10982_v45  ;;  %v4058_v18 = vpop.f32.mrb[159].mxu1  ;;  %v4160_v42 = vsel %vm1281_vm1, %v10982_v45, -inf }
 0x76f   : > { %4161 = vmax.xlane.f32.xlu1 %v4160_v42  ;;  %v4154_v35 = vsel %vm1281_vm1, %v10987_v37, -inf }
 0x771   : > { %v11003_v15 = vpop.permute.xlu0 %4558 }
 0x773   : > { %4155 = vmax.xlane.f32.xlu1 %v4154_v35 }
 0x783   : > { %4643 = vrot.lane.b32.xlu0 %v9241_v54, %s8790_s14 }
 0x784   : > { %4641 = vrot.lane.b32.xlu1 %v12382_v39, %s8790_s14 }
 0x787   : > { %4645 = vrot.lane.b32.xlu0 %v9259_v30, %s8790_s14 }
 0x788   : > { %5086 = vrot.lane.b32.xlu1 %v12256_v61, %s8791_s26 }
 0x78c   : > { %5076 = vrot.lane.b32.xlu1 %v12259_v52, %s8791_s26 }
 0x790   : > { %5189 = vrot.lane.b32.xlu1 %v12266_v14, %s8791_s26 }
 0x794   : > { %5191 = vrot.lane.b32.xlu1 %v12267_v22, %s8791_s26  ;;  %v4078_v0 = vpop.xlane.xlu0 %4077 }
 0x795   : > { %v4168_v61 = vsub.f32 %v10819_v7, %v4078_v0 }
 0x796   : > { %v4081_v16 = vpop.xlane.xlu1 %4080 }
 0x797   : > { %v4169_v42 = vsub.f32 %v10830_v6, %v4081_v16  ;;  %v4202_v45 = vmul.f32 1.442695, %v4168_v61  ;;  %v11027_v61 = vadd.f32 %v10864_v26, %v4058_v18 }
 0x798   : > { %5195 = vrot.lane.b32.xlu1 %v12262_v17, %s8791_s26  ;;  %v4072_v52 = vpop.xlane.xlu0 %4071 }
 0x799   : > { %v4204_v35 = vmul.f32 1.442695, %v4169_v42  ;;  %v4166_v30 = vsub.f32 %v10827_v51, %v4072_v52 }
 0x79a   : > { %v4075_v54 = vpop.xlane.xlu1 %4074 }
 0x79b   : > { %v4198_v14 = vmul.f32 1.442695, %v4166_v30  ;;  %v4167_v39 = vsub.f32 %v10835_v38, %v4075_v54  ;;  %8468 = vpow2.f32 %v4204_v35  ;;  %v11022_v30 = vadd.f32 %v7698_v50, %v10854_v28 }
 0x79c   : > { %5399 = vrot.lane.b32.xlu1 %v12274_v48, %s8791_s26  ;;  %v4090_v22 = vpop.xlane.xlu0 %4089 }
 0x79d   : > { %v4200_v6 = vmul.f32 1.442695, %v4167_v39  ;;  %8470 = vpow2.f32 %v4198_v14  ;;  %v4172_v0 = vsub.f32 %v10857_v58, %v4090_v22  ;;  %v4163_v58 = vsel %vm1281_vm1, %v11022_v30, -inf }
 0x79e   : > { %v4093_v7 = vpop.xlane.xlu1 %4092 }
 0x79f   : > { %8472 = vpow2.f32 %v4200_v6  ;;  %v4173_v17 = vsub.f32 %v10870_v62, %v4093_v7  ;;  %v4210_v39 = vmul.f32 1.442695, %v4172_v0 }
 0x7a0   : > { %8474 = vpow2.f32 %v4202_v45  ;;  %v4084_v51 = vpop.xlane.xlu0 %4083 }
 0x7a1   : > { %v4212_v54 = vmul.f32 1.442695, %v4173_v17  ;;  %v4170_v38 = vsub.f32 %v10867_v60, %v4084_v51 }
 0x7a2   : > { %v4087_v16 = vpop.xlane.xlu1 %4086 }
 0x7a3   : > { %v4206_v48 = vmul.f32 1.442695, %v4170_v38  ;;  %v4171_v42 = vsub.f32 %v10875_v24, %v4087_v16  ;;  %8476 = vpow2.f32 %v4212_v54  ;;  %v4157_v24 = vsel %vm1281_vm1, %v11027_v61, -inf }
 0x7a5   : > { %v4208_v62 = vmul.f32 1.442695, %v4171_v42  ;;  %8478 = vpow2.f32 %v4206_v48  ;;  %v11031_v28 = vpop.eup %8468 }
 0x7a6   : > { %4164 = vmax.xlane.f32.xlu0 %v4163_v58 }
 0x7a7   : > { %8480 = vpow2.f32 %v4208_v62  ;;  %v11033_v45 = vpop.eup %8470 }
 0x7a8   : > { %8482 = vpow2.f32 %v4210_v39 }
 0x7a9   : > { %v8473_v60 = vpop.eup %8472 }
 0x7aa   : > { %v11037_v50 = vpop.eup %8474  ;;  %4158 = vmax.xlane.f32.xlu0 %v4157_v24  ;;  %v4358_v26 = vpack.c.bf16 %v8473_v60, %v11033_v45 }
 0x7ab   : > { %v4359_v18 = vpack.c.bf16 %v11031_v28, %v11037_v50 }
 0x7ac   : > { %7707 = vmatprep.mubr.msk.bf16.mxu0 %vm1281_vm1, %v4358_v26 }
 0x7ad   : > { %7708 = vmatmul.mubr.msk.bf16.vlgmr.msra.gmra.mrb[152].mxu0 %vm1281_vm1, %v4359_v18  ;;  %v8477_v52 = vpop.eup %8476 }
 0x7ae   : > { %7732 = vmatpush3.bf16.msra.mxu0 %v10775_v33 }
 0x7af   : > { %7733 = vmatprep.subr.bf16.mxu0 %v4555_v47  ;;  %v11045_v35 = vpop.eup %8478 }
 0x7b1   : > { %v8481_v14 = vpop.eup %8480 }
 0x7b2   : > { %v11047_v22 = vpop.eup %8482  ;;  %7734 = vmatpush3.bf16.msra.mxu0 %v4555_v47  ;;  %v4360_v6 = vpack.c.bf16 %v8481_v14, %v11045_v35  ;;  %v4277_v26 = vsel %vm1281_vm1, %v8481_v14, 0.0 }
 0x7b3   : > { %7735 = vmatprep.subr.bf16.mxu0 %v11007_v10  ;;  %v4361_v7 = vpack.c.bf16 %v8477_v52, %v11047_v22 }
 0x7b4   : > { %v4102_v17 = vpop.xlane.xlu1 %4101  ;;  %7711 = vmatprep.mubr.msk.bf16.mxu0 %vm1281_vm1, %v4360_v6 }
 0x7b5   : > { %v4096_v0 = vpop.xlane.xlu0 %4095  ;;  %7712 = vmatmul.mubr.msk.bf16.gmra.mrb[156].mxu0 %vm1281_vm1, %v4361_v7  ;;  %v4176_v33 = vsub.f32 %v10884_v20, %v4102_v17 }
 0x7b6   : > { %7736 = vmatpush3.bf16.msra.mxu0 %v11007_v10  ;;  %v4174_v51 = vsub.f32 %v10887_v2, %v4096_v0  ;;  %v4265_v10 = vsel %vm1281_vm1, %v8473_v60, 0.0 }
 0x7b7   : > { %7737 = vmatprep.subr.bf16.mxu0 %v11003_v15  ;;  %v4218_v38 = vmul.f32 1.442695, %v4176_v33 }
 0x7b8   : > { %v4105_v47 = vpop.xlane.xlu1 %4104  ;;  %v4214_v16 = vmul.f32 1.442695, %v4174_v51 }
 0x7b9   : > { %v4177_v54 = vsub.f32 %v10890_v63, %v4105_v47  ;;  %8484 = vpow2.f32 %v4218_v38 }
 0x7ba   : > { %7738 = vmatpush3.bf16.msra.mxu0 %v11003_v15  ;;  %8486 = vpow2.f32 %v4214_v16  ;;  %v4283_v15 = vsel %vm1281_vm1, %v8477_v52, 0.0 }
 0x7bb   : > { %v4220_v48 = vmul.f32 1.442695, %v4177_v54 }
 0x7bc   : > { %v4099_v42 = vpop.xlane.xlu1 %4098 }
 0x7bd   : > { %v4175_v39 = vsub.f32 %v10897_v12, %v4099_v42  ;;  %8488 = vpow2.f32 %v4220_v48  ;;  %v4108_v2 = vpop.xlane.xlu0 %4107 }
 0x7be   : > { %v4178_v63 = vsub.f32 %v10902_v49, %v4108_v2 }
 0x7bf   : > { %v4216_v20 = vmul.f32 1.442695, %v4175_v39 }
 0x7c0   : > { %v4114_v62 = vpop.xlane.xlu1 %4113  ;;  %4647 = vrot.lane.b32.xlu0 %v9255_v21, %s8790_s14  ;;  %4266 = vadd.xlane.f32.xlu1 %v4265_v10  ;;  %v4222_v24 = vmul.f32 1.442695, %v4178_v63  ;;  %s6906_s14 = sshll.u32 %s8851_s25, 12  ;;  %s11918_s25 = scalar_lea.sflag [#allocation3], %s245_s16 }
 0x7c1   : > { %8490 = vpow2.f32 %v4216_v20  ;;  %v4180_v60 = vsub.f32 %v10905_v23, %v4114_v62  ;;  %s11908_s20 = scalar_lea.hbm %s11965_s6, %s6906_s14 }
 0x7c2   : > { %8492 = vpow2.f32 %v4222_v24 }
 0x7c3   : > { %v8485_v18 = vpop.eup %8484 }
 0x7c4   : > { %v4117_v58 = vpop.xlane.xlu1 %4116  ;;  %5084 = vrot.lane.b32.xlu0 %v12257_v46, %s8791_s26  ;;  %4284 = vadd.xlane.f32.xlu1 %v4283_v15  ;;  %v8487_v49 = vpop.eup %8486  ;;  %v4226_v46 = vmul.f32 1.442695, %v4180_v60  ;;  %v4292_v23 = vsel %vm1281_vm1, %v8485_v18, 0.0 }
 0x7c5   : > { %v4181_v12 = vsub.f32 %v10912_v32, %v4117_v58 }
 0x7c7   : > { %v4228_v6 = vmul.f32 1.442695, %v4181_v12  ;;  %v8489_v17 = vpop.eup %8488 }
 0x7c8   : > { %v4111_v7 = vpop.xlane.xlu1 %4110  ;;  %5088 = vrot.lane.b32.xlu0 %v12258_v9, %s8791_s26  ;;  %4278 = vadd.xlane.f32.xlu1 %v4277_v26  ;;  %v4363_v33 = vpack.c.bf16 %v8489_v17, %v8485_v18  ;;  %v11080_v9 = vld [vmem:[%s11963_s4 + $0x20] sm:$0xff]  }
 0x7c9   : > { %v4179_v52 = vsub.f32 %v10917_v44, %v4111_v7  ;;  %8494 = vpow2.f32 %v4228_v6  ;;  %v4286_v44 = vsel %vm1281_vm1, %v8487_v49, 0.0  ;;  %7763 = vmatprep.subr.bf16.mxu0 %v11080_v9 }
 0x7cb   : > { %v8491_v0 = vpop.eup %8490  ;;  %v4224_v32 = vmul.f32 1.442695, %v4179_v52 }
 0x7cc   : > { %5090 = vrot.lane.b32.xlu0 %v12265_v41, %s8791_s26  ;;  %4293 = vadd.xlane.f32.xlu1 %v4292_v23  ;;  %v4362_v14 = vpack.c.bf16 %v8491_v0, %v8487_v49  ;;  %v4295_v41 = vsel %vm1281_vm1, %v8489_v17, 0.0  ;;  %v11091_v47 = vpop.eup %8492  ;;  %v4289_v42 = vsel %vm1281_vm1, %v8491_v0, 0.0 }
 0x7cd   : > { %8496 = vpow2.f32 %v4224_v32 }
 0x7ce   : > { %8498 = vpow2.f32 %v4226_v46  ;;  %7723 = vmatprep.mubr.msk.bf16.mxu1 %vm1281_vm1, %v4362_v14 }
 0x7cf   : > { %7724 = vmatmul.mubr.msk.bf16.vlgmr.msra.gmra.mrb[160].mxu1 %vm1281_vm1, %v4363_v33 }
 0x7d0   : > { %5078 = vrot.lane.b32.xlu0 %v12260_v59, %s8791_s26  ;;  %4287 = vadd.xlane.f32.xlu1 %v4286_v44 }
 0x7d3   : > { %v11093_v38 = vpop.eup %8494 }
 0x7d4   : > { %v4126_v51 = vpop.xlane.xlu1 %4125  ;;  %5193 = vrot.lane.b32.xlu0 %v12261_v8, %s8791_s26  ;;  %4296 = vadd.xlane.f32.xlu1 %v4295_v41 }
 0x7d5   : > { %v4120_v54 = vpop.xlane.xlu0 %4119  ;;  %v4184_v2 = vsub.f32 %v10924_v57, %v4126_v51 }
 0x7d6   : > { %v4182_v48 = vsub.f32 %v10927_v55, %v4120_v54 }
 0x7d7   : > { %v11095_v16 = vpop.eup %8496  ;;  %v4234_v15 = vmul.f32 1.442695, %v4184_v2 }
 0x7d8   : > { %v11099_v59 = vpop.eup %8498  ;;  %v4129_v39 = vpop.xlane.xlu1 %4128  ;;  %5294 = vrot.lane.b32.xlu0 %v12270_v13, %s8791_s26  ;;  %4290 = vadd.xlane.f32.xlu1 %v4289_v42  ;;  %v4364_v8 = vpack.c.bf16 %v11095_v16, %v11091_v47  ;;  %v4230_v55 = vmul.f32 1.442695, %v4182_v48 }
 0x7d9   : > { %v4185_v20 = vsub.f32 %v10930_v40, %v4129_v39  ;;  %v4365_v10 = vpack.c.bf16 %v11093_v38, %v11099_v59 }
 0x7da   : > { %7727 = vmatprep.mubr.msk.bf16.mxu1 %vm1281_vm1, %v4364_v8  ;;  %8500 = vpow2.f32 %v4230_v55  ;;  %v4268_v55 = vsel %vm1281_vm1, %v11037_v50, 0.0  ;;  %v4280_v50 = vsel %vm1281_vm1, %v11047_v22, 0.0 }
 0x7db   : > { %7728 = vmatmul.mubr.msk.bf16.gmra.mrb[164].mxu1 %vm1281_vm1, %v4365_v10  ;;  %v4236_v62 = vmul.f32 1.442695, %v4185_v20 }
 0x7dc   : > { %v4123_v63 = vpop.xlane.xlu1 %4122  ;;  %5080 = vrot.lane.b32.xlu0 %v12268_v27, %s8791_s26 }
 0x7dd   : > { %v4183_v13 = vsub.f32 %v10937_v53, %v4123_v63  ;;  %8502 = vpow2.f32 %v4236_v62  ;;  %v4262_v63 = vsel %vm1281_vm1, %v11033_v45, 0.0 }
 0x7de   : > { %v4141_v58 = vpop.xlane.xlu0 %4140 }
 0x7df   : > { %v4232_v40 = vmul.f32 1.442695, %v4183_v13  ;;  %v4189_v60 = vsub.f32 %v10945_v25, %v4141_v58 }
 0x7e0   : > { %v4138_v12 = vpop.xlane.xlu1 %4137  ;;  %5082 = vrot.lane.b32.xlu0 %v12269_v43, %s8791_s26 }
 0x7e1   : > { %8504 = vpow2.f32 %v4232_v40  ;;  %v4188_v57 = vsub.f32 %v10942_v3, %v4138_v12  ;;  %v4244_v7 = vmul.f32 1.442695, %v4189_v60  ;;  %v4274_v12 = vsel %vm1281_vm1, %v11045_v35, 0.0 }
 0x7e2   : > { %8506 = vpow2.f32 %v4234_v15  ;;  %v4135_v24 = vpop.xlane.xlu0 %4134  ;;  %v4271_v15 = vsel %vm1281_vm1, %v11031_v28, 0.0 }
 0x7e3   : > { %v4242_v26 = vmul.f32 1.442695, %v4188_v57  ;;  %v4187_v27 = vsub.f32 %v10950_v36, %v4135_v24  ;;  %v4304_v57 = vsel %vm1281_vm1, %v11099_v59, 0.0  ;;  %v4298_v24 = vsel %vm1281_vm1, %v11091_v47, 0.0 }
 0x7e4   : > { %v4132_v53 = vpop.xlane.xlu1 %4131  ;;  %5296 = vrot.lane.b32.xlu0 %v12271_v29, %s8791_s26  ;;  %v8501_v3 = vpop.eup %8500 }
 0x7e5   : > { %v4240_v18 = vmul.f32 1.442695, %v4187_v27  ;;  %v4186_v6 = vsub.f32 %v10955_v56, %v4132_v53  ;;  %8508 = vpow2.f32 %v4242_v26  ;;  %v4310_v13 = vsel %vm1281_vm1, %v8501_v3, 0.0 }
 0x7e6   : > { %v4307_v26 = vsel %vm1281_vm1, %v11093_v38, 0.0 }
 0x7e7   : > { %v4238_v43 = vmul.f32 1.442695, %v4186_v6  ;;  %8510 = vpow2.f32 %v4240_v18  ;;  %v8503_v25 = vpop.eup %8502 }
 0x7e8   : > { %5181 = vrot.lane.b32.xlu0 %v9087_v19, %s8791_s26  ;;  %v8209_v19 = vld [vmem:[%s11963_s4 + $0x28] sm:$0xff]   ;;  %v4319_v58 = vsel %vm1281_vm1, %v8503_v25, 0.0 }
 0x7e9   : > { %8512 = vpow2.f32 %v4238_v43  ;;  %5187 = vrot.lane.b32.xlu1 %v12273_v5, %s8791_s26  ;;  %v12383_v5 = vld [vmem:[#allocation35_spill] sm:$0xff]  ;;  %v12384_v43 = vld [vmem:[#allocation50_spill] sm:$0xff] }
 0x7ea   : > { %8514 = vpow2.f32 %v4244_v7 }
 0x7eb   : > { %v11126_v36 = vpop.eup %8504 }
 0x7ec   : > { %v8507_v29 = vpop.eup %8506  ;;  %5183 = vrot.lane.b32.xlu0 %v9105_v34, %s8791_s26  ;;  %v4366_v56 = vpack.c.bf16 %v11126_v36, %v8501_v3  ;;  %v4313_v45 = vsel %vm1281_vm1, %v11126_v36, 0.0 }
 0x7ed   : > { %v4367_v49 = vpack.c.bf16 %v8503_v25, %v8507_v29  ;;  %v4316_v62 = vsel %vm1281_vm1, %v8507_v29, 0.0 }
 0x7ee   : > { %7739 = vmatprep.mubr.msk.bf16.mxu0 %vm1281_vm1, %v4366_v56 }
 0x7ef   : > { %7740 = vmatmul.mubr.msk.bf16.vlgmr.msra.gmra.mrb[160].mxu0 %vm1281_vm1, %v4367_v49  ;;  %v8509_v52 = vpop.eup %8508 }
 0x7f0   : > { %5298 = vrot.lane.b32.xlu0 %v12383_v5, %s8791_s26  ;;  %7764 = vmatpush3.bf16.msra.mxu0 %v11080_v9  ;;  %v12385_v5 = vld [vmem:[#allocation16_spill] sm:$0xff] }
 0x7f1   : > { %7765 = vmatprep.subr.bf16.mxu0 %v8209_v19  ;;  %v11139_v17 = vpop.eup %8510 }
 0x7f3   : > { %v8513_v34 = vpop.eup %8512 }
 0x7f4   : > { %v11141_v46 = vpop.eup %8514  ;;  %v4150_v0 = vpop.xlane.xlu1 %4149  ;;  %v4368_v32 = vpack.c.bf16 %v11139_v17, %v8513_v34  ;;  %7766 = vmatpush3.bf16.msra.mxu0 %v8209_v19  ;;  %v4322_v60 = vsel %vm1281_vm1, %v8513_v34, 0.0 }
 0x7f5   : > { %v4369_v23 = vpack.c.bf16 %v11141_v46, %v8509_v52 }
 0x7f6   : > { %7743 = vmatprep.mubr.msk.bf16.mxu0 %vm1281_vm1, %v4368_v32  ;;  %v4153_v14 = vpop.xlane.xlu0 %4152 }
 0x7f7   : > { %7744 = vmatmul.mubr.msk.bf16.gmra.mrb[164].mxu0 %vm1281_vm1, %v4369_v23  ;;  %v4193_v28 = vsub.f32 %v10970_v11, %v4153_v14  ;;  %v4331_v11 = vsel %vm1281_vm1, %v11141_v46, 0.0 }
 0x7f8   : > { %v4144_v33 = vpop.xlane.xlu1 %4143 }
 0x7f9   : > { %v4190_v9 = vsub.f32 %v10967_v31, %v4144_v33  ;;  %v4252_v22 = vmul.f32 1.442695, %v4193_v28 }
 0x7fa   : > { %v4147_v44 = vpop.xlane.xlu0 %4146 }
 0x7fb   : > { %v4246_v41 = vmul.f32 1.442695, %v4190_v9  ;;  %v4191_v51 = vsub.f32 %v10975_v4, %v4147_v44  ;;  %v4301_v4 = vsel %vm1281_vm1, %v11095_v16, 0.0  ;;  %v4192_v16 = vsub.f32 %v10964_v1, %v4150_v0 }
 0x7fc   : > { %v11149_v54 = vpop.xlane.xlu1 %4161  ;;  %v4328_v1 = vsel %vm1281_vm1, %v8509_v52, 0.0 }
 0x7fd   : > { %v4248_v48 = vmul.f32 1.442695, %v4191_v51  ;;  %8516 = vpow2.f32 %v4246_v41  ;;  %v4250_v40 = vmul.f32 1.442695, %v4192_v16  ;;  %v4196_v3 = vsub.f32 %v12384_v43, %v11149_v54 }
 0x7fe   : > { %v4644_v39 = vpop.permute.xlu0 %4643 }
 0x7ff   : > { %8518 = vpow2.f32 %v4248_v48  ;;  %v4258_v56 = vmul.f32 1.442695, %v4196_v3 }
 0x800   : > { %v11151_v42 = vpop.xlane.xlu1 %4155  ;;  %8520 = vpow2.f32 %v4250_v40 }
 0x801   : > { %8522 = vpow2.f32 %v4252_v22  ;;  %v4194_v47 = vsub.f32 %v10987_v37, %v11151_v42  ;;  %v12392_v22 = vld [vmem:[#allocation19_spill] sm:$0xff] }
 0x802   : > { %v4646_v31 = vpop.permute.xlu0 %4645 }
 0x803   : > { %v4254_v25 = vmul.f32 1.442695, %v4194_v47  ;;  %v12396_v47 = vld [vmem:[#allocation34_spill] sm:$0xff] }
 0x804   : > { %v4642_v8 = vpop.permute.xlu1 %4641 }
 0x805   : > { %7747 = vmatprep.subr.bf16.mxu1 %v4642_v8 }
 0x806   : > { %7748 = vmatpush3.bf16.msra.mxu1 %v4642_v8 }
 0x807   : > { %7749 = vmatprep.subr.bf16.mxu1 %v4644_v39  ;;  %v8517_v20 = vpop.eup %8516 }
 0x808   : > { %v4334_v27 = vsel %vm1281_vm1, %v8517_v20, 0.0  ;;  %v5087_v46 = vpop.permute.xlu1 %5086 }
 0x809   : > { %v11153_v10 = vpop.eup %8518  ;;  %v5108_v54 = vsel %vm924_vm0, %v5087_v46, 0 }
 0x80a   : > { %7750 = vmatpush3.bf16.msra.mxu1 %v4644_v39  ;;  %v4370_v2 = vpack.c.bf16 %v11153_v10, %v8517_v20  ;;  %v8521_v35 = vpop.eup %8520  ;;  %v12386_v39 = vld [vmem:[#allocation44_spill] sm:$0xff] }
 0x80b   : > { %7751 = vmatprep.subr.bf16.mxu1 %v4646_v31  ;;  %v4340_v59 = vsel %vm1281_vm1, %v8521_v35, 0.0  ;;  %v8523_v53 = vpop.eup %8522 }
 0x80c   : > { %7755 = vmatprep.mubr.msk.bf16.mxu1 %vm1281_vm1, %v4370_v2  ;;  %v4343_v7 = vsel %vm1281_vm1, %v8523_v53, 0.0  ;;  %v4371_v37 = vpack.c.bf16 %v8523_v53, %v8521_v35  ;;  %v5077_v41 = vpop.permute.xlu1 %5076  ;;  %v12395_v53 = vld [vmem:[#allocation32_spill] sm:$0xff] }
 0x80d   : > { %4302 = vadd.xlane.f32.xlu1 %v4301_v4 }
 0x80e   : > { %7752 = vmatpush3.bf16.msra.mxu1 %v4646_v31  ;;  %v12387_v31 = vld [vmem:[#allocation30_spill] sm:$0xff] }
 0x80f   : > { %4269 = vadd.xlane.f32.xlu0 %v4268_v55  ;;  %v12388_v55 = vld [vmem:[#allocation36_spill] sm:$0xff] }
 0x810   : > { %v5190_v20 = vpop.permute.xlu1 %5189 }
 0x811   : > { %4317 = vadd.xlane.f32.xlu1 %v4316_v62  ;;  %v5210_v40 = vsel %vm924_vm0, %v5190_v20, 0 }
 0x813   : > { %4263 = vadd.xlane.f32.xlu0 %v4262_v63  ;;  %v4325_v63 = vsel %vm1281_vm1, %v11139_v17, 0.0 }
 0x814   : > { %v5192_v4 = vpop.permute.xlu1 %5191 }
 0x815   : > { %4311 = vadd.xlane.f32.xlu1 %v4310_v13 }
 0x817   : > { %4272 = vadd.xlane.f32.xlu0 %v4271_v15  ;;  %v12389_v15 = vld [vmem:[#allocation48_spill] sm:$0xff] }
 0x818   : > { %v5196_v16 = vpop.permute.xlu1 %5195 }
 0x819   : > { %4320 = vadd.xlane.f32.xlu1 %v4319_v58  ;;  %v4337_v58 = vsel %vm1281_vm1, %v11153_v10, 0.0  ;;  %v12391_v10 = vld [vmem:[#allocation49_spill] sm:$0xff] }
 0x81b   : > { %4281 = vadd.xlane.f32.xlu0 %v4280_v50  ;;  %v12390_v50 = vld [vmem:[#allocation45_spill] sm:$0xff] }
 0x81d   : > { %4314 = vadd.xlane.f32.xlu1 %v4313_v45 }
 0x81f   : > { %4275 = vadd.xlane.f32.xlu0 %v4274_v12  ;;  %v5400_v12 = vpop.permute.xlu1 %5399 }
 0x821   : > { %4329 = vadd.xlane.f32.xlu1 %v4328_v1 }
 0x823   : > { %4305 = vadd.xlane.f32.xlu0 %v4304_v57 }
 0x825   : > { %4323 = vadd.xlane.f32.xlu1 %v4322_v60  ;;  %v5213_v60 = vsel %vm924_vm0, %v5192_v4, 0 }
 0x827   : > { %4299 = vadd.xlane.f32.xlu0 %v4298_v24 }
 0x829   : > { %4332 = vadd.xlane.f32.xlu1 %v4331_v11  ;;  %v12393_v11 = vld [vmem:[#allocation21_spill] sm:$0xff] }
 0x82b   : > { %4308 = vadd.xlane.f32.xlu0 %v4307_v26  ;;  %v12394_v26 = vld [vmem:[#allocation28_spill] sm:$0xff] }
 0x82d   : > { %4341 = vadd.xlane.f32.xlu1 %v4340_v59 }
 0x831   : > { %4335 = vadd.xlane.f32.xlu1 %v4334_v27 }
 0x833   : > { %v4165_v18 = vpop.xlane.xlu0 %4164 }
 0x834   : > { %v4197_v6 = vsub.f32 %v11022_v30, %v4165_v18  ;;  %v5219_v18 = vsel %vm924_vm0, %v5196_v16, 0 }
 0x835   : > { %4344 = vadd.xlane.f32.xlu1 %v4343_v7 }
 0x836   : > { %v4260_v38 = vmul.f32 1.442695, %v4197_v6 }
 0x837   : > { %v4159_v36 = vpop.xlane.xlu0 %4158 }
 0x838   : > { %8524 = vpow2.f32 %v4260_v38  ;;  %v4195_v29 = vsub.f32 %v11027_v61, %v4159_v36 }
 0x839   : > { %8526 = vpow2.f32 %v4254_v25 }
 0x83a   : > { %v4256_v49 = vmul.f32 1.442695, %v4195_v29  ;;  %v5420_v29 = vsel %vm924_vm0, %v5400_v12, 0 }
 0x83b   : > { %v4648_v19 = vpop.permute.xlu0 %4647 }
 0x83c   : > { %8528 = vpow2.f32 %v4256_v49  ;;  %7753 = vmatprep.subr.bf16.mxu1 %v4648_v19 }
 0x83d   : > { %8530 = vpow2.f32 %v4258_v56  ;;  %7754 = vmatpush3.bf16.msra.mxu1 %v4648_v19  ;;  %v12397_v56 = vld [vmem:[#allocation40_spill] sm:$0xff] }
 0x83f   : > { %v5085_v30 = vpop.permute.xlu0 %5084 }
 0x840   : > { %7756 = vmatmul.mubr.msk.bf16.vlgmr.msra.gmra.mrb[168].mxu1 %vm1281_vm1, %v4371_v37  ;;  %8111 = vmatprep.subr.msk.bf16.mxu1 %vm924_vm0, %v5085_v30  ;;  %v5105_v32 = vsel %vm924_vm0, %v5085_v30, 0  ;;  %v12398_v30 = vld [vmem:[#allocation24_spill] sm:$0xff] }
 0x841   : > { %5185 = vrot.lane.b32.xlu0 %v12385_v5, %s8791_s26 }
 0x842   : > { %v8525_v52 = vpop.eup %8524 }
 0x843   : > { %v5089_v34 = vpop.permute.xlu0 %5088  ;;  %v4355_v61 = vsel %vm1281_vm1, %v8525_v52, 0.0  ;;  %v8527_v0 = vpop.eup %8526 }
 0x844   : > { %4356 = vadd.xlane.f32.xlu1 %v4355_v61  ;;  %v5111_v8 = vsel %vm924_vm0, %v5089_v34, 0  ;;  %v4346_v28 = vsel %vm1281_vm1, %v8527_v0, 0.0 }
 0x846   : > { %v8529_v23 = vpop.eup %8528  ;;  %7800 = vmatpush3.bf16.xpose.msra.mxu1 %v5105_v32  ;;  %v12401_v32 = vld [vmem:[#allocation43_spill] sm:$0xff] }
 0x847   : > { %v8531_v14 = vpop.eup %8530  ;;  %8112 = vmatprep.subr.msk.bf16.mxu1 %vm924_vm0, %v5087_v46  ;;  %v5091_v33 = vpop.permute.xlu0 %5090  ;;  %v4372_v9 = vpack.c.bf16 %v8529_v23, %v8527_v0  ;;  %v4349_v24 = vsel %vm1281_vm1, %v8529_v23, 0.0  ;;  %v12400_v46 = vld [vmem:[#allocation41_spill] sm:$0xff] }
 0x848   : > { %v4373_v44 = vpack.c.bf16 %v8525_v52, %v8531_v14  ;;  %v5114_v62 = vsel %vm924_vm0, %v5091_v33, 0  ;;  %v4352_v45 = vsel %vm1281_vm1, %v8531_v14, 0.0 }
 0x849   : > { %7759 = vmatprep.mubr.msk.bf16.mxu1 %vm1281_vm1, %v4372_v9 }
 0x84a   : > { %7760 = vmatmul.mubr.msk.bf16.gmra.mrb[172].mxu1 %vm1281_vm1, %v4373_v44 }
 0x84b   : > { %7807 = vmatprep.mubr.msk.bf16.mxu1 %vm924_vm0, %v5077_v41  ;;  %v5079_v51 = vpop.permute.xlu0 %5078  ;;  %v12403_v41 = vld [vmem:[#allocation20_spill] sm:$0xff] }
 0x84d   : > { %v4267_v1 = vpop.xlane.xlu1 %4266 }
 0x84e   : > { %7802 = vmatpush3.bf16.xpose.msra.mxu1 %v5108_v54 }
 0x84f   : > { %8113 = vmatprep.subr.msk.bf16.mxu1 %vm924_vm0, %v5089_v34  ;;  %v5194_v48 = vpop.permute.xlu0 %5193  ;;  %v12399_v34 = vld [vmem:[#allocation46_spill] sm:$0xff] }
 0x850   : > { %v5216_v59 = vsel %vm924_vm0, %v5194_v48, 0 }
 0x851   : > { %v11248_v35 = vpop.xlane.xlu1 %4284 }
 0x853   : > { %v11207_v42 = vpop.permute.xlu0 %5294 }
 0x854   : > { %8119 = vmatprep.subr.msk.bf16.mxu0 %vm924_vm0, %v11207_v42 }
 0x855   : > { %5401 = vrot.lane.b32.xlu1 %v12386_v39, %s8791_s26  ;;  %v11254_v27 = vpop.xlane.xlu1 %4278 }
 0x856   : > { %7804 = vmatpush3.bf16.xpose.msra.mxu1 %v5111_v8  ;;  %v12404_v8 = vld [vmem:[#allocation22_spill] sm:$0xff] }
 0x857   : > { %8114 = vmatprep.subr.msk.bf16.mxu1 %vm924_vm0, %v5091_v33  ;;  %v5081_v2 = vpop.permute.xlu0 %5080  ;;  %v12402_v33 = vld [vmem:[#allocation47_spill] sm:$0xff] }
 0x859   : > { %5288 = vrot.lane.b32.xlu1 %v12387_v31, %s8791_s26  ;;  %v4294_v6 = vpop.xlane.xlu1 %4293 }
 0x85a   : > { %8532 = vrcp.f32 %v4294_v6 }
 0x85b   : > { %v5083_v13 = vpop.permute.xlu0 %5082 }
 0x85d   : > { %5290 = vrot.lane.b32.xlu1 %v12388_v55, %s8791_s26  ;;  %v4288_v25 = vpop.xlane.xlu1 %4287 }
 0x85e   : > { %7806 = vmatpush3.bf16.xpose.msra.mxu1 %v5114_v62  ;;  %8534 = vrcp.f32 %v4288_v25 }
 0x85f   : > { %8115 = vmatprep.subr.msk.bf16.mxu1 %vm924_vm0, %v5190_v20  ;;  %v11232_v17 = vpop.permute.xlu0 %5296 }
 0x860   : > { %4326 = vadd.xlane.f32.xlu0 %v4325_v63 }
 0x861   : > { %5405 = vrot.lane.b32.xlu1 %v12389_v15, %s8791_s26  ;;  %v4297_v37 = vpop.xlane.xlu1 %4296 }
 0x862   : > { %8536 = vrcp.f32 %v4297_v37  ;;  %v12408_v37 = vld [vmem:[#allocation31_spill] sm:$0xff] }
 0x863   : > { %v5182_v57 = vpop.permute.xlu0 %5181 }
 0x864   : > { %4338 = vadd.xlane.f32.xlu0 %v4337_v58  ;;  %v8533_v54 = vpop.eup %8532 }
 0x865   : > { %5393 = vrot.lane.b32.xlu1 %v12390_v50, %s8791_s26  ;;  %7808 = vmatmul.mubr.msk.bf16.vlgmr.msra.gmra.mrb[176].mxu1 %vm924_vm0, %v5079_v51  ;;  %v4291_v61 = vpop.xlane.xlu1 %4290 }
 0x866   : > { %7811 = vmatprep.mubr.msk.bf16.mxu1 %vm924_vm0, %v5081_v2  ;;  %7816 = vmatpush3.bf16.xpose.msra.mxu1 %v5210_v40  ;;  %8538 = vrcp.f32 %v4291_v61  ;;  %v12405_v40 = vld [vmem:[#allocation26_spill] sm:$0xff] }
 0x867   : > { %8116 = vmatprep.subr.msk.bf16.mxu1 %vm924_vm0, %v5192_v4  ;;  %v5184_v36 = vpop.permute.xlu0 %5183  ;;  %8540 = vrcp.f32 %v4267_v1 }
 0x868   : > { %4353 = vadd.xlane.f32.xlu0 %v4352_v45  ;;  %v8535_v20 = vpop.eup %8534 }
 0x869   : > { %5397 = vrot.lane.b32.xlu1 %v12391_v10, %s8791_s26  ;;  %v11286_v0 = vpop.permute.xlu1 %5187 }
 0x86b   : > { %v11290_v23 = vpop.permute.xlu0 %5298 }
 0x86c   : > { %4347 = vadd.xlane.f32.xlu0 %v4346_v28  ;;  %v8537_v2 = vpop.eup %8536 }
 0x86d   : > { %5802 = vrot.lane.b32.xlu1 %v12392_v22, %s8791_s26  ;;  %7812 = vmatmul.mubr.msk.bf16.gmra.mrb[180].mxu1 %vm924_vm0, %v5083_v13 }
 0x86e   : > { %7818 = vmatpush3.bf16.xpose.msra.mxu1 %v5213_v60  ;;  %7823 = vmatprep.mubr.msk.bf16.mxu1 %vm924_vm0, %v5182_v57  ;;  %v12406_v57 = vld [vmem:[#allocation25_spill] sm:$0xff] }
 0x86f   : > { %8117 = vmatprep.subr.msk.bf16.mxu1 %vm924_vm0, %v5194_v48 }
 0x870   : > { %4350 = vadd.xlane.f32.xlu0 %v4349_v24  ;;  %v8539_v62 = vpop.eup %8538 }
 0x871   : > { %5806 = vrot.lane.b32.xlu1 %v12393_v11, %s8791_s26  ;;  %v8541_v28 = vpop.eup %8540 }
 0x875   : > { %5893 = vrot.lane.b32.xlu1 %v12394_v26, %s8791_s26 }
 0x876   : > { %7820 = vmatpush3.bf16.xpose.msra.mxu1 %v5216_v59  ;;  %v12407_v59 = vld [vmem:[#allocation27_spill] sm:$0xff] }
 0x877   : > { %8118 = vmatprep.subr.msk.bf16.mxu1 %vm924_vm0, %v5196_v16 }
 0x879   : > { %5978 = vrot.lane.b32.xlu1 %v12395_v53, %s8791_s26 }
 0x87d   : > { %5982 = vrot.lane.b32.xlu1 %v12396_v47, %s8791_s26 }
 0x87e   : > { %7822 = vmatpush3.bf16.xpose.msra.mxu1 %v5219_v18 }
 0x87f   : > { %8123 = vmatprep.subr.msk.bf16.mxu1 %vm924_vm0, %v5400_v12 }
 0x880   : > { %v11262_v7 = vpop.f32.mrb[152].mxu0 }
 0x881   : > { %v11264_v43 = vpop.f32.mrb[153].mxu0 }
 0x882   : > { %v11266_v3 = vpop.f32.mrb[154].mxu0 }
 0x883   : > { %v4435_v38 = vpop.f32.mrb[155].mxu0 }
 0x884   : > { %v4763_v60 = vmul.f32 %v8541_v28, %v4435_v38 }
 0x885   : > { %7824 = vmatmul.mubr.msk.bf16.vlgmr.msra.gmra.mrb[184].mxu1 %vm924_vm0, %v5184_v36 }
 0x886   : > { %5300 = vrot.lane.b32.xlu0 %v12397_v56, %s8791_s26  ;;  %7848 = vmatpush3.bf16.xpose.msra.mxu1 %v5420_v29 }
 0x888   : > { %v11272_v49 = vpop.f32.mrb[156].mxu0 }
 0x889   : > { %v11274_v19 = vpop.f32.mrb[157].mxu0 }
 0x88a   : > { %5286 = vrot.lane.b32.xlu0 %v12398_v30, %s8791_s26  ;;  %v11278_v5 = vpop.f32.mrb[158].mxu0 }
 0x88b   : > { %v11280_v52 = vpop.f32.mrb[159].mxu0 }
 0x88e   : > { %5403 = vrot.lane.b32.xlu0 %v12399_v34, %s8791_s26 }
 0x892   : > { %5292 = vrot.lane.b32.xlu0 %v12400_v46, %s8791_s26 }
 0x896   : > { %5391 = vrot.lane.b32.xlu0 %v12401_v32, %s8791_s26 }
 0x89a   : > { %v4303_v14 = vpop.xlane.xlu1 %4302  ;;  %5395 = vrot.lane.b32.xlu0 %v12402_v33, %s8791_s26 }
 0x89c   : > { %v4270_v9 = vpop.xlane.xlu0 %4269 }
 0x89e   : > { %v11294_v44 = vpop.xlane.xlu1 %4317  ;;  %5800 = vrot.lane.b32.xlu0 %v12403_v41, %s8791_s26 }
 0x8a0   : > { %v4264_v51 = vpop.xlane.xlu0 %4263 }
 0x8a1   : > { %8542 = vrcp.f32 %v4264_v51  ;;  %v5318_v51 = vsel %vm924_vm0, %v11232_v17, 0 }
 0x8a2   : > { %v7725_v48 = vpop.f32.mrb[160].mxu1  ;;  %v11298_v39 = vpop.xlane.xlu1 %4311  ;;  %5804 = vrot.lane.b32.xlu0 %v12404_v8, %s8791_s26  ;;  %8544 = vrcp.f32 %v4270_v9 }
 0x8a3   : > { %v4521_v31 = vpop.f32.mrb[161].mxu1  ;;  %v11302_v63 = vmul.f32 %v8533_v54, %v7725_v48 }
 0x8a4   : > { %v7726_v4 = vpop.f32.mrb[162].mxu1  ;;  %v4273_v55 = vpop.xlane.xlu0 %4272  ;;  %v11306_v16 = vmul.f32 %v8535_v20, %v4521_v31 }
 0x8a5   : > { %v11304_v13 = vmul.f32 %v8537_v2, %v7726_v4  ;;  %8546 = vrcp.f32 %v4273_v55  ;;  %v4524_v15 = vpop.f32.mrb[163].mxu1 }
 0x8a6   : > { %v11308_v58 = vmul.f32 %v8539_v62, %v4524_v15  ;;  %v4321_v50 = vpop.xlane.xlu1 %4320  ;;  %5889 = vrot.lane.b32.xlu0 %v12405_v40, %s8791_s26  ;;  %8548 = vrcp.f32 %v11248_v35 }
 0x8a7   : > { %v4799_v45 = vpack.c.bf16 %v11304_v13, %v11302_v63 }
 0x8a8   : > { %v4798_v12 = vpack.c.bf16 %v11308_v58, %v11306_v16  ;;  %v4282_v10 = vpop.xlane.xlu0 %4281  ;;  %v5321_v58 = vsel %vm924_vm0, %v11290_v23, 0 }
 0x8a9   : > { %8550 = vrcp.f32 %v4282_v10 }
 0x8aa   : > { %v4315_v1 = vpop.xlane.xlu1 %4314  ;;  %5891 = vrot.lane.b32.xlu0 %v12406_v57, %s8791_s26  ;;  %8552 = vrcp.f32 %v11254_v27 }
 0x8ab   : > { %v8543_v22 = vpop.eup %8542 }
 0x8ac   : > { %v4276_v24 = vpop.xlane.xlu0 %4275  ;;  %v4762_v11 = vmul.f32 %v8543_v22, %v11264_v43  ;;  %v8545_v26 = vpop.eup %8544 }
 0x8ad   : > { %8554 = vrcp.f32 %v4276_v24  ;;  %v4764_v25 = vmul.f32 %v8545_v26, %v11262_v7  ;;  %v5315_v7 = vsel %vm924_vm0, %v11207_v42, 0 }
 0x8ae   : > { %v11321_v35 = vpop.f32.mrb[164].mxu1  ;;  %5895 = vrot.lane.b32.xlu0 %v12407_v59, %s8791_s26  ;;  %v4794_v53 = vpack.c.bf16 %v4763_v60, %v4762_v11  ;;  %v4330_v18 = vpop.xlane.xlu1 %4329  ;;  %8556 = vrcp.f32 %v4303_v14 }
 0x8af   : > { %v8547_v47 = vpop.eup %8546  ;;  %v4537_v6 = vpop.f32.mrb[165].mxu1 }
 0x8b0   : > { %v4765_v36 = vmul.f32 %v8547_v47, %v11266_v3  ;;  %v7730_v27 = vpop.f32.mrb[166].mxu1  ;;  %7767 = vmatprep.mubr.msk.bf16.mxu0 %vm924_vm0, %v4794_v53  ;;  %v4306_v38 = vpop.xlane.xlu0 %4305 }
 0x8b1   : > { %v4540_v43 = vpop.f32.mrb[167].mxu1  ;;  %v8549_v29 = vpop.eup %8548 }
 0x8b2   : > { %v4795_v56 = vpack.c.bf16 %v4765_v36, %v4764_v25  ;;  %5980 = vrot.lane.b32.xlu0 %v12408_v37, %s8791_s26  ;;  %v4769_v34 = vmul.f32 %v8549_v29, %v11278_v5  ;;  %v11335_v46 = vpop.xlane.xlu1 %4323  ;;  %v12409_v5 = vld [vmem:[#allocation33_spill] sm:$0xff] }
 0x8b3   : > { %v8551_v30 = vpop.eup %8550 }
 0x8b4   : > { %7768 = vmatmul.mubr.msk.bf16.vlgmr.msra.gmra.mrb[120].mxu0 %vm924_vm0, %v4795_v56  ;;  %v4300_v3 = vpop.xlane.xlu0 %4299  ;;  %v4768_v61 = vmul.f32 %v8551_v30, %v11272_v49  ;;  %v8553_v32 = vpop.eup %8552 }
 0x8b5   : > { %7832 = vmatpush3.bf16.xpose.msra.mxu0 %v5315_v7  ;;  %8558 = vrcp.f32 %v4300_v3  ;;  %v4767_v42 = vmul.f32 %v8553_v32, %v11280_v52 }
 0x8b6   : > { %8560 = vrcp.f32 %v11294_v44  ;;  %8120 = vmatprep.subr.msk.bf16.mxu0 %vm924_vm0, %v11232_v17  ;;  %5984 = vrot.lane.b32.xlu0 %v12409_v5, %s8791_s26  ;;  %v4797_v14 = vpack.c.bf16 %v4769_v34, %v4768_v61  ;;  %v4333_v44 = vpop.xlane.xlu1 %4332 }
 0x8b7   : > { %v8555_v33 = vpop.eup %8554  ;;  %8562 = vrcp.f32 %v4306_v38 }
 0x8b8   : > { %8564 = vrcp.f32 %v11298_v39  ;;  %v4309_v49 = vpop.xlane.xlu0 %4308  ;;  %v4766_v9 = vmul.f32 %v8555_v33, %v11274_v19  ;;  %v8557_v52 = vpop.eup %8556 }
 0x8b9   : > { %8566 = vrcp.f32 %v4309_v49  ;;  %v4775_v48 = vmul.f32 %v8557_v52, %v4540_v43 }
 0x8ba   : > { %8568 = vrcp.f32 %v4321_v50  ;;  %v4796_v41 = vpack.c.bf16 %v4767_v42, %v4766_v9  ;;  %v11358_v20 = vpop.xlane.xlu1 %4341 }
 0x8bb   : > { %8570 = vrcp.f32 %v4315_v1 }
 0x8bc   : > { %7771 = vmatprep.mubr.msk.bf16.mxu0 %vm924_vm0, %v4796_v41  ;;  %v5186_v54 = vpop.permute.xlu0 %5185  ;;  %8572 = vrcp.f32 %v4330_v18 }
 0x8bd   : > { %7834 = vmatpush3.bf16.xpose.msra.mxu0 %v5318_v51  ;;  %7827 = vmatprep.mubr.msk.bf16.mxu1 %vm924_vm0, %v5186_v54  ;;  %8574 = vrcp.f32 %v4333_v44 }
 0x8be   : > { %7772 = vmatmul.mubr.msk.bf16.gmra.mrb[124].mxu0 %vm924_vm0, %v4797_v14  ;;  %8121 = vmatprep.subr.msk.bf16.mxu0 %vm924_vm0, %v11290_v23  ;;  %v4336_v60 = vpop.xlane.xlu1 %4335  ;;  %8576 = vrcp.f32 %v11335_v46 }
 0x8bf   : > { %v8559_v19 = vpop.eup %8558  ;;  %7775 = vmatprep.mubr.msk.bf16.mxu0 %vm924_vm0, %v4798_v12  ;;  %7828 = vmatmul.mubr.msk.bf16.gmra.mrb[188].mxu1 %vm924_vm0, %v11286_v0 }
 0x8c0   : > { %v8561_v17 = vpop.eup %8560  ;;  %v4774_v39 = vmul.f32 %v8559_v19, %v4537_v6 }
 0x8c1   : > { %v8563_v8 = vpop.eup %8562 }
 0x8c2   : > { %v8565_v31 = vpop.eup %8564  ;;  %v7741_v2 = vpop.f32.mrb[160].mxu0  ;;  %v4800_v4 = vpack.c.bf16 %v4775_v48, %v4774_v39  ;;  %v4776_v0 = vmul.f32 %v8563_v8, %v11321_v35 }
 0x8c3   : > { %v8567_v55 = vpop.eup %8566  ;;  %v4610_v62 = vpop.f32.mrb[161].mxu0  ;;  %v4780_v12 = vmul.f32 %v8561_v17, %v7741_v2 }
 0x8c4   : > { %v8569_v15 = vpop.eup %8568  ;;  %v7742_v16 = vpop.f32.mrb[162].mxu0  ;;  %v4777_v50 = vmul.f32 %v8567_v55, %v7730_v27  ;;  %v4778_v1 = vmul.f32 %v8565_v31, %v4610_v62 }
 0x8c5   : > { %v8571_v40 = vpop.eup %8570  ;;  %v4781_v10 = vmul.f32 %v8569_v15, %v7742_v16  ;;  %7836 = vmatpush3.bf16.xpose.msra.mxu0 %v5321_v58  ;;  %v4613_v28 = vpop.f32.mrb[163].mxu0 }
 0x8c6   : > { %v4779_v57 = vmul.f32 %v8571_v40, %v4613_v28  ;;  %7776 = vmatmul.mubr.msk.bf16.gmra.mrb[128].mxu0 %vm924_vm0, %v4799_v45  ;;  %v4801_v22 = vpack.c.bf16 %v4777_v50, %v4776_v0  ;;  %v8573_v26 = vpop.eup %8572  ;;  %v4345_v47 = vpop.xlane.xlu1 %4344 }
 0x8c7   : > { %v4803_v24 = vpack.c.bf16 %v4781_v10, %v4780_v12  ;;  %7779 = vmatprep.mubr.msk.bf16.mxu0 %vm924_vm0, %v4800_v4  ;;  %v8575_v59 = vpop.eup %8574 }
 0x8c8   : > { %v4802_v23 = vpack.c.bf16 %v4779_v57, %v4778_v1  ;;  %v8577_v34 = vpop.eup %8576 }
 0x8ca   : > { %v7745_v11 = vpop.f32.mrb[164].mxu0 }
 0x8cb   : > { %v4626_v35 = vpop.f32.mrb[165].mxu0  ;;  %v4784_v18 = vmul.f32 %v8573_v26, %v7745_v11 }
 0x8cc   : > { %v7746_v53 = vpop.f32.mrb[166].mxu0  ;;  %v4782_v3 = vmul.f32 %v8577_v34, %v4626_v35 }
 0x8cd   : > { %v4785_v6 = vmul.f32 %v8575_v59, %v7746_v53  ;;  %v4629_v25 = vpop.f32.mrb[167].mxu0 }
 0x8ce   : > { %7780 = vmatmul.mubr.msk.bf16.gmra.mrb[132].mxu0 %vm924_vm0, %v4801_v22 }
 0x8cf   : > { %v4805_v63 = vpack.c.bf16 %v4785_v6, %v4784_v18  ;;  %7783 = vmatprep.mubr.msk.bf16.mxu0 %vm924_vm0, %v4802_v23 }
 0x8d1   : > { %v4357_v13 = vpop.xlane.xlu1 %4356 }
 0x8d5   : > { %v5402_v45 = vpop.permute.xlu1 %5401 }
 0x8d6   : > { %v5423_v36 = vsel %vm924_vm0, %v5402_v45, 0  ;;  %7784 = vmatmul.mubr.msk.bf16.gmra.mrb[136].mxu0 %vm924_vm0, %v4803_v24  ;;  %8124 = vmatprep.subr.msk.bf16.mxu1 %vm924_vm0, %v5402_v45 }
 0x8d7   : > { %7850 = vmatpush3.bf16.xpose.msra.mxu1 %v5423_v36 }
 0x8d9   : > { %v11373_v27 = vpop.permute.xlu1 %5288 }
 0x8dd   : > { %v11375_v38 = vpop.permute.xlu1 %5290 }
 0x8e1   : > { %v5406_v29 = vpop.permute.xlu1 %5405 }
 0x8e2   : > { %v5429_v17 = vsel %vm924_vm0, %v5406_v29, 0 }
 0x8e5   : > { %v5394_v37 = vpop.permute.xlu1 %5393 }
 0x8e9   : > { %v11378_v5 = vpop.permute.xlu1 %5397 }
 0x8ed   : > { %v4327_v43 = vpop.xlane.xlu0 %4326  ;;  %v11382_v46 = vpop.permute.xlu1 %5802 }
 0x8ee   : > { %8578 = vrcp.f32 %v4327_v43 }
 0x8ef   : > { %8580 = vrcp.f32 %v11358_v20 }
 0x8f0   : > { %8582 = vrcp.f32 %v4336_v60 }
 0x8f1   : > { %v4339_v56 = vpop.xlane.xlu0 %4338  ;;  %v11388_v41 = vpop.permute.xlu1 %5806  ;;  %8584 = vrcp.f32 %v4345_v47 }
 0x8f2   : > { %8586 = vrcp.f32 %v4339_v56 }
 0x8f3   : > { %8588 = vrcp.f32 %v4357_v13 }
 0x8f5   : > { %v4354_v30 = vpop.xlane.xlu0 %4353  ;;  %v11394_v54 = vpop.permute.xlu1 %5893 }
 0x8f6   : > { %8590 = vrcp.f32 %v4354_v30  ;;  %v11441_v30 = vld [vmem:[%s11962_s3 + $0xc8] sm:$0xff] }
 0x8f8   : > { %v8579_v7 = vpop.eup %8578 }
 0x8f9   : > { %v4348_v61 = vpop.xlane.xlu0 %4347  ;;  %v4783_v32 = vmul.f32 %v8579_v7, %v4629_v25  ;;  %v8581_v48 = vpop.eup %8580 }
 0x8fa   : > { %v5979_v39 = vpop.permute.xlu1 %5978  ;;  %v8583_v20 = vpop.eup %8582  ;;  %8592 = vrcp.f32 %v4348_v61 }
 0x8fb   : > { %v4804_v14 = vpack.c.bf16 %v4783_v32, %v4782_v3  ;;  %v8585_v4 = vpop.eup %8584  ;;  %v11452_v32 = vld [vmem:[%s11962_s3 + $0xd8] sm:$0xff] }
 0x8fc   : > { %v8587_v16 = vpop.eup %8586 }
 0x8fd   : > { %7787 = vmatprep.mubr.msk.bf16.mxu0 %vm924_vm0, %v4804_v14  ;;  %v4351_v33 = vpop.xlane.xlu0 %4350  ;;  %v8589_v28 = vpop.eup %8588 }
 0x8fe   : > { %7788 = vmatmul.mubr.msk.bf16.gmra.mrb[140].mxu0 %vm924_vm0, %v4805_v63  ;;  %8594 = vrcp.f32 %v4351_v33  ;;  %v5983_v36 = vpop.permute.xlu1 %5982 }
 0x900   : > { %v8591_v22 = vpop.eup %8590 }
 0x901   : > { %v5301_v42 = vpop.permute.xlu0 %5300 }
 0x902   : > { %v5324_v49 = vsel %vm924_vm0, %v5301_v42, 0  ;;  %8122 = vmatprep.subr.msk.bf16.mxu0 %vm924_vm0, %v5301_v42  ;;  %v11468_v42 = vld [vmem:[%s11962_s3 + $0xf0] sm:$0xff] }
 0x903   : > { %7838 = vmatpush3.bf16.xpose.msra.mxu0 %v5324_v49 }
 0x904   : > { %v8593_v24 = vpop.eup %8592 }
 0x905   : > { %v11386_v9 = vpop.permute.xlu0 %5286 }
 0x908   : > { %v8595_v11 = vpop.eup %8594 }
 0x909   : > { %v5404_v44 = vpop.permute.xlu0 %5403 }
 0x90a   : > { %v5426_v51 = vsel %vm924_vm0, %v5404_v44, 0  ;;  %8125 = vmatprep.subr.msk.bf16.mxu1 %vm924_vm0, %v5404_v44 }
 0x90b   : > { %7852 = vmatpush3.bf16.xpose.msra.mxu1 %v5426_v51  ;;  %v11478_v51 = vld [vmem:[%s11962_s3 + $0xe8] sm:$0xff] }
 0x90c   : > { %8126 = vmatprep.subr.msk.bf16.mxu1 %vm924_vm0, %v5406_v29  ;;  %v11433_v29 = vld [vmem:[%s11962_s3 + $0xc0] sm:$0xff] }
 0x90d   : > { %v11396_v52 = vpop.permute.xlu0 %5292 }
 0x911   : > { %v5392_v19 = vpop.permute.xlu0 %5391 }
 0x912   : > { %7855 = vmatprep.mubr.msk.bf16.mxu1 %vm924_vm0, %v5392_v19 }
 0x913   : > { %v7757_v8 = vpop.f32.mrb[168].mxu1  ;;  %7854 = vmatpush3.bf16.xpose.msra.mxu1 %v5429_v17 }
 0x914   : > { %v4788_v31 = vmul.f32 %v8581_v48, %v7757_v8  ;;  %v4699_v2 = vpop.f32.mrb[169].mxu1  ;;  %7895 = vmatprep.subr.bf16.mxu1 %v5979_v39 }
 0x915   : > { %v4786_v55 = vmul.f32 %v8583_v20, %v4699_v2  ;;  %v7758_v62 = vpop.f32.mrb[170].mxu1  ;;  %v5396_v15 = vpop.permute.xlu0 %5395 }
 0x916   : > { %v4789_v58 = vmul.f32 %v8585_v4, %v7758_v62  ;;  %v4702_v0 = vpop.f32.mrb[171].mxu1 }
 0x917   : > { %v4787_v50 = vmul.f32 %v8587_v16, %v4702_v0 }
 0x918   : > { %v4807_v40 = vpack.c.bf16 %v4789_v58, %v4788_v31 }
 0x919   : > { %v4806_v12 = vpack.c.bf16 %v4787_v50, %v4786_v55  ;;  %v5801_v10 = vpop.permute.xlu0 %5800 }
 0x91a   : > { %7856 = vmatmul.mubr.msk.bf16.vlgmr.msra.gmra.mrb[192].mxu1 %vm924_vm0, %v5394_v37  ;;  %7863 = vmatprep.subr.bf16.mxu0 %v5801_v10 }
 0x91b   : > { %7791 = vmatprep.mubr.msk.bf16.mxu0 %vm924_vm0, %v4806_v12  ;;  %7859 = vmatprep.mubr.msk.bf16.mxu1 %vm924_vm0, %v5396_v15 }
 0x91c   : > { %7896 = vmatpush3.bf16.msra.mxu1 %v5979_v39  ;;  %7792 = vmatmul.mubr.msk.bf16.gmra.mrb[144].mxu0 %vm924_vm0, %v4807_v40  ;;  %v11491_v39 = vld [vmem:[%s11962_s3 + $0xe0] sm:$0xff] }
 0x91d   : > { %v7761_v1 = vpop.f32.mrb[172].mxu1  ;;  %v5805_v57 = vpop.permute.xlu0 %5804 }
 0x91e   : > { %v4715_v60 = vpop.f32.mrb[173].mxu1  ;;  %v4792_v26 = vmul.f32 %v8591_v22, %v7761_v1 }
 0x91f   : > { %v7762_v23 = vpop.f32.mrb[174].mxu1  ;;  %v4790_v53 = vmul.f32 %v8593_v24, %v4715_v60 }
 0x920   : > { %v4793_v35 = vmul.f32 %v8589_v28, %v7762_v23  ;;  %v4718_v59 = vpop.f32.mrb[175].mxu1 }
 0x921   : > { %v4791_v47 = vmul.f32 %v8595_v11, %v4718_v59  ;;  %v11404_v18 = vpop.permute.xlu0 %5889 }
 0x922   : > { %v4809_v6 = vpack.c.bf16 %v4793_v35, %v4792_v26  ;;  %7860 = vmatmul.mubr.msk.bf16.gmra.mrb[196].mxu1 %vm924_vm0, %v11378_v5 }
 0x923   : > { %v4808_v25 = vpack.c.bf16 %v4791_v47, %v4790_v53 }
 0x925   : > { %7795 = vmatprep.mubr.msk.bf16.mxu0 %vm924_vm0, %v4808_v25  ;;  %v11409_v63 = vpop.permute.xlu0 %5891 }
 0x926   : > { %7796 = vmatmul.mubr.msk.bf16.gmra.mrb[148].mxu0 %vm924_vm0, %v4809_v6 }
 0x927   : > { %7839 = vmatprep.mubr.msk.bf16.mxu0 %vm924_vm0, %v11386_v9  ;;  %v11473_v9 = vld [vmem:[%s11962_s3 + $0xf8] sm:$0xff] }
 0x929   : > { %v11414_v13 = vpop.permute.xlu0 %5895 }
 0x92d   : > { %v5981_v45 = vpop.permute.xlu0 %5980 }
 0x92e   : > { %7840 = vmatmul.mubr.msk.bf16.vlgmr.msra.gmra.mrb[168].mxu0 %vm924_vm0, %v11373_v27  ;;  %7897 = vmatprep.subr.bf16.mxu1 %v5981_v45  ;;  %v11427_v27 = vld [vmem:[%s11962_s3 + $0xd0] sm:$0xff] }
 0x92f   : > { %7864 = vmatpush3.bf16.msra.mxu0 %v5801_v10  ;;  %7843 = vmatprep.mubr.msk.bf16.mxu0 %vm924_vm0, %v11375_v38 }
 0x930   : > { %7865 = vmatprep.subr.bf16.mxu0 %v11382_v46  ;;  %7898 = vmatpush3.bf16.msra.mxu1 %v5981_v45 }
 0x931   : > { %7899 = vmatprep.subr.bf16.mxu1 %v5983_v36  ;;  %v5985_v43 = vpop.permute.xlu0 %5984 }
 0x933   : > { %7866 = vmatpush3.bf16.msra.mxu0 %v11382_v46 }
 0x934   : > { %7867 = vmatprep.subr.bf16.mxu0 %v5805_v57  ;;  %7900 = vmatpush3.bf16.msra.mxu1 %v5983_v36 }
 0x935   : > { %7901 = vmatprep.subr.bf16.mxu1 %v5985_v43 }
 0x936   : > { %7844 = vmatmul.mubr.msk.bf16.gmra.mrb[172].mxu0 %vm924_vm0, %v11396_v52 }
 0x937   : > { %7868 = vmatpush3.bf16.msra.mxu0 %v5805_v57 }
 0x938   : > { %7869 = vmatprep.subr.bf16.mxu0 %v11388_v41  ;;  %7902 = vmatpush3.bf16.msra.mxu1 %v5985_v43  ;;  %v7809_v38 = vpop.f32.mrb[176].mxu1 }
 0x939   : > { %v11436_v56 = vadd.f32 %v7809_v38, %v11427_v27  ;;  %v5150_v37 = vpop.f32.mrb[177].mxu1 }
 0x93a   : > { %v7810_v34 = vpop.f32.mrb[178].mxu1  ;;  %v11444_v7 = vadd.f32 %v11433_v29, %v5150_v37 }
 0x93b   : > { %7870 = vmatpush3.bf16.msra.mxu0 %v11388_v41  ;;  %v5153_v3 = vpop.f32.mrb[179].mxu1  ;;  %v5502_v61 = vsel %vm1281_vm1, %v11436_v56, -inf  ;;  %v11461_v33 = vadd.f32 %v7810_v34, %v11452_v32 }
 0x93c   : > { %v11455_v5 = vadd.f32 %v11441_v30, %v5153_v3  ;;  %7879 = vmatprep.subr.bf16.mxu0 %v11404_v18  ;;  %5503 = vmax.xlane.f32.xlu0 %v5502_v61  ;;  %v5496_v46 = vsel %vm1281_vm1, %v11444_v7, -inf }
 0x93d   : > { %v5505_v48 = vsel %vm1281_vm1, %v11461_v33, -inf }
 0x93e   : > { %v5499_v14 = vsel %vm1281_vm1, %v11455_v5, -inf }
 0x93f   : > { %5500 = vmax.xlane.f32.xlu1 %v5499_v14 }
 0x940   : > { %5497 = vmax.xlane.f32.xlu0 %v5496_v46  ;;  %v7813_v49 = vpop.f32.mrb[180].mxu1 }
 0x941   : > { %v5166_v41 = vpop.f32.mrb[181].mxu1  ;;  %v11481_v52 = vadd.f32 %v7813_v49, %v11468_v42 }
 0x942   : > { %v7814_v44 = vpop.f32.mrb[182].mxu1  ;;  %v11499_v31 = vadd.f32 %v11491_v39, %v5166_v41 }
 0x943   : > { %v11484_v19 = vadd.f32 %v7814_v44, %v11473_v9  ;;  %v5169_v17 = vpop.f32.mrb[183].mxu1  ;;  %v5514_v2 = vsel %vm1281_vm1, %v11481_v52, -inf }
 0x944   : > { %5506 = vmax.xlane.f32.xlu0 %v5505_v48  ;;  %v11494_v8 = vadd.f32 %v11478_v51, %v5169_v17  ;;  %v5508_v55 = vsel %vm1281_vm1, %v11499_v31, -inf }
 0x945   : > { %v5517_v20 = vsel %vm1281_vm1, %v11484_v19, -inf }
 0x946   : > { %5518 = vmax.xlane.f32.xlu1 %v5517_v20  ;;  %v5511_v4 = vsel %vm1281_vm1, %v11494_v8, -inf }
 0x948   : > { %5515 = vmax.xlane.f32.xlu0 %v5514_v2 }
 0x94a   : > { %5512 = vmax.xlane.f32.xlu1 %v5511_v4 }
 0x94c   : > { %5509 = vmax.xlane.f32.xlu0 %v5508_v55 }
 0x958   : > { %v7825_v62 = vpop.f32.mrb[184].mxu1 }
 0x959   : > { %v11508_v15 = vadd.f32 %v7825_v62, %v11427_v27  ;;  %v5255_v16 = vpop.f32.mrb[185].mxu1 }
 0x95a   : > { %v11511_v58 = vadd.f32 %v11433_v29, %v5255_v16  ;;  %v7826_v0 = vpop.f32.mrb[186].mxu1 }
 0x95b   : > { %v11514_v50 = vadd.f32 %v7826_v0, %v11452_v32  ;;  %v5258_v40 = vpop.f32.mrb[187].mxu1  ;;  %v5526_v12 = vsel %vm1281_vm1, %v11508_v15, -inf }
 0x95c   : > { %5527 = vmax.xlane.f32.xlu1 %v5526_v12  ;;  %v5520_v10 = vsel %vm1281_vm1, %v11511_v58, -inf  ;;  %v11521_v28 = vadd.f32 %v11441_v30, %v5258_v40 }
 0x95d   : > { %5521 = vmax.xlane.f32.xlu0 %v5520_v10  ;;  %v5529_v1 = vsel %vm1281_vm1, %v11514_v50, -inf }
 0x95e   : > { %v5523_v57 = vsel %vm1281_vm1, %v11521_v28, -inf }
 0x960   : > { %5530 = vmax.xlane.f32.xlu1 %v5529_v1 }
 0x964   : > { %5524 = vmax.xlane.f32.xlu1 %v5523_v57 }
 0x992   : > { %v7829_v22 = vpop.f32.mrb[188].mxu1 }
 0x993   : > { %v11528_v60 = vadd.f32 %v7829_v22, %v11468_v42  ;;  %v5271_v24 = vpop.f32.mrb[189].mxu1 }
 0x994   : > { %v11531_v23 = vadd.f32 %v11491_v39, %v5271_v24  ;;  %v7830_v11 = vpop.f32.mrb[190].mxu1 }
 0x995   : > { %v11534_v26 = vadd.f32 %v7830_v11, %v11473_v9  ;;  %v5274_v35 = vpop.f32.mrb[191].mxu1  ;;  %v5538_v59 = vsel %vm1281_vm1, %v11528_v60, -inf }
 0x996   : > { %5539 = vmax.xlane.f32.xlu1 %v5538_v59  ;;  %v5532_v53 = vsel %vm1281_vm1, %v11531_v23, -inf  ;;  %v11541_v47 = vadd.f32 %v11478_v51, %v5274_v35 }
 0x997   : > { %5533 = vmax.xlane.f32.xlu0 %v5532_v53  ;;  %v5541_v6 = vsel %vm1281_vm1, %v11534_v26, -inf }
 0x998   : > { %v5535_v25 = vsel %vm1281_vm1, %v11541_v47, -inf }
 0x99a   : > { %5542 = vmax.xlane.f32.xlu1 %v5541_v6 }
 0x99e   : > { %5536 = vmax.xlane.f32.xlu1 %v5535_v25 }
 0x9c9   : > { %v5504_v45 = vpop.xlane.xlu0 %5503 }
 0x9ca   : > { %v5594_v43 = vsub.f32 %v11436_v56, %v5504_v45 }
 0x9cc   : > { %v5501_v36 = vpop.xlane.xlu1 %5500  ;;  %v5628_v14 = vmul.f32 1.442695, %v5594_v43 }
 0x9cd   : > { %v5593_v38 = vsub.f32 %v11455_v5, %v5501_v36  ;;  %v5498_v37 = vpop.xlane.xlu0 %5497 }
 0x9ce   : > { %v5592_v34 = vsub.f32 %v11444_v7, %v5498_v37 }
 0x9cf   : > { %v5626_v3 = vmul.f32 1.442695, %v5593_v38 }
 0x9d0   : > { %v5624_v61 = vmul.f32 1.442695, %v5592_v34 }
 0x9d1   : > { %8596 = vpow2.f32 %v5626_v3  ;;  %v5507_v46 = vpop.xlane.xlu0 %5506 }
 0x9d2   : > { %8598 = vpow2.f32 %v5624_v61  ;;  %v5595_v49 = vsub.f32 %v11461_v33, %v5507_v46 }
 0x9d3   : > { %v5519_v41 = vpop.xlane.xlu1 %5518  ;;  %8600 = vpow2.f32 %v5628_v14 }
 0x9d4   : > { %v5630_v44 = vmul.f32 1.442695, %v5595_v49  ;;  %v5599_v5 = vsub.f32 %v11484_v19, %v5519_v41 }
 0x9d5   : > { %v5516_v17 = vpop.xlane.xlu0 %5515 }
 0x9d6   : > { %8602 = vpow2.f32 %v5630_v44  ;;  %v5598_v56 = vsub.f32 %v11481_v52, %v5516_v17  ;;  %v5638_v16 = vmul.f32 1.442695, %v5599_v5 }
 0x9d7   : > { %v5513_v48 = vpop.xlane.xlu1 %5512 }
 0x9d8   : > { %v5636_v20 = vmul.f32 1.442695, %v5598_v56  ;;  %v5597_v7 = vsub.f32 %v11494_v8, %v5513_v48 }
 0x9d9   : > { %v5510_v2 = vpop.xlane.xlu0 %5509 }
 0x9da   : > { %v5634_v4 = vmul.f32 1.442695, %v5597_v7  ;;  %v5596_v55 = vsub.f32 %v11499_v31, %v5510_v2  ;;  %8604 = vpow2.f32 %v5636_v20 }
 0x9db   : > { %v11555_v62 = vpop.eup %8596 }
 0x9dc   : > { %v11557_v33 = vpop.eup %8598  ;;  %v5632_v0 = vmul.f32 1.442695, %v5596_v55  ;;  %8606 = vpow2.f32 %v5634_v4 }
 0x9dd   : > { %v5784_v52 = vpack.c.bf16 %v11555_v62, %v11557_v33  ;;  %v11561_v19 = vpop.eup %8600 }
 0x9de   : > { %8608 = vpow2.f32 %v5632_v0 }
 0x9df   : > { %7871 = vmatprep.mubr.msk.bf16.mxu0 %vm1281_vm1, %v5784_v52  ;;  %8610 = vpow2.f32 %v5638_v16 }
 0x9e0   : > { %v11564_v8 = vpop.eup %8602 }
 0x9e1   : > { %v5785_v31 = vpack.c.bf16 %v11564_v8, %v11561_v19 }
 0x9e3   : > { %7872 = vmatmul.mubr.msk.bf16.vlgmr.msra.gmra.mrb[176].mxu0 %vm1281_vm1, %v5785_v31 }
 0x9e4   : > { %7880 = vmatpush3.bf16.msra.mxu0 %v11404_v18  ;;  %v11571_v40 = vpop.eup %8604 }
 0x9e5   : > { %7881 = vmatprep.subr.bf16.mxu0 %v11409_v63 }
 0x9e6   : > { %v11573_v12 = vpop.eup %8606 }
 0x9e8   : > { %v11575_v10 = vpop.eup %8608  ;;  %7882 = vmatpush3.bf16.msra.mxu0 %v11409_v63 }
 0x9e9   : > { %7883 = vmatprep.subr.bf16.mxu0 %v11394_v54  ;;  %v5528_v1 = vpop.xlane.xlu1 %5527  ;;  %v5786_v57 = vpack.c.bf16 %v11573_v12, %v11575_v10  ;;  %v11581_v22 = vpop.eup %8610 }
 0x9ea   : > { %v5522_v24 = vpop.xlane.xlu0 %5521  ;;  %v5787_v18 = vpack.c.bf16 %v11581_v22, %v11571_v40  ;;  %v5602_v25 = vsub.f32 %v11508_v15, %v5528_v1 }
 0x9eb   : > { %7875 = vmatprep.mubr.msk.bf16.mxu0 %vm1281_vm1, %v5786_v57  ;;  %v5600_v11 = vsub.f32 %v11511_v58, %v5522_v24 }
 0x9ec   : > { %7884 = vmatpush3.bf16.msra.mxu0 %v11394_v54  ;;  %v5644_v61 = vmul.f32 1.442695, %v5602_v25 }
 0x9ed   : > { %7876 = vmatmul.mubr.msk.bf16.gmra.mrb[180].mxu0 %vm1281_vm1, %v5787_v18  ;;  %7885 = vmatprep.subr.bf16.mxu0 %v11414_v13  ;;  %v5531_v63 = vpop.xlane.xlu1 %5530  ;;  %v7857_v35 = vpop.f32.mrb[192].mxu1  ;;  %v5640_v36 = vmul.f32 1.442695, %v5600_v11 }
 0x9ee   : > { %v5603_v59 = vsub.f32 %v11514_v50, %v5531_v63  ;;  %v11592_v53 = vadd.f32 %v7857_v35, %v11427_v27  ;;  %v5465_v6 = vpop.f32.mrb[193].mxu1 }
 0x9ef   : > { %v7858_v45 = vpop.f32.mrb[194].mxu1  ;;  %v11596_v58 = vadd.f32 %v11433_v29, %v5465_v6  ;;  %8612 = vpow2.f32 %v5640_v36 }
 0x9f0   : > { %v11599_v54 = vadd.f32 %v7858_v45, %v11452_v32  ;;  %7886 = vmatpush3.bf16.msra.mxu0 %v11414_v13  ;;  %v5468_v43 = vpop.f32.mrb[195].mxu1  ;;  %v5574_v50 = vsel %vm1281_vm1, %v11592_v53, -inf  ;;  %v5646_v38 = vmul.f32 1.442695, %v5603_v59 }
 0x9f1   : > { %v5525_v37 = vpop.xlane.xlu1 %5524  ;;  %5575 = vmax.xlane.f32.xlu1 %v5574_v50  ;;  %v11605_v34 = vadd.f32 %v11441_v30, %v5468_v43  ;;  %v5568_v13 = vsel %vm1281_vm1, %v11596_v58, -inf }
 0x9f2   : > { %v5601_v15 = vsub.f32 %v11521_v28, %v5525_v37  ;;  %v5577_v3 = vsel %vm1281_vm1, %v11599_v54, -inf  ;;  %8614 = vpow2.f32 %v5646_v38 }
 0x9f3   : > { %5578 = vmax.xlane.f32.xlu0 %v5577_v3  ;;  %v5571_v28 = vsel %vm1281_vm1, %v11605_v34, -inf }
 0x9f4   : > { %v5642_v14 = vmul.f32 1.442695, %v5601_v15 }
 0x9f5   : > { %5569 = vmax.xlane.f32.xlu1 %v5568_v13  ;;  %v7861_v46 = vpop.f32.mrb[196].mxu1 }
 0x9f6   : > { %8616 = vpow2.f32 %v5642_v14  ;;  %v11613_v49 = vadd.f32 %v7861_v46, %v11468_v42  ;;  %v5481_v41 = vpop.f32.mrb[197].mxu1  ;;  %v12410_v46 = vld [vmem:[#allocation38_spill] sm:$0xff] }
 0x9f7   : > { %8618 = vpow2.f32 %v5644_v61  ;;  %5572 = vmax.xlane.f32.xlu0 %v5571_v28  ;;  %v7862_v44 = vpop.f32.mrb[198].mxu1  ;;  %v11618_v17 = vadd.f32 %v11491_v39, %v5481_v41 }
 0x9f8   : > { %v11621_v56 = vadd.f32 %v7862_v44, %v11473_v9  ;;  %v5484_v48 = vpop.f32.mrb[199].mxu1  ;;  %v5586_v5 = vsel %vm1281_vm1, %v11613_v49, -inf  ;;  %v12411_v44 = vld [vmem:[#allocation37_spill] sm:$0xff] }
 0x9f9   : > { %5587 = vmax.xlane.f32.xlu1 %v5586_v5  ;;  %v11626_v20 = vadd.f32 %v11478_v51, %v5484_v48  ;;  %v5580_v2 = vsel %vm1281_vm1, %v11618_v17, -inf  ;;  %v11632_v4 = vpop.eup %8612 }
 0x9fa   : > { %v5589_v7 = vsel %vm1281_vm1, %v11621_v56, -inf }
 0x9fb   : > { %5590 = vmax.xlane.f32.xlu0 %v5589_v7  ;;  %v5583_v55 = vsel %vm1281_vm1, %v11626_v20, -inf }
 0x9fc   : > { %v11636_v16 = vpop.eup %8614 }
 0x9fd   : > { %5581 = vmax.xlane.f32.xlu1 %v5580_v2 }
 0x9ff   : > { %5584 = vmax.xlane.f32.xlu0 %v5583_v55 }
 0xa00   : > { %v11638_v0 = vpop.eup %8616 }
 0xa01   : > { %v11640_v52 = vpop.eup %8618  ;;  %v7841_v31 = vpop.f32.mrb[168].mxu0  ;;  %v5788_v1 = vpack.c.bf16 %v11638_v0, %v11632_v4 }
 0xa02   : > { %v5789_v57 = vpack.c.bf16 %v11636_v16, %v11640_v52  ;;  %v11647_v24 = vadd.f32 %v7841_v31, %v11427_v27  ;;  %v5360_v18 = vpop.f32.mrb[169].mxu0  ;;  %v12412_v31 = vld [vmem:[#allocation39_spill] sm:$0xff] }
 0xa03   : > { %v11650_v11 = vadd.f32 %v11433_v29, %v5360_v18  ;;  %v7842_v63 = vpop.f32.mrb[170].mxu0  ;;  %7887 = vmatprep.mubr.msk.bf16.mxu0 %vm1281_vm1, %v5788_v1 }
 0xa04   : > { %v11654_v35 = vadd.f32 %v7842_v63, %v11452_v32  ;;  %v5363_v59 = vpop.f32.mrb[171].mxu0  ;;  %7888 = vmatmul.mubr.msk.bf16.vlgmr.msra.gmra.mrb[184].mxu0 %vm1281_vm1, %v5789_v57  ;;  %v5550_v6 = vsel %vm1281_vm1, %v11647_v24, -inf }
 0xa05   : > { %5551 = vmax.xlane.f32.xlu1 %v5550_v6  ;;  %v5544_v27 = vsel %vm1281_vm1, %v11650_v11, -inf  ;;  %v11662_v29 = vadd.f32 %v11441_v30, %v5363_v59  ;;  %v5703_v59 = vsel %vm1281_vm1, %v11573_v12, 0.0  ;;  %v5709_v6 = vsel %vm1281_vm1, %v11581_v22, 0.0 }
 0xa06   : > { %5545 = vmax.xlane.f32.xlu0 %v5544_v27  ;;  %v5553_v25 = vsel %vm1281_vm1, %v11654_v35, -inf  ;;  %v5694_v27 = vsel %vm1281_vm1, %v11561_v19, 0.0  ;;  %v5697_v12 = vsel %vm1281_vm1, %v11564_v8, 0.0  ;;  %v5700_v22 = vsel %vm1281_vm1, %v11575_v10, 0.0 }
 0xa07   : > { %v5547_v37 = vsel %vm1281_vm1, %v11662_v29, -inf  ;;  %v5706_v19 = vsel %vm1281_vm1, %v11571_v40, 0.0  ;;  %v5712_v8 = vsel %vm1281_vm1, %v11632_v4, 0.0 }
 0xa09   : > { %v7845_v45 = vpop.f32.mrb[172].mxu0  ;;  %5554 = vmax.xlane.f32.xlu1 %v5553_v25 }
 0xa0a   : > { %v5376_v32 = vpop.f32.mrb[173].mxu0  ;;  %v11667_v43 = vadd.f32 %v7845_v45, %v11468_v42 }
 0xa0b   : > { %v7846_v36 = vpop.f32.mrb[174].mxu0  ;;  %v11680_v3 = vadd.f32 %v11491_v39, %v5376_v32 }
 0xa0c   : > { %v11670_v50 = vadd.f32 %v7846_v36, %v11473_v9  ;;  %v5379_v38 = vpop.f32.mrb[175].mxu0  ;;  %v5562_v42 = vsel %vm1281_vm1, %v11667_v43, -inf }
 0xa0d   : > { %5548 = vmax.xlane.f32.xlu1 %v5547_v37  ;;  %v11675_v30 = vadd.f32 %v11478_v51, %v5379_v38  ;;  %v5556_v61 = vsel %vm1281_vm1, %v11680_v3, -inf }
 0xa0e   : > { %v5565_v15 = vsel %vm1281_vm1, %v11670_v50, -inf }
 0xa0f   : > { %5566 = vmax.xlane.f32.xlu0 %v5565_v15  ;;  %v5559_v9 = vsel %vm1281_vm1, %v11675_v30, -inf }
 0xa11   : > { %5563 = vmax.xlane.f32.xlu1 %v5562_v42 }
 0xa13   : > { %5560 = vmax.xlane.f32.xlu0 %v5559_v9 }
 0xa15   : > { %5557 = vmax.xlane.f32.xlu1 %v5556_v61 }
 0xa23   : > { %v5540_v51 = vpop.xlane.xlu1 %5539 }
 0xa24   : > { %v5534_v14 = vpop.xlane.xlu0 %5533  ;;  %v5606_v28 = vsub.f32 %v11528_v60, %v5540_v51 }
 0xa25   : > { %v5604_v13 = vsub.f32 %v11531_v23, %v5534_v14 }
 0xa26   : > { %6067 = vrot.lane.b32.xlu1 %v12410_v46, %s8791_s26  ;;  %v5652_v55 = vmul.f32 1.442695, %v5606_v28 }
 0xa27   : > { %v5543_v39 = vpop.xlane.xlu1 %5542  ;;  %v5648_v48 = vmul.f32 1.442695, %v5604_v13 }
 0xa28   : > { %v5607_v41 = vsub.f32 %v11534_v26, %v5543_v39 }
 0xa29   : > { %6069 = vrot.lane.b32.xlu0 %v12411_v44, %s8791_s26  ;;  %8620 = vpow2.f32 %v5648_v48 }
 0xa2a   : > { %v5654_v5 = vmul.f32 1.442695, %v5607_v41 }
 0xa2b   : > { %v5537_v7 = vpop.xlane.xlu1 %5536 }
 0xa2c   : > { %v5605_v2 = vsub.f32 %v11541_v47, %v5537_v7  ;;  %8622 = vpow2.f32 %v5654_v5  ;;  %v5691_v47 = vsel %vm1281_vm1, %v11555_v62, 0.0  ;;  %v5715_v62 = vsel %vm1281_vm1, %v11638_v0, 0.0 }
 0xa2d   : > { %6071 = vrot.lane.b32.xlu0 %v12412_v31, %s8791_s26 }
 0xa2e   : > { %v5650_v23 = vmul.f32 1.442695, %v5605_v2 }
 0xa30   : > { %8624 = vpow2.f32 %v5650_v23 }
 0xa31   : > { %8626 = vpow2.f32 %v5652_v55  ;;  %6073 = vrot.lane.b32.xlu0 %v9255_v21, %s8791_s26  ;;  %v5688_v21 = vsel %vm1281_vm1, %v11557_v33, 0.0  ;;  %v5721_v33 = vsel %vm1281_vm1, %v11636_v16, 0.0  ;;  %v5718_v16 = vsel %vm1281_vm1, %v11640_v52, 0.0  ;;  %s8792_s26 = smov [#allocation2]  }
 0xa32   : > { %s8728_s13 = sshll.u32 %s8792_s26, 4  ;;  %s8729_s13 = int_to_ptr.vmem [resolvable:$false] %s8728_s13 }
 0xa33   : > { %v8621_v60 = vpop.eup %8620  ;;  %s8730_s11 = scalar_lea.vmem %s8729_s13, 8192  ;;  %p8731_p0 = scmp.lt.s32.totalorder %s11910_s28, %s8729_s13 }
 0xa34   : > { %v5724_v10 = vsel %vm1281_vm1, %v8621_v60, 0.0  ;;  %p8732_p1 = scmp.lt.s32.totalorder %s8730_s11, %s8724_s12 }
 0xa36   : > { %v8623_v26 = vpop.eup %8622  ;;  %p8733_p2 = por %p8732_p1, %p8731_p0 }
 0xa37   : > { %v5733_v0 = vsel %vm1281_vm1, %v8623_v26, 0.0 }
 0xa38   : > { %p8734_p3 = pnand %p8733_p2, %p8727_p13 }
 0xa3a   : > { %v8625_v1 = vpop.eup %8624 }
 0xa3b   : > { %v8627_v57 = vpop.eup %8626  ;;  %v5790_v18 = vpack.c.bf16 %v8625_v1, %v8621_v60  ;;  %v5727_v25 = vsel %vm1281_vm1, %v8625_v1, 0.0 }
 0xa3c   : > { %v5791_v63 = vpack.c.bf16 %v8623_v26, %v8627_v57  ;;  %v5730_v45 = vsel %vm1281_vm1, %v8627_v57, 0.0 }
 0xa3d   : > { %7891 = vmatprep.mubr.msk.bf16.mxu0 %vm1281_vm1, %v5790_v18 }
 0xa3e   : > { %7892 = vmatmul.mubr.msk.bf16.gmra.mrb[188].mxu0 %vm1281_vm1, %v5791_v63 }
 0xa4a   : > { %5692 = vadd.xlane.f32.xlu1 %v5691_v47 }
 0xa4e   : > { %5704 = vadd.xlane.f32.xlu1 %v5703_v59 }
 0xa50   : > { %5689 = vadd.xlane.f32.xlu0 %v5688_v21 }
 0xa52   : > { %5710 = vadd.xlane.f32.xlu1 %v5709_v6 }
 0xa54   : > { %5695 = vadd.xlane.f32.xlu0 %v5694_v27 }
 0xa56   : > { %5716 = vadd.xlane.f32.xlu1 %v5715_v62 }
 0xa58   : > { %5698 = vadd.xlane.f32.xlu0 %v5697_v12 }
 0xa5a   : > { %5722 = vadd.xlane.f32.xlu1 %v5721_v33 }
 0xa5c   : > { %5701 = vadd.xlane.f32.xlu0 %v5700_v22 }
 0xa5e   : > { %5728 = vadd.xlane.f32.xlu1 %v5727_v25 }
 0xa60   : > { %5707 = vadd.xlane.f32.xlu0 %v5706_v19 }
 0xa62   : > { %5734 = vadd.xlane.f32.xlu1 %v5733_v0 }
 0xa64   : > { %5713 = vadd.xlane.f32.xlu0 %v5712_v8 }
 0xa68   : > { %5719 = vadd.xlane.f32.xlu0 %v5718_v16 }
 0xa6c   : > { %5725 = vadd.xlane.f32.xlu0 %v5724_v10 }
 0xa70   : > { %5731 = vadd.xlane.f32.xlu0 %v5730_v45 }
 0xa7e   : > { %v5576_v32 = vpop.xlane.xlu1 %5575 }
 0xa80   : > { %v5579_v40 = vpop.xlane.xlu0 %5578 }
 0xa81   : > { %v5619_v1 = vsub.f32 %v11599_v54, %v5579_v40 }
 0xa82   : > { %v5570_v36 = vpop.xlane.xlu1 %5569 }
 0xa83   : > { %v5616_v38 = vsub.f32 %v11596_v58, %v5570_v36  ;;  %v5678_v62 = vmul.f32 1.442695, %v5619_v1 }
 0xa84   : > { %v5573_v37 = vpop.xlane.xlu0 %5572 }
 0xa85   : > { %v5672_v15 = vmul.f32 1.442695, %v5616_v38  ;;  %v5617_v4 = vsub.f32 %v11605_v34, %v5573_v37 }
 0xa86   : > { %v11732_v9 = vpop.xlane.xlu1 %5587 }
 0xa87   : > { %v5674_v42 = vmul.f32 1.442695, %v5617_v4  ;;  %8628 = vpow2.f32 %v5672_v15  ;;  %v5622_v16 = vsub.f32 %v11613_v49, %v11732_v9  ;;  %v8210_v49 = vld [vmem:[%s11963_s4 + $0x30] sm:$0xff]  }
 0xa88   : > { %v11734_v52 = vpop.xlane.xlu0 %5590 }
 0xa89   : > { %8630 = vpow2.f32 %v5674_v42  ;;  %v5623_v25 = vsub.f32 %v11621_v56, %v11734_v52  ;;  %v5684_v40 = vmul.f32 1.442695, %v5622_v16 }
 0xa8a   : > { %v5582_v61 = vpop.xlane.xlu1 %5581 }
 0xa8b   : > { %v5686_v45 = vmul.f32 1.442695, %v5623_v25 }
 0xa8c   : > { %v5585_v51 = vpop.xlane.xlu0 %5584 }
 0xa8d   : > { %v5621_v18 = vsub.f32 %v11626_v20, %v5585_v51 }
 0xa8f   : > { %v5682_v12 = vmul.f32 1.442695, %v5621_v18 }
 0xa91   : > { %v11736_v14 = vpop.eup %8628 }
 0xa92   : > { %v5552_v13 = vpop.xlane.xlu1 %5551 }
 0xa93   : > { %v11738_v46 = vpop.eup %8630  ;;  %v5610_v58 = vsub.f32 %v11647_v24, %v5552_v13  ;;  %v5546_v39 = vpop.xlane.xlu0 %5545 }
 0xa94   : > { %v5608_v41 = vsub.f32 %v11650_v11, %v5546_v39  ;;  %v5796_v34 = vpack.c.bf16 %v11738_v46, %v11736_v14 }
 0xa95   : > { %v5660_v28 = vmul.f32 1.442695, %v5610_v58 }
 0xa96   : > { %v5656_v44 = vmul.f32 1.442695, %v5608_v41  ;;  %v5555_v48 = vpop.xlane.xlu1 %5554  ;;  %7919 = vmatprep.mubr.msk.bf16.mxu0 %vm1281_vm1, %v5796_v34 }
 0xa97   : > { %v5611_v5 = vsub.f32 %v11654_v35, %v5555_v48 }
 0xa98   : > { %8632 = vpow2.f32 %v5656_v44  ;;  %v8211_v44 = vld [vmem:[%s11963_s4 + $0x38] sm:$0xff]  }
 0xa99   : > { %8634 = vpow2.f32 %v5660_v28  ;;  %v5662_v7 = vmul.f32 1.442695, %v5611_v5 }
 0xa9a   : > { %v5549_v2 = vpop.xlane.xlu1 %5548 }
 0xa9b   : > { %v5609_v55 = vsub.f32 %v11662_v29, %v5549_v2  ;;  %8636 = vpow2.f32 %v5662_v7  ;;  %v5618_v29 = vsub.f32 %v11592_v53, %v5576_v32 }
 0xa9c   : > { %v5567_v24 = vpop.xlane.xlu0 %5566 }
 0xa9d   : > { %v5658_v31 = vmul.f32 1.442695, %v5609_v55  ;;  %v5615_v60 = vsub.f32 %v11670_v50, %v5567_v24  ;;  %v5620_v50 = vsub.f32 %v11618_v17, %v5582_v61  ;;  %v5676_v33 = vmul.f32 1.442695, %v5618_v29 }
 0xa9e   : > { %v5564_v11 = vpop.xlane.xlu1 %5563  ;;  %v5760_v55 = vsel %vm1281_vm1, %v11736_v14, 0.0  ;;  %v5763_v24 = vsel %vm1281_vm1, %v11738_v46, 0.0 }
 0xa9f   : > { %8638 = vpow2.f32 %v5658_v31  ;;  %v5614_v23 = vsub.f32 %v11667_v43, %v5564_v11  ;;  %v5670_v27 = vmul.f32 1.442695, %v5615_v60  ;;  %v5680_v22 = vmul.f32 1.442695, %v5620_v50 }
 0xaa0   : > { %v5561_v26 = vpop.xlane.xlu0 %5560 }
 0xaa1   : > { %v5613_v35 = vsub.f32 %v11675_v30, %v5561_v26  ;;  %v5668_v63 = vmul.f32 1.442695, %v5614_v23 }
 0xaa2   : > { %v8633_v57 = vpop.eup %8632  ;;  %v5558_v47 = vpop.xlane.xlu1 %5557 }
 0xaa3   : > { %v5666_v59 = vmul.f32 1.442695, %v5613_v35  ;;  %v5612_v21 = vsub.f32 %v11680_v3, %v5558_v47  ;;  %v5736_v6 = vsel %vm1281_vm1, %v8633_v57, 0.0  ;;  %v8635_v43 = vpop.eup %8634 }
 0xaa4   : > { %5737 = vadd.xlane.f32.xlu0 %v5736_v6  ;;  %v6070_v54 = vpop.permute.xlu0 %6069  ;;  %v5742_v53 = vsel %vm1281_vm1, %v8635_v43, 0.0 }
 0xaa5   : > { %8640 = vpow2.f32 %v5666_v59  ;;  %v5664_v30 = vmul.f32 1.442695, %v5612_v21  ;;  %v8637_v3 = vpop.eup %8636 }
 0xaa6   : > { %8642 = vpow2.f32 %v5668_v63  ;;  %v6068_v20 = vpop.permute.xlu1 %6067  ;;  %v5793_v10 = vpack.c.bf16 %v8637_v3, %v8635_v43  ;;  %v5745_v56 = vsel %vm1281_vm1, %v8637_v3, 0.0 }
 0xaa7   : > { %8644 = vpow2.f32 %v5664_v30  ;;  %7911 = vmatprep.subr.bf16.mxu0 %v6068_v20 }
 0xaa8   : > { %8646 = vpow2.f32 %v5670_v27  ;;  %7912 = vmatpush3.bf16.msra.mxu0 %v6068_v20  ;;  %5743 = vadd.xlane.f32.xlu0 %v5742_v53  ;;  %v6072_v19 = vpop.permute.xlu0 %6071 }
 0xaa9   : > { %v8639_v17 = vpop.eup %8638  ;;  %8648 = vpow2.f32 %v5678_v62  ;;  %7913 = vmatprep.subr.bf16.mxu0 %v6070_v54 }
 0xaaa   : > { %8650 = vpow2.f32 %v5682_v12  ;;  %v5739_v0 = vsel %vm1281_vm1, %v8639_v17, 0.0  ;;  %v5792_v8 = vpack.c.bf16 %v8639_v17, %v8633_v57 }
 0xaab   : > { %8652 = vpow2.f32 %v5676_v33  ;;  %5740 = vadd.xlane.f32.xlu1 %v5739_v0 }
 0xaac   : > { %8654 = vpow2.f32 %v5680_v22  ;;  %7903 = vmatprep.mubr.msk.bf16.mxu1 %vm1281_vm1, %v5792_v8  ;;  %7914 = vmatpush3.bf16.msra.mxu0 %v6070_v54  ;;  %v6074_v38 = vpop.permute.xlu0 %6073 }
 0xaad   : > { %7904 = vmatmul.mubr.msk.bf16.vlgmr.msra.gmra.mrb[200].mxu1 %vm1281_vm1, %v5793_v10  ;;  %7915 = vmatprep.subr.bf16.mxu0 %v6072_v19  ;;  %8656 = vpow2.f32 %v5686_v45 }
 0xaae   : > { %8658 = vpow2.f32 %v5684_v40 }
 0xaaf   : > { %v8641_v32 = vpop.eup %8640  ;;  %5746 = vadd.xlane.f32.xlu1 %v5745_v56 }
 0xab0   : > { %v8643_v36 = vpop.eup %8642  ;;  %7916 = vmatpush3.bf16.msra.mxu0 %v6072_v19  ;;  %v5751_v42 = vsel %vm1281_vm1, %v8641_v32, 0.0 }
 0xab1   : > { %v8645_v37 = vpop.eup %8644  ;;  %7917 = vmatprep.subr.bf16.mxu0 %v6074_v38  ;;  %v5754_v34 = vsel %vm1281_vm1, %v8643_v36, 0.0 }
 0xab2   : > { %v8647_v15 = vpop.eup %8646  ;;  %v5748_v4 = vsel %vm1281_vm1, %v8645_v37, 0.0  ;;  %v5794_v9 = vpack.c.bf16 %v8641_v32, %v8645_v37 }
 0xab3   : > { %v8649_v52 = vpop.eup %8648  ;;  %5749 = vadd.xlane.f32.xlu0 %v5748_v4  ;;  %5752 = vadd.xlane.f32.xlu1 %v5751_v42  ;;  %v5795_v61 = vpack.c.bf16 %v8647_v15, %v8643_v36  ;;  %v5757_v28 = vsel %vm1281_vm1, %v8647_v15, 0.0 }
 0xab4   : > { %v8651_v51 = vpop.eup %8650  ;;  %7907 = vmatprep.mubr.msk.bf16.mxu1 %vm1281_vm1, %v5794_v9  ;;  %7918 = vmatpush3.bf16.msra.mxu0 %v6074_v38  ;;  %v5769_v60 = vsel %vm1281_vm1, %v8649_v52, 0.0 }
 0xab5   : > { %v8653_v13 = vpop.eup %8652  ;;  %7908 = vmatmul.mubr.msk.bf16.gmra.mrb[204].mxu1 %vm1281_vm1, %v5795_v61  ;;  %7927 = vmatprep.subr.bf16.mxu0 %v8210_v49  ;;  %v5775_v57 = vsel %vm1281_vm1, %v8651_v51, 0.0 }
 0xab6   : > { %v8655_v58 = vpop.eup %8654  ;;  %v5797_v39 = vpack.c.bf16 %v8649_v52, %v8653_v13  ;;  %v11772_v41 = vpop.f32.mrb[176].mxu0  ;;  %v5766_v23 = vsel %vm1281_vm1, %v8653_v13, 0.0 }
 0xab7   : > { %v5858_v48 = vpop.f32.mrb[177].mxu0  ;;  %5755 = vadd.xlane.f32.xlu0 %v5754_v34  ;;  %5758 = vadd.xlane.f32.xlu1 %v5757_v28  ;;  %v5798_v5 = vpack.c.bf16 %v8651_v51, %v8655_v58  ;;  %v8657_v31 = vpop.eup %8656  ;;  %v5772_v46 = vsel %vm1281_vm1, %v8655_v58, 0.0 }
 0xab8   : > { %7920 = vmatmul.mubr.msk.bf16.vlgmr.msra.gmra.mrb[192].mxu0 %vm1281_vm1, %v5797_v39  ;;  %v7874_v7 = vpop.f32.mrb[178].mxu0  ;;  %v8659_v11 = vpop.eup %8658  ;;  %v5781_v47 = vsel %vm1281_vm1, %v8657_v31, 0.0 }
 0xab9   : > { %7923 = vmatprep.mubr.msk.bf16.mxu0 %vm1281_vm1, %v5798_v5  ;;  %v5861_v2 = vpop.f32.mrb[179].mxu0  ;;  %7928 = vmatpush3.bf16.msra.mxu0 %v8210_v49  ;;  %v5799_v26 = vpack.c.bf16 %v8657_v31, %v8659_v11  ;;  %v5778_v63 = vsel %vm1281_vm1, %v8659_v11, 0.0 }
 0xaba   : > { %7929 = vmatprep.subr.bf16.mxu0 %v8211_v44 }
 0xabb   : > { %5761 = vadd.xlane.f32.xlu0 %v5760_v55  ;;  %5764 = vadd.xlane.f32.xlu1 %v5763_v24 }
 0xabd   : > { %7930 = vmatpush3.bf16.msra.mxu0 %v8211_v44 }
 0xabf   : > { %5767 = vadd.xlane.f32.xlu0 %v5766_v23  ;;  %5770 = vadd.xlane.f32.xlu1 %v5769_v60 }
 0xac0   : > { %v7877_v1 = vpop.f32.mrb[180].mxu0  ;;  %7924 = vmatmul.mubr.msk.bf16.gmra.mrb[196].mxu0 %vm1281_vm1, %v5799_v26 }
 0xac1   : > { %v5874_v14 = vpop.f32.mrb[181].mxu0 }
 0xac2   : > { %v7878_v35 = vpop.f32.mrb[182].mxu0 }
 0xac3   : > { %v5877_v18 = vpop.f32.mrb[183].mxu0  ;;  %5773 = vadd.xlane.f32.xlu0 %v5772_v46  ;;  %5776 = vadd.xlane.f32.xlu1 %v5775_v57 }
 0xac7   : > { %5779 = vadd.xlane.f32.xlu0 %v5778_v63  ;;  %5782 = vadd.xlane.f32.xlu1 %v5781_v47 }
 0xad7   : > { %v7889_v29 = vpop.f32.mrb[184].mxu0  ;;  %v5693_v21 = vpop.xlane.xlu1 %5692 }
 0xad8   : > { %v5947_v59 = vpop.f32.mrb[185].mxu0  ;;  %8660 = vrcp.f32 %v5693_v21 }
 0xad9   : > { %v7890_v6 = vpop.f32.mrb[186].mxu0 }
 0xada   : > { %v5950_v43 = vpop.f32.mrb[187].mxu0 }
 0xadb   : > { %v5705_v27 = vpop.xlane.xlu1 %5704 }
 0xadd   : > { %v5690_v50 = vpop.xlane.xlu0 %5689 }
 0xade   : > { %8662 = vrcp.f32 %v5690_v50 }
 0xadf   : > { %v5711_v62 = vpop.xlane.xlu1 %5710 }
 0xae1   : > { %v5696_v54 = vpop.xlane.xlu0 %5695 }
 0xae2   : > { %8664 = vrcp.f32 %v5696_v54  ;;  %v8661_v12 = vpop.eup %8660 }
 0xae3   : > { %v6189_v3 = vmul.f32 %v8661_v12, %v5861_v2  ;;  %v5717_v22 = vpop.xlane.xlu1 %5716 }
 0xae5   : > { %v5699_v30 = vpop.xlane.xlu0 %5698 }
 0xae6   : > { %8666 = vrcp.f32 %v5699_v30 }
 0xae7   : > { %8668 = vrcp.f32 %v5705_v27  ;;  %v5723_v10 = vpop.xlane.xlu1 %5722 }
 0xae8   : > { %v8663_v20 = vpop.eup %8662 }
 0xae9   : > { %v5702_v33 = vpop.xlane.xlu0 %5701  ;;  %v6188_v53 = vmul.f32 %v8663_v20, %v5858_v48 }
 0xaea   : > { %8670 = vrcp.f32 %v5702_v33 }
 0xaeb   : > { %v6220_v17 = vpack.c.bf16 %v6189_v3, %v6188_v53  ;;  %8672 = vrcp.f32 %v5711_v62 }
 0xaec   : > { %v8665_v19 = vpop.eup %8664 }
 0xaed   : > { %7931 = vmatprep.mubr.msk.bf16.mxu0 %vm924_vm0, %v6220_v17  ;;  %v5708_v25 = vpop.xlane.xlu0 %5707  ;;  %v6190_v8 = vmul.f32 %v8665_v19, %v11772_v41  ;;  %v5729_v41 = vpop.xlane.xlu1 %5728 }
 0xaee   : > { %8674 = vrcp.f32 %v5708_v25 }
 0xaef   : > { %8676 = vrcp.f32 %v5717_v22 }
 0xaf0   : > { %v8667_v0 = vpop.eup %8666 }
 0xaf1   : > { %v6191_v16 = vmul.f32 %v8667_v0, %v7874_v7  ;;  %v5714_v45 = vpop.xlane.xlu0 %5713  ;;  %v8669_v56 = vpop.eup %8668 }
 0xaf2   : > { %8678 = vrcp.f32 %v5714_v45  ;;  %v6193_v37 = vmul.f32 %v8669_v56, %v5877_v18  ;;  %v5735_v2 = vpop.xlane.xlu1 %5734 }
 0xaf3   : > { %v6221_v32 = vpack.c.bf16 %v6191_v16, %v6190_v8  ;;  %8680 = vrcp.f32 %v5723_v10 }
 0xaf4   : > { %v8671_v40 = vpop.eup %8670 }
 0xaf5   : > { %7932 = vmatmul.mubr.msk.bf16.vlgmr.msra.gmra.mrb[120].mxu0 %vm924_vm0, %v6221_v32  ;;  %v5720_v36 = vpop.xlane.xlu0 %5719  ;;  %v6192_v38 = vmul.f32 %v8671_v40, %v5874_v14  ;;  %v8673_v49 = vpop.eup %8672 }
 0xaf6   : > { %8682 = vrcp.f32 %v5720_v36  ;;  %v6195_v9 = vmul.f32 %v8673_v49, %v7878_v35 }
 0xaf7   : > { %v6222_v15 = vpack.c.bf16 %v6193_v37, %v6192_v38  ;;  %8684 = vrcp.f32 %v5729_v41 }
 0xaf8   : > { %v8675_v4 = vpop.eup %8674  ;;  %8686 = vrcp.f32 %v5735_v2 }
 0xaf9   : > { %7935 = vmatprep.mubr.msk.bf16.mxu0 %vm924_vm0, %v6222_v15  ;;  %v6194_v42 = vmul.f32 %v8675_v4, %v7877_v1  ;;  %v8677_v52 = vpop.eup %8676  ;;  %v5726_v44 = vpop.xlane.xlu0 %5725 }
 0xafa   : > { %v6197_v58 = vmul.f32 %v8677_v52, %v5950_v43 }
 0xafb   : > { %v6223_v61 = vpack.c.bf16 %v6195_v9, %v6194_v42 }
 0xafc   : > { %v8679_v51 = vpop.eup %8678 }
 0xafd   : > { %7936 = vmatmul.mubr.msk.bf16.gmra.mrb[124].mxu0 %vm924_vm0, %v6223_v61  ;;  %v6196_v13 = vmul.f32 %v8679_v51, %v5947_v59  ;;  %v8681_v39 = vpop.eup %8680  ;;  %v5732_v55 = vpop.xlane.xlu0 %5731 }
 0xafe   : > { %v6199_v5 = vmul.f32 %v8681_v39, %v7890_v6  ;;  %8688 = vrcp.f32 %v5732_v55 }
 0xaff   : > { %v6224_v34 = vpack.c.bf16 %v6197_v58, %v6196_v13  ;;  %8690 = vrcp.f32 %v5726_v44 }
 0xb00   : > { %v8683_v28 = vpop.eup %8682 }
 0xb01   : > { %7939 = vmatprep.mubr.msk.bf16.mxu0 %vm924_vm0, %v6224_v34  ;;  %v6198_v48 = vmul.f32 %v8683_v28, %v7889_v29  ;;  %v8685_v24 = vpop.eup %8684 }
 0xb02   : > { %v8687_v11 = vpop.eup %8686 }
 0xb03   : > { %v6225_v7 = vpack.c.bf16 %v6199_v5, %v6198_v48 }
 0xb05   : > { %7940 = vmatmul.mubr.msk.bf16.gmra.mrb[128].mxu0 %vm924_vm0, %v6225_v7 }
 0xb08   : > { %v8689_v60 = vpop.eup %8688 }
 0xb09   : > { %v8691_v1 = vpop.eup %8690 }
 0xb11   : > { %v7893_v31 = vpop.f32.mrb[188].mxu0 }
 0xb12   : > { %v5963_v23 = vpop.f32.mrb[189].mxu0  ;;  %v6202_v14 = vmul.f32 %v8689_v60, %v7893_v31 }
 0xb13   : > { %v7894_v26 = vpop.f32.mrb[190].mxu0  ;;  %v6200_v57 = vmul.f32 %v8691_v1, %v5963_v23 }
 0xb14   : > { %v6203_v35 = vmul.f32 %v8687_v11, %v7894_v26  ;;  %v5966_v46 = vpop.f32.mrb[191].mxu0 }
 0xb15   : > { %v6201_v18 = vmul.f32 %v8685_v24, %v5966_v46 }
 0xb16   : > { %v6227_v63 = vpack.c.bf16 %v6203_v35, %v6202_v14 }
 0xb17   : > { %v6226_v47 = vpack.c.bf16 %v6201_v18, %v6200_v57 }
 0xb19   : > { %7943 = vmatprep.mubr.msk.bf16.mxu0 %vm924_vm0, %v6226_v47 }
 0xb1a   : > { %7944 = vmatmul.mubr.msk.bf16.gmra.mrb[132].mxu0 %vm924_vm0, %v6227_v63 }
 0xb31   : > { %v5738_v59 = vpop.xlane.xlu0 %5737 }
 0xb32   : > { %8692 = vrcp.f32 %v5738_v59 }
 0xb35   : > { %v5744_v6 = vpop.xlane.xlu0 %5743 }
 0xb36   : > { %8694 = vrcp.f32 %v5744_v6 }
 0xb38   : > { %v5741_v29 = vpop.xlane.xlu1 %5740 }
 0xb3c   : > { %v5747_v21 = vpop.xlane.xlu1 %5746  ;;  %v8693_v33 = vpop.eup %8692 }
 0xb3d   : > { %8696 = vrcp.f32 %v5747_v21 }
 0xb3e   : > { %8698 = vrcp.f32 %v5741_v29 }
 0xb40   : > { %v5753_v43 = vpop.xlane.xlu1 %5752  ;;  %v5750_v50 = vpop.xlane.xlu0 %5749 }
 0xb41   : > { %8700 = vrcp.f32 %v5753_v43  ;;  %v8695_v3 = vpop.eup %8694 }
 0xb42   : > { %8702 = vrcp.f32 %v5750_v50 }
 0xb44   : > { %v5759_v27 = vpop.xlane.xlu1 %5758  ;;  %v5756_v54 = vpop.xlane.xlu0 %5755 }
 0xb45   : > { %8704 = vrcp.f32 %v5759_v27 }
 0xb46   : > { %8706 = vrcp.f32 %v5756_v54 }
 0xb47   : > { %v8697_v25 = vpop.eup %8696 }
 0xb48   : > { %v5765_v62 = vpop.xlane.xlu1 %5764  ;;  %v5762_v30 = vpop.xlane.xlu0 %5761 }
 0xb49   : > { %8708 = vrcp.f32 %v5765_v62  ;;  %v8699_v8 = vpop.eup %8698  ;;  %v11815_v62 = vld [vmem:[%s11964_s5] ss:$0 sm:$0xff] }
 0xb4b   : > { %v8701_v38 = vpop.eup %8700 }
 0xb4c   : > { %v5771_v12 = vpop.xlane.xlu1 %5770  ;;  %v5768_v20 = vpop.xlane.xlu0 %5767 }
 0xb4d   : > { %8710 = vrcp.f32 %v5771_v12  ;;  %v8703_v49 = vpop.eup %8702 }
 0xb4e   : > { %8712 = vrcp.f32 %v5768_v20 }
 0xb4f   : > { %8714 = vrcp.f32 %v5762_v30  ;;  %v8705_v42 = vpop.eup %8704 }
 0xb50   : > { %v5777_v22 = vpop.xlane.xlu1 %5776  ;;  %v5774_v19 = vpop.xlane.xlu0 %5773 }
 0xb51   : > { %8716 = vrcp.f32 %v5777_v22  ;;  %v8707_v52 = vpop.eup %8706 }
 0xb53   : > { %v8709_v51 = vpop.eup %8708 }
 0xb54   : > { %v5783_v37 = vpop.xlane.xlu1 %5782  ;;  %v5780_v15 = vpop.xlane.xlu0 %5779 }
 0xb55   : > { %8718 = vrcp.f32 %v5783_v37  ;;  %v12414_v37 = vld [vmem:[#allocation5_spill] sm:$0xff] }
 0xb56   : > { %8720 = vrcp.f32 %v5780_v15 }
 0xb57   : > { %v8711_v34 = vpop.eup %8710  ;;  %8722 = vrcp.f32 %v5774_v19 }
 0xb58   : > { %v8713_v5 = vpop.eup %8712 }
 0xb59   : > { %v8715_v55 = vpop.eup %8714 }
 0xb5b   : > { %v8717_v35 = vpop.eup %8716 }
 0xb5f   : > { %v8719_v57 = vpop.eup %8718 }
 0xb60   : > { %v8721_v63 = vpop.eup %8720 }
 0xb61   : > { %v8723_v29 = vpop.eup %8722 }
 0xb80   : > { %v7905_v53 = vpop.f32.mrb[200].mxu1 }
 0xb81   : > { %v6036_v17 = vpop.f32.mrb[201].mxu1  ;;  %v6206_v16 = vmul.f32 %v8695_v3, %v7905_v53 }
 0xb82   : > { %v7906_v0 = vpop.f32.mrb[202].mxu1  ;;  %v6204_v56 = vmul.f32 %v8693_v33, %v6036_v17 }
 0xb83   : > { %v6207_v10 = vmul.f32 %v8697_v25, %v7906_v0  ;;  %v6039_v45 = vpop.f32.mrb[203].mxu1 }
 0xb84   : > { %v6205_v32 = vmul.f32 %v8699_v8, %v6039_v45 }
 0xb85   : > { %v6229_v40 = vpack.c.bf16 %v6207_v10, %v6206_v16 }
 0xb86   : > { %v6228_v36 = vpack.c.bf16 %v6205_v32, %v6204_v56 }
 0xb88   : > { %v7909_v4 = vpop.f32.mrb[204].mxu1  ;;  %7947 = vmatprep.mubr.msk.bf16.mxu0 %vm924_vm0, %v6228_v36 }
 0xb89   : > { %v6052_v9 = vpop.f32.mrb[205].mxu1  ;;  %7948 = vmatmul.mubr.msk.bf16.gmra.mrb[136].mxu0 %vm924_vm0, %v6229_v40  ;;  %v6210_v13 = vmul.f32 %v8707_v52, %v7909_v4  ;;  %v12413_v40 = vld [vmem:[#allocation7_spill] sm:$0xff] }
 0xb8a   : > { %v7910_v61 = vpop.f32.mrb[206].mxu1  ;;  %v6208_v28 = vmul.f32 %v8703_v49, %v6052_v9 }
 0xb8b   : > { %v6211_v58 = vmul.f32 %v8705_v42, %v7910_v61  ;;  %v7921_v39 = vpop.f32.mrb[192].mxu0  ;;  %v6055_v41 = vpop.f32.mrb[207].mxu1  ;;  %v12415_v42 = vld [vmem:[#allocation9_spill] sm:$0xff] }
 0xb8c   : > { %v6209_v44 = vmul.f32 %v8701_v38, %v6055_v41  ;;  %v6125_v48 = vpop.f32.mrb[193].mxu0  ;;  %v6214_v24 = vmul.f32 %v8713_v5, %v7921_v39 }
 0xb8d   : > { %v6231_v7 = vpack.c.bf16 %v6211_v58, %v6210_v13  ;;  %v7922_v2 = vpop.f32.mrb[194].mxu0  ;;  %v6212_v60 = vmul.f32 %v8715_v55, %v6125_v48  ;;  %v12418_v48 = vld [vmem:[#allocation15_spill] sm:$0xff]  ;;  %v12419_v55 = vld [vmem:[#allocation17_spill] sm:$0xff] }
 0xb8e   : > { %v6230_v31 = vpack.c.bf16 %v6209_v44, %v6208_v28  ;;  %v6215_v11 = vmul.f32 %v8711_v34, %v7922_v2  ;;  %v6128_v23 = vpop.f32.mrb[195].mxu0  ;;  %v12417_v34 = vld [vmem:[#allocation8_spill] sm:$0xff] }
 0xb8f   : > { %v6213_v26 = vmul.f32 %v8709_v51, %v6128_v23  ;;  %v12416_v51 = vld [vmem:[#allocation6_spill] sm:$0xff]  ;;  %v12420_v23 = vld [vmem:[#allocation11_spill] sm:$0xff] }
 0xb90   : > { %v6233_v1 = vpack.c.bf16 %v6215_v11, %v6214_v24  ;;  %7951 = vmatprep.mubr.msk.bf16.mxu0 %vm924_vm0, %v6230_v31 }
 0xb91   : > { %v6232_v14 = vpack.c.bf16 %v6213_v26, %v6212_v60  ;;  %7952 = vmatmul.mubr.msk.bf16.gmra.mrb[140].mxu0 %vm924_vm0, %v6231_v7 }
 0xb93   : > { %v7925_v46 = vpop.f32.mrb[196].mxu0  ;;  %7955 = vmatprep.mubr.msk.bf16.mxu0 %vm924_vm0, %v6232_v14 }
 0xb94   : > { %v6141_v18 = vpop.f32.mrb[197].mxu0  ;;  %v6218_v59 = vmul.f32 %v8721_v63, %v7925_v46 }
 0xb95   : > { %v7926_v47 = vpop.f32.mrb[198].mxu0  ;;  %v6216_v43 = vmul.f32 %v8723_v29, %v6141_v18  ;;  %v12422_v18 = vld [vmem:[#allocation14_spill] sm:$0xff] }
 0xb96   : > { %v6219_v21 = vmul.f32 %v8719_v57, %v7926_v47  ;;  %v6144_v6 = vpop.f32.mrb[199].mxu0 }
 0xb97   : > { %v6217_v50 = vmul.f32 %v8717_v35, %v6144_v6  ;;  %v12421_v35 = vld [vmem:[#allocation13_spill] sm:$0xff] }
 0xb98   : > { %v6235_v27 = vpack.c.bf16 %v6219_v21, %v6218_v59  ;;  %v12423_v59 = vld [vmem:[#allocation10_spill] sm:$0xff] }
 0xb99   : > { %v6234_v54 = vpack.c.bf16 %v6217_v50, %v6216_v43  ;;  %7956 = vmatmul.mubr.msk.bf16.gmra.mrb[144].mxu0 %vm924_vm0, %v6233_v1  ;;  %v12424_v50 = vld [vmem:[#allocation12_spill] sm:$0xff] }
 0xb9b   : > { %7959 = vmatprep.mubr.msk.bf16.mxu0 %vm924_vm0, %v6234_v54 }
 0xba1   : > { %7960 = vmatmul.mubr.msk.bf16.gmra.mrb[148].mxu0 %vm924_vm0, %v6235_v27 }
 0xbc8   : > { %v7933_v30 = vpop.f32.mrb[120].mxu0 }
 0xbc9   : > { %v6502_v12 = vadd.f32 %v7933_v30, %v11815_v62  ;;  %v6334_v20 = vpop.f32.mrb[121].mxu0 }
 0xbca   : > { %v6500_v33 = vadd.f32 %v11815_v62, %v6334_v20  ;;  %v7934_v53 = vpop.f32.mrb[122].mxu0  ;;  %v12425_v20 = vld [vmem:[#allocation23_spill] sm:$0xff] }
 0xbcb   : > { %6534 = vst [vmem:[%s11819_s19 + $0x10] sm:$0xff] %v6502_v12  ;;  %v6503_v3 = vadd.f32 %v7934_v53, %v11815_v62  ;;  %v6337_v22 = vpop.f32.mrb[123].mxu0 }
 0xbcc   : > { %6532 = vst [vmem:[%s11819_s19] sm:$0xff] %v6500_v33  ;;  %v6501_v17 = vadd.f32 %v11815_v62, %v6337_v22 }
 0xbcd   : > { %6535 = vst [vmem:[%s11819_s19 + $0x18] sm:$0xff] %v6503_v3  ;;  %v12426_v3 = vld [vmem:[#allocation29_spill] sm:$0xff] }
 0xbce   : > { %6533 = vst [vmem:[%s11819_s19 + $0x8] sm:$0xff] %v6501_v17 }
 0xbd0   : > { %v7937_v25 = vpop.f32.mrb[124].mxu0 }
 0xbd1   : > { %v6506_v19 = vadd.f32 %v7937_v25, %v11815_v62  ;;  %v6350_v0 = vpop.f32.mrb[125].mxu0 }
 0xbd2   : > { %v6504_v8 = vadd.f32 %v11815_v62, %v6350_v0  ;;  %v7938_v16 = vpop.f32.mrb[126].mxu0 }
 0xbd3   : > { %6538 = vst [vmem:[%s11819_s19 + $0x30] sm:$0xff] %v6506_v19  ;;  %v6507_v10 = vadd.f32 %v7938_v16, %v11815_v62  ;;  %v6353_v45 = vpop.f32.mrb[127].mxu0  ;;  %v12427_v19 = vld [vmem:[#allocation18_spill] sm:$0xff] }
 0xbd4   : > { %6536 = vst [vmem:[%s11819_s19 + $0x20] sm:$0xff] %v6504_v8  ;;  %v6505_v56 = vadd.f32 %v11815_v62, %v6353_v45 }
 0xbd5   : > { %6539 = vst [vmem:[%s11819_s19 + $0x38] sm:$0xff] %v6507_v10  ;;  %v12428_v10 = vld [vmem:[#allocation42_spill] sm:$0xff] }
 0xbd6   : > { %6537 = vst [vmem:[%s11819_s19 + $0x28] sm:$0xff] %v6505_v56 }
 0xbd8   : > { %v7941_v32 = vpop.f32.mrb[128].mxu0 }
 0xbd9   : > { %v7967_v36 = vadd.f32 %v7941_v32, %v12413_v40  ;;  %v6366_v38 = vpop.f32.mrb[129].mxu0 }
 0xbda   : > { %v7968_v49 = vadd.f32 %v6366_v38, %v12414_v37  ;;  %v7942_v15 = vpop.f32.mrb[130].mxu0 }
 0xbdb   : > { %v6510_v4 = vadd.f32 %v7967_v36, %v11815_v62  ;;  %v7969_v9 = vadd.f32 %v7942_v15, %v12415_v42  ;;  %v6369_v52 = vpop.f32.mrb[131].mxu0  ;;  %v12429_v36 = vld [vmem:[#allocation66_spill] sm:$0xff] }
 0xbdc   : > { %v6508_v61 = vadd.f32 %v7968_v49, %v11815_v62  ;;  %v7970_v13 = vadd.f32 %v6369_v52, %v12416_v51  ;;  %v12430_v49 = vld [vmem:[#allocation69_spill] sm:$0xff] }
 0xbdd   : > { %6542 = vst [vmem:[%s11819_s19 + $0x50] sm:$0xff] %v6510_v4  ;;  %v6511_v58 = vadd.f32 %v7969_v9, %v11815_v62  ;;  %v12431_v9 = vld [vmem:[#allocation72_spill] sm:$0xff] }
 0xbde   : > { %6540 = vst [vmem:[%s11819_s19 + $0x40] sm:$0xff] %v6508_v61  ;;  %v6509_v39 = vadd.f32 %v7970_v13, %v11815_v62  ;;  %v12432_v13 = vld [vmem:[#allocation70_spill] sm:$0xff] }
 0xbdf   : > { %6543 = vst [vmem:[%s11819_s19 + $0x58] sm:$0xff] %v6511_v58 }
 0xbe0   : > { %6541 = vst [vmem:[%s11819_s19 + $0x48] sm:$0xff] %v6509_v39 }
 0xbed   : > { %v7945_v41 = vpop.f32.mrb[132].mxu0 }
 0xbee   : > { %v7971_v28 = vadd.f32 %v7945_v41, %v12417_v34  ;;  %v6382_v44 = vpop.f32.mrb[133].mxu0 }
 0xbef   : > { %v7972_v5 = vadd.f32 %v6382_v44, %v12418_v48  ;;  %v7946_v7 = vpop.f32.mrb[134].mxu0 }
 0xbf0   : > { %v6514_v2 = vadd.f32 %v7971_v28, %v11815_v62  ;;  %v7973_v24 = vadd.f32 %v7946_v7, %v12419_v55  ;;  %v6385_v31 = vpop.f32.mrb[135].mxu0  ;;  %v12433_v28 = vld [vmem:[#allocation75_spill] sm:$0xff] }
 0xbf1   : > { %v6512_v11 = vadd.f32 %v7972_v5, %v11815_v62  ;;  %v7974_v60 = vadd.f32 %v6385_v31, %v12420_v23  ;;  %v12434_v5 = vld [vmem:[#allocation77_spill] sm:$0xff] }
 0xbf2   : > { %6546 = vst [vmem:[%s11819_s19 + $0x70] sm:$0xff] %v6514_v2  ;;  %v6515_v26 = vadd.f32 %v7973_v24, %v11815_v62  ;;  %v12435_v24 = vld [vmem:[#allocation79_spill] sm:$0xff] }
 0xbf3   : > { %6544 = vst [vmem:[%s11819_s19 + $0x60] sm:$0xff] %v6512_v11  ;;  %v6513_v1 = vadd.f32 %v7974_v60, %v11815_v62  ;;  %v12436_v60 = vld [vmem:[#allocation81_spill] sm:$0xff] }
 0xbf4   : > { %6547 = vst [vmem:[%s11819_s19 + $0x78] sm:$0xff] %v6515_v26 }
 0xbf5   : > { %6545 = vst [vmem:[%s11819_s19 + $0x68] sm:$0xff] %v6513_v1 }
 0xc5c   : > { %v7949_v14 = vpop.f32.mrb[136].mxu0 }
 0xc5d   : > { %v7975_v46 = vadd.f32 %v7949_v14, %v12421_v35  ;;  %v6398_v57 = vpop.f32.mrb[137].mxu0 }
 0xc5e   : > { %v7976_v63 = vadd.f32 %v6398_v57, %v12422_v18  ;;  %v7950_v47 = vpop.f32.mrb[138].mxu0 }
 0xc5f   : > { %v6518_v29 = vadd.f32 %v7975_v46, %v11815_v62  ;;  %v7977_v21 = vadd.f32 %v7950_v47, %v12423_v59  ;;  %v6401_v6 = vpop.f32.mrb[139].mxu0 }
 0xc60   : > { %v6516_v43 = vadd.f32 %v7976_v63, %v11815_v62  ;;  %v7978_v27 = vadd.f32 %v6401_v6, %v12424_v50 }
 0xc61   : > { %6550 = vst [vmem:[%s11819_s19 + $0x90] sm:$0xff] %v6518_v29  ;;  %v6519_v54 = vadd.f32 %v7977_v21, %v11815_v62 }
 0xc62   : > { %6548 = vst [vmem:[%s11819_s19 + $0x80] sm:$0xff] %v6516_v43  ;;  %v6517_v30 = vadd.f32 %v7978_v27, %v11815_v62 }
 0xc63   : > { %6551 = vst [vmem:[%s11819_s19 + $0x98] sm:$0xff] %v6519_v54 }
 0xc64   : > { %6549 = vst [vmem:[%s11819_s19 + $0x88] sm:$0xff] %v6517_v30  ;;  %v7953_v12 = vpop.f32.mrb[140].mxu0 }
 0xc65   : > { %v7979_v33 = vadd.f32 %v7953_v12, %v12425_v20  ;;  %v6414_v53 = vpop.f32.mrb[141].mxu0 }
 0xc66   : > { %v7980_v22 = vadd.f32 %v6414_v53, %v12426_v3  ;;  %v7954_v17 = vpop.f32.mrb[142].mxu0 }
 0xc67   : > { %v6522_v25 = vadd.f32 %v7979_v33, %v11815_v62  ;;  %v7981_v0 = vadd.f32 %v7954_v17, %v12427_v19  ;;  %v6417_v8 = vpop.f32.mrb[143].mxu0 }
 0xc68   : > { %v6520_v16 = vadd.f32 %v7980_v22, %v11815_v62  ;;  %v7982_v45 = vadd.f32 %v6417_v8, %v12428_v10 }
 0xc69   : > { %6554 = vst [vmem:[%s11819_s19 + $0xb0] sm:$0xff] %v6522_v25  ;;  %v6523_v56 = vadd.f32 %v7981_v0, %v11815_v62 }
 0xc6a   : > { %6552 = vst [vmem:[%s11819_s19 + $0xa0] sm:$0xff] %v6520_v16  ;;  %v6521_v32 = vadd.f32 %v7982_v45, %v11815_v62 }
 0xc6b   : > { %6555 = vst [vmem:[%s11819_s19 + $0xb8] sm:$0xff] %v6523_v56 }
 0xc6c   : > { %6553 = vst [vmem:[%s11819_s19 + $0xa8] sm:$0xff] %v6521_v32  ;;  %v7957_v40 = vpop.f32.mrb[144].mxu0 }
 0xc6d   : > { %v7983_v38 = vadd.f32 %v7957_v40, %v12429_v36  ;;  %v6430_v37 = vpop.f32.mrb[145].mxu0 }
 0xc6e   : > { %v7984_v15 = vadd.f32 %v6430_v37, %v12430_v49  ;;  %v7958_v4 = vpop.f32.mrb[146].mxu0 }
 0xc6f   : > { %v6526_v42 = vadd.f32 %v7983_v38, %v11815_v62  ;;  %v7985_v52 = vadd.f32 %v7958_v4, %v12431_v9  ;;  %v6433_v61 = vpop.f32.mrb[147].mxu0 }
 0xc70   : > { %v6524_v51 = vadd.f32 %v7984_v15, %v11815_v62  ;;  %v7986_v58 = vadd.f32 %v6433_v61, %v12432_v13 }
 0xc71   : > { %6558 = vst [vmem:[%s11819_s19 + $0xd0] sm:$0xff] %v6526_v42  ;;  %v6527_v39 = vadd.f32 %v7985_v52, %v11815_v62 }
 0xc72   : > { %6556 = vst [vmem:[%s11819_s19 + $0xc0] sm:$0xff] %v6524_v51  ;;  %v6525_v41 = vadd.f32 %v7986_v58, %v11815_v62 }
 0xc73   : > { %6559 = vst [vmem:[%s11819_s19 + $0xd8] sm:$0xff] %v6527_v39 }
 0xc74   : > { %6557 = vst [vmem:[%s11819_s19 + $0xc8] sm:$0xff] %v6525_v41  ;;  %v7961_v34 = vpop.f32.mrb[148].mxu0 }
 0xc75   : > { %v7987_v44 = vadd.f32 %v7961_v34, %v12433_v28  ;;  %v6446_v48 = vpop.f32.mrb[149].mxu0 }
 0xc76   : > { %v7988_v7 = vadd.f32 %v6446_v48, %v12434_v5  ;;  %v7962_v2 = vpop.f32.mrb[150].mxu0 }
 0xc77   : > { %v6530_v55 = vadd.f32 %v7987_v44, %v11815_v62  ;;  %v7989_v31 = vadd.f32 %v7962_v2, %v12435_v24  ;;  %v6449_v11 = vpop.f32.mrb[151].mxu0 }
 0xc78   : > { %v6528_v23 = vadd.f32 %v7988_v7, %v11815_v62  ;;  %v7990_v26 = vadd.f32 %v6449_v11, %v12436_v60 }
 0xc79   : > { %6562 = vst [vmem:[%s11819_s19 + $0xf0] sm:$0xff] %v6530_v55  ;;  %v6531_v1 = vadd.f32 %v7989_v31, %v11815_v62 }
 0xc7a   : > { %6560 = vst [vmem:[%s11819_s19 + $0xe0] sm:$0xff] %v6528_v23  ;;  %v6529_v14 = vadd.f32 %v7990_v26, %v11815_v62 }
 0xc7b   : > { %6563 = vst [vmem:[%s11819_s19 + $0xf8] sm:$0xff] %v6531_v1 }
 0xc7c   : > { %6561 = vst [vmem:[%s11819_s19 + $0xe8] sm:$0xff] %v6529_v14 }
 0xc7d   : > { %8737 = shalt.err (!%p8734_p3)
}
 0xc7e   : > { %s8738_s15 = scalar_lea.hbm %s11908_s20, 4096  ;;  %s8742_s18 = scalar_lea.hbm %s11965_s6, 8192 }
 0xc7f   : > { %p8739_p4 = scmp.ne.s32.totalorder %s11908_s20, %s8738_s15  ;;  %p8743_p9 = scmp.lt.u32.totalorder %s11908_s20, %s11965_s6 }
 0xc80   : > { %p8744_p10 = scmp.lt.u32.totalorder %s8742_s18, %s8738_s15  ;;  %p8746_p12 = scmp.lt.u32.totalorder %s8738_s15, %s11908_s20 }
 0xc81   : > { %p8740_p7 = pnand %p8739_p4, %p8868_p5 }
 0xc82   : > { %p8745_p11 = por %p8744_p10, %p8743_p9 }
 0xc83   : > { %p8741_p8 = pneg %p8740_p7 }
 0xc84   : > { %p8747_p13 = por %p8746_p12, %p8745_p11 }
 0xc86   : > { %p8748_p0 = pnand %p8747_p13, %p8741_p8 }
 0xc88   : > { %8751 = shalt.err (!%p8748_p0)
}
 0xc89   : > { %s8793_s14 = smov 128   ;;  %s8794_s29 = smov 8  }
 0xc8a   : > { %8127 = dma.vmem_to_hbm [thread:$0]  (%p8868_p5), %s11910_s28, 4096, %s11908_s20, %s11918_s25, %s8793_s14, %s8793_s14, %s8794_s29  }
 0xc8b PF: > { %p8133_p1 = scmp.ge.s32.totalorder %s8786_s24, 2  ;;  %s6594_s9 = sand.u32 1, %s8774_s21  }
 0xc8c   : > { %s6595_s12 = scalar_lea.sflag [#allocation3], %s6594_s9 }
 0xc8d   : > { %p8130_p2 = pnand %p8133_p1, %p8872_p6 }
 0xc8f   : > { %8769 = dma.done.wait (!%p8130_p2), %s6595_s12, 4096  }
 0xc90   : > { %8771 = vsyncadd (!%p8130_p2), %s6595_s12, 4294963200  ;;  %p16_p3 = scmp.ge.s32.totalorder %s8855_s27, 4   ;;  %s12437_s21 = smov %s8778_s22 }
 0xc91   : > { %s12438_s22 = smov %s8782_s23  ;;  %s12439_s23 = smov %s8866_s30 }
 0xc92   : > { %s12440_s24 = smov %s8855_s27  ;;  %18 = sbr.rel (!%p16_p3) target bundleno = 3 (0x3), region = 82 }
 0xc99   :  { %6600 = vsyncpa [#allocation3], 1 }
 0xc9a   :  { %6602 = vsyncpa [#allocation3 + $0x1], 1 }

</bundles_post_ra>
